<compile_context>
chip_gen: v7x
topology: tpu7x:2x2x1
jax: 0.10.0
libtpu: 0.0.40
codegen_flags: <defaults>
</compile_context>

<pallas_src>
import functools
import math

import jax
import jax.numpy as jnp
import numpy as np
from jax import lax
from jax.experimental import pallas as pl
from jax.experimental.pallas import tpu as pltpu


# --------------------------------------------------------------------------
# In-kernel building blocks
# --------------------------------------------------------------------------
def _gru_gates(gi, gh, h_prev, H):
    """torch.nn.GRUCell gate math; gi/gh are (M, 3H) with gate order r,z,n."""
    r = jax.nn.sigmoid(gi[:, :H] + gh[:, :H])
    z = jax.nn.sigmoid(gi[:, H:2 * H] + gh[:, H:2 * H])
    n = jnp.tanh(gi[:, 2 * H:] + r * gh[:, 2 * H:])
    return (1.0 - z) * n + z * h_prev


def _run_layer_bidir(x_f, x_b, wih_ref, whh_ref, bih_ref, bhh_ref,
                     dilation, H, T_pad, B_pad,
                     gi_f_ref, gi_b_ref, act_f_ref, act_b_ref):
    """One dilated GRU layer; both directions advance in the same loop.

    x_f / x_b : values (T_pad * B_pad, D_in), row index = t * B_pad + b.
    Writes all hidden states into act_{f,b}_ref of shape (T_pad * B_pad, H).
    """
    D_in = x_f.shape[1]
    dB = dilation * B_pad            # rows handled per sequential step
    S = T_pad // dilation            # number of sequential steps
    H3 = 3 * H

    def input_proj(x, g):
        w = wih_ref[g]               # (D_in, 3H), columns ordered r|z|n
        b = bih_ref[g]               # (1, 3H)
        if D_in == 1:
            gi = x * w               # K=1 matmul == broadcast multiply (VPU)
        else:
            gi = jnp.dot(x, w, preferred_element_type=jnp.float32)
        return gi + b

    # Hoisted non-recurrent projection for the entire (padded) sequence.
    gi_f_ref[...] = input_proj(x_f, 0)
    gi_b_ref[...] = input_proj(x_b, 1)

    whh_f = whh_ref[0]               # (H, 3H)
    whh_b = whh_ref[1]
    bhh_f = jnp.broadcast_to(bhh_ref[0], (dB, H3))   # hoisted broadcasts
    bhh_b = jnp.broadcast_to(bhh_ref[1], (dB, H3))

    def step(s, carry):
        h_f, h_b = carry
        start = pl.multiple_of(s * dB, dB)           # dB is a multiple of 8
        gi_f = gi_f_ref[pl.ds(start, dB), :]
        gi_b = gi_b_ref[pl.ds(start, dB), :]
        gh_f = jnp.dot(h_f, whh_f, preferred_element_type=jnp.float32) + bhh_f
        gh_b = jnp.dot(h_b, whh_b, preferred_element_type=jnp.float32) + bhh_b
        h_f = _gru_gates(gi_f, gh_f, h_f, H)
        h_b = _gru_gates(gi_b, gh_b, h_b, H)
        act_f_ref[pl.ds(start, dB), :] = h_f
        act_b_ref[pl.ds(start, dB), :] = h_b
        return (h_f, h_b)

    h0 = jnp.zeros((dB, H), jnp.float32)             # zero init for all chains
    lax.fori_loop(0, S, step, (h0, h0), unroll=(S <= 16))


def _gru_encoder_kernel(x_f_ref, x_b_ref,
                        wih1_ref, whh1_ref, bih1_ref, bhh1_ref,
                        wih2_ref, whh2_ref, bih2_ref, bhh2_ref,
                        wih3_ref, whh3_ref, bih3_ref, bhh3_ref,
                        out_ref,
                        gi1f, gi1b, a1f, a1b,
                        gi2f, gi2b, a2f, a2b,
                        gi3f, gi3b, a3f, a3b,
                        *, T, T_pad, B_pad, hidden_sizes, dilations):
    H1, H2, H3 = hidden_sizes
    d1, d2, d3 = dilations

    _run_layer_bidir(x_f_ref[...], x_b_ref[...],
                     wih1_ref, whh1_ref, bih1_ref, bhh1_ref,
                     d1, H1, T_pad, B_pad, gi1f, gi1b, a1f, a1b)
    _run_layer_bidir(a1f[...], a1b[...],
                     wih2_ref, whh2_ref, bih2_ref, bhh2_ref,
                     d2, H2, T_pad, B_pad, gi2f, gi2b, a2f, a2b)
    _run_layer_bidir(a2f[...], a2b[...],
                     wih3_ref, whh3_ref, bih3_ref, bhh3_ref,
                     d3, H3, T_pad, B_pad, gi3f, gi3b, a3f, a3b)

    # Gather last valid time step (original index T-1); the row block is
    # 8-sublane aligned because B_pad is a multiple of 8.
    row = (T - 1) * B_pad
    off = 0
    for act_ref, H in ((a1f, H1), (a2f, H2), (a3f, H3),
                       (a1b, H1), (a2b, H2), (a3b, H3)):
        out_ref[:, off:off + H] = act_ref[row:row + B_pad, :]
        off += H


# --------------------------------------------------------------------------
# Wrapper: PyTorch layouts in / out, one pallas_call for the whole encoder.
# --------------------------------------------------------------------------
def gru_encoder_forward(data, fwd_params, bwd_params, dilations):
    """data: (B, T, 1) float -> (B, 2 * sum(hidden_sizes)) float32."""
    data = data.astype(jnp.float32)
    B, T, _ = data.shape
    hidden_sizes = tuple(int(p[1].shape[1]) for p in fwd_params)
    dilations = tuple(int(d) for d in dilations)

    L = math.lcm(*dilations)
    T_pad = ((T + L - 1) // L) * L           # multiple of every dilation
    B_pad = ((B + 7) // 8) * 8               # fill the 8 sublanes
    M = T_pad * B_pad

    def prep_x(x):                           # (B, T, 1) -> (T_pad*B_pad, 1)
        x = jnp.transpose(x, (1, 0, 2))                          # (T, B, 1)
        x = jnp.pad(x, ((0, T_pad - T), (0, B_pad - B), (0, 0)))
        return x.reshape(M, 1)

    x_f = prep_x(data)
    x_b = prep_x(jnp.flip(data, axis=1))

    def prep_params(pf, pb):
        w_ih_f, w_hh_f, b_ih_f, b_hh_f = pf
        w_ih_b, w_hh_b, b_ih_b, b_hh_b = pb
        H = w_hh_f.shape[1]
        w_ih = jnp.stack([w_ih_f.T, w_ih_b.T])              # (2, D, 3H)
        w_hh = jnp.stack([w_hh_f.T, w_hh_b.T])              # (2, H, 3H)
        b_ih = jnp.stack([b_ih_f, b_ih_b]).reshape(2, 1, 3 * H)
        b_hh = jnp.stack([b_hh_f, b_hh_b]).reshape(2, 1, 3 * H)
        return w_ih, w_hh, b_ih, b_hh

    params = []
    for pf, pb in zip(fwd_params, bwd_params):
        params.extend(prep_params(pf, pb))

    scratch = []
    for H in hidden_sizes:
        scratch += [pltpu.VMEM((M, 3 * H), jnp.float32),   # gi  fwd
                    pltpu.VMEM((M, 3 * H), jnp.float32),   # gi  bwd
                    pltpu.VMEM((M, H), jnp.float32),       # act fwd
                    pltpu.VMEM((M, H), jnp.float32)]       # act bwd

    sum_h = sum(hidden_sizes)
    n_in = 2 + len(params)
    kernel = functools.partial(_gru_encoder_kernel, T=T, T_pad=T_pad,
                               B_pad=B_pad, hidden_sizes=hidden_sizes,
                               dilations=dilations)

    out = pl.pallas_call(
        kernel,
        out_shape=jax.ShapeDtypeStruct((B_pad, 2 * sum_h), jnp.float32),
        in_specs=[pl.BlockSpec(memory_space=pltpu.MemorySpace.VMEM)] * n_in,
        out_specs=pl.BlockSpec(memory_space=pltpu.MemorySpace.VMEM),
        scratch_shapes=scratch,
    )(x_f, x_b, *params)

    return out[:B]


# --------------------------------------------------------------------------
# Pure-JAX reference (mirrors torch.nn.GRUCell / dilated_gru exactly).
# --------------------------------------------------------------------------
def _gru_cell_ref(x, h, w_ih, w_hh, b_ih, b_hh):
    H = w_hh.shape[1]
    gi = x @ w_ih.T + b_ih
    gh = h @ w_hh.T + b_hh
    r = jax.nn.sigmoid(gi[:, :H] + gh[:, :H])
    z = jax.nn.sigmoid(gi[:, H:2 * H] + gh[:, H:2 * H])
    n = jnp.tanh(gi[:, 2 * H:] + r * gh[:, 2 * H:])
    return (1.0 - z) * n + z * h


def _dilated_gru_ref(x, w_ih, w_hh, b_ih, b_hh, dilation):
    B, T, _ = x.shape
    H = w_hh.shape[1]
    hiddens = []
    for i in range(T):
        h_prev = hiddens[i - dilation] if i - dilation >= 0 else jnp.zeros(
            (B, H), jnp.float32)
        hiddens.append(_gru_cell_ref(x[:, i, :], h_prev, w_ih, w_hh, b_ih, b_hh))
    return jnp.stack(hiddens, axis=1)


def gru_encoder_ref(data, fwd_params, bwd_params, dilations):
    hiddens = []
    x = data
    for p, d in zip(fwd_params, dilations):
        x = _dilated_gru_ref(x, *p, d)
        hiddens.append(x[:, -1, :])
    x = jnp.flip(data, axis=1)
    for p, d in zip(bwd_params, dilations):
        x = _dilated_gru_ref(x, *p, d)
        hiddens.append(x[:, -1, :])
    return jnp.concatenate(hiddens, axis=1)


# --------------------------------------------------------------------------
# Deterministic parameter init (same shapes / init range as torch.nn.GRUCell).
# --------------------------------------------------------------------------
def init_gru_cell_params(key, input_size, hidden_size):
    k = 1.0 / np.sqrt(hidden_size)
    k1, k2, k3, k4 = jax.random.split(key, 4)
    w_ih = jax.random.uniform(k1, (3 * hidden_size, input_size), jnp.float32, -k, k)
    w_hh = jax.random.uniform(k2, (3 * hidden_size, hidden_size), jnp.float32, -k, k)
    b_ih = jax.random.uniform(k3, (3 * hidden_size,), jnp.float32, -k, k)
    b_hh = jax.random.uniform(k4, (3 * hidden_size,), jnp.float32, -k, k)
    return (w_ih, w_hh, b_ih, b_hh)


if __name__ == "__main__":
    # Small shapes consistent with the module's forward (input feature dim = 1).
    hidden_sizes = (32, 16, 16)
    dilations = (1, 2, 4)
    batch, seq_len = 2, 16

    key = jax.random.PRNGKey(0)
    keys = jax.random.split(key, 7)
    data = jax.random.normal(keys[0], (batch, seq_len, 1), jnp.float32)

    in_sizes = (1, hidden_sizes[0], hidden_sizes[1])
    fwd_params = [init_gru_cell_params(keys[1 + i], in_sizes[i], hidden_sizes[i])
                  for i in range(3)]
    bwd_params = [init_gru_cell_params(keys[4 + i], in_sizes[i], hidden_sizes[i])
                  for i in range(3)]

    out = gru_encoder_forward(data, fwd_params, bwd_params, dilations)
    out = jax.block_until_ready(out)

    assert out.shape == (batch, 2 * sum(hidden_sizes)), out.shape

    ref = jax.block_until_ready(
        gru_encoder_ref(data, fwd_params, bwd_params, dilations))
    np.testing.assert_allclose(np.asarray(out), np.asarray(ref),
                               rtol=1e-4, atol=1e-4)

    print("KERNEL_OK")
</pallas_src>

<mosaic_0001>
module attributes {stable_mosaic.version = 11 : i64} {
  func.func @_gru_encoder_kernel(%arg0: memref<128x1xf32, #tpu.memory_space<vmem>>, %arg1: memref<128x1xf32, #tpu.memory_space<vmem>>, %arg2: memref<2x1x96xf32, #tpu.memory_space<vmem>>, %arg3: memref<2x32x96xf32, #tpu.memory_space<vmem>>, %arg4: memref<2x1x96xf32, #tpu.memory_space<vmem>>, %arg5: memref<2x1x96xf32, #tpu.memory_space<vmem>>, %arg6: memref<2x32x48xf32, #tpu.memory_space<vmem>>, %arg7: memref<2x16x48xf32, #tpu.memory_space<vmem>>, %arg8: memref<2x1x48xf32, #tpu.memory_space<vmem>>, %arg9: memref<2x1x48xf32, #tpu.memory_space<vmem>>, %arg10: memref<2x16x48xf32, #tpu.memory_space<vmem>>, %arg11: memref<2x16x48xf32, #tpu.memory_space<vmem>>, %arg12: memref<2x1x48xf32, #tpu.memory_space<vmem>>, %arg13: memref<2x1x48xf32, #tpu.memory_space<vmem>>, %arg14: memref<8x128xf32, #tpu.memory_space<vmem>>, %arg15: memref<128x96xf32, #tpu.memory_space<vmem>>, %arg16: memref<128x96xf32, #tpu.memory_space<vmem>>, %arg17: memref<128x32xf32, #tpu.memory_space<vmem>>, %arg18: memref<128x32xf32, #tpu.memory_space<vmem>>, %arg19: memref<128x48xf32, #tpu.memory_space<vmem>>, %arg20: memref<128x48xf32, #tpu.memory_space<vmem>>, %arg21: memref<128x16xf32, #tpu.memory_space<vmem>>, %arg22: memref<128x16xf32, #tpu.memory_space<vmem>>, %arg23: memref<128x48xf32, #tpu.memory_space<vmem>>, %arg24: memref<128x48xf32, #tpu.memory_space<vmem>>, %arg25: memref<128x16xf32, #tpu.memory_space<vmem>>, %arg26: memref<128x16xf32, #tpu.memory_space<vmem>>) attributes {dimension_semantics = [], scalar_prefetch = 0 : i64, scratch_operands = 12 : i64, tpu.core_type = #tpu.core_type<tc>} {
    %c0 = arith.constant 0 : index
    %c0_0 = arith.constant 0 : index
    %0 = vector.load %arg0[%c0, %c0_0] : memref<128x1xf32, #tpu.memory_space<vmem>>, vector<128x1xf32>
    %c0_1 = arith.constant 0 : index
    %c0_2 = arith.constant 0 : index
    %1 = vector.load %arg1[%c0_1, %c0_2] : memref<128x1xf32, #tpu.memory_space<vmem>>, vector<128x1xf32>
    %c0_3 = arith.constant 0 : index
    %c0_4 = arith.constant 0 : index
    %c0_5 = arith.constant 0 : index
    %2 = vector.load %arg2[%c0_3, %c0_4, %c0_5] : memref<2x1x96xf32, #tpu.memory_space<vmem>>, vector<1x1x96xf32>
    %3 = vector.shape_cast %2 : vector<1x1x96xf32> to vector<1x96xf32>
    %c0_6 = arith.constant 0 : index
    %c0_7 = arith.constant 0 : index
    %c0_8 = arith.constant 0 : index
    %4 = vector.load %arg4[%c0_6, %c0_7, %c0_8] : memref<2x1x96xf32, #tpu.memory_space<vmem>>, vector<1x1x96xf32>
    %5 = vector.shape_cast %4 : vector<1x1x96xf32> to vector<1x96xf32>
    %6 = vector.broadcast %0 : vector<128x1xf32> to vector<128x96xf32>
    %7 = vector.broadcast %3 : vector<1x96xf32> to vector<128x96xf32>
    %8 = arith.mulf %6, %7 : vector<128x96xf32>
    %9 = vector.broadcast %5 : vector<1x96xf32> to vector<128x96xf32>
    %10 = arith.addf %8, %9 : vector<128x96xf32>
    %c0_9 = arith.constant 0 : index
    %c0_10 = arith.constant 0 : index
    %11 = vector.load %arg15[%c0_9, %c0_10] : memref<128x96xf32, #tpu.memory_space<vmem>>, vector<128x96xf32>
    tpu.vector_store %arg15[%c0_9, %c0_10], %10 {strides = array<i32>} : memref<128x96xf32, #tpu.memory_space<vmem>>, vector<128x96xf32>,
    %c1 = arith.constant 1 : index
    %c0_11 = arith.constant 0 : index
    %c0_12 = arith.constant 0 : index
    %12 = vector.load %arg2[%c1, %c0_11, %c0_12] : memref<2x1x96xf32, #tpu.memory_space<vmem>>, vector<1x1x96xf32>
    %13 = vector.shape_cast %12 : vector<1x1x96xf32> to vector<1x96xf32>
    %c1_13 = arith.constant 1 : index
    %c0_14 = arith.constant 0 : index
    %c0_15 = arith.constant 0 : index
    %14 = vector.load %arg4[%c1_13, %c0_14, %c0_15] : memref<2x1x96xf32, #tpu.memory_space<vmem>>, vector<1x1x96xf32>
    %15 = vector.shape_cast %14 : vector<1x1x96xf32> to vector<1x96xf32>
    %16 = vector.broadcast %1 : vector<128x1xf32> to vector<128x96xf32>
    %17 = vector.broadcast %13 : vector<1x96xf32> to vector<128x96xf32>
    %18 = arith.mulf %16, %17 : vector<128x96xf32>
    %19 = vector.broadcast %15 : vector<1x96xf32> to vector<128x96xf32>
    %20 = arith.addf %18, %19 : vector<128x96xf32>
    %c0_16 = arith.constant 0 : index
    %c0_17 = arith.constant 0 : index
    %21 = vector.load %arg16[%c0_16, %c0_17] : memref<128x96xf32, #tpu.memory_space<vmem>>, vector<128x96xf32>
    tpu.vector_store %arg16[%c0_16, %c0_17], %20 {strides = array<i32>} : memref<128x96xf32, #tpu.memory_space<vmem>>, vector<128x96xf32>,
    %c0_18 = arith.constant 0 : index
    %c0_19 = arith.constant 0 : index
    %c0_20 = arith.constant 0 : index
    %22 = vector.load %arg3[%c0_18, %c0_19, %c0_20] : memref<2x32x96xf32, #tpu.memory_space<vmem>>, vector<1x32x96xf32>
    %23 = vector.shape_cast %22 : vector<1x32x96xf32> to vector<32x96xf32>
    %c1_21 = arith.constant 1 : index
    %c0_22 = arith.constant 0 : index
    %c0_23 = arith.constant 0 : index
    %24 = vector.load %arg3[%c1_21, %c0_22, %c0_23] : memref<2x32x96xf32, #tpu.memory_space<vmem>>, vector<1x32x96xf32>
    %25 = vector.shape_cast %24 : vector<1x32x96xf32> to vector<32x96xf32>
    %c0_24 = arith.constant 0 : index
    %c0_25 = arith.constant 0 : index
    %c0_26 = arith.constant 0 : index
    %26 = vector.load %arg5[%c0_24, %c0_25, %c0_26] : memref<2x1x96xf32, #tpu.memory_space<vmem>>, vector<1x1x96xf32>
    %27 = vector.shape_cast %26 : vector<1x1x96xf32> to vector<1x96xf32>
    %28 = vector.shape_cast %27 : vector<1x96xf32> to vector<1x96xf32>
    %29 = vector.broadcast %28 : vector<1x96xf32> to vector<8x96xf32>
    %c1_27 = arith.constant 1 : index
    %c0_28 = arith.constant 0 : index
    %c0_29 = arith.constant 0 : index
    %30 = vector.load %arg5[%c1_27, %c0_28, %c0_29] : memref<2x1x96xf32, #tpu.memory_space<vmem>>, vector<1x1x96xf32>
    %31 = vector.shape_cast %30 : vector<1x1x96xf32> to vector<1x96xf32>
    %32 = vector.shape_cast %31 : vector<1x96xf32> to vector<1x96xf32>
    %33 = vector.broadcast %32 : vector<1x96xf32> to vector<8x96xf32>
    %cst = arith.constant 0.000000e+00 : f32
    %34 = vector.broadcast %cst : f32 to vector<8x32xf32>
    %c0_i32 = arith.constant 0 : i32
    %c8_i32 = arith.constant 8 : i32
    %35 = arith.muli %c0_i32, %c8_i32 : i32
    %36 = tpu.assume_multiple %35, 8 : i32
    %37 = arith.index_cast %36 : i32 to index
    %c0_30 = arith.constant 0 : index
    %38 = vector.load %arg15[%37, %c0_30] : memref<128x96xf32, #tpu.memory_space<vmem>>, vector<8x96xf32>
    %39 = arith.index_cast %36 : i32 to index
    %c0_31 = arith.constant 0 : index
    %40 = vector.load %arg16[%39, %c0_31] : memref<128x96xf32, #tpu.memory_space<vmem>>, vector<8x96xf32>
    %cst_32 = arith.constant dense<0.000000e+00> : vector<8x96xf32>
    %41 = tpu.matmul %34, %23, %cst_32 {dimension_numbers = #tpu.dot_dimension_numbers<[1], [0], [0], [1], [0, 0, 1, 1], [], []>} : vector<8x32xf32>, vector<32x96xf32>, vector<8x96xf32> -> vector<8x96xf32>
    %42 = arith.addf %41, %29 : vector<8x96xf32>
    %cst_33 = arith.constant dense<0.000000e+00> : vector<8x96xf32>
    %43 = tpu.matmul %34, %25, %cst_33 {dimension_numbers = #tpu.dot_dimension_numbers<[1], [0], [0], [1], [0, 0, 1, 1], [], []>} : vector<8x32xf32>, vector<32x96xf32>, vector<8x96xf32> -> vector<8x96xf32>
    %44 = arith.addf %43, %33 : vector<8x96xf32>
    %45 = vector.extract_strided_slice %38 {offsets = [0, 0], sizes = [8, 32], strides = [1, 1]} : vector<8x96xf32> to vector<8x32xf32>
    %46 = vector.extract_strided_slice %42 {offsets = [0, 0], sizes = [8, 32], strides = [1, 1]} : vector<8x96xf32> to vector<8x32xf32>
    %47 = arith.addf %45, %46 : vector<8x32xf32>
    %48 = arith.negf %47 : vector<8x32xf32>
    %49 = math.exp %48 : vector<8x32xf32>
    %cst_34 = arith.constant 1.000000e+00 : f32
    %50 = vector.broadcast %cst_34 : f32 to vector<8x32xf32>
    %51 = arith.addf %50, %49 : vector<8x32xf32>
    %52 = arith.divf %50, %51 : vector<8x32xf32>
    %53 = vector.extract_strided_slice %38 {offsets = [0, 32], sizes = [8, 32], strides = [1, 1]} : vector<8x96xf32> to vector<8x32xf32>
    %54 = vector.extract_strided_slice %42 {offsets = [0, 32], sizes = [8, 32], strides = [1, 1]} : vector<8x96xf32> to vector<8x32xf32>
    %55 = arith.addf %53, %54 : vector<8x32xf32>
    %56 = arith.negf %55 : vector<8x32xf32>
    %57 = math.exp %56 : vector<8x32xf32>
    %cst_35 = arith.constant 1.000000e+00 : f32
    %58 = vector.broadcast %cst_35 : f32 to vector<8x32xf32>
    %59 = arith.addf %58, %57 : vector<8x32xf32>
    %60 = arith.divf %58, %59 : vector<8x32xf32>
    %61 = vector.extract_strided_slice %38 {offsets = [0, 64], sizes = [8, 32], strides = [1, 1]} : vector<8x96xf32> to vector<8x32xf32>
    %62 = vector.extract_strided_slice %42 {offsets = [0, 64], sizes = [8, 32], strides = [1, 1]} : vector<8x96xf32> to vector<8x32xf32>
    %63 = arith.mulf %52, %62 : vector<8x32xf32>
    %64 = arith.addf %61, %63 : vector<8x32xf32>
    %65 = math.tanh %64 : vector<8x32xf32>
    %cst_36 = arith.constant 1.000000e+00 : f32
    %66 = vector.broadcast %cst_36 : f32 to vector<8x32xf32>
    %67 = arith.subf %66, %60 : vector<8x32xf32>
    %68 = arith.mulf %67, %65 : vector<8x32xf32>
    %69 = arith.mulf %60, %34 : vector<8x32xf32>
    %70 = arith.addf %68, %69 : vector<8x32xf32>
    %71 = vector.extract_strided_slice %40 {offsets = [0, 0], sizes = [8, 32], strides = [1, 1]} : vector<8x96xf32> to vector<8x32xf32>
    %72 = vector.extract_strided_slice %44 {offsets = [0, 0], sizes = [8, 32], strides = [1, 1]} : vector<8x96xf32> to vector<8x32xf32>
    %73 = arith.addf %71, %72 : vector<8x32xf32>
    %74 = arith.negf %73 : vector<8x32xf32>
    %75 = math.exp %74 : vector<8x32xf32>
    %cst_37 = arith.constant 1.000000e+00 : f32
    %76 = vector.broadcast %cst_37 : f32 to vector<8x32xf32>
    %77 = arith.addf %76, %75 : vector<8x32xf32>
    %78 = arith.divf %76, %77 : vector<8x32xf32>
    %79 = vector.extract_strided_slice %40 {offsets = [0, 32], sizes = [8, 32], strides = [1, 1]} : vector<8x96xf32> to vector<8x32xf32>
    %80 = vector.extract_strided_slice %44 {offsets = [0, 32], sizes = [8, 32], strides = [1, 1]} : vector<8x96xf32> to vector<8x32xf32>
    %81 = arith.addf %79, %80 : vector<8x32xf32>
    %82 = arith.negf %81 : vector<8x32xf32>
    %83 = math.exp %82 : vector<8x32xf32>
    %cst_38 = arith.constant 1.000000e+00 : f32
    %84 = vector.broadcast %cst_38 : f32 to vector<8x32xf32>
    %85 = arith.addf %84, %83 : vector<8x32xf32>
    %86 = arith.divf %84, %85 : vector<8x32xf32>
    %87 = vector.extract_strided_slice %40 {offsets = [0, 64], sizes = [8, 32], strides = [1, 1]} : vector<8x96xf32> to vector<8x32xf32>
    %88 = vector.extract_strided_slice %44 {offsets = [0, 64], sizes = [8, 32], strides = [1, 1]} : vector<8x96xf32> to vector<8x32xf32>
    %89 = arith.mulf %78, %88 : vector<8x32xf32>
    %90 = arith.addf %87, %89 : vector<8x32xf32>
    %91 = math.tanh %90 : vector<8x32xf32>
    %cst_39 = arith.constant 1.000000e+00 : f32
    %92 = vector.broadcast %cst_39 : f32 to vector<8x32xf32>
    %93 = arith.subf %92, %86 : vector<8x32xf32>
    %94 = arith.mulf %93, %91 : vector<8x32xf32>
    %95 = arith.mulf %86, %34 : vector<8x32xf32>
    %96 = arith.addf %94, %95 : vector<8x32xf32>
    %97 = arith.index_cast %36 : i32 to index
    %c0_40 = arith.constant 0 : index
    %98 = vector.load %arg17[%97, %c0_40] : memref<128x32xf32, #tpu.memory_space<vmem>>, vector<8x32xf32>
    tpu.vector_store %arg17[%97, %c0_40], %70 {strides = array<i32>} : memref<128x32xf32, #tpu.memory_space<vmem>>, vector<8x32xf32>,
    %99 = arith.index_cast %36 : i32 to index
    %c0_41 = arith.constant 0 : index
    %100 = vector.load %arg18[%99, %c0_41] : memref<128x32xf32, #tpu.memory_space<vmem>>, vector<8x32xf32>
    tpu.vector_store %arg18[%99, %c0_41], %96 {strides = array<i32>} : memref<128x32xf32, #tpu.memory_space<vmem>>, vector<8x32xf32>,
    %c1_i32 = arith.constant 1 : i32
    %c8_i32_42 = arith.constant 8 : i32
    %101 = arith.muli %c1_i32, %c8_i32_42 : i32
    %102 = tpu.assume_multiple %101, 8 : i32
    %103 = arith.index_cast %102 : i32 to index
    %c0_43 = arith.constant 0 : index
    %104 = vector.load %arg15[%103, %c0_43] : memref<128x96xf32, #tpu.memory_space<vmem>>, vector<8x96xf32>
    %105 = arith.index_cast %102 : i32 to index
    %c0_44 = arith.constant 0 : index
    %106 = vector.load %arg16[%105, %c0_44] : memref<128x96xf32, #tpu.memory_space<vmem>>, vector<8x96xf32>
    %cst_45 = arith.constant dense<0.000000e+00> : vector<8x96xf32>
    %107 = tpu.matmul %70, %23, %cst_45 {dimension_numbers = #tpu.dot_dimension_numbers<[1], [0], [0], [1], [0, 0, 1, 1], [], []>} : vector<8x32xf32>, vector<32x96xf32>, vector<8x96xf32> -> vector<8x96xf32>
    %108 = arith.addf %107, %29 : vector<8x96xf32>
    %cst_46 = arith.constant dense<0.000000e+00> : vector<8x96xf32>
    %109 = tpu.matmul %96, %25, %cst_46 {dimension_numbers = #tpu.dot_dimension_numbers<[1], [0], [0], [1], [0, 0, 1, 1], [], []>} : vector<8x32xf32>, vector<32x96xf32>, vector<8x96xf32> -> vector<8x96xf32>
    %110 = arith.addf %109, %33 : vector<8x96xf32>
    %111 = vector.extract_strided_slice %104 {offsets = [0, 0], sizes = [8, 32], strides = [1, 1]} : vector<8x96xf32> to vector<8x32xf32>
    %112 = vector.extract_strided_slice %108 {offsets = [0, 0], sizes = [8, 32], strides = [1, 1]} : vector<8x96xf32> to vector<8x32xf32>
    %113 = arith.addf %111, %112 : vector<8x32xf32>
    %114 = arith.negf %113 : vector<8x32xf32>
    %115 = math.exp %114 : vector<8x32xf32>
    %cst_47 = arith.constant 1.000000e+00 : f32
    %116 = vector.broadcast %cst_47 : f32 to vector<8x32xf32>
    %117 = arith.addf %116, %115 : vector<8x32xf32>
    %118 = arith.divf %116, %117 : vector<8x32xf32>
    %119 = vector.extract_strided_slice %104 {offsets = [0, 32], sizes = [8, 32], strides = [1, 1]} : vector<8x96xf32> to vector<8x32xf32>
    %120 = vector.extract_strided_slice %108 {offsets = [0, 32], sizes = [8, 32], strides = [1, 1]} : vector<8x96xf32> to vector<8x32xf32>
    %121 = arith.addf %119, %120 : vector<8x32xf32>
    %122 = arith.negf %121 : vector<8x32xf32>
    %123 = math.exp %122 : vector<8x32xf32>
    %cst_48 = arith.constant 1.000000e+00 : f32
    %124 = vector.broadcast %cst_48 : f32 to vector<8x32xf32>
    %125 = arith.addf %124, %123 : vector<8x32xf32>
    %126 = arith.divf %124, %125 : vector<8x32xf32>
    %127 = vector.extract_strided_slice %104 {offsets = [0, 64], sizes = [8, 32], strides = [1, 1]} : vector<8x96xf32> to vector<8x32xf32>
    %128 = vector.extract_strided_slice %108 {offsets = [0, 64], sizes = [8, 32], strides = [1, 1]} : vector<8x96xf32> to vector<8x32xf32>
    %129 = arith.mulf %118, %128 : vector<8x32xf32>
    %130 = arith.addf %127, %129 : vector<8x32xf32>
    %131 = math.tanh %130 : vector<8x32xf32>
    %cst_49 = arith.constant 1.000000e+00 : f32
    %132 = vector.broadcast %cst_49 : f32 to vector<8x32xf32>
    %133 = arith.subf %132, %126 : vector<8x32xf32>
    %134 = arith.mulf %133, %131 : vector<8x32xf32>
    %135 = arith.mulf %126, %70 : vector<8x32xf32>
    %136 = arith.addf %134, %135 : vector<8x32xf32>
    %137 = vector.extract_strided_slice %106 {offsets = [0, 0], sizes = [8, 32], strides = [1, 1]} : vector<8x96xf32> to vector<8x32xf32>
    %138 = vector.extract_strided_slice %110 {offsets = [0, 0], sizes = [8, 32], strides = [1, 1]} : vector<8x96xf32> to vector<8x32xf32>
    %139 = arith.addf %137, %138 : vector<8x32xf32>
    %140 = arith.negf %139 : vector<8x32xf32>
    %141 = math.exp %140 : vector<8x32xf32>
    %cst_50 = arith.constant 1.000000e+00 : f32
    %142 = vector.broadcast %cst_50 : f32 to vector<8x32xf32>
    %143 = arith.addf %142, %141 : vector<8x32xf32>
    %144 = arith.divf %142, %143 : vector<8x32xf32>
    %145 = vector.extract_strided_slice %106 {offsets = [0, 32], sizes = [8, 32], strides = [1, 1]} : vector<8x96xf32> to vector<8x32xf32>
    %146 = vector.extract_strided_slice %110 {offsets = [0, 32], sizes = [8, 32], strides = [1, 1]} : vector<8x96xf32> to vector<8x32xf32>
    %147 = arith.addf %145, %146 : vector<8x32xf32>
    %148 = arith.negf %147 : vector<8x32xf32>
    %149 = math.exp %148 : vector<8x32xf32>
    %cst_51 = arith.constant 1.000000e+00 : f32
    %150 = vector.broadcast %cst_51 : f32 to vector<8x32xf32>
    %151 = arith.addf %150, %149 : vector<8x32xf32>
    %152 = arith.divf %150, %151 : vector<8x32xf32>
    %153 = vector.extract_strided_slice %106 {offsets = [0, 64], sizes = [8, 32], strides = [1, 1]} : vector<8x96xf32> to vector<8x32xf32>
    %154 = vector.extract_strided_slice %110 {offsets = [0, 64], sizes = [8, 32], strides = [1, 1]} : vector<8x96xf32> to vector<8x32xf32>
    %155 = arith.mulf %144, %154 : vector<8x32xf32>
    %156 = arith.addf %153, %155 : vector<8x32xf32>
    %157 = math.tanh %156 : vector<8x32xf32>
    %cst_52 = arith.constant 1.000000e+00 : f32
    %158 = vector.broadcast %cst_52 : f32 to vector<8x32xf32>
    %159 = arith.subf %158, %152 : vector<8x32xf32>
    %160 = arith.mulf %159, %157 : vector<8x32xf32>
    %161 = arith.mulf %152, %96 : vector<8x32xf32>
    %162 = arith.addf %160, %161 : vector<8x32xf32>
    %163 = arith.index_cast %102 : i32 to index
    %c0_53 = arith.constant 0 : index
    %164 = vector.load %arg17[%163, %c0_53] : memref<128x32xf32, #tpu.memory_space<vmem>>, vector<8x32xf32>
    tpu.vector_store %arg17[%163, %c0_53], %136 {strides = array<i32>} : memref<128x32xf32, #tpu.memory_space<vmem>>, vector<8x32xf32>,
    %165 = arith.index_cast %102 : i32 to index
    %c0_54 = arith.constant 0 : index
    %166 = vector.load %arg18[%165, %c0_54] : memref<128x32xf32, #tpu.memory_space<vmem>>, vector<8x32xf32>
    tpu.vector_store %arg18[%165, %c0_54], %162 {strides = array<i32>} : memref<128x32xf32, #tpu.memory_space<vmem>>, vector<8x32xf32>,
    %c2_i32 = arith.constant 2 : i32
    %c8_i32_55 = arith.constant 8 : i32
    %167 = arith.muli %c2_i32, %c8_i32_55 : i32
    %168 = tpu.assume_multiple %167, 8 : i32
    %169 = arith.index_cast %168 : i32 to index
    %c0_56 = arith.constant 0 : index
    %170 = vector.load %arg15[%169, %c0_56] : memref<128x96xf32, #tpu.memory_space<vmem>>, vector<8x96xf32>
    %171 = arith.index_cast %168 : i32 to index
    %c0_57 = arith.constant 0 : index
    %172 = vector.load %arg16[%171, %c0_57] : memref<128x96xf32, #tpu.memory_space<vmem>>, vector<8x96xf32>
    %cst_58 = arith.constant dense<0.000000e+00> : vector<8x96xf32>
    %173 = tpu.matmul %136, %23, %cst_58 {dimension_numbers = #tpu.dot_dimension_numbers<[1], [0], [0], [1], [0, 0, 1, 1], [], []>} : vector<8x32xf32>, vector<32x96xf32>, vector<8x96xf32> -> vector<8x96xf32>
    %174 = arith.addf %173, %29 : vector<8x96xf32>
    %cst_59 = arith.constant dense<0.000000e+00> : vector<8x96xf32>
    %175 = tpu.matmul %162, %25, %cst_59 {dimension_numbers = #tpu.dot_dimension_numbers<[1], [0], [0], [1], [0, 0, 1, 1], [], []>} : vector<8x32xf32>, vector<32x96xf32>, vector<8x96xf32> -> vector<8x96xf32>
    %176 = arith.addf %175, %33 : vector<8x96xf32>
    %177 = vector.extract_strided_slice %170 {offsets = [0, 0], sizes = [8, 32], strides = [1, 1]} : vector<8x96xf32> to vector<8x32xf32>
    %178 = vector.extract_strided_slice %174 {offsets = [0, 0], sizes = [8, 32], strides = [1, 1]} : vector<8x96xf32> to vector<8x32xf32>
    %179 = arith.addf %177, %178 : vector<8x32xf32>
    %180 = arith.negf %179 : vector<8x32xf32>
    %181 = math.exp %180 : vector<8x32xf32>
    %cst_60 = arith.constant 1.000000e+00 : f32
    %182 = vector.broadcast %cst_60 : f32 to vector<8x32xf32>
    %183 = arith.addf %182, %181 : vector<8x32xf32>
    %184 = arith.divf %182, %183 : vector<8x32xf32>
    %185 = vector.extract_strided_slice %170 {offsets = [0, 32], sizes = [8, 32], strides = [1, 1]} : vector<8x96xf32> to vector<8x32xf32>
    %186 = vector.extract_strided_slice %174 {offsets = [0, 32], sizes = [8, 32], strides = [1, 1]} : vector<8x96xf32> to vector<8x32xf32>
    %187 = arith.addf %185, %186 : vector<8x32xf32>
    %188 = arith.negf %187 : vector<8x32xf32>
    %189 = math.exp %188 : vector<8x32xf32>
    %cst_61 = arith.constant 1.000000e+00 : f32
    %190 = vector.broadcast %cst_61 : f32 to vector<8x32xf32>
    %191 = arith.addf %190, %189 : vector<8x32xf32>
    %192 = arith.divf %190, %191 : vector<8x32xf32>
    %193 = vector.extract_strided_slice %170 {offsets = [0, 64], sizes = [8, 32], strides = [1, 1]} : vector<8x96xf32> to vector<8x32xf32>
    %194 = vector.extract_strided_slice %174 {offsets = [0, 64], sizes = [8, 32], strides = [1, 1]} : vector<8x96xf32> to vector<8x32xf32>
    %195 = arith.mulf %184, %194 : vector<8x32xf32>
    %196 = arith.addf %193, %195 : vector<8x32xf32>
    %197 = math.tanh %196 : vector<8x32xf32>
    %cst_62 = arith.constant 1.000000e+00 : f32
    %198 = vector.broadcast %cst_62 : f32 to vector<8x32xf32>
    %199 = arith.subf %198, %192 : vector<8x32xf32>
    %200 = arith.mulf %199, %197 : vector<8x32xf32>
    %201 = arith.mulf %192, %136 : vector<8x32xf32>
    %202 = arith.addf %200, %201 : vector<8x32xf32>
    %203 = vector.extract_strided_slice %172 {offsets = [0, 0], sizes = [8, 32], strides = [1, 1]} : vector<8x96xf32> to vector<8x32xf32>
    %204 = vector.extract_strided_slice %176 {offsets = [0, 0], sizes = [8, 32], strides = [1, 1]} : vector<8x96xf32> to vector<8x32xf32>
    %205 = arith.addf %203, %204 : vector<8x32xf32>
    %206 = arith.negf %205 : vector<8x32xf32>
    %207 = math.exp %206 : vector<8x32xf32>
    %cst_63 = arith.constant 1.000000e+00 : f32
    %208 = vector.broadcast %cst_63 : f32 to vector<8x32xf32>
    %209 = arith.addf %208, %207 : vector<8x32xf32>
    %210 = arith.divf %208, %209 : vector<8x32xf32>
    %211 = vector.extract_strided_slice %172 {offsets = [0, 32], sizes = [8, 32], strides = [1, 1]} : vector<8x96xf32> to vector<8x32xf32>
    %212 = vector.extract_strided_slice %176 {offsets = [0, 32], sizes = [8, 32], strides = [1, 1]} : vector<8x96xf32> to vector<8x32xf32>
    %213 = arith.addf %211, %212 : vector<8x32xf32>
    %214 = arith.negf %213 : vector<8x32xf32>
    %215 = math.exp %214 : vector<8x32xf32>
    %cst_64 = arith.constant 1.000000e+00 : f32
    %216 = vector.broadcast %cst_64 : f32 to vector<8x32xf32>
    %217 = arith.addf %216, %215 : vector<8x32xf32>
    %218 = arith.divf %216, %217 : vector<8x32xf32>
    %219 = vector.extract_strided_slice %172 {offsets = [0, 64], sizes = [8, 32], strides = [1, 1]} : vector<8x96xf32> to vector<8x32xf32>
    %220 = vector.extract_strided_slice %176 {offsets = [0, 64], sizes = [8, 32], strides = [1, 1]} : vector<8x96xf32> to vector<8x32xf32>
    %221 = arith.mulf %210, %220 : vector<8x32xf32>
    %222 = arith.addf %219, %221 : vector<8x32xf32>
    %223 = math.tanh %222 : vector<8x32xf32>
    %cst_65 = arith.constant 1.000000e+00 : f32
    %224 = vector.broadcast %cst_65 : f32 to vector<8x32xf32>
    %225 = arith.subf %224, %218 : vector<8x32xf32>
    %226 = arith.mulf %225, %223 : vector<8x32xf32>
    %227 = arith.mulf %218, %162 : vector<8x32xf32>
    %228 = arith.addf %226, %227 : vector<8x32xf32>
    %229 = arith.index_cast %168 : i32 to index
    %c0_66 = arith.constant 0 : index
    %230 = vector.load %arg17[%229, %c0_66] : memref<128x32xf32, #tpu.memory_space<vmem>>, vector<8x32xf32>
    tpu.vector_store %arg17[%229, %c0_66], %202 {strides = array<i32>} : memref<128x32xf32, #tpu.memory_space<vmem>>, vector<8x32xf32>,
    %231 = arith.index_cast %168 : i32 to index
    %c0_67 = arith.constant 0 : index
    %232 = vector.load %arg18[%231, %c0_67] : memref<128x32xf32, #tpu.memory_space<vmem>>, vector<8x32xf32>
    tpu.vector_store %arg18[%231, %c0_67], %228 {strides = array<i32>} : memref<128x32xf32, #tpu.memory_space<vmem>>, vector<8x32xf32>,
    %c3_i32 = arith.constant 3 : i32
    %c8_i32_68 = arith.constant 8 : i32
    %233 = arith.muli %c3_i32, %c8_i32_68 : i32
    %234 = tpu.assume_multiple %233, 8 : i32
    %235 = arith.index_cast %234 : i32 to index
    %c0_69 = arith.constant 0 : index
    %236 = vector.load %arg15[%235, %c0_69] : memref<128x96xf32, #tpu.memory_space<vmem>>, vector<8x96xf32>
    %237 = arith.index_cast %234 : i32 to index
    %c0_70 = arith.constant 0 : index
    %238 = vector.load %arg16[%237, %c0_70] : memref<128x96xf32, #tpu.memory_space<vmem>>, vector<8x96xf32>
    %cst_71 = arith.constant dense<0.000000e+00> : vector<8x96xf32>
    %239 = tpu.matmul %202, %23, %cst_71 {dimension_numbers = #tpu.dot_dimension_numbers<[1], [0], [0], [1], [0, 0, 1, 1], [], []>} : vector<8x32xf32>, vector<32x96xf32>, vector<8x96xf32> -> vector<8x96xf32>
    %240 = arith.addf %239, %29 : vector<8x96xf32>
    %cst_72 = arith.constant dense<0.000000e+00> : vector<8x96xf32>
    %241 = tpu.matmul %228, %25, %cst_72 {dimension_numbers = #tpu.dot_dimension_numbers<[1], [0], [0], [1], [0, 0, 1, 1], [], []>} : vector<8x32xf32>, vector<32x96xf32>, vector<8x96xf32> -> vector<8x96xf32>
    %242 = arith.addf %241, %33 : vector<8x96xf32>
    %243 = vector.extract_strided_slice %236 {offsets = [0, 0], sizes = [8, 32], strides = [1, 1]} : vector<8x96xf32> to vector<8x32xf32>
    %244 = vector.extract_strided_slice %240 {offsets = [0, 0], sizes = [8, 32], strides = [1, 1]} : vector<8x96xf32> to vector<8x32xf32>
    %245 = arith.addf %243, %244 : vector<8x32xf32>
    %246 = arith.negf %245 : vector<8x32xf32>
    %247 = math.exp %246 : vector<8x32xf32>
    %cst_73 = arith.constant 1.000000e+00 : f32
    %248 = vector.broadcast %cst_73 : f32 to vector<8x32xf32>
    %249 = arith.addf %248, %247 : vector<8x32xf32>
    %250 = arith.divf %248, %249 : vector<8x32xf32>
    %251 = vector.extract_strided_slice %236 {offsets = [0, 32], sizes = [8, 32], strides = [1, 1]} : vector<8x96xf32> to vector<8x32xf32>
    %252 = vector.extract_strided_slice %240 {offsets = [0, 32], sizes = [8, 32], strides = [1, 1]} : vector<8x96xf32> to vector<8x32xf32>
    %253 = arith.addf %251, %252 : vector<8x32xf32>
    %254 = arith.negf %253 : vector<8x32xf32>
    %255 = math.exp %254 : vector<8x32xf32>
    %cst_74 = arith.constant 1.000000e+00 : f32
    %256 = vector.broadcast %cst_74 : f32 to vector<8x32xf32>
    %257 = arith.addf %256, %255 : vector<8x32xf32>
    %258 = arith.divf %256, %257 : vector<8x32xf32>
    %259 = vector.extract_strided_slice %236 {offsets = [0, 64], sizes = [8, 32], strides = [1, 1]} : vector<8x96xf32> to vector<8x32xf32>
    %260 = vector.extract_strided_slice %240 {offsets = [0, 64], sizes = [8, 32], strides = [1, 1]} : vector<8x96xf32> to vector<8x32xf32>
    %261 = arith.mulf %250, %260 : vector<8x32xf32>
    %262 = arith.addf %259, %261 : vector<8x32xf32>
    %263 = math.tanh %262 : vector<8x32xf32>
    %cst_75 = arith.constant 1.000000e+00 : f32
    %264 = vector.broadcast %cst_75 : f32 to vector<8x32xf32>
    %265 = arith.subf %264, %258 : vector<8x32xf32>
    %266 = arith.mulf %265, %263 : vector<8x32xf32>
    %267 = arith.mulf %258, %202 : vector<8x32xf32>
    %268 = arith.addf %266, %267 : vector<8x32xf32>
    %269 = vector.extract_strided_slice %238 {offsets = [0, 0], sizes = [8, 32], strides = [1, 1]} : vector<8x96xf32> to vector<8x32xf32>
    %270 = vector.extract_strided_slice %242 {offsets = [0, 0], sizes = [8, 32], strides = [1, 1]} : vector<8x96xf32> to vector<8x32xf32>
    %271 = arith.addf %269, %270 : vector<8x32xf32>
    %272 = arith.negf %271 : vector<8x32xf32>
    %273 = math.exp %272 : vector<8x32xf32>
    %cst_76 = arith.constant 1.000000e+00 : f32
    %274 = vector.broadcast %cst_76 : f32 to vector<8x32xf32>
    %275 = arith.addf %274, %273 : vector<8x32xf32>
    %276 = arith.divf %274, %275 : vector<8x32xf32>
    %277 = vector.extract_strided_slice %238 {offsets = [0, 32], sizes = [8, 32], strides = [1, 1]} : vector<8x96xf32> to vector<8x32xf32>
    %278 = vector.extract_strided_slice %242 {offsets = [0, 32], sizes = [8, 32], strides = [1, 1]} : vector<8x96xf32> to vector<8x32xf32>
    %279 = arith.addf %277, %278 : vector<8x32xf32>
    %280 = arith.negf %279 : vector<8x32xf32>
    %281 = math.exp %280 : vector<8x32xf32>
    %cst_77 = arith.constant 1.000000e+00 : f32
    %282 = vector.broadcast %cst_77 : f32 to vector<8x32xf32>
    %283 = arith.addf %282, %281 : vector<8x32xf32>
    %284 = arith.divf %282, %283 : vector<8x32xf32>
    %285 = vector.extract_strided_slice %238 {offsets = [0, 64], sizes = [8, 32], strides = [1, 1]} : vector<8x96xf32> to vector<8x32xf32>
    %286 = vector.extract_strided_slice %242 {offsets = [0, 64], sizes = [8, 32], strides = [1, 1]} : vector<8x96xf32> to vector<8x32xf32>
    %287 = arith.mulf %276, %286 : vector<8x32xf32>
    %288 = arith.addf %285, %287 : vector<8x32xf32>
    %289 = math.tanh %288 : vector<8x32xf32>
    %cst_78 = arith.constant 1.000000e+00 : f32
    %290 = vector.broadcast %cst_78 : f32 to vector<8x32xf32>
    %291 = arith.subf %290, %284 : vector<8x32xf32>
    %292 = arith.mulf %291, %289 : vector<8x32xf32>
    %293 = arith.mulf %284, %228 : vector<8x32xf32>
    %294 = arith.addf %292, %293 : vector<8x32xf32>
    %295 = arith.index_cast %234 : i32 to index
    %c0_79 = arith.constant 0 : index
    %296 = vector.load %arg17[%295, %c0_79] : memref<128x32xf32, #tpu.memory_space<vmem>>, vector<8x32xf32>
    tpu.vector_store %arg17[%295, %c0_79], %268 {strides = array<i32>} : memref<128x32xf32, #tpu.memory_space<vmem>>, vector<8x32xf32>,
    %297 = arith.index_cast %234 : i32 to index
    %c0_80 = arith.constant 0 : index
    %298 = vector.load %arg18[%297, %c0_80] : memref<128x32xf32, #tpu.memory_space<vmem>>, vector<8x32xf32>
    tpu.vector_store %arg18[%297, %c0_80], %294 {strides = array<i32>} : memref<128x32xf32, #tpu.memory_space<vmem>>, vector<8x32xf32>,
    %c4_i32 = arith.constant 4 : i32
    %c8_i32_81 = arith.constant 8 : i32
    %299 = arith.muli %c4_i32, %c8_i32_81 : i32
    %300 = tpu.assume_multiple %299, 8 : i32
    %301 = arith.index_cast %300 : i32 to index
    %c0_82 = arith.constant 0 : index
    %302 = vector.load %arg15[%301, %c0_82] : memref<128x96xf32, #tpu.memory_space<vmem>>, vector<8x96xf32>
    %303 = arith.index_cast %300 : i32 to index
    %c0_83 = arith.constant 0 : index
    %304 = vector.load %arg16[%303, %c0_83] : memref<128x96xf32, #tpu.memory_space<vmem>>, vector<8x96xf32>
    %cst_84 = arith.constant dense<0.000000e+00> : vector<8x96xf32>
    %305 = tpu.matmul %268, %23, %cst_84 {dimension_numbers = #tpu.dot_dimension_numbers<[1], [0], [0], [1], [0, 0, 1, 1], [], []>} : vector<8x32xf32>, vector<32x96xf32>, vector<8x96xf32> -> vector<8x96xf32>
    %306 = arith.addf %305, %29 : vector<8x96xf32>
    %cst_85 = arith.constant dense<0.000000e+00> : vector<8x96xf32>
    %307 = tpu.matmul %294, %25, %cst_85 {dimension_numbers = #tpu.dot_dimension_numbers<[1], [0], [0], [1], [0, 0, 1, 1], [], []>} : vector<8x32xf32>, vector<32x96xf32>, vector<8x96xf32> -> vector<8x96xf32>
    %308 = arith.addf %307, %33 : vector<8x96xf32>
    %309 = vector.extract_strided_slice %302 {offsets = [0, 0], sizes = [8, 32], strides = [1, 1]} : vector<8x96xf32> to vector<8x32xf32>
    %310 = vector.extract_strided_slice %306 {offsets = [0, 0], sizes = [8, 32], strides = [1, 1]} : vector<8x96xf32> to vector<8x32xf32>
    %311 = arith.addf %309, %310 : vector<8x32xf32>
    %312 = arith.negf %311 : vector<8x32xf32>
    %313 = math.exp %312 : vector<8x32xf32>
    %cst_86 = arith.constant 1.000000e+00 : f32
    %314 = vector.broadcast %cst_86 : f32 to vector<8x32xf32>
    %315 = arith.addf %314, %313 : vector<8x32xf32>
    %316 = arith.divf %314, %315 : vector<8x32xf32>
    %317 = vector.extract_strided_slice %302 {offsets = [0, 32], sizes = [8, 32], strides = [1, 1]} : vector<8x96xf32> to vector<8x32xf32>
    %318 = vector.extract_strided_slice %306 {offsets = [0, 32], sizes = [8, 32], strides = [1, 1]} : vector<8x96xf32> to vector<8x32xf32>
    %319 = arith.addf %317, %318 : vector<8x32xf32>
    %320 = arith.negf %319 : vector<8x32xf32>
    %321 = math.exp %320 : vector<8x32xf32>
    %cst_87 = arith.constant 1.000000e+00 : f32
    %322 = vector.broadcast %cst_87 : f32 to vector<8x32xf32>
    %323 = arith.addf %322, %321 : vector<8x32xf32>
    %324 = arith.divf %322, %323 : vector<8x32xf32>
    %325 = vector.extract_strided_slice %302 {offsets = [0, 64], sizes = [8, 32], strides = [1, 1]} : vector<8x96xf32> to vector<8x32xf32>
    %326 = vector.extract_strided_slice %306 {offsets = [0, 64], sizes = [8, 32], strides = [1, 1]} : vector<8x96xf32> to vector<8x32xf32>
    %327 = arith.mulf %316, %326 : vector<8x32xf32>
    %328 = arith.addf %325, %327 : vector<8x32xf32>
    %329 = math.tanh %328 : vector<8x32xf32>
    %cst_88 = arith.constant 1.000000e+00 : f32
    %330 = vector.broadcast %cst_88 : f32 to vector<8x32xf32>
    %331 = arith.subf %330, %324 : vector<8x32xf32>
    %332 = arith.mulf %331, %329 : vector<8x32xf32>
    %333 = arith.mulf %324, %268 : vector<8x32xf32>
    %334 = arith.addf %332, %333 : vector<8x32xf32>
    %335 = vector.extract_strided_slice %304 {offsets = [0, 0], sizes = [8, 32], strides = [1, 1]} : vector<8x96xf32> to vector<8x32xf32>
    %336 = vector.extract_strided_slice %308 {offsets = [0, 0], sizes = [8, 32], strides = [1, 1]} : vector<8x96xf32> to vector<8x32xf32>
    %337 = arith.addf %335, %336 : vector<8x32xf32>
    %338 = arith.negf %337 : vector<8x32xf32>
    %339 = math.exp %338 : vector<8x32xf32>
    %cst_89 = arith.constant 1.000000e+00 : f32
    %340 = vector.broadcast %cst_89 : f32 to vector<8x32xf32>
    %341 = arith.addf %340, %339 : vector<8x32xf32>
    %342 = arith.divf %340, %341 : vector<8x32xf32>
    %343 = vector.extract_strided_slice %304 {offsets = [0, 32], sizes = [8, 32], strides = [1, 1]} : vector<8x96xf32> to vector<8x32xf32>
    %344 = vector.extract_strided_slice %308 {offsets = [0, 32], sizes = [8, 32], strides = [1, 1]} : vector<8x96xf32> to vector<8x32xf32>
    %345 = arith.addf %343, %344 : vector<8x32xf32>
    %346 = arith.negf %345 : vector<8x32xf32>
    %347 = math.exp %346 : vector<8x32xf32>
    %cst_90 = arith.constant 1.000000e+00 : f32
    %348 = vector.broadcast %cst_90 : f32 to vector<8x32xf32>
    %349 = arith.addf %348, %347 : vector<8x32xf32>
    %350 = arith.divf %348, %349 : vector<8x32xf32>
    %351 = vector.extract_strided_slice %304 {offsets = [0, 64], sizes = [8, 32], strides = [1, 1]} : vector<8x96xf32> to vector<8x32xf32>
    %352 = vector.extract_strided_slice %308 {offsets = [0, 64], sizes = [8, 32], strides = [1, 1]} : vector<8x96xf32> to vector<8x32xf32>
    %353 = arith.mulf %342, %352 : vector<8x32xf32>
    %354 = arith.addf %351, %353 : vector<8x32xf32>
    %355 = math.tanh %354 : vector<8x32xf32>
    %cst_91 = arith.constant 1.000000e+00 : f32
    %356 = vector.broadcast %cst_91 : f32 to vector<8x32xf32>
    %357 = arith.subf %356, %350 : vector<8x32xf32>
    %358 = arith.mulf %357, %355 : vector<8x32xf32>
    %359 = arith.mulf %350, %294 : vector<8x32xf32>
    %360 = arith.addf %358, %359 : vector<8x32xf32>
    %361 = arith.index_cast %300 : i32 to index
    %c0_92 = arith.constant 0 : index
    %362 = vector.load %arg17[%361, %c0_92] : memref<128x32xf32, #tpu.memory_space<vmem>>, vector<8x32xf32>
    tpu.vector_store %arg17[%361, %c0_92], %334 {strides = array<i32>} : memref<128x32xf32, #tpu.memory_space<vmem>>, vector<8x32xf32>,
    %363 = arith.index_cast %300 : i32 to index
    %c0_93 = arith.constant 0 : index
    %364 = vector.load %arg18[%363, %c0_93] : memref<128x32xf32, #tpu.memory_space<vmem>>, vector<8x32xf32>
    tpu.vector_store %arg18[%363, %c0_93], %360 {strides = array<i32>} : memref<128x32xf32, #tpu.memory_space<vmem>>, vector<8x32xf32>,
    %c5_i32 = arith.constant 5 : i32
    %c8_i32_94 = arith.constant 8 : i32
    %365 = arith.muli %c5_i32, %c8_i32_94 : i32
    %366 = tpu.assume_multiple %365, 8 : i32
    %367 = arith.index_cast %366 : i32 to index
    %c0_95 = arith.constant 0 : index
    %368 = vector.load %arg15[%367, %c0_95] : memref<128x96xf32, #tpu.memory_space<vmem>>, vector<8x96xf32>
    %369 = arith.index_cast %366 : i32 to index
    %c0_96 = arith.constant 0 : index
    %370 = vector.load %arg16[%369, %c0_96] : memref<128x96xf32, #tpu.memory_space<vmem>>, vector<8x96xf32>
    %cst_97 = arith.constant dense<0.000000e+00> : vector<8x96xf32>
    %371 = tpu.matmul %334, %23, %cst_97 {dimension_numbers = #tpu.dot_dimension_numbers<[1], [0], [0], [1], [0, 0, 1, 1], [], []>} : vector<8x32xf32>, vector<32x96xf32>, vector<8x96xf32> -> vector<8x96xf32>
    %372 = arith.addf %371, %29 : vector<8x96xf32>
    %cst_98 = arith.constant dense<0.000000e+00> : vector<8x96xf32>
    %373 = tpu.matmul %360, %25, %cst_98 {dimension_numbers = #tpu.dot_dimension_numbers<[1], [0], [0], [1], [0, 0, 1, 1], [], []>} : vector<8x32xf32>, vector<32x96xf32>, vector<8x96xf32> -> vector<8x96xf32>
    %374 = arith.addf %373, %33 : vector<8x96xf32>
    %375 = vector.extract_strided_slice %368 {offsets = [0, 0], sizes = [8, 32], strides = [1, 1]} : vector<8x96xf32> to vector<8x32xf32>
    %376 = vector.extract_strided_slice %372 {offsets = [0, 0], sizes = [8, 32], strides = [1, 1]} : vector<8x96xf32> to vector<8x32xf32>
    %377 = arith.addf %375, %376 : vector<8x32xf32>
    %378 = arith.negf %377 : vector<8x32xf32>
    %379 = math.exp %378 : vector<8x32xf32>
    %cst_99 = arith.constant 1.000000e+00 : f32
    %380 = vector.broadcast %cst_99 : f32 to vector<8x32xf32>
    %381 = arith.addf %380, %379 : vector<8x32xf32>
    %382 = arith.divf %380, %381 : vector<8x32xf32>
    %383 = vector.extract_strided_slice %368 {offsets = [0, 32], sizes = [8, 32], strides = [1, 1]} : vector<8x96xf32> to vector<8x32xf32>
    %384 = vector.extract_strided_slice %372 {offsets = [0, 32], sizes = [8, 32], strides = [1, 1]} : vector<8x96xf32> to vector<8x32xf32>
    %385 = arith.addf %383, %384 : vector<8x32xf32>
    %386 = arith.negf %385 : vector<8x32xf32>
    %387 = math.exp %386 : vector<8x32xf32>
    %cst_100 = arith.constant 1.000000e+00 : f32
    %388 = vector.broadcast %cst_100 : f32 to vector<8x32xf32>
    %389 = arith.addf %388, %387 : vector<8x32xf32>
    %390 = arith.divf %388, %389 : vector<8x32xf32>
    %391 = vector.extract_strided_slice %368 {offsets = [0, 64], sizes = [8, 32], strides = [1, 1]} : vector<8x96xf32> to vector<8x32xf32>
    %392 = vector.extract_strided_slice %372 {offsets = [0, 64], sizes = [8, 32], strides = [1, 1]} : vector<8x96xf32> to vector<8x32xf32>
    %393 = arith.mulf %382, %392 : vector<8x32xf32>
    %394 = arith.addf %391, %393 : vector<8x32xf32>
    %395 = math.tanh %394 : vector<8x32xf32>
    %cst_101 = arith.constant 1.000000e+00 : f32
    %396 = vector.broadcast %cst_101 : f32 to vector<8x32xf32>
    %397 = arith.subf %396, %390 : vector<8x32xf32>
    %398 = arith.mulf %397, %395 : vector<8x32xf32>
    %399 = arith.mulf %390, %334 : vector<8x32xf32>
    %400 = arith.addf %398, %399 : vector<8x32xf32>
    %401 = vector.extract_strided_slice %370 {offsets = [0, 0], sizes = [8, 32], strides = [1, 1]} : vector<8x96xf32> to vector<8x32xf32>
    %402 = vector.extract_strided_slice %374 {offsets = [0, 0], sizes = [8, 32], strides = [1, 1]} : vector<8x96xf32> to vector<8x32xf32>
    %403 = arith.addf %401, %402 : vector<8x32xf32>
    %404 = arith.negf %403 : vector<8x32xf32>
    %405 = math.exp %404 : vector<8x32xf32>
    %cst_102 = arith.constant 1.000000e+00 : f32
    %406 = vector.broadcast %cst_102 : f32 to vector<8x32xf32>
    %407 = arith.addf %406, %405 : vector<8x32xf32>
    %408 = arith.divf %406, %407 : vector<8x32xf32>
    %409 = vector.extract_strided_slice %370 {offsets = [0, 32], sizes = [8, 32], strides = [1, 1]} : vector<8x96xf32> to vector<8x32xf32>
    %410 = vector.extract_strided_slice %374 {offsets = [0, 32], sizes = [8, 32], strides = [1, 1]} : vector<8x96xf32> to vector<8x32xf32>
    %411 = arith.addf %409, %410 : vector<8x32xf32>
    %412 = arith.negf %411 : vector<8x32xf32>
    %413 = math.exp %412 : vector<8x32xf32>
    %cst_103 = arith.constant 1.000000e+00 : f32
    %414 = vector.broadcast %cst_103 : f32 to vector<8x32xf32>
    %415 = arith.addf %414, %413 : vector<8x32xf32>
    %416 = arith.divf %414, %415 : vector<8x32xf32>
    %417 = vector.extract_strided_slice %370 {offsets = [0, 64], sizes = [8, 32], strides = [1, 1]} : vector<8x96xf32> to vector<8x32xf32>
    %418 = vector.extract_strided_slice %374 {offsets = [0, 64], sizes = [8, 32], strides = [1, 1]} : vector<8x96xf32> to vector<8x32xf32>
    %419 = arith.mulf %408, %418 : vector<8x32xf32>
    %420 = arith.addf %417, %419 : vector<8x32xf32>
    %421 = math.tanh %420 : vector<8x32xf32>
    %cst_104 = arith.constant 1.000000e+00 : f32
    %422 = vector.broadcast %cst_104 : f32 to vector<8x32xf32>
    %423 = arith.subf %422, %416 : vector<8x32xf32>
    %424 = arith.mulf %423, %421 : vector<8x32xf32>
    %425 = arith.mulf %416, %360 : vector<8x32xf32>
    %426 = arith.addf %424, %425 : vector<8x32xf32>
    %427 = arith.index_cast %366 : i32 to index
    %c0_105 = arith.constant 0 : index
    %428 = vector.load %arg17[%427, %c0_105] : memref<128x32xf32, #tpu.memory_space<vmem>>, vector<8x32xf32>
    tpu.vector_store %arg17[%427, %c0_105], %400 {strides = array<i32>} : memref<128x32xf32, #tpu.memory_space<vmem>>, vector<8x32xf32>,
    %429 = arith.index_cast %366 : i32 to index
    %c0_106 = arith.constant 0 : index
    %430 = vector.load %arg18[%429, %c0_106] : memref<128x32xf32, #tpu.memory_space<vmem>>, vector<8x32xf32>
    tpu.vector_store %arg18[%429, %c0_106], %426 {strides = array<i32>} : memref<128x32xf32, #tpu.memory_space<vmem>>, vector<8x32xf32>,
    %c6_i32 = arith.constant 6 : i32
    %c8_i32_107 = arith.constant 8 : i32
    %431 = arith.muli %c6_i32, %c8_i32_107 : i32
    %432 = tpu.assume_multiple %431, 8 : i32
    %433 = arith.index_cast %432 : i32 to index
    %c0_108 = arith.constant 0 : index
    %434 = vector.load %arg15[%433, %c0_108] : memref<128x96xf32, #tpu.memory_space<vmem>>, vector<8x96xf32>
    %435 = arith.index_cast %432 : i32 to index
    %c0_109 = arith.constant 0 : index
    %436 = vector.load %arg16[%435, %c0_109] : memref<128x96xf32, #tpu.memory_space<vmem>>, vector<8x96xf32>
    %cst_110 = arith.constant dense<0.000000e+00> : vector<8x96xf32>
    %437 = tpu.matmul %400, %23, %cst_110 {dimension_numbers = #tpu.dot_dimension_numbers<[1], [0], [0], [1], [0, 0, 1, 1], [], []>} : vector<8x32xf32>, vector<32x96xf32>, vector<8x96xf32> -> vector<8x96xf32>
    %438 = arith.addf %437, %29 : vector<8x96xf32>
    %cst_111 = arith.constant dense<0.000000e+00> : vector<8x96xf32>
    %439 = tpu.matmul %426, %25, %cst_111 {dimension_numbers = #tpu.dot_dimension_numbers<[1], [0], [0], [1], [0, 0, 1, 1], [], []>} : vector<8x32xf32>, vector<32x96xf32>, vector<8x96xf32> -> vector<8x96xf32>
    %440 = arith.addf %439, %33 : vector<8x96xf32>
    %441 = vector.extract_strided_slice %434 {offsets = [0, 0], sizes = [8, 32], strides = [1, 1]} : vector<8x96xf32> to vector<8x32xf32>
    %442 = vector.extract_strided_slice %438 {offsets = [0, 0], sizes = [8, 32], strides = [1, 1]} : vector<8x96xf32> to vector<8x32xf32>
    %443 = arith.addf %441, %442 : vector<8x32xf32>
    %444 = arith.negf %443 : vector<8x32xf32>
    %445 = math.exp %444 : vector<8x32xf32>
    %cst_112 = arith.constant 1.000000e+00 : f32
    %446 = vector.broadcast %cst_112 : f32 to vector<8x32xf32>
    %447 = arith.addf %446, %445 : vector<8x32xf32>
    %448 = arith.divf %446, %447 : vector<8x32xf32>
    %449 = vector.extract_strided_slice %434 {offsets = [0, 32], sizes = [8, 32], strides = [1, 1]} : vector<8x96xf32> to vector<8x32xf32>
    %450 = vector.extract_strided_slice %438 {offsets = [0, 32], sizes = [8, 32], strides = [1, 1]} : vector<8x96xf32> to vector<8x32xf32>
    %451 = arith.addf %449, %450 : vector<8x32xf32>
    %452 = arith.negf %451 : vector<8x32xf32>
    %453 = math.exp %452 : vector<8x32xf32>
    %cst_113 = arith.constant 1.000000e+00 : f32
    %454 = vector.broadcast %cst_113 : f32 to vector<8x32xf32>
    %455 = arith.addf %454, %453 : vector<8x32xf32>
    %456 = arith.divf %454, %455 : vector<8x32xf32>
    %457 = vector.extract_strided_slice %434 {offsets = [0, 64], sizes = [8, 32], strides = [1, 1]} : vector<8x96xf32> to vector<8x32xf32>
    %458 = vector.extract_strided_slice %438 {offsets = [0, 64], sizes = [8, 32], strides = [1, 1]} : vector<8x96xf32> to vector<8x32xf32>
    %459 = arith.mulf %448, %458 : vector<8x32xf32>
    %460 = arith.addf %457, %459 : vector<8x32xf32>
    %461 = math.tanh %460 : vector<8x32xf32>
    %cst_114 = arith.constant 1.000000e+00 : f32
    %462 = vector.broadcast %cst_114 : f32 to vector<8x32xf32>
    %463 = arith.subf %462, %456 : vector<8x32xf32>
    %464 = arith.mulf %463, %461 : vector<8x32xf32>
    %465 = arith.mulf %456, %400 : vector<8x32xf32>
    %466 = arith.addf %464, %465 : vector<8x32xf32>
    %467 = vector.extract_strided_slice %436 {offsets = [0, 0], sizes = [8, 32], strides = [1, 1]} : vector<8x96xf32> to vector<8x32xf32>
    %468 = vector.extract_strided_slice %440 {offsets = [0, 0], sizes = [8, 32], strides = [1, 1]} : vector<8x96xf32> to vector<8x32xf32>
    %469 = arith.addf %467, %468 : vector<8x32xf32>
    %470 = arith.negf %469 : vector<8x32xf32>
    %471 = math.exp %470 : vector<8x32xf32>
    %cst_115 = arith.constant 1.000000e+00 : f32
    %472 = vector.broadcast %cst_115 : f32 to vector<8x32xf32>
    %473 = arith.addf %472, %471 : vector<8x32xf32>
    %474 = arith.divf %472, %473 : vector<8x32xf32>
    %475 = vector.extract_strided_slice %436 {offsets = [0, 32], sizes = [8, 32], strides = [1, 1]} : vector<8x96xf32> to vector<8x32xf32>
    %476 = vector.extract_strided_slice %440 {offsets = [0, 32], sizes = [8, 32], strides = [1, 1]} : vector<8x96xf32> to vector<8x32xf32>
    %477 = arith.addf %475, %476 : vector<8x32xf32>
    %478 = arith.negf %477 : vector<8x32xf32>
    %479 = math.exp %478 : vector<8x32xf32>
    %cst_116 = arith.constant 1.000000e+00 : f32
    %480 = vector.broadcast %cst_116 : f32 to vector<8x32xf32>
    %481 = arith.addf %480, %479 : vector<8x32xf32>
    %482 = arith.divf %480, %481 : vector<8x32xf32>
    %483 = vector.extract_strided_slice %436 {offsets = [0, 64], sizes = [8, 32], strides = [1, 1]} : vector<8x96xf32> to vector<8x32xf32>
    %484 = vector.extract_strided_slice %440 {offsets = [0, 64], sizes = [8, 32], strides = [1, 1]} : vector<8x96xf32> to vector<8x32xf32>
    %485 = arith.mulf %474, %484 : vector<8x32xf32>
    %486 = arith.addf %483, %485 : vector<8x32xf32>
    %487 = math.tanh %486 : vector<8x32xf32>
    %cst_117 = arith.constant 1.000000e+00 : f32
    %488 = vector.broadcast %cst_117 : f32 to vector<8x32xf32>
    %489 = arith.subf %488, %482 : vector<8x32xf32>
    %490 = arith.mulf %489, %487 : vector<8x32xf32>
    %491 = arith.mulf %482, %426 : vector<8x32xf32>
    %492 = arith.addf %490, %491 : vector<8x32xf32>
    %493 = arith.index_cast %432 : i32 to index
    %c0_118 = arith.constant 0 : index
    %494 = vector.load %arg17[%493, %c0_118] : memref<128x32xf32, #tpu.memory_space<vmem>>, vector<8x32xf32>
    tpu.vector_store %arg17[%493, %c0_118], %466 {strides = array<i32>} : memref<128x32xf32, #tpu.memory_space<vmem>>, vector<8x32xf32>,
    %495 = arith.index_cast %432 : i32 to index
    %c0_119 = arith.constant 0 : index
    %496 = vector.load %arg18[%495, %c0_119] : memref<128x32xf32, #tpu.memory_space<vmem>>, vector<8x32xf32>
    tpu.vector_store %arg18[%495, %c0_119], %492 {strides = array<i32>} : memref<128x32xf32, #tpu.memory_space<vmem>>, vector<8x32xf32>,
    %c7_i32 = arith.constant 7 : i32
    %c8_i32_120 = arith.constant 8 : i32
    %497 = arith.muli %c7_i32, %c8_i32_120 : i32
    %498 = tpu.assume_multiple %497, 8 : i32
    %499 = arith.index_cast %498 : i32 to index
    %c0_121 = arith.constant 0 : index
    %500 = vector.load %arg15[%499, %c0_121] : memref<128x96xf32, #tpu.memory_space<vmem>>, vector<8x96xf32>
    %501 = arith.index_cast %498 : i32 to index
    %c0_122 = arith.constant 0 : index
    %502 = vector.load %arg16[%501, %c0_122] : memref<128x96xf32, #tpu.memory_space<vmem>>, vector<8x96xf32>
    %cst_123 = arith.constant dense<0.000000e+00> : vector<8x96xf32>
    %503 = tpu.matmul %466, %23, %cst_123 {dimension_numbers = #tpu.dot_dimension_numbers<[1], [0], [0], [1], [0, 0, 1, 1], [], []>} : vector<8x32xf32>, vector<32x96xf32>, vector<8x96xf32> -> vector<8x96xf32>
    %504 = arith.addf %503, %29 : vector<8x96xf32>
    %cst_124 = arith.constant dense<0.000000e+00> : vector<8x96xf32>
    %505 = tpu.matmul %492, %25, %cst_124 {dimension_numbers = #tpu.dot_dimension_numbers<[1], [0], [0], [1], [0, 0, 1, 1], [], []>} : vector<8x32xf32>, vector<32x96xf32>, vector<8x96xf32> -> vector<8x96xf32>
    %506 = arith.addf %505, %33 : vector<8x96xf32>
    %507 = vector.extract_strided_slice %500 {offsets = [0, 0], sizes = [8, 32], strides = [1, 1]} : vector<8x96xf32> to vector<8x32xf32>
    %508 = vector.extract_strided_slice %504 {offsets = [0, 0], sizes = [8, 32], strides = [1, 1]} : vector<8x96xf32> to vector<8x32xf32>
    %509 = arith.addf %507, %508 : vector<8x32xf32>
    %510 = arith.negf %509 : vector<8x32xf32>
    %511 = math.exp %510 : vector<8x32xf32>
    %cst_125 = arith.constant 1.000000e+00 : f32
    %512 = vector.broadcast %cst_125 : f32 to vector<8x32xf32>
    %513 = arith.addf %512, %511 : vector<8x32xf32>
    %514 = arith.divf %512, %513 : vector<8x32xf32>
    %515 = vector.extract_strided_slice %500 {offsets = [0, 32], sizes = [8, 32], strides = [1, 1]} : vector<8x96xf32> to vector<8x32xf32>
    %516 = vector.extract_strided_slice %504 {offsets = [0, 32], sizes = [8, 32], strides = [1, 1]} : vector<8x96xf32> to vector<8x32xf32>
    %517 = arith.addf %515, %516 : vector<8x32xf32>
    %518 = arith.negf %517 : vector<8x32xf32>
    %519 = math.exp %518 : vector<8x32xf32>
    %cst_126 = arith.constant 1.000000e+00 : f32
    %520 = vector.broadcast %cst_126 : f32 to vector<8x32xf32>
    %521 = arith.addf %520, %519 : vector<8x32xf32>
    %522 = arith.divf %520, %521 : vector<8x32xf32>
    %523 = vector.extract_strided_slice %500 {offsets = [0, 64], sizes = [8, 32], strides = [1, 1]} : vector<8x96xf32> to vector<8x32xf32>
    %524 = vector.extract_strided_slice %504 {offsets = [0, 64], sizes = [8, 32], strides = [1, 1]} : vector<8x96xf32> to vector<8x32xf32>
    %525 = arith.mulf %514, %524 : vector<8x32xf32>
    %526 = arith.addf %523, %525 : vector<8x32xf32>
    %527 = math.tanh %526 : vector<8x32xf32>
    %cst_127 = arith.constant 1.000000e+00 : f32
    %528 = vector.broadcast %cst_127 : f32 to vector<8x32xf32>
    %529 = arith.subf %528, %522 : vector<8x32xf32>
    %530 = arith.mulf %529, %527 : vector<8x32xf32>
    %531 = arith.mulf %522, %466 : vector<8x32xf32>
    %532 = arith.addf %530, %531 : vector<8x32xf32>
    %533 = vector.extract_strided_slice %502 {offsets = [0, 0], sizes = [8, 32], strides = [1, 1]} : vector<8x96xf32> to vector<8x32xf32>
    %534 = vector.extract_strided_slice %506 {offsets = [0, 0], sizes = [8, 32], strides = [1, 1]} : vector<8x96xf32> to vector<8x32xf32>
    %535 = arith.addf %533, %534 : vector<8x32xf32>
    %536 = arith.negf %535 : vector<8x32xf32>
    %537 = math.exp %536 : vector<8x32xf32>
    %cst_128 = arith.constant 1.000000e+00 : f32
    %538 = vector.broadcast %cst_128 : f32 to vector<8x32xf32>
    %539 = arith.addf %538, %537 : vector<8x32xf32>
    %540 = arith.divf %538, %539 : vector<8x32xf32>
    %541 = vector.extract_strided_slice %502 {offsets = [0, 32], sizes = [8, 32], strides = [1, 1]} : vector<8x96xf32> to vector<8x32xf32>
    %542 = vector.extract_strided_slice %506 {offsets = [0, 32], sizes = [8, 32], strides = [1, 1]} : vector<8x96xf32> to vector<8x32xf32>
    %543 = arith.addf %541, %542 : vector<8x32xf32>
    %544 = arith.negf %543 : vector<8x32xf32>
    %545 = math.exp %544 : vector<8x32xf32>
    %cst_129 = arith.constant 1.000000e+00 : f32
    %546 = vector.broadcast %cst_129 : f32 to vector<8x32xf32>
    %547 = arith.addf %546, %545 : vector<8x32xf32>
    %548 = arith.divf %546, %547 : vector<8x32xf32>
    %549 = vector.extract_strided_slice %502 {offsets = [0, 64], sizes = [8, 32], strides = [1, 1]} : vector<8x96xf32> to vector<8x32xf32>
    %550 = vector.extract_strided_slice %506 {offsets = [0, 64], sizes = [8, 32], strides = [1, 1]} : vector<8x96xf32> to vector<8x32xf32>
    %551 = arith.mulf %540, %550 : vector<8x32xf32>
    %552 = arith.addf %549, %551 : vector<8x32xf32>
    %553 = math.tanh %552 : vector<8x32xf32>
    %cst_130 = arith.constant 1.000000e+00 : f32
    %554 = vector.broadcast %cst_130 : f32 to vector<8x32xf32>
    %555 = arith.subf %554, %548 : vector<8x32xf32>
    %556 = arith.mulf %555, %553 : vector<8x32xf32>
    %557 = arith.mulf %548, %492 : vector<8x32xf32>
    %558 = arith.addf %556, %557 : vector<8x32xf32>
    %559 = arith.index_cast %498 : i32 to index
    %c0_131 = arith.constant 0 : index
    %560 = vector.load %arg17[%559, %c0_131] : memref<128x32xf32, #tpu.memory_space<vmem>>, vector<8x32xf32>
    tpu.vector_store %arg17[%559, %c0_131], %532 {strides = array<i32>} : memref<128x32xf32, #tpu.memory_space<vmem>>, vector<8x32xf32>,
    %561 = arith.index_cast %498 : i32 to index
    %c0_132 = arith.constant 0 : index
    %562 = vector.load %arg18[%561, %c0_132] : memref<128x32xf32, #tpu.memory_space<vmem>>, vector<8x32xf32>
    tpu.vector_store %arg18[%561, %c0_132], %558 {strides = array<i32>} : memref<128x32xf32, #tpu.memory_space<vmem>>, vector<8x32xf32>,
    %c8_i32_133 = arith.constant 8 : i32
    %c8_i32_134 = arith.constant 8 : i32
    %563 = arith.muli %c8_i32_133, %c8_i32_134 : i32
    %564 = tpu.assume_multiple %563, 8 : i32
    %565 = arith.index_cast %564 : i32 to index
    %c0_135 = arith.constant 0 : index
    %566 = vector.load %arg15[%565, %c0_135] : memref<128x96xf32, #tpu.memory_space<vmem>>, vector<8x96xf32>
    %567 = arith.index_cast %564 : i32 to index
    %c0_136 = arith.constant 0 : index
    %568 = vector.load %arg16[%567, %c0_136] : memref<128x96xf32, #tpu.memory_space<vmem>>, vector<8x96xf32>
    %cst_137 = arith.constant dense<0.000000e+00> : vector<8x96xf32>
    %569 = tpu.matmul %532, %23, %cst_137 {dimension_numbers = #tpu.dot_dimension_numbers<[1], [0], [0], [1], [0, 0, 1, 1], [], []>} : vector<8x32xf32>, vector<32x96xf32>, vector<8x96xf32> -> vector<8x96xf32>
    %570 = arith.addf %569, %29 : vector<8x96xf32>
    %cst_138 = arith.constant dense<0.000000e+00> : vector<8x96xf32>
    %571 = tpu.matmul %558, %25, %cst_138 {dimension_numbers = #tpu.dot_dimension_numbers<[1], [0], [0], [1], [0, 0, 1, 1], [], []>} : vector<8x32xf32>, vector<32x96xf32>, vector<8x96xf32> -> vector<8x96xf32>
    %572 = arith.addf %571, %33 : vector<8x96xf32>
    %573 = vector.extract_strided_slice %566 {offsets = [0, 0], sizes = [8, 32], strides = [1, 1]} : vector<8x96xf32> to vector<8x32xf32>
    %574 = vector.extract_strided_slice %570 {offsets = [0, 0], sizes = [8, 32], strides = [1, 1]} : vector<8x96xf32> to vector<8x32xf32>
    %575 = arith.addf %573, %574 : vector<8x32xf32>
    %576 = arith.negf %575 : vector<8x32xf32>
    %577 = math.exp %576 : vector<8x32xf32>
    %cst_139 = arith.constant 1.000000e+00 : f32
    %578 = vector.broadcast %cst_139 : f32 to vector<8x32xf32>
    %579 = arith.addf %578, %577 : vector<8x32xf32>
    %580 = arith.divf %578, %579 : vector<8x32xf32>
    %581 = vector.extract_strided_slice %566 {offsets = [0, 32], sizes = [8, 32], strides = [1, 1]} : vector<8x96xf32> to vector<8x32xf32>
    %582 = vector.extract_strided_slice %570 {offsets = [0, 32], sizes = [8, 32], strides = [1, 1]} : vector<8x96xf32> to vector<8x32xf32>
    %583 = arith.addf %581, %582 : vector<8x32xf32>
    %584 = arith.negf %583 : vector<8x32xf32>
    %585 = math.exp %584 : vector<8x32xf32>
    %cst_140 = arith.constant 1.000000e+00 : f32
    %586 = vector.broadcast %cst_140 : f32 to vector<8x32xf32>
    %587 = arith.addf %586, %585 : vector<8x32xf32>
    %588 = arith.divf %586, %587 : vector<8x32xf32>
    %589 = vector.extract_strided_slice %566 {offsets = [0, 64], sizes = [8, 32], strides = [1, 1]} : vector<8x96xf32> to vector<8x32xf32>
    %590 = vector.extract_strided_slice %570 {offsets = [0, 64], sizes = [8, 32], strides = [1, 1]} : vector<8x96xf32> to vector<8x32xf32>
    %591 = arith.mulf %580, %590 : vector<8x32xf32>
    %592 = arith.addf %589, %591 : vector<8x32xf32>
    %593 = math.tanh %592 : vector<8x32xf32>
    %cst_141 = arith.constant 1.000000e+00 : f32
    %594 = vector.broadcast %cst_141 : f32 to vector<8x32xf32>
    %595 = arith.subf %594, %588 : vector<8x32xf32>
    %596 = arith.mulf %595, %593 : vector<8x32xf32>
    %597 = arith.mulf %588, %532 : vector<8x32xf32>
    %598 = arith.addf %596, %597 : vector<8x32xf32>
    %599 = vector.extract_strided_slice %568 {offsets = [0, 0], sizes = [8, 32], strides = [1, 1]} : vector<8x96xf32> to vector<8x32xf32>
    %600 = vector.extract_strided_slice %572 {offsets = [0, 0], sizes = [8, 32], strides = [1, 1]} : vector<8x96xf32> to vector<8x32xf32>
    %601 = arith.addf %599, %600 : vector<8x32xf32>
    %602 = arith.negf %601 : vector<8x32xf32>
    %603 = math.exp %602 : vector<8x32xf32>
    %cst_142 = arith.constant 1.000000e+00 : f32
    %604 = vector.broadcast %cst_142 : f32 to vector<8x32xf32>
    %605 = arith.addf %604, %603 : vector<8x32xf32>
    %606 = arith.divf %604, %605 : vector<8x32xf32>
    %607 = vector.extract_strided_slice %568 {offsets = [0, 32], sizes = [8, 32], strides = [1, 1]} : vector<8x96xf32> to vector<8x32xf32>
    %608 = vector.extract_strided_slice %572 {offsets = [0, 32], sizes = [8, 32], strides = [1, 1]} : vector<8x96xf32> to vector<8x32xf32>
    %609 = arith.addf %607, %608 : vector<8x32xf32>
    %610 = arith.negf %609 : vector<8x32xf32>
    %611 = math.exp %610 : vector<8x32xf32>
    %cst_143 = arith.constant 1.000000e+00 : f32
    %612 = vector.broadcast %cst_143 : f32 to vector<8x32xf32>
    %613 = arith.addf %612, %611 : vector<8x32xf32>
    %614 = arith.divf %612, %613 : vector<8x32xf32>
    %615 = vector.extract_strided_slice %568 {offsets = [0, 64], sizes = [8, 32], strides = [1, 1]} : vector<8x96xf32> to vector<8x32xf32>
    %616 = vector.extract_strided_slice %572 {offsets = [0, 64], sizes = [8, 32], strides = [1, 1]} : vector<8x96xf32> to vector<8x32xf32>
    %617 = arith.mulf %606, %616 : vector<8x32xf32>
    %618 = arith.addf %615, %617 : vector<8x32xf32>
    %619 = math.tanh %618 : vector<8x32xf32>
    %cst_144 = arith.constant 1.000000e+00 : f32
    %620 = vector.broadcast %cst_144 : f32 to vector<8x32xf32>
    %621 = arith.subf %620, %614 : vector<8x32xf32>
    %622 = arith.mulf %621, %619 : vector<8x32xf32>
    %623 = arith.mulf %614, %558 : vector<8x32xf32>
    %624 = arith.addf %622, %623 : vector<8x32xf32>
    %625 = arith.index_cast %564 : i32 to index
    %c0_145 = arith.constant 0 : index
    %626 = vector.load %arg17[%625, %c0_145] : memref<128x32xf32, #tpu.memory_space<vmem>>, vector<8x32xf32>
    tpu.vector_store %arg17[%625, %c0_145], %598 {strides = array<i32>} : memref<128x32xf32, #tpu.memory_space<vmem>>, vector<8x32xf32>,
    %627 = arith.index_cast %564 : i32 to index
    %c0_146 = arith.constant 0 : index
    %628 = vector.load %arg18[%627, %c0_146] : memref<128x32xf32, #tpu.memory_space<vmem>>, vector<8x32xf32>
    tpu.vector_store %arg18[%627, %c0_146], %624 {strides = array<i32>} : memref<128x32xf32, #tpu.memory_space<vmem>>, vector<8x32xf32>,
    %c9_i32 = arith.constant 9 : i32
    %c8_i32_147 = arith.constant 8 : i32
    %629 = arith.muli %c9_i32, %c8_i32_147 : i32
    %630 = tpu.assume_multiple %629, 8 : i32
    %631 = arith.index_cast %630 : i32 to index
    %c0_148 = arith.constant 0 : index
    %632 = vector.load %arg15[%631, %c0_148] : memref<128x96xf32, #tpu.memory_space<vmem>>, vector<8x96xf32>
    %633 = arith.index_cast %630 : i32 to index
    %c0_149 = arith.constant 0 : index
    %634 = vector.load %arg16[%633, %c0_149] : memref<128x96xf32, #tpu.memory_space<vmem>>, vector<8x96xf32>
    %cst_150 = arith.constant dense<0.000000e+00> : vector<8x96xf32>
    %635 = tpu.matmul %598, %23, %cst_150 {dimension_numbers = #tpu.dot_dimension_numbers<[1], [0], [0], [1], [0, 0, 1, 1], [], []>} : vector<8x32xf32>, vector<32x96xf32>, vector<8x96xf32> -> vector<8x96xf32>
    %636 = arith.addf %635, %29 : vector<8x96xf32>
    %cst_151 = arith.constant dense<0.000000e+00> : vector<8x96xf32>
    %637 = tpu.matmul %624, %25, %cst_151 {dimension_numbers = #tpu.dot_dimension_numbers<[1], [0], [0], [1], [0, 0, 1, 1], [], []>} : vector<8x32xf32>, vector<32x96xf32>, vector<8x96xf32> -> vector<8x96xf32>
    %638 = arith.addf %637, %33 : vector<8x96xf32>
    %639 = vector.extract_strided_slice %632 {offsets = [0, 0], sizes = [8, 32], strides = [1, 1]} : vector<8x96xf32> to vector<8x32xf32>
    %640 = vector.extract_strided_slice %636 {offsets = [0, 0], sizes = [8, 32], strides = [1, 1]} : vector<8x96xf32> to vector<8x32xf32>
    %641 = arith.addf %639, %640 : vector<8x32xf32>
    %642 = arith.negf %641 : vector<8x32xf32>
    %643 = math.exp %642 : vector<8x32xf32>
    %cst_152 = arith.constant 1.000000e+00 : f32
    %644 = vector.broadcast %cst_152 : f32 to vector<8x32xf32>
    %645 = arith.addf %644, %643 : vector<8x32xf32>
    %646 = arith.divf %644, %645 : vector<8x32xf32>
    %647 = vector.extract_strided_slice %632 {offsets = [0, 32], sizes = [8, 32], strides = [1, 1]} : vector<8x96xf32> to vector<8x32xf32>
    %648 = vector.extract_strided_slice %636 {offsets = [0, 32], sizes = [8, 32], strides = [1, 1]} : vector<8x96xf32> to vector<8x32xf32>
    %649 = arith.addf %647, %648 : vector<8x32xf32>
    %650 = arith.negf %649 : vector<8x32xf32>
    %651 = math.exp %650 : vector<8x32xf32>
    %cst_153 = arith.constant 1.000000e+00 : f32
    %652 = vector.broadcast %cst_153 : f32 to vector<8x32xf32>
    %653 = arith.addf %652, %651 : vector<8x32xf32>
    %654 = arith.divf %652, %653 : vector<8x32xf32>
    %655 = vector.extract_strided_slice %632 {offsets = [0, 64], sizes = [8, 32], strides = [1, 1]} : vector<8x96xf32> to vector<8x32xf32>
    %656 = vector.extract_strided_slice %636 {offsets = [0, 64], sizes = [8, 32], strides = [1, 1]} : vector<8x96xf32> to vector<8x32xf32>
    %657 = arith.mulf %646, %656 : vector<8x32xf32>
    %658 = arith.addf %655, %657 : vector<8x32xf32>
    %659 = math.tanh %658 : vector<8x32xf32>
    %cst_154 = arith.constant 1.000000e+00 : f32
    %660 = vector.broadcast %cst_154 : f32 to vector<8x32xf32>
    %661 = arith.subf %660, %654 : vector<8x32xf32>
    %662 = arith.mulf %661, %659 : vector<8x32xf32>
    %663 = arith.mulf %654, %598 : vector<8x32xf32>
    %664 = arith.addf %662, %663 : vector<8x32xf32>
    %665 = vector.extract_strided_slice %634 {offsets = [0, 0], sizes = [8, 32], strides = [1, 1]} : vector<8x96xf32> to vector<8x32xf32>
    %666 = vector.extract_strided_slice %638 {offsets = [0, 0], sizes = [8, 32], strides = [1, 1]} : vector<8x96xf32> to vector<8x32xf32>
    %667 = arith.addf %665, %666 : vector<8x32xf32>
    %668 = arith.negf %667 : vector<8x32xf32>
    %669 = math.exp %668 : vector<8x32xf32>
    %cst_155 = arith.constant 1.000000e+00 : f32
    %670 = vector.broadcast %cst_155 : f32 to vector<8x32xf32>
    %671 = arith.addf %670, %669 : vector<8x32xf32>
    %672 = arith.divf %670, %671 : vector<8x32xf32>
    %673 = vector.extract_strided_slice %634 {offsets = [0, 32], sizes = [8, 32], strides = [1, 1]} : vector<8x96xf32> to vector<8x32xf32>
    %674 = vector.extract_strided_slice %638 {offsets = [0, 32], sizes = [8, 32], strides = [1, 1]} : vector<8x96xf32> to vector<8x32xf32>
    %675 = arith.addf %673, %674 : vector<8x32xf32>
    %676 = arith.negf %675 : vector<8x32xf32>
    %677 = math.exp %676 : vector<8x32xf32>
    %cst_156 = arith.constant 1.000000e+00 : f32
    %678 = vector.broadcast %cst_156 : f32 to vector<8x32xf32>
    %679 = arith.addf %678, %677 : vector<8x32xf32>
    %680 = arith.divf %678, %679 : vector<8x32xf32>
    %681 = vector.extract_strided_slice %634 {offsets = [0, 64], sizes = [8, 32], strides = [1, 1]} : vector<8x96xf32> to vector<8x32xf32>
    %682 = vector.extract_strided_slice %638 {offsets = [0, 64], sizes = [8, 32], strides = [1, 1]} : vector<8x96xf32> to vector<8x32xf32>
    %683 = arith.mulf %672, %682 : vector<8x32xf32>
    %684 = arith.addf %681, %683 : vector<8x32xf32>
    %685 = math.tanh %684 : vector<8x32xf32>
    %cst_157 = arith.constant 1.000000e+00 : f32
    %686 = vector.broadcast %cst_157 : f32 to vector<8x32xf32>
    %687 = arith.subf %686, %680 : vector<8x32xf32>
    %688 = arith.mulf %687, %685 : vector<8x32xf32>
    %689 = arith.mulf %680, %624 : vector<8x32xf32>
    %690 = arith.addf %688, %689 : vector<8x32xf32>
    %691 = arith.index_cast %630 : i32 to index
    %c0_158 = arith.constant 0 : index
    %692 = vector.load %arg17[%691, %c0_158] : memref<128x32xf32, #tpu.memory_space<vmem>>, vector<8x32xf32>
    tpu.vector_store %arg17[%691, %c0_158], %664 {strides = array<i32>} : memref<128x32xf32, #tpu.memory_space<vmem>>, vector<8x32xf32>,
    %693 = arith.index_cast %630 : i32 to index
    %c0_159 = arith.constant 0 : index
    %694 = vector.load %arg18[%693, %c0_159] : memref<128x32xf32, #tpu.memory_space<vmem>>, vector<8x32xf32>
    tpu.vector_store %arg18[%693, %c0_159], %690 {strides = array<i32>} : memref<128x32xf32, #tpu.memory_space<vmem>>, vector<8x32xf32>,
    %c10_i32 = arith.constant 10 : i32
    %c8_i32_160 = arith.constant 8 : i32
    %695 = arith.muli %c10_i32, %c8_i32_160 : i32
    %696 = tpu.assume_multiple %695, 8 : i32
    %697 = arith.index_cast %696 : i32 to index
    %c0_161 = arith.constant 0 : index
    %698 = vector.load %arg15[%697, %c0_161] : memref<128x96xf32, #tpu.memory_space<vmem>>, vector<8x96xf32>
    %699 = arith.index_cast %696 : i32 to index
    %c0_162 = arith.constant 0 : index
    %700 = vector.load %arg16[%699, %c0_162] : memref<128x96xf32, #tpu.memory_space<vmem>>, vector<8x96xf32>
    %cst_163 = arith.constant dense<0.000000e+00> : vector<8x96xf32>
    %701 = tpu.matmul %664, %23, %cst_163 {dimension_numbers = #tpu.dot_dimension_numbers<[1], [0], [0], [1], [0, 0, 1, 1], [], []>} : vector<8x32xf32>, vector<32x96xf32>, vector<8x96xf32> -> vector<8x96xf32>
    %702 = arith.addf %701, %29 : vector<8x96xf32>
    %cst_164 = arith.constant dense<0.000000e+00> : vector<8x96xf32>
    %703 = tpu.matmul %690, %25, %cst_164 {dimension_numbers = #tpu.dot_dimension_numbers<[1], [0], [0], [1], [0, 0, 1, 1], [], []>} : vector<8x32xf32>, vector<32x96xf32>, vector<8x96xf32> -> vector<8x96xf32>
    %704 = arith.addf %703, %33 : vector<8x96xf32>
    %705 = vector.extract_strided_slice %698 {offsets = [0, 0], sizes = [8, 32], strides = [1, 1]} : vector<8x96xf32> to vector<8x32xf32>
    %706 = vector.extract_strided_slice %702 {offsets = [0, 0], sizes = [8, 32], strides = [1, 1]} : vector<8x96xf32> to vector<8x32xf32>
    %707 = arith.addf %705, %706 : vector<8x32xf32>
    %708 = arith.negf %707 : vector<8x32xf32>
    %709 = math.exp %708 : vector<8x32xf32>
    %cst_165 = arith.constant 1.000000e+00 : f32
    %710 = vector.broadcast %cst_165 : f32 to vector<8x32xf32>
    %711 = arith.addf %710, %709 : vector<8x32xf32>
    %712 = arith.divf %710, %711 : vector<8x32xf32>
    %713 = vector.extract_strided_slice %698 {offsets = [0, 32], sizes = [8, 32], strides = [1, 1]} : vector<8x96xf32> to vector<8x32xf32>
    %714 = vector.extract_strided_slice %702 {offsets = [0, 32], sizes = [8, 32], strides = [1, 1]} : vector<8x96xf32> to vector<8x32xf32>
    %715 = arith.addf %713, %714 : vector<8x32xf32>
    %716 = arith.negf %715 : vector<8x32xf32>
    %717 = math.exp %716 : vector<8x32xf32>
    %cst_166 = arith.constant 1.000000e+00 : f32
    %718 = vector.broadcast %cst_166 : f32 to vector<8x32xf32>
    %719 = arith.addf %718, %717 : vector<8x32xf32>
    %720 = arith.divf %718, %719 : vector<8x32xf32>
    %721 = vector.extract_strided_slice %698 {offsets = [0, 64], sizes = [8, 32], strides = [1, 1]} : vector<8x96xf32> to vector<8x32xf32>
    %722 = vector.extract_strided_slice %702 {offsets = [0, 64], sizes = [8, 32], strides = [1, 1]} : vector<8x96xf32> to vector<8x32xf32>
    %723 = arith.mulf %712, %722 : vector<8x32xf32>
    %724 = arith.addf %721, %723 : vector<8x32xf32>
    %725 = math.tanh %724 : vector<8x32xf32>
    %cst_167 = arith.constant 1.000000e+00 : f32
    %726 = vector.broadcast %cst_167 : f32 to vector<8x32xf32>
    %727 = arith.subf %726, %720 : vector<8x32xf32>
    %728 = arith.mulf %727, %725 : vector<8x32xf32>
    %729 = arith.mulf %720, %664 : vector<8x32xf32>
    %730 = arith.addf %728, %729 : vector<8x32xf32>
    %731 = vector.extract_strided_slice %700 {offsets = [0, 0], sizes = [8, 32], strides = [1, 1]} : vector<8x96xf32> to vector<8x32xf32>
    %732 = vector.extract_strided_slice %704 {offsets = [0, 0], sizes = [8, 32], strides = [1, 1]} : vector<8x96xf32> to vector<8x32xf32>
    %733 = arith.addf %731, %732 : vector<8x32xf32>
    %734 = arith.negf %733 : vector<8x32xf32>
    %735 = math.exp %734 : vector<8x32xf32>
    %cst_168 = arith.constant 1.000000e+00 : f32
    %736 = vector.broadcast %cst_168 : f32 to vector<8x32xf32>
    %737 = arith.addf %736, %735 : vector<8x32xf32>
    %738 = arith.divf %736, %737 : vector<8x32xf32>
    %739 = vector.extract_strided_slice %700 {offsets = [0, 32], sizes = [8, 32], strides = [1, 1]} : vector<8x96xf32> to vector<8x32xf32>
    %740 = vector.extract_strided_slice %704 {offsets = [0, 32], sizes = [8, 32], strides = [1, 1]} : vector<8x96xf32> to vector<8x32xf32>
    %741 = arith.addf %739, %740 : vector<8x32xf32>
    %742 = arith.negf %741 : vector<8x32xf32>
    %743 = math.exp %742 : vector<8x32xf32>
    %cst_169 = arith.constant 1.000000e+00 : f32
    %744 = vector.broadcast %cst_169 : f32 to vector<8x32xf32>
    %745 = arith.addf %744, %743 : vector<8x32xf32>
    %746 = arith.divf %744, %745 : vector<8x32xf32>
    %747 = vector.extract_strided_slice %700 {offsets = [0, 64], sizes = [8, 32], strides = [1, 1]} : vector<8x96xf32> to vector<8x32xf32>
    %748 = vector.extract_strided_slice %704 {offsets = [0, 64], sizes = [8, 32], strides = [1, 1]} : vector<8x96xf32> to vector<8x32xf32>
    %749 = arith.mulf %738, %748 : vector<8x32xf32>
    %750 = arith.addf %747, %749 : vector<8x32xf32>
    %751 = math.tanh %750 : vector<8x32xf32>
    %cst_170 = arith.constant 1.000000e+00 : f32
    %752 = vector.broadcast %cst_170 : f32 to vector<8x32xf32>
    %753 = arith.subf %752, %746 : vector<8x32xf32>
    %754 = arith.mulf %753, %751 : vector<8x32xf32>
    %755 = arith.mulf %746, %690 : vector<8x32xf32>
    %756 = arith.addf %754, %755 : vector<8x32xf32>
    %757 = arith.index_cast %696 : i32 to index
    %c0_171 = arith.constant 0 : index
    %758 = vector.load %arg17[%757, %c0_171] : memref<128x32xf32, #tpu.memory_space<vmem>>, vector<8x32xf32>
    tpu.vector_store %arg17[%757, %c0_171], %730 {strides = array<i32>} : memref<128x32xf32, #tpu.memory_space<vmem>>, vector<8x32xf32>,
    %759 = arith.index_cast %696 : i32 to index
    %c0_172 = arith.constant 0 : index
    %760 = vector.load %arg18[%759, %c0_172] : memref<128x32xf32, #tpu.memory_space<vmem>>, vector<8x32xf32>
    tpu.vector_store %arg18[%759, %c0_172], %756 {strides = array<i32>} : memref<128x32xf32, #tpu.memory_space<vmem>>, vector<8x32xf32>,
    %c11_i32 = arith.constant 11 : i32
    %c8_i32_173 = arith.constant 8 : i32
    %761 = arith.muli %c11_i32, %c8_i32_173 : i32
    %762 = tpu.assume_multiple %761, 8 : i32
    %763 = arith.index_cast %762 : i32 to index
    %c0_174 = arith.constant 0 : index
    %764 = vector.load %arg15[%763, %c0_174] : memref<128x96xf32, #tpu.memory_space<vmem>>, vector<8x96xf32>
    %765 = arith.index_cast %762 : i32 to index
    %c0_175 = arith.constant 0 : index
    %766 = vector.load %arg16[%765, %c0_175] : memref<128x96xf32, #tpu.memory_space<vmem>>, vector<8x96xf32>
    %cst_176 = arith.constant dense<0.000000e+00> : vector<8x96xf32>
    %767 = tpu.matmul %730, %23, %cst_176 {dimension_numbers = #tpu.dot_dimension_numbers<[1], [0], [0], [1], [0, 0, 1, 1], [], []>} : vector<8x32xf32>, vector<32x96xf32>, vector<8x96xf32> -> vector<8x96xf32>
    %768 = arith.addf %767, %29 : vector<8x96xf32>
    %cst_177 = arith.constant dense<0.000000e+00> : vector<8x96xf32>
    %769 = tpu.matmul %756, %25, %cst_177 {dimension_numbers = #tpu.dot_dimension_numbers<[1], [0], [0], [1], [0, 0, 1, 1], [], []>} : vector<8x32xf32>, vector<32x96xf32>, vector<8x96xf32> -> vector<8x96xf32>
    %770 = arith.addf %769, %33 : vector<8x96xf32>
    %771 = vector.extract_strided_slice %764 {offsets = [0, 0], sizes = [8, 32], strides = [1, 1]} : vector<8x96xf32> to vector<8x32xf32>
    %772 = vector.extract_strided_slice %768 {offsets = [0, 0], sizes = [8, 32], strides = [1, 1]} : vector<8x96xf32> to vector<8x32xf32>
    %773 = arith.addf %771, %772 : vector<8x32xf32>
    %774 = arith.negf %773 : vector<8x32xf32>
    %775 = math.exp %774 : vector<8x32xf32>
    %cst_178 = arith.constant 1.000000e+00 : f32
    %776 = vector.broadcast %cst_178 : f32 to vector<8x32xf32>
    %777 = arith.addf %776, %775 : vector<8x32xf32>
    %778 = arith.divf %776, %777 : vector<8x32xf32>
    %779 = vector.extract_strided_slice %764 {offsets = [0, 32], sizes = [8, 32], strides = [1, 1]} : vector<8x96xf32> to vector<8x32xf32>
    %780 = vector.extract_strided_slice %768 {offsets = [0, 32], sizes = [8, 32], strides = [1, 1]} : vector<8x96xf32> to vector<8x32xf32>
    %781 = arith.addf %779, %780 : vector<8x32xf32>
    %782 = arith.negf %781 : vector<8x32xf32>
    %783 = math.exp %782 : vector<8x32xf32>
    %cst_179 = arith.constant 1.000000e+00 : f32
    %784 = vector.broadcast %cst_179 : f32 to vector<8x32xf32>
    %785 = arith.addf %784, %783 : vector<8x32xf32>
    %786 = arith.divf %784, %785 : vector<8x32xf32>
    %787 = vector.extract_strided_slice %764 {offsets = [0, 64], sizes = [8, 32], strides = [1, 1]} : vector<8x96xf32> to vector<8x32xf32>
    %788 = vector.extract_strided_slice %768 {offsets = [0, 64], sizes = [8, 32], strides = [1, 1]} : vector<8x96xf32> to vector<8x32xf32>
    %789 = arith.mulf %778, %788 : vector<8x32xf32>
    %790 = arith.addf %787, %789 : vector<8x32xf32>
    %791 = math.tanh %790 : vector<8x32xf32>
    %cst_180 = arith.constant 1.000000e+00 : f32
    %792 = vector.broadcast %cst_180 : f32 to vector<8x32xf32>
    %793 = arith.subf %792, %786 : vector<8x32xf32>
    %794 = arith.mulf %793, %791 : vector<8x32xf32>
    %795 = arith.mulf %786, %730 : vector<8x32xf32>
    %796 = arith.addf %794, %795 : vector<8x32xf32>
    %797 = vector.extract_strided_slice %766 {offsets = [0, 0], sizes = [8, 32], strides = [1, 1]} : vector<8x96xf32> to vector<8x32xf32>
    %798 = vector.extract_strided_slice %770 {offsets = [0, 0], sizes = [8, 32], strides = [1, 1]} : vector<8x96xf32> to vector<8x32xf32>
    %799 = arith.addf %797, %798 : vector<8x32xf32>
    %800 = arith.negf %799 : vector<8x32xf32>
    %801 = math.exp %800 : vector<8x32xf32>
    %cst_181 = arith.constant 1.000000e+00 : f32
    %802 = vector.broadcast %cst_181 : f32 to vector<8x32xf32>
    %803 = arith.addf %802, %801 : vector<8x32xf32>
    %804 = arith.divf %802, %803 : vector<8x32xf32>
    %805 = vector.extract_strided_slice %766 {offsets = [0, 32], sizes = [8, 32], strides = [1, 1]} : vector<8x96xf32> to vector<8x32xf32>
    %806 = vector.extract_strided_slice %770 {offsets = [0, 32], sizes = [8, 32], strides = [1, 1]} : vector<8x96xf32> to vector<8x32xf32>
    %807 = arith.addf %805, %806 : vector<8x32xf32>
    %808 = arith.negf %807 : vector<8x32xf32>
    %809 = math.exp %808 : vector<8x32xf32>
    %cst_182 = arith.constant 1.000000e+00 : f32
    %810 = vector.broadcast %cst_182 : f32 to vector<8x32xf32>
    %811 = arith.addf %810, %809 : vector<8x32xf32>
    %812 = arith.divf %810, %811 : vector<8x32xf32>
    %813 = vector.extract_strided_slice %766 {offsets = [0, 64], sizes = [8, 32], strides = [1, 1]} : vector<8x96xf32> to vector<8x32xf32>
    %814 = vector.extract_strided_slice %770 {offsets = [0, 64], sizes = [8, 32], strides = [1, 1]} : vector<8x96xf32> to vector<8x32xf32>
    %815 = arith.mulf %804, %814 : vector<8x32xf32>
    %816 = arith.addf %813, %815 : vector<8x32xf32>
    %817 = math.tanh %816 : vector<8x32xf32>
    %cst_183 = arith.constant 1.000000e+00 : f32
    %818 = vector.broadcast %cst_183 : f32 to vector<8x32xf32>
    %819 = arith.subf %818, %812 : vector<8x32xf32>
    %820 = arith.mulf %819, %817 : vector<8x32xf32>
    %821 = arith.mulf %812, %756 : vector<8x32xf32>
    %822 = arith.addf %820, %821 : vector<8x32xf32>
    %823 = arith.index_cast %762 : i32 to index
    %c0_184 = arith.constant 0 : index
    %824 = vector.load %arg17[%823, %c0_184] : memref<128x32xf32, #tpu.memory_space<vmem>>, vector<8x32xf32>
    tpu.vector_store %arg17[%823, %c0_184], %796 {strides = array<i32>} : memref<128x32xf32, #tpu.memory_space<vmem>>, vector<8x32xf32>,
    %825 = arith.index_cast %762 : i32 to index
    %c0_185 = arith.constant 0 : index
    %826 = vector.load %arg18[%825, %c0_185] : memref<128x32xf32, #tpu.memory_space<vmem>>, vector<8x32xf32>
    tpu.vector_store %arg18[%825, %c0_185], %822 {strides = array<i32>} : memref<128x32xf32, #tpu.memory_space<vmem>>, vector<8x32xf32>,
    %c12_i32 = arith.constant 12 : i32
    %c8_i32_186 = arith.constant 8 : i32
    %827 = arith.muli %c12_i32, %c8_i32_186 : i32
    %828 = tpu.assume_multiple %827, 8 : i32
    %829 = arith.index_cast %828 : i32 to index
    %c0_187 = arith.constant 0 : index
    %830 = vector.load %arg15[%829, %c0_187] : memref<128x96xf32, #tpu.memory_space<vmem>>, vector<8x96xf32>
    %831 = arith.index_cast %828 : i32 to index
    %c0_188 = arith.constant 0 : index
    %832 = vector.load %arg16[%831, %c0_188] : memref<128x96xf32, #tpu.memory_space<vmem>>, vector<8x96xf32>
    %cst_189 = arith.constant dense<0.000000e+00> : vector<8x96xf32>
    %833 = tpu.matmul %796, %23, %cst_189 {dimension_numbers = #tpu.dot_dimension_numbers<[1], [0], [0], [1], [0, 0, 1, 1], [], []>} : vector<8x32xf32>, vector<32x96xf32>, vector<8x96xf32> -> vector<8x96xf32>
    %834 = arith.addf %833, %29 : vector<8x96xf32>
    %cst_190 = arith.constant dense<0.000000e+00> : vector<8x96xf32>
    %835 = tpu.matmul %822, %25, %cst_190 {dimension_numbers = #tpu.dot_dimension_numbers<[1], [0], [0], [1], [0, 0, 1, 1], [], []>} : vector<8x32xf32>, vector<32x96xf32>, vector<8x96xf32> -> vector<8x96xf32>
    %836 = arith.addf %835, %33 : vector<8x96xf32>
    %837 = vector.extract_strided_slice %830 {offsets = [0, 0], sizes = [8, 32], strides = [1, 1]} : vector<8x96xf32> to vector<8x32xf32>
    %838 = vector.extract_strided_slice %834 {offsets = [0, 0], sizes = [8, 32], strides = [1, 1]} : vector<8x96xf32> to vector<8x32xf32>
    %839 = arith.addf %837, %838 : vector<8x32xf32>
    %840 = arith.negf %839 : vector<8x32xf32>
    %841 = math.exp %840 : vector<8x32xf32>
    %cst_191 = arith.constant 1.000000e+00 : f32
    %842 = vector.broadcast %cst_191 : f32 to vector<8x32xf32>
    %843 = arith.addf %842, %841 : vector<8x32xf32>
    %844 = arith.divf %842, %843 : vector<8x32xf32>
    %845 = vector.extract_strided_slice %830 {offsets = [0, 32], sizes = [8, 32], strides = [1, 1]} : vector<8x96xf32> to vector<8x32xf32>
    %846 = vector.extract_strided_slice %834 {offsets = [0, 32], sizes = [8, 32], strides = [1, 1]} : vector<8x96xf32> to vector<8x32xf32>
    %847 = arith.addf %845, %846 : vector<8x32xf32>
    %848 = arith.negf %847 : vector<8x32xf32>
    %849 = math.exp %848 : vector<8x32xf32>
    %cst_192 = arith.constant 1.000000e+00 : f32
    %850 = vector.broadcast %cst_192 : f32 to vector<8x32xf32>
    %851 = arith.addf %850, %849 : vector<8x32xf32>
    %852 = arith.divf %850, %851 : vector<8x32xf32>
    %853 = vector.extract_strided_slice %830 {offsets = [0, 64], sizes = [8, 32], strides = [1, 1]} : vector<8x96xf32> to vector<8x32xf32>
    %854 = vector.extract_strided_slice %834 {offsets = [0, 64], sizes = [8, 32], strides = [1, 1]} : vector<8x96xf32> to vector<8x32xf32>
    %855 = arith.mulf %844, %854 : vector<8x32xf32>
    %856 = arith.addf %853, %855 : vector<8x32xf32>
    %857 = math.tanh %856 : vector<8x32xf32>
    %cst_193 = arith.constant 1.000000e+00 : f32
    %858 = vector.broadcast %cst_193 : f32 to vector<8x32xf32>
    %859 = arith.subf %858, %852 : vector<8x32xf32>
    %860 = arith.mulf %859, %857 : vector<8x32xf32>
    %861 = arith.mulf %852, %796 : vector<8x32xf32>
    %862 = arith.addf %860, %861 : vector<8x32xf32>
    %863 = vector.extract_strided_slice %832 {offsets = [0, 0], sizes = [8, 32], strides = [1, 1]} : vector<8x96xf32> to vector<8x32xf32>
    %864 = vector.extract_strided_slice %836 {offsets = [0, 0], sizes = [8, 32], strides = [1, 1]} : vector<8x96xf32> to vector<8x32xf32>
    %865 = arith.addf %863, %864 : vector<8x32xf32>
    %866 = arith.negf %865 : vector<8x32xf32>
    %867 = math.exp %866 : vector<8x32xf32>
    %cst_194 = arith.constant 1.000000e+00 : f32
    %868 = vector.broadcast %cst_194 : f32 to vector<8x32xf32>
    %869 = arith.addf %868, %867 : vector<8x32xf32>
    %870 = arith.divf %868, %869 : vector<8x32xf32>
    %871 = vector.extract_strided_slice %832 {offsets = [0, 32], sizes = [8, 32], strides = [1, 1]} : vector<8x96xf32> to vector<8x32xf32>
    %872 = vector.extract_strided_slice %836 {offsets = [0, 32], sizes = [8, 32], strides = [1, 1]} : vector<8x96xf32> to vector<8x32xf32>
    %873 = arith.addf %871, %872 : vector<8x32xf32>
    %874 = arith.negf %873 : vector<8x32xf32>
    %875 = math.exp %874 : vector<8x32xf32>
    %cst_195 = arith.constant 1.000000e+00 : f32
    %876 = vector.broadcast %cst_195 : f32 to vector<8x32xf32>
    %877 = arith.addf %876, %875 : vector<8x32xf32>
    %878 = arith.divf %876, %877 : vector<8x32xf32>
    %879 = vector.extract_strided_slice %832 {offsets = [0, 64], sizes = [8, 32], strides = [1, 1]} : vector<8x96xf32> to vector<8x32xf32>
    %880 = vector.extract_strided_slice %836 {offsets = [0, 64], sizes = [8, 32], strides = [1, 1]} : vector<8x96xf32> to vector<8x32xf32>
    %881 = arith.mulf %870, %880 : vector<8x32xf32>
    %882 = arith.addf %879, %881 : vector<8x32xf32>
    %883 = math.tanh %882 : vector<8x32xf32>
    %cst_196 = arith.constant 1.000000e+00 : f32
    %884 = vector.broadcast %cst_196 : f32 to vector<8x32xf32>
    %885 = arith.subf %884, %878 : vector<8x32xf32>
    %886 = arith.mulf %885, %883 : vector<8x32xf32>
    %887 = arith.mulf %878, %822 : vector<8x32xf32>
    %888 = arith.addf %886, %887 : vector<8x32xf32>
    %889 = arith.index_cast %828 : i32 to index
    %c0_197 = arith.constant 0 : index
    %890 = vector.load %arg17[%889, %c0_197] : memref<128x32xf32, #tpu.memory_space<vmem>>, vector<8x32xf32>
    tpu.vector_store %arg17[%889, %c0_197], %862 {strides = array<i32>} : memref<128x32xf32, #tpu.memory_space<vmem>>, vector<8x32xf32>,
    %891 = arith.index_cast %828 : i32 to index
    %c0_198 = arith.constant 0 : index
    %892 = vector.load %arg18[%891, %c0_198] : memref<128x32xf32, #tpu.memory_space<vmem>>, vector<8x32xf32>
    tpu.vector_store %arg18[%891, %c0_198], %888 {strides = array<i32>} : memref<128x32xf32, #tpu.memory_space<vmem>>, vector<8x32xf32>,
    %c13_i32 = arith.constant 13 : i32
    %c8_i32_199 = arith.constant 8 : i32
    %893 = arith.muli %c13_i32, %c8_i32_199 : i32
    %894 = tpu.assume_multiple %893, 8 : i32
    %895 = arith.index_cast %894 : i32 to index
    %c0_200 = arith.constant 0 : index
    %896 = vector.load %arg15[%895, %c0_200] : memref<128x96xf32, #tpu.memory_space<vmem>>, vector<8x96xf32>
    %897 = arith.index_cast %894 : i32 to index
    %c0_201 = arith.constant 0 : index
    %898 = vector.load %arg16[%897, %c0_201] : memref<128x96xf32, #tpu.memory_space<vmem>>, vector<8x96xf32>
    %cst_202 = arith.constant dense<0.000000e+00> : vector<8x96xf32>
    %899 = tpu.matmul %862, %23, %cst_202 {dimension_numbers = #tpu.dot_dimension_numbers<[1], [0], [0], [1], [0, 0, 1, 1], [], []>} : vector<8x32xf32>, vector<32x96xf32>, vector<8x96xf32> -> vector<8x96xf32>
    %900 = arith.addf %899, %29 : vector<8x96xf32>
    %cst_203 = arith.constant dense<0.000000e+00> : vector<8x96xf32>
    %901 = tpu.matmul %888, %25, %cst_203 {dimension_numbers = #tpu.dot_dimension_numbers<[1], [0], [0], [1], [0, 0, 1, 1], [], []>} : vector<8x32xf32>, vector<32x96xf32>, vector<8x96xf32> -> vector<8x96xf32>
    %902 = arith.addf %901, %33 : vector<8x96xf32>
    %903 = vector.extract_strided_slice %896 {offsets = [0, 0], sizes = [8, 32], strides = [1, 1]} : vector<8x96xf32> to vector<8x32xf32>
    %904 = vector.extract_strided_slice %900 {offsets = [0, 0], sizes = [8, 32], strides = [1, 1]} : vector<8x96xf32> to vector<8x32xf32>
    %905 = arith.addf %903, %904 : vector<8x32xf32>
    %906 = arith.negf %905 : vector<8x32xf32>
    %907 = math.exp %906 : vector<8x32xf32>
    %cst_204 = arith.constant 1.000000e+00 : f32
    %908 = vector.broadcast %cst_204 : f32 to vector<8x32xf32>
    %909 = arith.addf %908, %907 : vector<8x32xf32>
    %910 = arith.divf %908, %909 : vector<8x32xf32>
    %911 = vector.extract_strided_slice %896 {offsets = [0, 32], sizes = [8, 32], strides = [1, 1]} : vector<8x96xf32> to vector<8x32xf32>
    %912 = vector.extract_strided_slice %900 {offsets = [0, 32], sizes = [8, 32], strides = [1, 1]} : vector<8x96xf32> to vector<8x32xf32>
    %913 = arith.addf %911, %912 : vector<8x32xf32>
    %914 = arith.negf %913 : vector<8x32xf32>
    %915 = math.exp %914 : vector<8x32xf32>
    %cst_205 = arith.constant 1.000000e+00 : f32
    %916 = vector.broadcast %cst_205 : f32 to vector<8x32xf32>
    %917 = arith.addf %916, %915 : vector<8x32xf32>
    %918 = arith.divf %916, %917 : vector<8x32xf32>
    %919 = vector.extract_strided_slice %896 {offsets = [0, 64], sizes = [8, 32], strides = [1, 1]} : vector<8x96xf32> to vector<8x32xf32>
    %920 = vector.extract_strided_slice %900 {offsets = [0, 64], sizes = [8, 32], strides = [1, 1]} : vector<8x96xf32> to vector<8x32xf32>
    %921 = arith.mulf %910, %920 : vector<8x32xf32>
    %922 = arith.addf %919, %921 : vector<8x32xf32>
    %923 = math.tanh %922 : vector<8x32xf32>
    %cst_206 = arith.constant 1.000000e+00 : f32
    %924 = vector.broadcast %cst_206 : f32 to vector<8x32xf32>
    %925 = arith.subf %924, %918 : vector<8x32xf32>
    %926 = arith.mulf %925, %923 : vector<8x32xf32>
    %927 = arith.mulf %918, %862 : vector<8x32xf32>
    %928 = arith.addf %926, %927 : vector<8x32xf32>
    %929 = vector.extract_strided_slice %898 {offsets = [0, 0], sizes = [8, 32], strides = [1, 1]} : vector<8x96xf32> to vector<8x32xf32>
    %930 = vector.extract_strided_slice %902 {offsets = [0, 0], sizes = [8, 32], strides = [1, 1]} : vector<8x96xf32> to vector<8x32xf32>
    %931 = arith.addf %929, %930 : vector<8x32xf32>
    %932 = arith.negf %931 : vector<8x32xf32>
    %933 = math.exp %932 : vector<8x32xf32>
    %cst_207 = arith.constant 1.000000e+00 : f32
    %934 = vector.broadcast %cst_207 : f32 to vector<8x32xf32>
    %935 = arith.addf %934, %933 : vector<8x32xf32>
    %936 = arith.divf %934, %935 : vector<8x32xf32>
    %937 = vector.extract_strided_slice %898 {offsets = [0, 32], sizes = [8, 32], strides = [1, 1]} : vector<8x96xf32> to vector<8x32xf32>
    %938 = vector.extract_strided_slice %902 {offsets = [0, 32], sizes = [8, 32], strides = [1, 1]} : vector<8x96xf32> to vector<8x32xf32>
    %939 = arith.addf %937, %938 : vector<8x32xf32>
    %940 = arith.negf %939 : vector<8x32xf32>
    %941 = math.exp %940 : vector<8x32xf32>
    %cst_208 = arith.constant 1.000000e+00 : f32
    %942 = vector.broadcast %cst_208 : f32 to vector<8x32xf32>
    %943 = arith.addf %942, %941 : vector<8x32xf32>
    %944 = arith.divf %942, %943 : vector<8x32xf32>
    %945 = vector.extract_strided_slice %898 {offsets = [0, 64], sizes = [8, 32], strides = [1, 1]} : vector<8x96xf32> to vector<8x32xf32>
    %946 = vector.extract_strided_slice %902 {offsets = [0, 64], sizes = [8, 32], strides = [1, 1]} : vector<8x96xf32> to vector<8x32xf32>
    %947 = arith.mulf %936, %946 : vector<8x32xf32>
    %948 = arith.addf %945, %947 : vector<8x32xf32>
    %949 = math.tanh %948 : vector<8x32xf32>
    %cst_209 = arith.constant 1.000000e+00 : f32
    %950 = vector.broadcast %cst_209 : f32 to vector<8x32xf32>
    %951 = arith.subf %950, %944 : vector<8x32xf32>
    %952 = arith.mulf %951, %949 : vector<8x32xf32>
    %953 = arith.mulf %944, %888 : vector<8x32xf32>
    %954 = arith.addf %952, %953 : vector<8x32xf32>
    %955 = arith.index_cast %894 : i32 to index
    %c0_210 = arith.constant 0 : index
    %956 = vector.load %arg17[%955, %c0_210] : memref<128x32xf32, #tpu.memory_space<vmem>>, vector<8x32xf32>
    tpu.vector_store %arg17[%955, %c0_210], %928 {strides = array<i32>} : memref<128x32xf32, #tpu.memory_space<vmem>>, vector<8x32xf32>,
    %957 = arith.index_cast %894 : i32 to index
    %c0_211 = arith.constant 0 : index
    %958 = vector.load %arg18[%957, %c0_211] : memref<128x32xf32, #tpu.memory_space<vmem>>, vector<8x32xf32>
    tpu.vector_store %arg18[%957, %c0_211], %954 {strides = array<i32>} : memref<128x32xf32, #tpu.memory_space<vmem>>, vector<8x32xf32>,
    %c14_i32 = arith.constant 14 : i32
    %c8_i32_212 = arith.constant 8 : i32
    %959 = arith.muli %c14_i32, %c8_i32_212 : i32
    %960 = tpu.assume_multiple %959, 8 : i32
    %961 = arith.index_cast %960 : i32 to index
    %c0_213 = arith.constant 0 : index
    %962 = vector.load %arg15[%961, %c0_213] : memref<128x96xf32, #tpu.memory_space<vmem>>, vector<8x96xf32>
    %963 = arith.index_cast %960 : i32 to index
    %c0_214 = arith.constant 0 : index
    %964 = vector.load %arg16[%963, %c0_214] : memref<128x96xf32, #tpu.memory_space<vmem>>, vector<8x96xf32>
    %cst_215 = arith.constant dense<0.000000e+00> : vector<8x96xf32>
    %965 = tpu.matmul %928, %23, %cst_215 {dimension_numbers = #tpu.dot_dimension_numbers<[1], [0], [0], [1], [0, 0, 1, 1], [], []>} : vector<8x32xf32>, vector<32x96xf32>, vector<8x96xf32> -> vector<8x96xf32>
    %966 = arith.addf %965, %29 : vector<8x96xf32>
    %cst_216 = arith.constant dense<0.000000e+00> : vector<8x96xf32>
    %967 = tpu.matmul %954, %25, %cst_216 {dimension_numbers = #tpu.dot_dimension_numbers<[1], [0], [0], [1], [0, 0, 1, 1], [], []>} : vector<8x32xf32>, vector<32x96xf32>, vector<8x96xf32> -> vector<8x96xf32>
    %968 = arith.addf %967, %33 : vector<8x96xf32>
    %969 = vector.extract_strided_slice %962 {offsets = [0, 0], sizes = [8, 32], strides = [1, 1]} : vector<8x96xf32> to vector<8x32xf32>
    %970 = vector.extract_strided_slice %966 {offsets = [0, 0], sizes = [8, 32], strides = [1, 1]} : vector<8x96xf32> to vector<8x32xf32>
    %971 = arith.addf %969, %970 : vector<8x32xf32>
    %972 = arith.negf %971 : vector<8x32xf32>
    %973 = math.exp %972 : vector<8x32xf32>
    %cst_217 = arith.constant 1.000000e+00 : f32
    %974 = vector.broadcast %cst_217 : f32 to vector<8x32xf32>
    %975 = arith.addf %974, %973 : vector<8x32xf32>
    %976 = arith.divf %974, %975 : vector<8x32xf32>
    %977 = vector.extract_strided_slice %962 {offsets = [0, 32], sizes = [8, 32], strides = [1, 1]} : vector<8x96xf32> to vector<8x32xf32>
    %978 = vector.extract_strided_slice %966 {offsets = [0, 32], sizes = [8, 32], strides = [1, 1]} : vector<8x96xf32> to vector<8x32xf32>
    %979 = arith.addf %977, %978 : vector<8x32xf32>
    %980 = arith.negf %979 : vector<8x32xf32>
    %981 = math.exp %980 : vector<8x32xf32>
    %cst_218 = arith.constant 1.000000e+00 : f32
    %982 = vector.broadcast %cst_218 : f32 to vector<8x32xf32>
    %983 = arith.addf %982, %981 : vector<8x32xf32>
    %984 = arith.divf %982, %983 : vector<8x32xf32>
    %985 = vector.extract_strided_slice %962 {offsets = [0, 64], sizes = [8, 32], strides = [1, 1]} : vector<8x96xf32> to vector<8x32xf32>
    %986 = vector.extract_strided_slice %966 {offsets = [0, 64], sizes = [8, 32], strides = [1, 1]} : vector<8x96xf32> to vector<8x32xf32>
    %987 = arith.mulf %976, %986 : vector<8x32xf32>
    %988 = arith.addf %985, %987 : vector<8x32xf32>
    %989 = math.tanh %988 : vector<8x32xf32>
    %cst_219 = arith.constant 1.000000e+00 : f32
    %990 = vector.broadcast %cst_219 : f32 to vector<8x32xf32>
    %991 = arith.subf %990, %984 : vector<8x32xf32>
    %992 = arith.mulf %991, %989 : vector<8x32xf32>
    %993 = arith.mulf %984, %928 : vector<8x32xf32>
    %994 = arith.addf %992, %993 : vector<8x32xf32>
    %995 = vector.extract_strided_slice %964 {offsets = [0, 0], sizes = [8, 32], strides = [1, 1]} : vector<8x96xf32> to vector<8x32xf32>
    %996 = vector.extract_strided_slice %968 {offsets = [0, 0], sizes = [8, 32], strides = [1, 1]} : vector<8x96xf32> to vector<8x32xf32>
    %997 = arith.addf %995, %996 : vector<8x32xf32>
    %998 = arith.negf %997 : vector<8x32xf32>
    %999 = math.exp %998 : vector<8x32xf32>
    %cst_220 = arith.constant 1.000000e+00 : f32
    %1000 = vector.broadcast %cst_220 : f32 to vector<8x32xf32>
    %1001 = arith.addf %1000, %999 : vector<8x32xf32>
    %1002 = arith.divf %1000, %1001 : vector<8x32xf32>
    %1003 = vector.extract_strided_slice %964 {offsets = [0, 32], sizes = [8, 32], strides = [1, 1]} : vector<8x96xf32> to vector<8x32xf32>
    %1004 = vector.extract_strided_slice %968 {offsets = [0, 32], sizes = [8, 32], strides = [1, 1]} : vector<8x96xf32> to vector<8x32xf32>
    %1005 = arith.addf %1003, %1004 : vector<8x32xf32>
    %1006 = arith.negf %1005 : vector<8x32xf32>
    %1007 = math.exp %1006 : vector<8x32xf32>
    %cst_221 = arith.constant 1.000000e+00 : f32
    %1008 = vector.broadcast %cst_221 : f32 to vector<8x32xf32>
    %1009 = arith.addf %1008, %1007 : vector<8x32xf32>
    %1010 = arith.divf %1008, %1009 : vector<8x32xf32>
    %1011 = vector.extract_strided_slice %964 {offsets = [0, 64], sizes = [8, 32], strides = [1, 1]} : vector<8x96xf32> to vector<8x32xf32>
    %1012 = vector.extract_strided_slice %968 {offsets = [0, 64], sizes = [8, 32], strides = [1, 1]} : vector<8x96xf32> to vector<8x32xf32>
    %1013 = arith.mulf %1002, %1012 : vector<8x32xf32>
    %1014 = arith.addf %1011, %1013 : vector<8x32xf32>
    %1015 = math.tanh %1014 : vector<8x32xf32>
    %cst_222 = arith.constant 1.000000e+00 : f32
    %1016 = vector.broadcast %cst_222 : f32 to vector<8x32xf32>
    %1017 = arith.subf %1016, %1010 : vector<8x32xf32>
    %1018 = arith.mulf %1017, %1015 : vector<8x32xf32>
    %1019 = arith.mulf %1010, %954 : vector<8x32xf32>
    %1020 = arith.addf %1018, %1019 : vector<8x32xf32>
    %1021 = arith.index_cast %960 : i32 to index
    %c0_223 = arith.constant 0 : index
    %1022 = vector.load %arg17[%1021, %c0_223] : memref<128x32xf32, #tpu.memory_space<vmem>>, vector<8x32xf32>
    tpu.vector_store %arg17[%1021, %c0_223], %994 {strides = array<i32>} : memref<128x32xf32, #tpu.memory_space<vmem>>, vector<8x32xf32>,
    %1023 = arith.index_cast %960 : i32 to index
    %c0_224 = arith.constant 0 : index
    %1024 = vector.load %arg18[%1023, %c0_224] : memref<128x32xf32, #tpu.memory_space<vmem>>, vector<8x32xf32>
    tpu.vector_store %arg18[%1023, %c0_224], %1020 {strides = array<i32>} : memref<128x32xf32, #tpu.memory_space<vmem>>, vector<8x32xf32>,
    %c15_i32 = arith.constant 15 : i32
    %c8_i32_225 = arith.constant 8 : i32
    %1025 = arith.muli %c15_i32, %c8_i32_225 : i32
    %1026 = tpu.assume_multiple %1025, 8 : i32
    %1027 = arith.index_cast %1026 : i32 to index
    %c0_226 = arith.constant 0 : index
    %1028 = vector.load %arg15[%1027, %c0_226] : memref<128x96xf32, #tpu.memory_space<vmem>>, vector<8x96xf32>
    %1029 = arith.index_cast %1026 : i32 to index
    %c0_227 = arith.constant 0 : index
    %1030 = vector.load %arg16[%1029, %c0_227] : memref<128x96xf32, #tpu.memory_space<vmem>>, vector<8x96xf32>
    %cst_228 = arith.constant dense<0.000000e+00> : vector<8x96xf32>
    %1031 = tpu.matmul %994, %23, %cst_228 {dimension_numbers = #tpu.dot_dimension_numbers<[1], [0], [0], [1], [0, 0, 1, 1], [], []>} : vector<8x32xf32>, vector<32x96xf32>, vector<8x96xf32> -> vector<8x96xf32>
    %1032 = arith.addf %1031, %29 : vector<8x96xf32>
    %cst_229 = arith.constant dense<0.000000e+00> : vector<8x96xf32>
    %1033 = tpu.matmul %1020, %25, %cst_229 {dimension_numbers = #tpu.dot_dimension_numbers<[1], [0], [0], [1], [0, 0, 1, 1], [], []>} : vector<8x32xf32>, vector<32x96xf32>, vector<8x96xf32> -> vector<8x96xf32>
    %1034 = arith.addf %1033, %33 : vector<8x96xf32>
    %1035 = vector.extract_strided_slice %1028 {offsets = [0, 0], sizes = [8, 32], strides = [1, 1]} : vector<8x96xf32> to vector<8x32xf32>
    %1036 = vector.extract_strided_slice %1032 {offsets = [0, 0], sizes = [8, 32], strides = [1, 1]} : vector<8x96xf32> to vector<8x32xf32>
    %1037 = arith.addf %1035, %1036 : vector<8x32xf32>
    %1038 = arith.negf %1037 : vector<8x32xf32>
    %1039 = math.exp %1038 : vector<8x32xf32>
    %cst_230 = arith.constant 1.000000e+00 : f32
    %1040 = vector.broadcast %cst_230 : f32 to vector<8x32xf32>
    %1041 = arith.addf %1040, %1039 : vector<8x32xf32>
    %1042 = arith.divf %1040, %1041 : vector<8x32xf32>
    %1043 = vector.extract_strided_slice %1028 {offsets = [0, 32], sizes = [8, 32], strides = [1, 1]} : vector<8x96xf32> to vector<8x32xf32>
    %1044 = vector.extract_strided_slice %1032 {offsets = [0, 32], sizes = [8, 32], strides = [1, 1]} : vector<8x96xf32> to vector<8x32xf32>
    %1045 = arith.addf %1043, %1044 : vector<8x32xf32>
    %1046 = arith.negf %1045 : vector<8x32xf32>
    %1047 = math.exp %1046 : vector<8x32xf32>
    %cst_231 = arith.constant 1.000000e+00 : f32
    %1048 = vector.broadcast %cst_231 : f32 to vector<8x32xf32>
    %1049 = arith.addf %1048, %1047 : vector<8x32xf32>
    %1050 = arith.divf %1048, %1049 : vector<8x32xf32>
    %1051 = vector.extract_strided_slice %1028 {offsets = [0, 64], sizes = [8, 32], strides = [1, 1]} : vector<8x96xf32> to vector<8x32xf32>
    %1052 = vector.extract_strided_slice %1032 {offsets = [0, 64], sizes = [8, 32], strides = [1, 1]} : vector<8x96xf32> to vector<8x32xf32>
    %1053 = arith.mulf %1042, %1052 : vector<8x32xf32>
    %1054 = arith.addf %1051, %1053 : vector<8x32xf32>
    %1055 = math.tanh %1054 : vector<8x32xf32>
    %cst_232 = arith.constant 1.000000e+00 : f32
    %1056 = vector.broadcast %cst_232 : f32 to vector<8x32xf32>
    %1057 = arith.subf %1056, %1050 : vector<8x32xf32>
    %1058 = arith.mulf %1057, %1055 : vector<8x32xf32>
    %1059 = arith.mulf %1050, %994 : vector<8x32xf32>
    %1060 = arith.addf %1058, %1059 : vector<8x32xf32>
    %1061 = vector.extract_strided_slice %1030 {offsets = [0, 0], sizes = [8, 32], strides = [1, 1]} : vector<8x96xf32> to vector<8x32xf32>
    %1062 = vector.extract_strided_slice %1034 {offsets = [0, 0], sizes = [8, 32], strides = [1, 1]} : vector<8x96xf32> to vector<8x32xf32>
    %1063 = arith.addf %1061, %1062 : vector<8x32xf32>
    %1064 = arith.negf %1063 : vector<8x32xf32>
    %1065 = math.exp %1064 : vector<8x32xf32>
    %cst_233 = arith.constant 1.000000e+00 : f32
    %1066 = vector.broadcast %cst_233 : f32 to vector<8x32xf32>
    %1067 = arith.addf %1066, %1065 : vector<8x32xf32>
    %1068 = arith.divf %1066, %1067 : vector<8x32xf32>
    %1069 = vector.extract_strided_slice %1030 {offsets = [0, 32], sizes = [8, 32], strides = [1, 1]} : vector<8x96xf32> to vector<8x32xf32>
    %1070 = vector.extract_strided_slice %1034 {offsets = [0, 32], sizes = [8, 32], strides = [1, 1]} : vector<8x96xf32> to vector<8x32xf32>
    %1071 = arith.addf %1069, %1070 : vector<8x32xf32>
    %1072 = arith.negf %1071 : vector<8x32xf32>
    %1073 = math.exp %1072 : vector<8x32xf32>
    %cst_234 = arith.constant 1.000000e+00 : f32
    %1074 = vector.broadcast %cst_234 : f32 to vector<8x32xf32>
    %1075 = arith.addf %1074, %1073 : vector<8x32xf32>
    %1076 = arith.divf %1074, %1075 : vector<8x32xf32>
    %1077 = vector.extract_strided_slice %1030 {offsets = [0, 64], sizes = [8, 32], strides = [1, 1]} : vector<8x96xf32> to vector<8x32xf32>
    %1078 = vector.extract_strided_slice %1034 {offsets = [0, 64], sizes = [8, 32], strides = [1, 1]} : vector<8x96xf32> to vector<8x32xf32>
    %1079 = arith.mulf %1068, %1078 : vector<8x32xf32>
    %1080 = arith.addf %1077, %1079 : vector<8x32xf32>
    %1081 = math.tanh %1080 : vector<8x32xf32>
    %cst_235 = arith.constant 1.000000e+00 : f32
    %1082 = vector.broadcast %cst_235 : f32 to vector<8x32xf32>
    %1083 = arith.subf %1082, %1076 : vector<8x32xf32>
    %1084 = arith.mulf %1083, %1081 : vector<8x32xf32>
    %1085 = arith.mulf %1076, %1020 : vector<8x32xf32>
    %1086 = arith.addf %1084, %1085 : vector<8x32xf32>
    %1087 = arith.index_cast %1026 : i32 to index
    %c0_236 = arith.constant 0 : index
    %1088 = vector.load %arg17[%1087, %c0_236] : memref<128x32xf32, #tpu.memory_space<vmem>>, vector<8x32xf32>
    tpu.vector_store %arg17[%1087, %c0_236], %1060 {strides = array<i32>} : memref<128x32xf32, #tpu.memory_space<vmem>>, vector<8x32xf32>,
    %1089 = arith.index_cast %1026 : i32 to index
    %c0_237 = arith.constant 0 : index
    %1090 = vector.load %arg18[%1089, %c0_237] : memref<128x32xf32, #tpu.memory_space<vmem>>, vector<8x32xf32>
    tpu.vector_store %arg18[%1089, %c0_237], %1086 {strides = array<i32>} : memref<128x32xf32, #tpu.memory_space<vmem>>, vector<8x32xf32>,
    %c16_i32 = arith.constant 16 : i32
    %c0_238 = arith.constant 0 : index
    %c0_239 = arith.constant 0 : index
    %1091 = vector.load %arg17[%c0_238, %c0_239] : memref<128x32xf32, #tpu.memory_space<vmem>>, vector<128x32xf32>
    %c0_240 = arith.constant 0 : index
    %c0_241 = arith.constant 0 : index
    %1092 = vector.load %arg18[%c0_240, %c0_241] : memref<128x32xf32, #tpu.memory_space<vmem>>, vector<128x32xf32>
    %c0_242 = arith.constant 0 : index
    %c0_243 = arith.constant 0 : index
    %c0_244 = arith.constant 0 : index
    %1093 = vector.load %arg6[%c0_242, %c0_243, %c0_244] : memref<2x32x48xf32, #tpu.memory_space<vmem>>, vector<1x32x48xf32>
    %1094 = vector.shape_cast %1093 : vector<1x32x48xf32> to vector<32x48xf32>
    %c0_245 = arith.constant 0 : index
    %c0_246 = arith.constant 0 : index
    %c0_247 = arith.constant 0 : index
    %1095 = vector.load %arg8[%c0_245, %c0_246, %c0_247] : memref<2x1x48xf32, #tpu.memory_space<vmem>>, vector<1x1x48xf32>
    %1096 = vector.shape_cast %1095 : vector<1x1x48xf32> to vector<1x48xf32>
    %cst_248 = arith.constant dense<0.000000e+00> : vector<128x48xf32>
    %1097 = tpu.matmul %1091, %1094, %cst_248 {dimension_numbers = #tpu.dot_dimension_numbers<[1], [0], [0], [1], [0, 0, 1, 1], [], []>} : vector<128x32xf32>, vector<32x48xf32>, vector<128x48xf32> -> vector<128x48xf32>
    %1098 = vector.broadcast %1096 : vector<1x48xf32> to vector<128x48xf32>
    %1099 = arith.addf %1097, %1098 : vector<128x48xf32>
    %c0_249 = arith.constant 0 : index
    %c0_250 = arith.constant 0 : index
    %1100 = vector.load %arg19[%c0_249, %c0_250] : memref<128x48xf32, #tpu.memory_space<vmem>>, vector<128x48xf32>
    tpu.vector_store %arg19[%c0_249, %c0_250], %1099 {strides = array<i32>} : memref<128x48xf32, #tpu.memory_space<vmem>>, vector<128x48xf32>,
    %c1_251 = arith.constant 1 : index
    %c0_252 = arith.constant 0 : index
    %c0_253 = arith.constant 0 : index
    %1101 = vector.load %arg6[%c1_251, %c0_252, %c0_253] : memref<2x32x48xf32, #tpu.memory_space<vmem>>, vector<1x32x48xf32>
    %1102 = vector.shape_cast %1101 : vector<1x32x48xf32> to vector<32x48xf32>
    %c1_254 = arith.constant 1 : index
    %c0_255 = arith.constant 0 : index
    %c0_256 = arith.constant 0 : index
    %1103 = vector.load %arg8[%c1_254, %c0_255, %c0_256] : memref<2x1x48xf32, #tpu.memory_space<vmem>>, vector<1x1x48xf32>
    %1104 = vector.shape_cast %1103 : vector<1x1x48xf32> to vector<1x48xf32>
    %cst_257 = arith.constant dense<0.000000e+00> : vector<128x48xf32>
    %1105 = tpu.matmul %1092, %1102, %cst_257 {dimension_numbers = #tpu.dot_dimension_numbers<[1], [0], [0], [1], [0, 0, 1, 1], [], []>} : vector<128x32xf32>, vector<32x48xf32>, vector<128x48xf32> -> vector<128x48xf32>
    %1106 = vector.broadcast %1104 : vector<1x48xf32> to vector<128x48xf32>
    %1107 = arith.addf %1105, %1106 : vector<128x48xf32>
    %c0_258 = arith.constant 0 : index
    %c0_259 = arith.constant 0 : index
    %1108 = vector.load %arg20[%c0_258, %c0_259] : memref<128x48xf32, #tpu.memory_space<vmem>>, vector<128x48xf32>
    tpu.vector_store %arg20[%c0_258, %c0_259], %1107 {strides = array<i32>} : memref<128x48xf32, #tpu.memory_space<vmem>>, vector<128x48xf32>,
    %c0_260 = arith.constant 0 : index
    %c0_261 = arith.constant 0 : index
    %c0_262 = arith.constant 0 : index
    %1109 = vector.load %arg7[%c0_260, %c0_261, %c0_262] : memref<2x16x48xf32, #tpu.memory_space<vmem>>, vector<1x16x48xf32>
    %1110 = vector.shape_cast %1109 : vector<1x16x48xf32> to vector<16x48xf32>
    %c1_263 = arith.constant 1 : index
    %c0_264 = arith.constant 0 : index
    %c0_265 = arith.constant 0 : index
    %1111 = vector.load %arg7[%c1_263, %c0_264, %c0_265] : memref<2x16x48xf32, #tpu.memory_space<vmem>>, vector<1x16x48xf32>
    %1112 = vector.shape_cast %1111 : vector<1x16x48xf32> to vector<16x48xf32>
    %c0_266 = arith.constant 0 : index
    %c0_267 = arith.constant 0 : index
    %c0_268 = arith.constant 0 : index
    %1113 = vector.load %arg9[%c0_266, %c0_267, %c0_268] : memref<2x1x48xf32, #tpu.memory_space<vmem>>, vector<1x1x48xf32>
    %1114 = vector.shape_cast %1113 : vector<1x1x48xf32> to vector<1x48xf32>
    %1115 = vector.shape_cast %1114 : vector<1x48xf32> to vector<1x48xf32>
    %1116 = vector.broadcast %1115 : vector<1x48xf32> to vector<16x48xf32>
    %c1_269 = arith.constant 1 : index
    %c0_270 = arith.constant 0 : index
    %c0_271 = arith.constant 0 : index
    %1117 = vector.load %arg9[%c1_269, %c0_270, %c0_271] : memref<2x1x48xf32, #tpu.memory_space<vmem>>, vector<1x1x48xf32>
    %1118 = vector.shape_cast %1117 : vector<1x1x48xf32> to vector<1x48xf32>
    %1119 = vector.shape_cast %1118 : vector<1x48xf32> to vector<1x48xf32>
    %1120 = vector.broadcast %1119 : vector<1x48xf32> to vector<16x48xf32>
    %cst_272 = arith.constant 0.000000e+00 : f32
    %1121 = vector.broadcast %cst_272 : f32 to vector<16x16xf32>
    %c0_i32_273 = arith.constant 0 : i32
    %c16_i32_274 = arith.constant 16 : i32
    %1122 = arith.muli %c0_i32_273, %c16_i32_274 : i32
    %1123 = tpu.assume_multiple %1122, 16 : i32
    %1124 = arith.index_cast %1123 : i32 to index
    %c0_275 = arith.constant 0 : index
    %1125 = vector.load %arg19[%1124, %c0_275] : memref<128x48xf32, #tpu.memory_space<vmem>>, vector<16x48xf32>
    %1126 = arith.index_cast %1123 : i32 to index
    %c0_276 = arith.constant 0 : index
    %1127 = vector.load %arg20[%1126, %c0_276] : memref<128x48xf32, #tpu.memory_space<vmem>>, vector<16x48xf32>
    %cst_277 = arith.constant dense<0.000000e+00> : vector<16x48xf32>
    %1128 = tpu.matmul %1121, %1110, %cst_277 {dimension_numbers = #tpu.dot_dimension_numbers<[1], [0], [0], [1], [0, 0, 1, 1], [], []>} : vector<16x16xf32>, vector<16x48xf32>, vector<16x48xf32> -> vector<16x48xf32>
    %1129 = arith.addf %1128, %1116 : vector<16x48xf32>
    %cst_278 = arith.constant dense<0.000000e+00> : vector<16x48xf32>
    %1130 = tpu.matmul %1121, %1112, %cst_278 {dimension_numbers = #tpu.dot_dimension_numbers<[1], [0], [0], [1], [0, 0, 1, 1], [], []>} : vector<16x16xf32>, vector<16x48xf32>, vector<16x48xf32> -> vector<16x48xf32>
    %1131 = arith.addf %1130, %1120 : vector<16x48xf32>
    %1132 = vector.extract_strided_slice %1125 {offsets = [0, 0], sizes = [16, 16], strides = [1, 1]} : vector<16x48xf32> to vector<16x16xf32>
    %1133 = vector.extract_strided_slice %1129 {offsets = [0, 0], sizes = [16, 16], strides = [1, 1]} : vector<16x48xf32> to vector<16x16xf32>
    %1134 = arith.addf %1132, %1133 : vector<16x16xf32>
    %1135 = arith.negf %1134 : vector<16x16xf32>
    %1136 = math.exp %1135 : vector<16x16xf32>
    %cst_279 = arith.constant 1.000000e+00 : f32
    %1137 = vector.broadcast %cst_279 : f32 to vector<16x16xf32>
    %1138 = arith.addf %1137, %1136 : vector<16x16xf32>
    %1139 = arith.divf %1137, %1138 : vector<16x16xf32>
    %1140 = vector.extract_strided_slice %1125 {offsets = [0, 16], sizes = [16, 16], strides = [1, 1]} : vector<16x48xf32> to vector<16x16xf32>
    %1141 = vector.extract_strided_slice %1129 {offsets = [0, 16], sizes = [16, 16], strides = [1, 1]} : vector<16x48xf32> to vector<16x16xf32>
    %1142 = arith.addf %1140, %1141 : vector<16x16xf32>
    %1143 = arith.negf %1142 : vector<16x16xf32>
    %1144 = math.exp %1143 : vector<16x16xf32>
    %cst_280 = arith.constant 1.000000e+00 : f32
    %1145 = vector.broadcast %cst_280 : f32 to vector<16x16xf32>
    %1146 = arith.addf %1145, %1144 : vector<16x16xf32>
    %1147 = arith.divf %1145, %1146 : vector<16x16xf32>
    %1148 = vector.extract_strided_slice %1125 {offsets = [0, 32], sizes = [16, 16], strides = [1, 1]} : vector<16x48xf32> to vector<16x16xf32>
    %1149 = vector.extract_strided_slice %1129 {offsets = [0, 32], sizes = [16, 16], strides = [1, 1]} : vector<16x48xf32> to vector<16x16xf32>
    %1150 = arith.mulf %1139, %1149 : vector<16x16xf32>
    %1151 = arith.addf %1148, %1150 : vector<16x16xf32>
    %1152 = math.tanh %1151 : vector<16x16xf32>
    %cst_281 = arith.constant 1.000000e+00 : f32
    %1153 = vector.broadcast %cst_281 : f32 to vector<16x16xf32>
    %1154 = arith.subf %1153, %1147 : vector<16x16xf32>
    %1155 = arith.mulf %1154, %1152 : vector<16x16xf32>
    %1156 = arith.mulf %1147, %1121 : vector<16x16xf32>
    %1157 = arith.addf %1155, %1156 : vector<16x16xf32>
    %1158 = vector.extract_strided_slice %1127 {offsets = [0, 0], sizes = [16, 16], strides = [1, 1]} : vector<16x48xf32> to vector<16x16xf32>
    %1159 = vector.extract_strided_slice %1131 {offsets = [0, 0], sizes = [16, 16], strides = [1, 1]} : vector<16x48xf32> to vector<16x16xf32>
    %1160 = arith.addf %1158, %1159 : vector<16x16xf32>
    %1161 = arith.negf %1160 : vector<16x16xf32>
    %1162 = math.exp %1161 : vector<16x16xf32>
    %cst_282 = arith.constant 1.000000e+00 : f32
    %1163 = vector.broadcast %cst_282 : f32 to vector<16x16xf32>
    %1164 = arith.addf %1163, %1162 : vector<16x16xf32>
    %1165 = arith.divf %1163, %1164 : vector<16x16xf32>
    %1166 = vector.extract_strided_slice %1127 {offsets = [0, 16], sizes = [16, 16], strides = [1, 1]} : vector<16x48xf32> to vector<16x16xf32>
    %1167 = vector.extract_strided_slice %1131 {offsets = [0, 16], sizes = [16, 16], strides = [1, 1]} : vector<16x48xf32> to vector<16x16xf32>
    %1168 = arith.addf %1166, %1167 : vector<16x16xf32>
    %1169 = arith.negf %1168 : vector<16x16xf32>
    %1170 = math.exp %1169 : vector<16x16xf32>
    %cst_283 = arith.constant 1.000000e+00 : f32
    %1171 = vector.broadcast %cst_283 : f32 to vector<16x16xf32>
    %1172 = arith.addf %1171, %1170 : vector<16x16xf32>
    %1173 = arith.divf %1171, %1172 : vector<16x16xf32>
    %1174 = vector.extract_strided_slice %1127 {offsets = [0, 32], sizes = [16, 16], strides = [1, 1]} : vector<16x48xf32> to vector<16x16xf32>
    %1175 = vector.extract_strided_slice %1131 {offsets = [0, 32], sizes = [16, 16], strides = [1, 1]} : vector<16x48xf32> to vector<16x16xf32>
    %1176 = arith.mulf %1165, %1175 : vector<16x16xf32>
    %1177 = arith.addf %1174, %1176 : vector<16x16xf32>
    %1178 = math.tanh %1177 : vector<16x16xf32>
    %cst_284 = arith.constant 1.000000e+00 : f32
    %1179 = vector.broadcast %cst_284 : f32 to vector<16x16xf32>
    %1180 = arith.subf %1179, %1173 : vector<16x16xf32>
    %1181 = arith.mulf %1180, %1178 : vector<16x16xf32>
    %1182 = arith.mulf %1173, %1121 : vector<16x16xf32>
    %1183 = arith.addf %1181, %1182 : vector<16x16xf32>
    %1184 = arith.index_cast %1123 : i32 to index
    %c0_285 = arith.constant 0 : index
    %1185 = vector.load %arg21[%1184, %c0_285] : memref<128x16xf32, #tpu.memory_space<vmem>>, vector<16x16xf32>
    tpu.vector_store %arg21[%1184, %c0_285], %1157 {strides = array<i32>} : memref<128x16xf32, #tpu.memory_space<vmem>>, vector<16x16xf32>,
    %1186 = arith.index_cast %1123 : i32 to index
    %c0_286 = arith.constant 0 : index
    %1187 = vector.load %arg22[%1186, %c0_286] : memref<128x16xf32, #tpu.memory_space<vmem>>, vector<16x16xf32>
    tpu.vector_store %arg22[%1186, %c0_286], %1183 {strides = array<i32>} : memref<128x16xf32, #tpu.memory_space<vmem>>, vector<16x16xf32>,
    %c1_i32_287 = arith.constant 1 : i32
    %c16_i32_288 = arith.constant 16 : i32
    %1188 = arith.muli %c1_i32_287, %c16_i32_288 : i32
    %1189 = tpu.assume_multiple %1188, 16 : i32
    %1190 = arith.index_cast %1189 : i32 to index
    %c0_289 = arith.constant 0 : index
    %1191 = vector.load %arg19[%1190, %c0_289] : memref<128x48xf32, #tpu.memory_space<vmem>>, vector<16x48xf32>
    %1192 = arith.index_cast %1189 : i32 to index
    %c0_290 = arith.constant 0 : index
    %1193 = vector.load %arg20[%1192, %c0_290] : memref<128x48xf32, #tpu.memory_space<vmem>>, vector<16x48xf32>
    %cst_291 = arith.constant dense<0.000000e+00> : vector<16x48xf32>
    %1194 = tpu.matmul %1157, %1110, %cst_291 {dimension_numbers = #tpu.dot_dimension_numbers<[1], [0], [0], [1], [0, 0, 1, 1], [], []>} : vector<16x16xf32>, vector<16x48xf32>, vector<16x48xf32> -> vector<16x48xf32>
    %1195 = arith.addf %1194, %1116 : vector<16x48xf32>
    %cst_292 = arith.constant dense<0.000000e+00> : vector<16x48xf32>
    %1196 = tpu.matmul %1183, %1112, %cst_292 {dimension_numbers = #tpu.dot_dimension_numbers<[1], [0], [0], [1], [0, 0, 1, 1], [], []>} : vector<16x16xf32>, vector<16x48xf32>, vector<16x48xf32> -> vector<16x48xf32>
    %1197 = arith.addf %1196, %1120 : vector<16x48xf32>
    %1198 = vector.extract_strided_slice %1191 {offsets = [0, 0], sizes = [16, 16], strides = [1, 1]} : vector<16x48xf32> to vector<16x16xf32>
    %1199 = vector.extract_strided_slice %1195 {offsets = [0, 0], sizes = [16, 16], strides = [1, 1]} : vector<16x48xf32> to vector<16x16xf32>
    %1200 = arith.addf %1198, %1199 : vector<16x16xf32>
    %1201 = arith.negf %1200 : vector<16x16xf32>
    %1202 = math.exp %1201 : vector<16x16xf32>
    %cst_293 = arith.constant 1.000000e+00 : f32
    %1203 = vector.broadcast %cst_293 : f32 to vector<16x16xf32>
    %1204 = arith.addf %1203, %1202 : vector<16x16xf32>
    %1205 = arith.divf %1203, %1204 : vector<16x16xf32>
    %1206 = vector.extract_strided_slice %1191 {offsets = [0, 16], sizes = [16, 16], strides = [1, 1]} : vector<16x48xf32> to vector<16x16xf32>
    %1207 = vector.extract_strided_slice %1195 {offsets = [0, 16], sizes = [16, 16], strides = [1, 1]} : vector<16x48xf32> to vector<16x16xf32>
    %1208 = arith.addf %1206, %1207 : vector<16x16xf32>
    %1209 = arith.negf %1208 : vector<16x16xf32>
    %1210 = math.exp %1209 : vector<16x16xf32>
    %cst_294 = arith.constant 1.000000e+00 : f32
    %1211 = vector.broadcast %cst_294 : f32 to vector<16x16xf32>
    %1212 = arith.addf %1211, %1210 : vector<16x16xf32>
    %1213 = arith.divf %1211, %1212 : vector<16x16xf32>
    %1214 = vector.extract_strided_slice %1191 {offsets = [0, 32], sizes = [16, 16], strides = [1, 1]} : vector<16x48xf32> to vector<16x16xf32>
    %1215 = vector.extract_strided_slice %1195 {offsets = [0, 32], sizes = [16, 16], strides = [1, 1]} : vector<16x48xf32> to vector<16x16xf32>
    %1216 = arith.mulf %1205, %1215 : vector<16x16xf32>
    %1217 = arith.addf %1214, %1216 : vector<16x16xf32>
    %1218 = math.tanh %1217 : vector<16x16xf32>
    %cst_295 = arith.constant 1.000000e+00 : f32
    %1219 = vector.broadcast %cst_295 : f32 to vector<16x16xf32>
    %1220 = arith.subf %1219, %1213 : vector<16x16xf32>
    %1221 = arith.mulf %1220, %1218 : vector<16x16xf32>
    %1222 = arith.mulf %1213, %1157 : vector<16x16xf32>
    %1223 = arith.addf %1221, %1222 : vector<16x16xf32>
    %1224 = vector.extract_strided_slice %1193 {offsets = [0, 0], sizes = [16, 16], strides = [1, 1]} : vector<16x48xf32> to vector<16x16xf32>
    %1225 = vector.extract_strided_slice %1197 {offsets = [0, 0], sizes = [16, 16], strides = [1, 1]} : vector<16x48xf32> to vector<16x16xf32>
    %1226 = arith.addf %1224, %1225 : vector<16x16xf32>
    %1227 = arith.negf %1226 : vector<16x16xf32>
    %1228 = math.exp %1227 : vector<16x16xf32>
    %cst_296 = arith.constant 1.000000e+00 : f32
    %1229 = vector.broadcast %cst_296 : f32 to vector<16x16xf32>
    %1230 = arith.addf %1229, %1228 : vector<16x16xf32>
    %1231 = arith.divf %1229, %1230 : vector<16x16xf32>
    %1232 = vector.extract_strided_slice %1193 {offsets = [0, 16], sizes = [16, 16], strides = [1, 1]} : vector<16x48xf32> to vector<16x16xf32>
    %1233 = vector.extract_strided_slice %1197 {offsets = [0, 16], sizes = [16, 16], strides = [1, 1]} : vector<16x48xf32> to vector<16x16xf32>
    %1234 = arith.addf %1232, %1233 : vector<16x16xf32>
    %1235 = arith.negf %1234 : vector<16x16xf32>
    %1236 = math.exp %1235 : vector<16x16xf32>
    %cst_297 = arith.constant 1.000000e+00 : f32
    %1237 = vector.broadcast %cst_297 : f32 to vector<16x16xf32>
    %1238 = arith.addf %1237, %1236 : vector<16x16xf32>
    %1239 = arith.divf %1237, %1238 : vector<16x16xf32>
    %1240 = vector.extract_strided_slice %1193 {offsets = [0, 32], sizes = [16, 16], strides = [1, 1]} : vector<16x48xf32> to vector<16x16xf32>
    %1241 = vector.extract_strided_slice %1197 {offsets = [0, 32], sizes = [16, 16], strides = [1, 1]} : vector<16x48xf32> to vector<16x16xf32>
    %1242 = arith.mulf %1231, %1241 : vector<16x16xf32>
    %1243 = arith.addf %1240, %1242 : vector<16x16xf32>
    %1244 = math.tanh %1243 : vector<16x16xf32>
    %cst_298 = arith.constant 1.000000e+00 : f32
    %1245 = vector.broadcast %cst_298 : f32 to vector<16x16xf32>
    %1246 = arith.subf %1245, %1239 : vector<16x16xf32>
    %1247 = arith.mulf %1246, %1244 : vector<16x16xf32>
    %1248 = arith.mulf %1239, %1183 : vector<16x16xf32>
    %1249 = arith.addf %1247, %1248 : vector<16x16xf32>
    %1250 = arith.index_cast %1189 : i32 to index
    %c0_299 = arith.constant 0 : index
    %1251 = vector.load %arg21[%1250, %c0_299] : memref<128x16xf32, #tpu.memory_space<vmem>>, vector<16x16xf32>
    tpu.vector_store %arg21[%1250, %c0_299], %1223 {strides = array<i32>} : memref<128x16xf32, #tpu.memory_space<vmem>>, vector<16x16xf32>,
    %1252 = arith.index_cast %1189 : i32 to index
    %c0_300 = arith.constant 0 : index
    %1253 = vector.load %arg22[%1252, %c0_300] : memref<128x16xf32, #tpu.memory_space<vmem>>, vector<16x16xf32>
    tpu.vector_store %arg22[%1252, %c0_300], %1249 {strides = array<i32>} : memref<128x16xf32, #tpu.memory_space<vmem>>, vector<16x16xf32>,
    %c2_i32_301 = arith.constant 2 : i32
    %c16_i32_302 = arith.constant 16 : i32
    %1254 = arith.muli %c2_i32_301, %c16_i32_302 : i32
    %1255 = tpu.assume_multiple %1254, 16 : i32
    %1256 = arith.index_cast %1255 : i32 to index
    %c0_303 = arith.constant 0 : index
    %1257 = vector.load %arg19[%1256, %c0_303] : memref<128x48xf32, #tpu.memory_space<vmem>>, vector<16x48xf32>
    %1258 = arith.index_cast %1255 : i32 to index
    %c0_304 = arith.constant 0 : index
    %1259 = vector.load %arg20[%1258, %c0_304] : memref<128x48xf32, #tpu.memory_space<vmem>>, vector<16x48xf32>
    %cst_305 = arith.constant dense<0.000000e+00> : vector<16x48xf32>
    %1260 = tpu.matmul %1223, %1110, %cst_305 {dimension_numbers = #tpu.dot_dimension_numbers<[1], [0], [0], [1], [0, 0, 1, 1], [], []>} : vector<16x16xf32>, vector<16x48xf32>, vector<16x48xf32> -> vector<16x48xf32>
    %1261 = arith.addf %1260, %1116 : vector<16x48xf32>
    %cst_306 = arith.constant dense<0.000000e+00> : vector<16x48xf32>
    %1262 = tpu.matmul %1249, %1112, %cst_306 {dimension_numbers = #tpu.dot_dimension_numbers<[1], [0], [0], [1], [0, 0, 1, 1], [], []>} : vector<16x16xf32>, vector<16x48xf32>, vector<16x48xf32> -> vector<16x48xf32>
    %1263 = arith.addf %1262, %1120 : vector<16x48xf32>
    %1264 = vector.extract_strided_slice %1257 {offsets = [0, 0], sizes = [16, 16], strides = [1, 1]} : vector<16x48xf32> to vector<16x16xf32>
    %1265 = vector.extract_strided_slice %1261 {offsets = [0, 0], sizes = [16, 16], strides = [1, 1]} : vector<16x48xf32> to vector<16x16xf32>
    %1266 = arith.addf %1264, %1265 : vector<16x16xf32>
    %1267 = arith.negf %1266 : vector<16x16xf32>
    %1268 = math.exp %1267 : vector<16x16xf32>
    %cst_307 = arith.constant 1.000000e+00 : f32
    %1269 = vector.broadcast %cst_307 : f32 to vector<16x16xf32>
    %1270 = arith.addf %1269, %1268 : vector<16x16xf32>
    %1271 = arith.divf %1269, %1270 : vector<16x16xf32>
    %1272 = vector.extract_strided_slice %1257 {offsets = [0, 16], sizes = [16, 16], strides = [1, 1]} : vector<16x48xf32> to vector<16x16xf32>
    %1273 = vector.extract_strided_slice %1261 {offsets = [0, 16], sizes = [16, 16], strides = [1, 1]} : vector<16x48xf32> to vector<16x16xf32>
    %1274 = arith.addf %1272, %1273 : vector<16x16xf32>
    %1275 = arith.negf %1274 : vector<16x16xf32>
    %1276 = math.exp %1275 : vector<16x16xf32>
    %cst_308 = arith.constant 1.000000e+00 : f32
    %1277 = vector.broadcast %cst_308 : f32 to vector<16x16xf32>
    %1278 = arith.addf %1277, %1276 : vector<16x16xf32>
    %1279 = arith.divf %1277, %1278 : vector<16x16xf32>
    %1280 = vector.extract_strided_slice %1257 {offsets = [0, 32], sizes = [16, 16], strides = [1, 1]} : vector<16x48xf32> to vector<16x16xf32>
    %1281 = vector.extract_strided_slice %1261 {offsets = [0, 32], sizes = [16, 16], strides = [1, 1]} : vector<16x48xf32> to vector<16x16xf32>
    %1282 = arith.mulf %1271, %1281 : vector<16x16xf32>
    %1283 = arith.addf %1280, %1282 : vector<16x16xf32>
    %1284 = math.tanh %1283 : vector<16x16xf32>
    %cst_309 = arith.constant 1.000000e+00 : f32
    %1285 = vector.broadcast %cst_309 : f32 to vector<16x16xf32>
    %1286 = arith.subf %1285, %1279 : vector<16x16xf32>
    %1287 = arith.mulf %1286, %1284 : vector<16x16xf32>
    %1288 = arith.mulf %1279, %1223 : vector<16x16xf32>
    %1289 = arith.addf %1287, %1288 : vector<16x16xf32>
    %1290 = vector.extract_strided_slice %1259 {offsets = [0, 0], sizes = [16, 16], strides = [1, 1]} : vector<16x48xf32> to vector<16x16xf32>
    %1291 = vector.extract_strided_slice %1263 {offsets = [0, 0], sizes = [16, 16], strides = [1, 1]} : vector<16x48xf32> to vector<16x16xf32>
    %1292 = arith.addf %1290, %1291 : vector<16x16xf32>
    %1293 = arith.negf %1292 : vector<16x16xf32>
    %1294 = math.exp %1293 : vector<16x16xf32>
    %cst_310 = arith.constant 1.000000e+00 : f32
    %1295 = vector.broadcast %cst_310 : f32 to vector<16x16xf32>
    %1296 = arith.addf %1295, %1294 : vector<16x16xf32>
    %1297 = arith.divf %1295, %1296 : vector<16x16xf32>
    %1298 = vector.extract_strided_slice %1259 {offsets = [0, 16], sizes = [16, 16], strides = [1, 1]} : vector<16x48xf32> to vector<16x16xf32>
    %1299 = vector.extract_strided_slice %1263 {offsets = [0, 16], sizes = [16, 16], strides = [1, 1]} : vector<16x48xf32> to vector<16x16xf32>
    %1300 = arith.addf %1298, %1299 : vector<16x16xf32>
    %1301 = arith.negf %1300 : vector<16x16xf32>
    %1302 = math.exp %1301 : vector<16x16xf32>
    %cst_311 = arith.constant 1.000000e+00 : f32
    %1303 = vector.broadcast %cst_311 : f32 to vector<16x16xf32>
    %1304 = arith.addf %1303, %1302 : vector<16x16xf32>
    %1305 = arith.divf %1303, %1304 : vector<16x16xf32>
    %1306 = vector.extract_strided_slice %1259 {offsets = [0, 32], sizes = [16, 16], strides = [1, 1]} : vector<16x48xf32> to vector<16x16xf32>
    %1307 = vector.extract_strided_slice %1263 {offsets = [0, 32], sizes = [16, 16], strides = [1, 1]} : vector<16x48xf32> to vector<16x16xf32>
    %1308 = arith.mulf %1297, %1307 : vector<16x16xf32>
    %1309 = arith.addf %1306, %1308 : vector<16x16xf32>
    %1310 = math.tanh %1309 : vector<16x16xf32>
    %cst_312 = arith.constant 1.000000e+00 : f32
    %1311 = vector.broadcast %cst_312 : f32 to vector<16x16xf32>
    %1312 = arith.subf %1311, %1305 : vector<16x16xf32>
    %1313 = arith.mulf %1312, %1310 : vector<16x16xf32>
    %1314 = arith.mulf %1305, %1249 : vector<16x16xf32>
    %1315 = arith.addf %1313, %1314 : vector<16x16xf32>
    %1316 = arith.index_cast %1255 : i32 to index
    %c0_313 = arith.constant 0 : index
    %1317 = vector.load %arg21[%1316, %c0_313] : memref<128x16xf32, #tpu.memory_space<vmem>>, vector<16x16xf32>
    tpu.vector_store %arg21[%1316, %c0_313], %1289 {strides = array<i32>} : memref<128x16xf32, #tpu.memory_space<vmem>>, vector<16x16xf32>,
    %1318 = arith.index_cast %1255 : i32 to index
    %c0_314 = arith.constant 0 : index
    %1319 = vector.load %arg22[%1318, %c0_314] : memref<128x16xf32, #tpu.memory_space<vmem>>, vector<16x16xf32>
    tpu.vector_store %arg22[%1318, %c0_314], %1315 {strides = array<i32>} : memref<128x16xf32, #tpu.memory_space<vmem>>, vector<16x16xf32>,
    %c3_i32_315 = arith.constant 3 : i32
    %c16_i32_316 = arith.constant 16 : i32
    %1320 = arith.muli %c3_i32_315, %c16_i32_316 : i32
    %1321 = tpu.assume_multiple %1320, 16 : i32
    %1322 = arith.index_cast %1321 : i32 to index
    %c0_317 = arith.constant 0 : index
    %1323 = vector.load %arg19[%1322, %c0_317] : memref<128x48xf32, #tpu.memory_space<vmem>>, vector<16x48xf32>
    %1324 = arith.index_cast %1321 : i32 to index
    %c0_318 = arith.constant 0 : index
    %1325 = vector.load %arg20[%1324, %c0_318] : memref<128x48xf32, #tpu.memory_space<vmem>>, vector<16x48xf32>
    %cst_319 = arith.constant dense<0.000000e+00> : vector<16x48xf32>
    %1326 = tpu.matmul %1289, %1110, %cst_319 {dimension_numbers = #tpu.dot_dimension_numbers<[1], [0], [0], [1], [0, 0, 1, 1], [], []>} : vector<16x16xf32>, vector<16x48xf32>, vector<16x48xf32> -> vector<16x48xf32>
    %1327 = arith.addf %1326, %1116 : vector<16x48xf32>
    %cst_320 = arith.constant dense<0.000000e+00> : vector<16x48xf32>
    %1328 = tpu.matmul %1315, %1112, %cst_320 {dimension_numbers = #tpu.dot_dimension_numbers<[1], [0], [0], [1], [0, 0, 1, 1], [], []>} : vector<16x16xf32>, vector<16x48xf32>, vector<16x48xf32> -> vector<16x48xf32>
    %1329 = arith.addf %1328, %1120 : vector<16x48xf32>
    %1330 = vector.extract_strided_slice %1323 {offsets = [0, 0], sizes = [16, 16], strides = [1, 1]} : vector<16x48xf32> to vector<16x16xf32>
    %1331 = vector.extract_strided_slice %1327 {offsets = [0, 0], sizes = [16, 16], strides = [1, 1]} : vector<16x48xf32> to vector<16x16xf32>
    %1332 = arith.addf %1330, %1331 : vector<16x16xf32>
    %1333 = arith.negf %1332 : vector<16x16xf32>
    %1334 = math.exp %1333 : vector<16x16xf32>
    %cst_321 = arith.constant 1.000000e+00 : f32
    %1335 = vector.broadcast %cst_321 : f32 to vector<16x16xf32>
    %1336 = arith.addf %1335, %1334 : vector<16x16xf32>
    %1337 = arith.divf %1335, %1336 : vector<16x16xf32>
    %1338 = vector.extract_strided_slice %1323 {offsets = [0, 16], sizes = [16, 16], strides = [1, 1]} : vector<16x48xf32> to vector<16x16xf32>
    %1339 = vector.extract_strided_slice %1327 {offsets = [0, 16], sizes = [16, 16], strides = [1, 1]} : vector<16x48xf32> to vector<16x16xf32>
    %1340 = arith.addf %1338, %1339 : vector<16x16xf32>
    %1341 = arith.negf %1340 : vector<16x16xf32>
    %1342 = math.exp %1341 : vector<16x16xf32>
    %cst_322 = arith.constant 1.000000e+00 : f32
    %1343 = vector.broadcast %cst_322 : f32 to vector<16x16xf32>
    %1344 = arith.addf %1343, %1342 : vector<16x16xf32>
    %1345 = arith.divf %1343, %1344 : vector<16x16xf32>
    %1346 = vector.extract_strided_slice %1323 {offsets = [0, 32], sizes = [16, 16], strides = [1, 1]} : vector<16x48xf32> to vector<16x16xf32>
    %1347 = vector.extract_strided_slice %1327 {offsets = [0, 32], sizes = [16, 16], strides = [1, 1]} : vector<16x48xf32> to vector<16x16xf32>
    %1348 = arith.mulf %1337, %1347 : vector<16x16xf32>
    %1349 = arith.addf %1346, %1348 : vector<16x16xf32>
    %1350 = math.tanh %1349 : vector<16x16xf32>
    %cst_323 = arith.constant 1.000000e+00 : f32
    %1351 = vector.broadcast %cst_323 : f32 to vector<16x16xf32>
    %1352 = arith.subf %1351, %1345 : vector<16x16xf32>
    %1353 = arith.mulf %1352, %1350 : vector<16x16xf32>
    %1354 = arith.mulf %1345, %1289 : vector<16x16xf32>
    %1355 = arith.addf %1353, %1354 : vector<16x16xf32>
    %1356 = vector.extract_strided_slice %1325 {offsets = [0, 0], sizes = [16, 16], strides = [1, 1]} : vector<16x48xf32> to vector<16x16xf32>
    %1357 = vector.extract_strided_slice %1329 {offsets = [0, 0], sizes = [16, 16], strides = [1, 1]} : vector<16x48xf32> to vector<16x16xf32>
    %1358 = arith.addf %1356, %1357 : vector<16x16xf32>
    %1359 = arith.negf %1358 : vector<16x16xf32>
    %1360 = math.exp %1359 : vector<16x16xf32>
    %cst_324 = arith.constant 1.000000e+00 : f32
    %1361 = vector.broadcast %cst_324 : f32 to vector<16x16xf32>
    %1362 = arith.addf %1361, %1360 : vector<16x16xf32>
    %1363 = arith.divf %1361, %1362 : vector<16x16xf32>
    %1364 = vector.extract_strided_slice %1325 {offsets = [0, 16], sizes = [16, 16], strides = [1, 1]} : vector<16x48xf32> to vector<16x16xf32>
    %1365 = vector.extract_strided_slice %1329 {offsets = [0, 16], sizes = [16, 16], strides = [1, 1]} : vector<16x48xf32> to vector<16x16xf32>
    %1366 = arith.addf %1364, %1365 : vector<16x16xf32>
    %1367 = arith.negf %1366 : vector<16x16xf32>
    %1368 = math.exp %1367 : vector<16x16xf32>
    %cst_325 = arith.constant 1.000000e+00 : f32
    %1369 = vector.broadcast %cst_325 : f32 to vector<16x16xf32>
    %1370 = arith.addf %1369, %1368 : vector<16x16xf32>
    %1371 = arith.divf %1369, %1370 : vector<16x16xf32>
    %1372 = vector.extract_strided_slice %1325 {offsets = [0, 32], sizes = [16, 16], strides = [1, 1]} : vector<16x48xf32> to vector<16x16xf32>
    %1373 = vector.extract_strided_slice %1329 {offsets = [0, 32], sizes = [16, 16], strides = [1, 1]} : vector<16x48xf32> to vector<16x16xf32>
    %1374 = arith.mulf %1363, %1373 : vector<16x16xf32>
    %1375 = arith.addf %1372, %1374 : vector<16x16xf32>
    %1376 = math.tanh %1375 : vector<16x16xf32>
    %cst_326 = arith.constant 1.000000e+00 : f32
    %1377 = vector.broadcast %cst_326 : f32 to vector<16x16xf32>
    %1378 = arith.subf %1377, %1371 : vector<16x16xf32>
    %1379 = arith.mulf %1378, %1376 : vector<16x16xf32>
    %1380 = arith.mulf %1371, %1315 : vector<16x16xf32>
    %1381 = arith.addf %1379, %1380 : vector<16x16xf32>
    %1382 = arith.index_cast %1321 : i32 to index
    %c0_327 = arith.constant 0 : index
    %1383 = vector.load %arg21[%1382, %c0_327] : memref<128x16xf32, #tpu.memory_space<vmem>>, vector<16x16xf32>
    tpu.vector_store %arg21[%1382, %c0_327], %1355 {strides = array<i32>} : memref<128x16xf32, #tpu.memory_space<vmem>>, vector<16x16xf32>,
    %1384 = arith.index_cast %1321 : i32 to index
    %c0_328 = arith.constant 0 : index
    %1385 = vector.load %arg22[%1384, %c0_328] : memref<128x16xf32, #tpu.memory_space<vmem>>, vector<16x16xf32>
    tpu.vector_store %arg22[%1384, %c0_328], %1381 {strides = array<i32>} : memref<128x16xf32, #tpu.memory_space<vmem>>, vector<16x16xf32>,
    %c4_i32_329 = arith.constant 4 : i32
    %c16_i32_330 = arith.constant 16 : i32
    %1386 = arith.muli %c4_i32_329, %c16_i32_330 : i32
    %1387 = tpu.assume_multiple %1386, 16 : i32
    %1388 = arith.index_cast %1387 : i32 to index
    %c0_331 = arith.constant 0 : index
    %1389 = vector.load %arg19[%1388, %c0_331] : memref<128x48xf32, #tpu.memory_space<vmem>>, vector<16x48xf32>
    %1390 = arith.index_cast %1387 : i32 to index
    %c0_332 = arith.constant 0 : index
    %1391 = vector.load %arg20[%1390, %c0_332] : memref<128x48xf32, #tpu.memory_space<vmem>>, vector<16x48xf32>
    %cst_333 = arith.constant dense<0.000000e+00> : vector<16x48xf32>
    %1392 = tpu.matmul %1355, %1110, %cst_333 {dimension_numbers = #tpu.dot_dimension_numbers<[1], [0], [0], [1], [0, 0, 1, 1], [], []>} : vector<16x16xf32>, vector<16x48xf32>, vector<16x48xf32> -> vector<16x48xf32>
    %1393 = arith.addf %1392, %1116 : vector<16x48xf32>
    %cst_334 = arith.constant dense<0.000000e+00> : vector<16x48xf32>
    %1394 = tpu.matmul %1381, %1112, %cst_334 {dimension_numbers = #tpu.dot_dimension_numbers<[1], [0], [0], [1], [0, 0, 1, 1], [], []>} : vector<16x16xf32>, vector<16x48xf32>, vector<16x48xf32> -> vector<16x48xf32>
    %1395 = arith.addf %1394, %1120 : vector<16x48xf32>
    %1396 = vector.extract_strided_slice %1389 {offsets = [0, 0], sizes = [16, 16], strides = [1, 1]} : vector<16x48xf32> to vector<16x16xf32>
    %1397 = vector.extract_strided_slice %1393 {offsets = [0, 0], sizes = [16, 16], strides = [1, 1]} : vector<16x48xf32> to vector<16x16xf32>
    %1398 = arith.addf %1396, %1397 : vector<16x16xf32>
    %1399 = arith.negf %1398 : vector<16x16xf32>
    %1400 = math.exp %1399 : vector<16x16xf32>
    %cst_335 = arith.constant 1.000000e+00 : f32
    %1401 = vector.broadcast %cst_335 : f32 to vector<16x16xf32>
    %1402 = arith.addf %1401, %1400 : vector<16x16xf32>
    %1403 = arith.divf %1401, %1402 : vector<16x16xf32>
    %1404 = vector.extract_strided_slice %1389 {offsets = [0, 16], sizes = [16, 16], strides = [1, 1]} : vector<16x48xf32> to vector<16x16xf32>
    %1405 = vector.extract_strided_slice %1393 {offsets = [0, 16], sizes = [16, 16], strides = [1, 1]} : vector<16x48xf32> to vector<16x16xf32>
    %1406 = arith.addf %1404, %1405 : vector<16x16xf32>
    %1407 = arith.negf %1406 : vector<16x16xf32>
    %1408 = math.exp %1407 : vector<16x16xf32>
    %cst_336 = arith.constant 1.000000e+00 : f32
    %1409 = vector.broadcast %cst_336 : f32 to vector<16x16xf32>
    %1410 = arith.addf %1409, %1408 : vector<16x16xf32>
    %1411 = arith.divf %1409, %1410 : vector<16x16xf32>
    %1412 = vector.extract_strided_slice %1389 {offsets = [0, 32], sizes = [16, 16], strides = [1, 1]} : vector<16x48xf32> to vector<16x16xf32>
    %1413 = vector.extract_strided_slice %1393 {offsets = [0, 32], sizes = [16, 16], strides = [1, 1]} : vector<16x48xf32> to vector<16x16xf32>
    %1414 = arith.mulf %1403, %1413 : vector<16x16xf32>
    %1415 = arith.addf %1412, %1414 : vector<16x16xf32>
    %1416 = math.tanh %1415 : vector<16x16xf32>
    %cst_337 = arith.constant 1.000000e+00 : f32
    %1417 = vector.broadcast %cst_337 : f32 to vector<16x16xf32>
    %1418 = arith.subf %1417, %1411 : vector<16x16xf32>
    %1419 = arith.mulf %1418, %1416 : vector<16x16xf32>
    %1420 = arith.mulf %1411, %1355 : vector<16x16xf32>
    %1421 = arith.addf %1419, %1420 : vector<16x16xf32>
    %1422 = vector.extract_strided_slice %1391 {offsets = [0, 0], sizes = [16, 16], strides = [1, 1]} : vector<16x48xf32> to vector<16x16xf32>
    %1423 = vector.extract_strided_slice %1395 {offsets = [0, 0], sizes = [16, 16], strides = [1, 1]} : vector<16x48xf32> to vector<16x16xf32>
    %1424 = arith.addf %1422, %1423 : vector<16x16xf32>
    %1425 = arith.negf %1424 : vector<16x16xf32>
    %1426 = math.exp %1425 : vector<16x16xf32>
    %cst_338 = arith.constant 1.000000e+00 : f32
    %1427 = vector.broadcast %cst_338 : f32 to vector<16x16xf32>
    %1428 = arith.addf %1427, %1426 : vector<16x16xf32>
    %1429 = arith.divf %1427, %1428 : vector<16x16xf32>
    %1430 = vector.extract_strided_slice %1391 {offsets = [0, 16], sizes = [16, 16], strides = [1, 1]} : vector<16x48xf32> to vector<16x16xf32>
    %1431 = vector.extract_strided_slice %1395 {offsets = [0, 16], sizes = [16, 16], strides = [1, 1]} : vector<16x48xf32> to vector<16x16xf32>
    %1432 = arith.addf %1430, %1431 : vector<16x16xf32>
    %1433 = arith.negf %1432 : vector<16x16xf32>
    %1434 = math.exp %1433 : vector<16x16xf32>
    %cst_339 = arith.constant 1.000000e+00 : f32
    %1435 = vector.broadcast %cst_339 : f32 to vector<16x16xf32>
    %1436 = arith.addf %1435, %1434 : vector<16x16xf32>
    %1437 = arith.divf %1435, %1436 : vector<16x16xf32>
    %1438 = vector.extract_strided_slice %1391 {offsets = [0, 32], sizes = [16, 16], strides = [1, 1]} : vector<16x48xf32> to vector<16x16xf32>
    %1439 = vector.extract_strided_slice %1395 {offsets = [0, 32], sizes = [16, 16], strides = [1, 1]} : vector<16x48xf32> to vector<16x16xf32>
    %1440 = arith.mulf %1429, %1439 : vector<16x16xf32>
    %1441 = arith.addf %1438, %1440 : vector<16x16xf32>
    %1442 = math.tanh %1441 : vector<16x16xf32>
    %cst_340 = arith.constant 1.000000e+00 : f32
    %1443 = vector.broadcast %cst_340 : f32 to vector<16x16xf32>
    %1444 = arith.subf %1443, %1437 : vector<16x16xf32>
    %1445 = arith.mulf %1444, %1442 : vector<16x16xf32>
    %1446 = arith.mulf %1437, %1381 : vector<16x16xf32>
    %1447 = arith.addf %1445, %1446 : vector<16x16xf32>
    %1448 = arith.index_cast %1387 : i32 to index
    %c0_341 = arith.constant 0 : index
    %1449 = vector.load %arg21[%1448, %c0_341] : memref<128x16xf32, #tpu.memory_space<vmem>>, vector<16x16xf32>
    tpu.vector_store %arg21[%1448, %c0_341], %1421 {strides = array<i32>} : memref<128x16xf32, #tpu.memory_space<vmem>>, vector<16x16xf32>,
    %1450 = arith.index_cast %1387 : i32 to index
    %c0_342 = arith.constant 0 : index
    %1451 = vector.load %arg22[%1450, %c0_342] : memref<128x16xf32, #tpu.memory_space<vmem>>, vector<16x16xf32>
    tpu.vector_store %arg22[%1450, %c0_342], %1447 {strides = array<i32>} : memref<128x16xf32, #tpu.memory_space<vmem>>, vector<16x16xf32>,
    %c5_i32_343 = arith.constant 5 : i32
    %c16_i32_344 = arith.constant 16 : i32
    %1452 = arith.muli %c5_i32_343, %c16_i32_344 : i32
    %1453 = tpu.assume_multiple %1452, 16 : i32
    %1454 = arith.index_cast %1453 : i32 to index
    %c0_345 = arith.constant 0 : index
    %1455 = vector.load %arg19[%1454, %c0_345] : memref<128x48xf32, #tpu.memory_space<vmem>>, vector<16x48xf32>
    %1456 = arith.index_cast %1453 : i32 to index
    %c0_346 = arith.constant 0 : index
    %1457 = vector.load %arg20[%1456, %c0_346] : memref<128x48xf32, #tpu.memory_space<vmem>>, vector<16x48xf32>
    %cst_347 = arith.constant dense<0.000000e+00> : vector<16x48xf32>
    %1458 = tpu.matmul %1421, %1110, %cst_347 {dimension_numbers = #tpu.dot_dimension_numbers<[1], [0], [0], [1], [0, 0, 1, 1], [], []>} : vector<16x16xf32>, vector<16x48xf32>, vector<16x48xf32> -> vector<16x48xf32>
    %1459 = arith.addf %1458, %1116 : vector<16x48xf32>
    %cst_348 = arith.constant dense<0.000000e+00> : vector<16x48xf32>
    %1460 = tpu.matmul %1447, %1112, %cst_348 {dimension_numbers = #tpu.dot_dimension_numbers<[1], [0], [0], [1], [0, 0, 1, 1], [], []>} : vector<16x16xf32>, vector<16x48xf32>, vector<16x48xf32> -> vector<16x48xf32>
    %1461 = arith.addf %1460, %1120 : vector<16x48xf32>
    %1462 = vector.extract_strided_slice %1455 {offsets = [0, 0], sizes = [16, 16], strides = [1, 1]} : vector<16x48xf32> to vector<16x16xf32>
    %1463 = vector.extract_strided_slice %1459 {offsets = [0, 0], sizes = [16, 16], strides = [1, 1]} : vector<16x48xf32> to vector<16x16xf32>
    %1464 = arith.addf %1462, %1463 : vector<16x16xf32>
    %1465 = arith.negf %1464 : vector<16x16xf32>
    %1466 = math.exp %1465 : vector<16x16xf32>
    %cst_349 = arith.constant 1.000000e+00 : f32
    %1467 = vector.broadcast %cst_349 : f32 to vector<16x16xf32>
    %1468 = arith.addf %1467, %1466 : vector<16x16xf32>
    %1469 = arith.divf %1467, %1468 : vector<16x16xf32>
    %1470 = vector.extract_strided_slice %1455 {offsets = [0, 16], sizes = [16, 16], strides = [1, 1]} : vector<16x48xf32> to vector<16x16xf32>
    %1471 = vector.extract_strided_slice %1459 {offsets = [0, 16], sizes = [16, 16], strides = [1, 1]} : vector<16x48xf32> to vector<16x16xf32>
    %1472 = arith.addf %1470, %1471 : vector<16x16xf32>
    %1473 = arith.negf %1472 : vector<16x16xf32>
    %1474 = math.exp %1473 : vector<16x16xf32>
    %cst_350 = arith.constant 1.000000e+00 : f32
    %1475 = vector.broadcast %cst_350 : f32 to vector<16x16xf32>
    %1476 = arith.addf %1475, %1474 : vector<16x16xf32>
    %1477 = arith.divf %1475, %1476 : vector<16x16xf32>
    %1478 = vector.extract_strided_slice %1455 {offsets = [0, 32], sizes = [16, 16], strides = [1, 1]} : vector<16x48xf32> to vector<16x16xf32>
    %1479 = vector.extract_strided_slice %1459 {offsets = [0, 32], sizes = [16, 16], strides = [1, 1]} : vector<16x48xf32> to vector<16x16xf32>
    %1480 = arith.mulf %1469, %1479 : vector<16x16xf32>
    %1481 = arith.addf %1478, %1480 : vector<16x16xf32>
    %1482 = math.tanh %1481 : vector<16x16xf32>
    %cst_351 = arith.constant 1.000000e+00 : f32
    %1483 = vector.broadcast %cst_351 : f32 to vector<16x16xf32>
    %1484 = arith.subf %1483, %1477 : vector<16x16xf32>
    %1485 = arith.mulf %1484, %1482 : vector<16x16xf32>
    %1486 = arith.mulf %1477, %1421 : vector<16x16xf32>
    %1487 = arith.addf %1485, %1486 : vector<16x16xf32>
    %1488 = vector.extract_strided_slice %1457 {offsets = [0, 0], sizes = [16, 16], strides = [1, 1]} : vector<16x48xf32> to vector<16x16xf32>
    %1489 = vector.extract_strided_slice %1461 {offsets = [0, 0], sizes = [16, 16], strides = [1, 1]} : vector<16x48xf32> to vector<16x16xf32>
    %1490 = arith.addf %1488, %1489 : vector<16x16xf32>
    %1491 = arith.negf %1490 : vector<16x16xf32>
    %1492 = math.exp %1491 : vector<16x16xf32>
    %cst_352 = arith.constant 1.000000e+00 : f32
    %1493 = vector.broadcast %cst_352 : f32 to vector<16x16xf32>
    %1494 = arith.addf %1493, %1492 : vector<16x16xf32>
    %1495 = arith.divf %1493, %1494 : vector<16x16xf32>
    %1496 = vector.extract_strided_slice %1457 {offsets = [0, 16], sizes = [16, 16], strides = [1, 1]} : vector<16x48xf32> to vector<16x16xf32>
    %1497 = vector.extract_strided_slice %1461 {offsets = [0, 16], sizes = [16, 16], strides = [1, 1]} : vector<16x48xf32> to vector<16x16xf32>
    %1498 = arith.addf %1496, %1497 : vector<16x16xf32>
    %1499 = arith.negf %1498 : vector<16x16xf32>
    %1500 = math.exp %1499 : vector<16x16xf32>
    %cst_353 = arith.constant 1.000000e+00 : f32
    %1501 = vector.broadcast %cst_353 : f32 to vector<16x16xf32>
    %1502 = arith.addf %1501, %1500 : vector<16x16xf32>
    %1503 = arith.divf %1501, %1502 : vector<16x16xf32>
    %1504 = vector.extract_strided_slice %1457 {offsets = [0, 32], sizes = [16, 16], strides = [1, 1]} : vector<16x48xf32> to vector<16x16xf32>
    %1505 = vector.extract_strided_slice %1461 {offsets = [0, 32], sizes = [16, 16], strides = [1, 1]} : vector<16x48xf32> to vector<16x16xf32>
    %1506 = arith.mulf %1495, %1505 : vector<16x16xf32>
    %1507 = arith.addf %1504, %1506 : vector<16x16xf32>
    %1508 = math.tanh %1507 : vector<16x16xf32>
    %cst_354 = arith.constant 1.000000e+00 : f32
    %1509 = vector.broadcast %cst_354 : f32 to vector<16x16xf32>
    %1510 = arith.subf %1509, %1503 : vector<16x16xf32>
    %1511 = arith.mulf %1510, %1508 : vector<16x16xf32>
    %1512 = arith.mulf %1503, %1447 : vector<16x16xf32>
    %1513 = arith.addf %1511, %1512 : vector<16x16xf32>
    %1514 = arith.index_cast %1453 : i32 to index
    %c0_355 = arith.constant 0 : index
    %1515 = vector.load %arg21[%1514, %c0_355] : memref<128x16xf32, #tpu.memory_space<vmem>>, vector<16x16xf32>
    tpu.vector_store %arg21[%1514, %c0_355], %1487 {strides = array<i32>} : memref<128x16xf32, #tpu.memory_space<vmem>>, vector<16x16xf32>,
    %1516 = arith.index_cast %1453 : i32 to index
    %c0_356 = arith.constant 0 : index
    %1517 = vector.load %arg22[%1516, %c0_356] : memref<128x16xf32, #tpu.memory_space<vmem>>, vector<16x16xf32>
    tpu.vector_store %arg22[%1516, %c0_356], %1513 {strides = array<i32>} : memref<128x16xf32, #tpu.memory_space<vmem>>, vector<16x16xf32>,
    %c6_i32_357 = arith.constant 6 : i32
    %c16_i32_358 = arith.constant 16 : i32
    %1518 = arith.muli %c6_i32_357, %c16_i32_358 : i32
    %1519 = tpu.assume_multiple %1518, 16 : i32
    %1520 = arith.index_cast %1519 : i32 to index
    %c0_359 = arith.constant 0 : index
    %1521 = vector.load %arg19[%1520, %c0_359] : memref<128x48xf32, #tpu.memory_space<vmem>>, vector<16x48xf32>
    %1522 = arith.index_cast %1519 : i32 to index
    %c0_360 = arith.constant 0 : index
    %1523 = vector.load %arg20[%1522, %c0_360] : memref<128x48xf32, #tpu.memory_space<vmem>>, vector<16x48xf32>
    %cst_361 = arith.constant dense<0.000000e+00> : vector<16x48xf32>
    %1524 = tpu.matmul %1487, %1110, %cst_361 {dimension_numbers = #tpu.dot_dimension_numbers<[1], [0], [0], [1], [0, 0, 1, 1], [], []>} : vector<16x16xf32>, vector<16x48xf32>, vector<16x48xf32> -> vector<16x48xf32>
    %1525 = arith.addf %1524, %1116 : vector<16x48xf32>
    %cst_362 = arith.constant dense<0.000000e+00> : vector<16x48xf32>
    %1526 = tpu.matmul %1513, %1112, %cst_362 {dimension_numbers = #tpu.dot_dimension_numbers<[1], [0], [0], [1], [0, 0, 1, 1], [], []>} : vector<16x16xf32>, vector<16x48xf32>, vector<16x48xf32> -> vector<16x48xf32>
    %1527 = arith.addf %1526, %1120 : vector<16x48xf32>
    %1528 = vector.extract_strided_slice %1521 {offsets = [0, 0], sizes = [16, 16], strides = [1, 1]} : vector<16x48xf32> to vector<16x16xf32>
    %1529 = vector.extract_strided_slice %1525 {offsets = [0, 0], sizes = [16, 16], strides = [1, 1]} : vector<16x48xf32> to vector<16x16xf32>
    %1530 = arith.addf %1528, %1529 : vector<16x16xf32>
    %1531 = arith.negf %1530 : vector<16x16xf32>
    %1532 = math.exp %1531 : vector<16x16xf32>
    %cst_363 = arith.constant 1.000000e+00 : f32
    %1533 = vector.broadcast %cst_363 : f32 to vector<16x16xf32>
    %1534 = arith.addf %1533, %1532 : vector<16x16xf32>
    %1535 = arith.divf %1533, %1534 : vector<16x16xf32>
    %1536 = vector.extract_strided_slice %1521 {offsets = [0, 16], sizes = [16, 16], strides = [1, 1]} : vector<16x48xf32> to vector<16x16xf32>
    %1537 = vector.extract_strided_slice %1525 {offsets = [0, 16], sizes = [16, 16], strides = [1, 1]} : vector<16x48xf32> to vector<16x16xf32>
    %1538 = arith.addf %1536, %1537 : vector<16x16xf32>
    %1539 = arith.negf %1538 : vector<16x16xf32>
    %1540 = math.exp %1539 : vector<16x16xf32>
    %cst_364 = arith.constant 1.000000e+00 : f32
    %1541 = vector.broadcast %cst_364 : f32 to vector<16x16xf32>
    %1542 = arith.addf %1541, %1540 : vector<16x16xf32>
    %1543 = arith.divf %1541, %1542 : vector<16x16xf32>
    %1544 = vector.extract_strided_slice %1521 {offsets = [0, 32], sizes = [16, 16], strides = [1, 1]} : vector<16x48xf32> to vector<16x16xf32>
    %1545 = vector.extract_strided_slice %1525 {offsets = [0, 32], sizes = [16, 16], strides = [1, 1]} : vector<16x48xf32> to vector<16x16xf32>
    %1546 = arith.mulf %1535, %1545 : vector<16x16xf32>
    %1547 = arith.addf %1544, %1546 : vector<16x16xf32>
    %1548 = math.tanh %1547 : vector<16x16xf32>
    %cst_365 = arith.constant 1.000000e+00 : f32
    %1549 = vector.broadcast %cst_365 : f32 to vector<16x16xf32>
    %1550 = arith.subf %1549, %1543 : vector<16x16xf32>
    %1551 = arith.mulf %1550, %1548 : vector<16x16xf32>
    %1552 = arith.mulf %1543, %1487 : vector<16x16xf32>
    %1553 = arith.addf %1551, %1552 : vector<16x16xf32>
    %1554 = vector.extract_strided_slice %1523 {offsets = [0, 0], sizes = [16, 16], strides = [1, 1]} : vector<16x48xf32> to vector<16x16xf32>
    %1555 = vector.extract_strided_slice %1527 {offsets = [0, 0], sizes = [16, 16], strides = [1, 1]} : vector<16x48xf32> to vector<16x16xf32>
    %1556 = arith.addf %1554, %1555 : vector<16x16xf32>
    %1557 = arith.negf %1556 : vector<16x16xf32>
    %1558 = math.exp %1557 : vector<16x16xf32>
    %cst_366 = arith.constant 1.000000e+00 : f32
    %1559 = vector.broadcast %cst_366 : f32 to vector<16x16xf32>
    %1560 = arith.addf %1559, %1558 : vector<16x16xf32>
    %1561 = arith.divf %1559, %1560 : vector<16x16xf32>
    %1562 = vector.extract_strided_slice %1523 {offsets = [0, 16], sizes = [16, 16], strides = [1, 1]} : vector<16x48xf32> to vector<16x16xf32>
    %1563 = vector.extract_strided_slice %1527 {offsets = [0, 16], sizes = [16, 16], strides = [1, 1]} : vector<16x48xf32> to vector<16x16xf32>
    %1564 = arith.addf %1562, %1563 : vector<16x16xf32>
    %1565 = arith.negf %1564 : vector<16x16xf32>
    %1566 = math.exp %1565 : vector<16x16xf32>
    %cst_367 = arith.constant 1.000000e+00 : f32
    %1567 = vector.broadcast %cst_367 : f32 to vector<16x16xf32>
    %1568 = arith.addf %1567, %1566 : vector<16x16xf32>
    %1569 = arith.divf %1567, %1568 : vector<16x16xf32>
    %1570 = vector.extract_strided_slice %1523 {offsets = [0, 32], sizes = [16, 16], strides = [1, 1]} : vector<16x48xf32> to vector<16x16xf32>
    %1571 = vector.extract_strided_slice %1527 {offsets = [0, 32], sizes = [16, 16], strides = [1, 1]} : vector<16x48xf32> to vector<16x16xf32>
    %1572 = arith.mulf %1561, %1571 : vector<16x16xf32>
    %1573 = arith.addf %1570, %1572 : vector<16x16xf32>
    %1574 = math.tanh %1573 : vector<16x16xf32>
    %cst_368 = arith.constant 1.000000e+00 : f32
    %1575 = vector.broadcast %cst_368 : f32 to vector<16x16xf32>
    %1576 = arith.subf %1575, %1569 : vector<16x16xf32>
    %1577 = arith.mulf %1576, %1574 : vector<16x16xf32>
    %1578 = arith.mulf %1569, %1513 : vector<16x16xf32>
    %1579 = arith.addf %1577, %1578 : vector<16x16xf32>
    %1580 = arith.index_cast %1519 : i32 to index
    %c0_369 = arith.constant 0 : index
    %1581 = vector.load %arg21[%1580, %c0_369] : memref<128x16xf32, #tpu.memory_space<vmem>>, vector<16x16xf32>
    tpu.vector_store %arg21[%1580, %c0_369], %1553 {strides = array<i32>} : memref<128x16xf32, #tpu.memory_space<vmem>>, vector<16x16xf32>,
    %1582 = arith.index_cast %1519 : i32 to index
    %c0_370 = arith.constant 0 : index
    %1583 = vector.load %arg22[%1582, %c0_370] : memref<128x16xf32, #tpu.memory_space<vmem>>, vector<16x16xf32>
    tpu.vector_store %arg22[%1582, %c0_370], %1579 {strides = array<i32>} : memref<128x16xf32, #tpu.memory_space<vmem>>, vector<16x16xf32>,
    %c7_i32_371 = arith.constant 7 : i32
    %c16_i32_372 = arith.constant 16 : i32
    %1584 = arith.muli %c7_i32_371, %c16_i32_372 : i32
    %1585 = tpu.assume_multiple %1584, 16 : i32
    %1586 = arith.index_cast %1585 : i32 to index
    %c0_373 = arith.constant 0 : index
    %1587 = vector.load %arg19[%1586, %c0_373] : memref<128x48xf32, #tpu.memory_space<vmem>>, vector<16x48xf32>
    %1588 = arith.index_cast %1585 : i32 to index
    %c0_374 = arith.constant 0 : index
    %1589 = vector.load %arg20[%1588, %c0_374] : memref<128x48xf32, #tpu.memory_space<vmem>>, vector<16x48xf32>
    %cst_375 = arith.constant dense<0.000000e+00> : vector<16x48xf32>
    %1590 = tpu.matmul %1553, %1110, %cst_375 {dimension_numbers = #tpu.dot_dimension_numbers<[1], [0], [0], [1], [0, 0, 1, 1], [], []>} : vector<16x16xf32>, vector<16x48xf32>, vector<16x48xf32> -> vector<16x48xf32>
    %1591 = arith.addf %1590, %1116 : vector<16x48xf32>
    %cst_376 = arith.constant dense<0.000000e+00> : vector<16x48xf32>
    %1592 = tpu.matmul %1579, %1112, %cst_376 {dimension_numbers = #tpu.dot_dimension_numbers<[1], [0], [0], [1], [0, 0, 1, 1], [], []>} : vector<16x16xf32>, vector<16x48xf32>, vector<16x48xf32> -> vector<16x48xf32>
    %1593 = arith.addf %1592, %1120 : vector<16x48xf32>
    %1594 = vector.extract_strided_slice %1587 {offsets = [0, 0], sizes = [16, 16], strides = [1, 1]} : vector<16x48xf32> to vector<16x16xf32>
    %1595 = vector.extract_strided_slice %1591 {offsets = [0, 0], sizes = [16, 16], strides = [1, 1]} : vector<16x48xf32> to vector<16x16xf32>
    %1596 = arith.addf %1594, %1595 : vector<16x16xf32>
    %1597 = arith.negf %1596 : vector<16x16xf32>
    %1598 = math.exp %1597 : vector<16x16xf32>
    %cst_377 = arith.constant 1.000000e+00 : f32
    %1599 = vector.broadcast %cst_377 : f32 to vector<16x16xf32>
    %1600 = arith.addf %1599, %1598 : vector<16x16xf32>
    %1601 = arith.divf %1599, %1600 : vector<16x16xf32>
    %1602 = vector.extract_strided_slice %1587 {offsets = [0, 16], sizes = [16, 16], strides = [1, 1]} : vector<16x48xf32> to vector<16x16xf32>
    %1603 = vector.extract_strided_slice %1591 {offsets = [0, 16], sizes = [16, 16], strides = [1, 1]} : vector<16x48xf32> to vector<16x16xf32>
    %1604 = arith.addf %1602, %1603 : vector<16x16xf32>
    %1605 = arith.negf %1604 : vector<16x16xf32>
    %1606 = math.exp %1605 : vector<16x16xf32>
    %cst_378 = arith.constant 1.000000e+00 : f32
    %1607 = vector.broadcast %cst_378 : f32 to vector<16x16xf32>
    %1608 = arith.addf %1607, %1606 : vector<16x16xf32>
    %1609 = arith.divf %1607, %1608 : vector<16x16xf32>
    %1610 = vector.extract_strided_slice %1587 {offsets = [0, 32], sizes = [16, 16], strides = [1, 1]} : vector<16x48xf32> to vector<16x16xf32>
    %1611 = vector.extract_strided_slice %1591 {offsets = [0, 32], sizes = [16, 16], strides = [1, 1]} : vector<16x48xf32> to vector<16x16xf32>
    %1612 = arith.mulf %1601, %1611 : vector<16x16xf32>
    %1613 = arith.addf %1610, %1612 : vector<16x16xf32>
    %1614 = math.tanh %1613 : vector<16x16xf32>
    %cst_379 = arith.constant 1.000000e+00 : f32
    %1615 = vector.broadcast %cst_379 : f32 to vector<16x16xf32>
    %1616 = arith.subf %1615, %1609 : vector<16x16xf32>
    %1617 = arith.mulf %1616, %1614 : vector<16x16xf32>
    %1618 = arith.mulf %1609, %1553 : vector<16x16xf32>
    %1619 = arith.addf %1617, %1618 : vector<16x16xf32>
    %1620 = vector.extract_strided_slice %1589 {offsets = [0, 0], sizes = [16, 16], strides = [1, 1]} : vector<16x48xf32> to vector<16x16xf32>
    %1621 = vector.extract_strided_slice %1593 {offsets = [0, 0], sizes = [16, 16], strides = [1, 1]} : vector<16x48xf32> to vector<16x16xf32>
    %1622 = arith.addf %1620, %1621 : vector<16x16xf32>
    %1623 = arith.negf %1622 : vector<16x16xf32>
    %1624 = math.exp %1623 : vector<16x16xf32>
    %cst_380 = arith.constant 1.000000e+00 : f32
    %1625 = vector.broadcast %cst_380 : f32 to vector<16x16xf32>
    %1626 = arith.addf %1625, %1624 : vector<16x16xf32>
    %1627 = arith.divf %1625, %1626 : vector<16x16xf32>
    %1628 = vector.extract_strided_slice %1589 {offsets = [0, 16], sizes = [16, 16], strides = [1, 1]} : vector<16x48xf32> to vector<16x16xf32>
    %1629 = vector.extract_strided_slice %1593 {offsets = [0, 16], sizes = [16, 16], strides = [1, 1]} : vector<16x48xf32> to vector<16x16xf32>
    %1630 = arith.addf %1628, %1629 : vector<16x16xf32>
    %1631 = arith.negf %1630 : vector<16x16xf32>
    %1632 = math.exp %1631 : vector<16x16xf32>
    %cst_381 = arith.constant 1.000000e+00 : f32
    %1633 = vector.broadcast %cst_381 : f32 to vector<16x16xf32>
    %1634 = arith.addf %1633, %1632 : vector<16x16xf32>
    %1635 = arith.divf %1633, %1634 : vector<16x16xf32>
    %1636 = vector.extract_strided_slice %1589 {offsets = [0, 32], sizes = [16, 16], strides = [1, 1]} : vector<16x48xf32> to vector<16x16xf32>
    %1637 = vector.extract_strided_slice %1593 {offsets = [0, 32], sizes = [16, 16], strides = [1, 1]} : vector<16x48xf32> to vector<16x16xf32>
    %1638 = arith.mulf %1627, %1637 : vector<16x16xf32>
    %1639 = arith.addf %1636, %1638 : vector<16x16xf32>
    %1640 = math.tanh %1639 : vector<16x16xf32>
    %cst_382 = arith.constant 1.000000e+00 : f32
    %1641 = vector.broadcast %cst_382 : f32 to vector<16x16xf32>
    %1642 = arith.subf %1641, %1635 : vector<16x16xf32>
    %1643 = arith.mulf %1642, %1640 : vector<16x16xf32>
    %1644 = arith.mulf %1635, %1579 : vector<16x16xf32>
    %1645 = arith.addf %1643, %1644 : vector<16x16xf32>
    %1646 = arith.index_cast %1585 : i32 to index
    %c0_383 = arith.constant 0 : index
    %1647 = vector.load %arg21[%1646, %c0_383] : memref<128x16xf32, #tpu.memory_space<vmem>>, vector<16x16xf32>
    tpu.vector_store %arg21[%1646, %c0_383], %1619 {strides = array<i32>} : memref<128x16xf32, #tpu.memory_space<vmem>>, vector<16x16xf32>,
    %1648 = arith.index_cast %1585 : i32 to index
    %c0_384 = arith.constant 0 : index
    %1649 = vector.load %arg22[%1648, %c0_384] : memref<128x16xf32, #tpu.memory_space<vmem>>, vector<16x16xf32>
    tpu.vector_store %arg22[%1648, %c0_384], %1645 {strides = array<i32>} : memref<128x16xf32, #tpu.memory_space<vmem>>, vector<16x16xf32>,
    %c8_i32_385 = arith.constant 8 : i32
    %c0_386 = arith.constant 0 : index
    %c0_387 = arith.constant 0 : index
    %1650 = vector.load %arg21[%c0_386, %c0_387] : memref<128x16xf32, #tpu.memory_space<vmem>>, vector<128x16xf32>
    %c0_388 = arith.constant 0 : index
    %c0_389 = arith.constant 0 : index
    %1651 = vector.load %arg22[%c0_388, %c0_389] : memref<128x16xf32, #tpu.memory_space<vmem>>, vector<128x16xf32>
    %c0_390 = arith.constant 0 : index
    %c0_391 = arith.constant 0 : index
    %c0_392 = arith.constant 0 : index
    %1652 = vector.load %arg10[%c0_390, %c0_391, %c0_392] : memref<2x16x48xf32, #tpu.memory_space<vmem>>, vector<1x16x48xf32>
    %1653 = vector.shape_cast %1652 : vector<1x16x48xf32> to vector<16x48xf32>
    %c0_393 = arith.constant 0 : index
    %c0_394 = arith.constant 0 : index
    %c0_395 = arith.constant 0 : index
    %1654 = vector.load %arg12[%c0_393, %c0_394, %c0_395] : memref<2x1x48xf32, #tpu.memory_space<vmem>>, vector<1x1x48xf32>
    %1655 = vector.shape_cast %1654 : vector<1x1x48xf32> to vector<1x48xf32>
    %cst_396 = arith.constant dense<0.000000e+00> : vector<128x48xf32>
    %1656 = tpu.matmul %1650, %1653, %cst_396 {dimension_numbers = #tpu.dot_dimension_numbers<[1], [0], [0], [1], [0, 0, 1, 1], [], []>} : vector<128x16xf32>, vector<16x48xf32>, vector<128x48xf32> -> vector<128x48xf32>
    %1657 = vector.broadcast %1655 : vector<1x48xf32> to vector<128x48xf32>
    %1658 = arith.addf %1656, %1657 : vector<128x48xf32>
    %c0_397 = arith.constant 0 : index
    %c0_398 = arith.constant 0 : index
    %1659 = vector.load %arg23[%c0_397, %c0_398] : memref<128x48xf32, #tpu.memory_space<vmem>>, vector<128x48xf32>
    tpu.vector_store %arg23[%c0_397, %c0_398], %1658 {strides = array<i32>} : memref<128x48xf32, #tpu.memory_space<vmem>>, vector<128x48xf32>,
    %c1_399 = arith.constant 1 : index
    %c0_400 = arith.constant 0 : index
    %c0_401 = arith.constant 0 : index
    %1660 = vector.load %arg10[%c1_399, %c0_400, %c0_401] : memref<2x16x48xf32, #tpu.memory_space<vmem>>, vector<1x16x48xf32>
    %1661 = vector.shape_cast %1660 : vector<1x16x48xf32> to vector<16x48xf32>
    %c1_402 = arith.constant 1 : index
    %c0_403 = arith.constant 0 : index
    %c0_404 = arith.constant 0 : index
    %1662 = vector.load %arg12[%c1_402, %c0_403, %c0_404] : memref<2x1x48xf32, #tpu.memory_space<vmem>>, vector<1x1x48xf32>
    %1663 = vector.shape_cast %1662 : vector<1x1x48xf32> to vector<1x48xf32>
    %cst_405 = arith.constant dense<0.000000e+00> : vector<128x48xf32>
    %1664 = tpu.matmul %1651, %1661, %cst_405 {dimension_numbers = #tpu.dot_dimension_numbers<[1], [0], [0], [1], [0, 0, 1, 1], [], []>} : vector<128x16xf32>, vector<16x48xf32>, vector<128x48xf32> -> vector<128x48xf32>
    %1665 = vector.broadcast %1663 : vector<1x48xf32> to vector<128x48xf32>
    %1666 = arith.addf %1664, %1665 : vector<128x48xf32>
    %c0_406 = arith.constant 0 : index
    %c0_407 = arith.constant 0 : index
    %1667 = vector.load %arg24[%c0_406, %c0_407] : memref<128x48xf32, #tpu.memory_space<vmem>>, vector<128x48xf32>
    tpu.vector_store %arg24[%c0_406, %c0_407], %1666 {strides = array<i32>} : memref<128x48xf32, #tpu.memory_space<vmem>>, vector<128x48xf32>,
    %c0_408 = arith.constant 0 : index
    %c0_409 = arith.constant 0 : index
    %c0_410 = arith.constant 0 : index
    %1668 = vector.load %arg11[%c0_408, %c0_409, %c0_410] : memref<2x16x48xf32, #tpu.memory_space<vmem>>, vector<1x16x48xf32>
    %1669 = vector.shape_cast %1668 : vector<1x16x48xf32> to vector<16x48xf32>
    %c1_411 = arith.constant 1 : index
    %c0_412 = arith.constant 0 : index
    %c0_413 = arith.constant 0 : index
    %1670 = vector.load %arg11[%c1_411, %c0_412, %c0_413] : memref<2x16x48xf32, #tpu.memory_space<vmem>>, vector<1x16x48xf32>
    %1671 = vector.shape_cast %1670 : vector<1x16x48xf32> to vector<16x48xf32>
    %c0_414 = arith.constant 0 : index
    %c0_415 = arith.constant 0 : index
    %c0_416 = arith.constant 0 : index
    %1672 = vector.load %arg13[%c0_414, %c0_415, %c0_416] : memref<2x1x48xf32, #tpu.memory_space<vmem>>, vector<1x1x48xf32>
    %1673 = vector.shape_cast %1672 : vector<1x1x48xf32> to vector<1x48xf32>
    %1674 = vector.shape_cast %1673 : vector<1x48xf32> to vector<1x48xf32>
    %1675 = vector.broadcast %1674 : vector<1x48xf32> to vector<32x48xf32>
    %c1_417 = arith.constant 1 : index
    %c0_418 = arith.constant 0 : index
    %c0_419 = arith.constant 0 : index
    %1676 = vector.load %arg13[%c1_417, %c0_418, %c0_419] : memref<2x1x48xf32, #tpu.memory_space<vmem>>, vector<1x1x48xf32>
    %1677 = vector.shape_cast %1676 : vector<1x1x48xf32> to vector<1x48xf32>
    %1678 = vector.shape_cast %1677 : vector<1x48xf32> to vector<1x48xf32>
    %1679 = vector.broadcast %1678 : vector<1x48xf32> to vector<32x48xf32>
    %cst_420 = arith.constant 0.000000e+00 : f32
    %1680 = vector.broadcast %cst_420 : f32 to vector<32x16xf32>
    %c0_i32_421 = arith.constant 0 : i32
    %c32_i32 = arith.constant 32 : i32
    %1681 = arith.muli %c0_i32_421, %c32_i32 : i32
    %1682 = tpu.assume_multiple %1681, 32 : i32
    %1683 = arith.index_cast %1682 : i32 to index
    %c0_422 = arith.constant 0 : index
    %1684 = vector.load %arg23[%1683, %c0_422] : memref<128x48xf32, #tpu.memory_space<vmem>>, vector<32x48xf32>
    %1685 = arith.index_cast %1682 : i32 to index
    %c0_423 = arith.constant 0 : index
    %1686 = vector.load %arg24[%1685, %c0_423] : memref<128x48xf32, #tpu.memory_space<vmem>>, vector<32x48xf32>
    %cst_424 = arith.constant dense<0.000000e+00> : vector<32x48xf32>
    %1687 = tpu.matmul %1680, %1669, %cst_424 {dimension_numbers = #tpu.dot_dimension_numbers<[1], [0], [0], [1], [0, 0, 1, 1], [], []>} : vector<32x16xf32>, vector<16x48xf32>, vector<32x48xf32> -> vector<32x48xf32>
    %1688 = arith.addf %1687, %1675 : vector<32x48xf32>
    %cst_425 = arith.constant dense<0.000000e+00> : vector<32x48xf32>
    %1689 = tpu.matmul %1680, %1671, %cst_425 {dimension_numbers = #tpu.dot_dimension_numbers<[1], [0], [0], [1], [0, 0, 1, 1], [], []>} : vector<32x16xf32>, vector<16x48xf32>, vector<32x48xf32> -> vector<32x48xf32>
    %1690 = arith.addf %1689, %1679 : vector<32x48xf32>
    %1691 = vector.extract_strided_slice %1684 {offsets = [0, 0], sizes = [32, 16], strides = [1, 1]} : vector<32x48xf32> to vector<32x16xf32>
    %1692 = vector.extract_strided_slice %1688 {offsets = [0, 0], sizes = [32, 16], strides = [1, 1]} : vector<32x48xf32> to vector<32x16xf32>
    %1693 = arith.addf %1691, %1692 : vector<32x16xf32>
    %1694 = arith.negf %1693 : vector<32x16xf32>
    %1695 = math.exp %1694 : vector<32x16xf32>
    %cst_426 = arith.constant 1.000000e+00 : f32
    %1696 = vector.broadcast %cst_426 : f32 to vector<32x16xf32>
    %1697 = arith.addf %1696, %1695 : vector<32x16xf32>
    %1698 = arith.divf %1696, %1697 : vector<32x16xf32>
    %1699 = vector.extract_strided_slice %1684 {offsets = [0, 16], sizes = [32, 16], strides = [1, 1]} : vector<32x48xf32> to vector<32x16xf32>
    %1700 = vector.extract_strided_slice %1688 {offsets = [0, 16], sizes = [32, 16], strides = [1, 1]} : vector<32x48xf32> to vector<32x16xf32>
    %1701 = arith.addf %1699, %1700 : vector<32x16xf32>
    %1702 = arith.negf %1701 : vector<32x16xf32>
    %1703 = math.exp %1702 : vector<32x16xf32>
    %cst_427 = arith.constant 1.000000e+00 : f32
    %1704 = vector.broadcast %cst_427 : f32 to vector<32x16xf32>
    %1705 = arith.addf %1704, %1703 : vector<32x16xf32>
    %1706 = arith.divf %1704, %1705 : vector<32x16xf32>
    %1707 = vector.extract_strided_slice %1684 {offsets = [0, 32], sizes = [32, 16], strides = [1, 1]} : vector<32x48xf32> to vector<32x16xf32>
    %1708 = vector.extract_strided_slice %1688 {offsets = [0, 32], sizes = [32, 16], strides = [1, 1]} : vector<32x48xf32> to vector<32x16xf32>
    %1709 = arith.mulf %1698, %1708 : vector<32x16xf32>
    %1710 = arith.addf %1707, %1709 : vector<32x16xf32>
    %1711 = math.tanh %1710 : vector<32x16xf32>
    %cst_428 = arith.constant 1.000000e+00 : f32
    %1712 = vector.broadcast %cst_428 : f32 to vector<32x16xf32>
    %1713 = arith.subf %1712, %1706 : vector<32x16xf32>
    %1714 = arith.mulf %1713, %1711 : vector<32x16xf32>
    %1715 = arith.mulf %1706, %1680 : vector<32x16xf32>
    %1716 = arith.addf %1714, %1715 : vector<32x16xf32>
    %1717 = vector.extract_strided_slice %1686 {offsets = [0, 0], sizes = [32, 16], strides = [1, 1]} : vector<32x48xf32> to vector<32x16xf32>
    %1718 = vector.extract_strided_slice %1690 {offsets = [0, 0], sizes = [32, 16], strides = [1, 1]} : vector<32x48xf32> to vector<32x16xf32>
    %1719 = arith.addf %1717, %1718 : vector<32x16xf32>
    %1720 = arith.negf %1719 : vector<32x16xf32>
    %1721 = math.exp %1720 : vector<32x16xf32>
    %cst_429 = arith.constant 1.000000e+00 : f32
    %1722 = vector.broadcast %cst_429 : f32 to vector<32x16xf32>
    %1723 = arith.addf %1722, %1721 : vector<32x16xf32>
    %1724 = arith.divf %1722, %1723 : vector<32x16xf32>
    %1725 = vector.extract_strided_slice %1686 {offsets = [0, 16], sizes = [32, 16], strides = [1, 1]} : vector<32x48xf32> to vector<32x16xf32>
    %1726 = vector.extract_strided_slice %1690 {offsets = [0, 16], sizes = [32, 16], strides = [1, 1]} : vector<32x48xf32> to vector<32x16xf32>
    %1727 = arith.addf %1725, %1726 : vector<32x16xf32>
    %1728 = arith.negf %1727 : vector<32x16xf32>
    %1729 = math.exp %1728 : vector<32x16xf32>
    %cst_430 = arith.constant 1.000000e+00 : f32
    %1730 = vector.broadcast %cst_430 : f32 to vector<32x16xf32>
    %1731 = arith.addf %1730, %1729 : vector<32x16xf32>
    %1732 = arith.divf %1730, %1731 : vector<32x16xf32>
    %1733 = vector.extract_strided_slice %1686 {offsets = [0, 32], sizes = [32, 16], strides = [1, 1]} : vector<32x48xf32> to vector<32x16xf32>
    %1734 = vector.extract_strided_slice %1690 {offsets = [0, 32], sizes = [32, 16], strides = [1, 1]} : vector<32x48xf32> to vector<32x16xf32>
    %1735 = arith.mulf %1724, %1734 : vector<32x16xf32>
    %1736 = arith.addf %1733, %1735 : vector<32x16xf32>
    %1737 = math.tanh %1736 : vector<32x16xf32>
    %cst_431 = arith.constant 1.000000e+00 : f32
    %1738 = vector.broadcast %cst_431 : f32 to vector<32x16xf32>
    %1739 = arith.subf %1738, %1732 : vector<32x16xf32>
    %1740 = arith.mulf %1739, %1737 : vector<32x16xf32>
    %1741 = arith.mulf %1732, %1680 : vector<32x16xf32>
    %1742 = arith.addf %1740, %1741 : vector<32x16xf32>
    %1743 = arith.index_cast %1682 : i32 to index
    %c0_432 = arith.constant 0 : index
    %1744 = vector.load %arg25[%1743, %c0_432] : memref<128x16xf32, #tpu.memory_space<vmem>>, vector<32x16xf32>
    tpu.vector_store %arg25[%1743, %c0_432], %1716 {strides = array<i32>} : memref<128x16xf32, #tpu.memory_space<vmem>>, vector<32x16xf32>,
    %1745 = arith.index_cast %1682 : i32 to index
    %c0_433 = arith.constant 0 : index
    %1746 = vector.load %arg26[%1745, %c0_433] : memref<128x16xf32, #tpu.memory_space<vmem>>, vector<32x16xf32>
    tpu.vector_store %arg26[%1745, %c0_433], %1742 {strides = array<i32>} : memref<128x16xf32, #tpu.memory_space<vmem>>, vector<32x16xf32>,
    %c1_i32_434 = arith.constant 1 : i32
    %c32_i32_435 = arith.constant 32 : i32
    %1747 = arith.muli %c1_i32_434, %c32_i32_435 : i32
    %1748 = tpu.assume_multiple %1747, 32 : i32
    %1749 = arith.index_cast %1748 : i32 to index
    %c0_436 = arith.constant 0 : index
    %1750 = vector.load %arg23[%1749, %c0_436] : memref<128x48xf32, #tpu.memory_space<vmem>>, vector<32x48xf32>
    %1751 = arith.index_cast %1748 : i32 to index
    %c0_437 = arith.constant 0 : index
    %1752 = vector.load %arg24[%1751, %c0_437] : memref<128x48xf32, #tpu.memory_space<vmem>>, vector<32x48xf32>
    %cst_438 = arith.constant dense<0.000000e+00> : vector<32x48xf32>
    %1753 = tpu.matmul %1716, %1669, %cst_438 {dimension_numbers = #tpu.dot_dimension_numbers<[1], [0], [0], [1], [0, 0, 1, 1], [], []>} : vector<32x16xf32>, vector<16x48xf32>, vector<32x48xf32> -> vector<32x48xf32>
    %1754 = arith.addf %1753, %1675 : vector<32x48xf32>
    %cst_439 = arith.constant dense<0.000000e+00> : vector<32x48xf32>
    %1755 = tpu.matmul %1742, %1671, %cst_439 {dimension_numbers = #tpu.dot_dimension_numbers<[1], [0], [0], [1], [0, 0, 1, 1], [], []>} : vector<32x16xf32>, vector<16x48xf32>, vector<32x48xf32> -> vector<32x48xf32>
    %1756 = arith.addf %1755, %1679 : vector<32x48xf32>
    %1757 = vector.extract_strided_slice %1750 {offsets = [0, 0], sizes = [32, 16], strides = [1, 1]} : vector<32x48xf32> to vector<32x16xf32>
    %1758 = vector.extract_strided_slice %1754 {offsets = [0, 0], sizes = [32, 16], strides = [1, 1]} : vector<32x48xf32> to vector<32x16xf32>
    %1759 = arith.addf %1757, %1758 : vector<32x16xf32>
    %1760 = arith.negf %1759 : vector<32x16xf32>
    %1761 = math.exp %1760 : vector<32x16xf32>
    %cst_440 = arith.constant 1.000000e+00 : f32
    %1762 = vector.broadcast %cst_440 : f32 to vector<32x16xf32>
    %1763 = arith.addf %1762, %1761 : vector<32x16xf32>
    %1764 = arith.divf %1762, %1763 : vector<32x16xf32>
    %1765 = vector.extract_strided_slice %1750 {offsets = [0, 16], sizes = [32, 16], strides = [1, 1]} : vector<32x48xf32> to vector<32x16xf32>
    %1766 = vector.extract_strided_slice %1754 {offsets = [0, 16], sizes = [32, 16], strides = [1, 1]} : vector<32x48xf32> to vector<32x16xf32>
    %1767 = arith.addf %1765, %1766 : vector<32x16xf32>
    %1768 = arith.negf %1767 : vector<32x16xf32>
    %1769 = math.exp %1768 : vector<32x16xf32>
    %cst_441 = arith.constant 1.000000e+00 : f32
    %1770 = vector.broadcast %cst_441 : f32 to vector<32x16xf32>
    %1771 = arith.addf %1770, %1769 : vector<32x16xf32>
    %1772 = arith.divf %1770, %1771 : vector<32x16xf32>
    %1773 = vector.extract_strided_slice %1750 {offsets = [0, 32], sizes = [32, 16], strides = [1, 1]} : vector<32x48xf32> to vector<32x16xf32>
    %1774 = vector.extract_strided_slice %1754 {offsets = [0, 32], sizes = [32, 16], strides = [1, 1]} : vector<32x48xf32> to vector<32x16xf32>
    %1775 = arith.mulf %1764, %1774 : vector<32x16xf32>
    %1776 = arith.addf %1773, %1775 : vector<32x16xf32>
    %1777 = math.tanh %1776 : vector<32x16xf32>
    %cst_442 = arith.constant 1.000000e+00 : f32
    %1778 = vector.broadcast %cst_442 : f32 to vector<32x16xf32>
    %1779 = arith.subf %1778, %1772 : vector<32x16xf32>
    %1780 = arith.mulf %1779, %1777 : vector<32x16xf32>
    %1781 = arith.mulf %1772, %1716 : vector<32x16xf32>
    %1782 = arith.addf %1780, %1781 : vector<32x16xf32>
    %1783 = vector.extract_strided_slice %1752 {offsets = [0, 0], sizes = [32, 16], strides = [1, 1]} : vector<32x48xf32> to vector<32x16xf32>
    %1784 = vector.extract_strided_slice %1756 {offsets = [0, 0], sizes = [32, 16], strides = [1, 1]} : vector<32x48xf32> to vector<32x16xf32>
    %1785 = arith.addf %1783, %1784 : vector<32x16xf32>
    %1786 = arith.negf %1785 : vector<32x16xf32>
    %1787 = math.exp %1786 : vector<32x16xf32>
    %cst_443 = arith.constant 1.000000e+00 : f32
    %1788 = vector.broadcast %cst_443 : f32 to vector<32x16xf32>
    %1789 = arith.addf %1788, %1787 : vector<32x16xf32>
    %1790 = arith.divf %1788, %1789 : vector<32x16xf32>
    %1791 = vector.extract_strided_slice %1752 {offsets = [0, 16], sizes = [32, 16], strides = [1, 1]} : vector<32x48xf32> to vector<32x16xf32>
    %1792 = vector.extract_strided_slice %1756 {offsets = [0, 16], sizes = [32, 16], strides = [1, 1]} : vector<32x48xf32> to vector<32x16xf32>
    %1793 = arith.addf %1791, %1792 : vector<32x16xf32>
    %1794 = arith.negf %1793 : vector<32x16xf32>
    %1795 = math.exp %1794 : vector<32x16xf32>
    %cst_444 = arith.constant 1.000000e+00 : f32
    %1796 = vector.broadcast %cst_444 : f32 to vector<32x16xf32>
    %1797 = arith.addf %1796, %1795 : vector<32x16xf32>
    %1798 = arith.divf %1796, %1797 : vector<32x16xf32>
    %1799 = vector.extract_strided_slice %1752 {offsets = [0, 32], sizes = [32, 16], strides = [1, 1]} : vector<32x48xf32> to vector<32x16xf32>
    %1800 = vector.extract_strided_slice %1756 {offsets = [0, 32], sizes = [32, 16], strides = [1, 1]} : vector<32x48xf32> to vector<32x16xf32>
    %1801 = arith.mulf %1790, %1800 : vector<32x16xf32>
    %1802 = arith.addf %1799, %1801 : vector<32x16xf32>
    %1803 = math.tanh %1802 : vector<32x16xf32>
    %cst_445 = arith.constant 1.000000e+00 : f32
    %1804 = vector.broadcast %cst_445 : f32 to vector<32x16xf32>
    %1805 = arith.subf %1804, %1798 : vector<32x16xf32>
    %1806 = arith.mulf %1805, %1803 : vector<32x16xf32>
    %1807 = arith.mulf %1798, %1742 : vector<32x16xf32>
    %1808 = arith.addf %1806, %1807 : vector<32x16xf32>
    %1809 = arith.index_cast %1748 : i32 to index
    %c0_446 = arith.constant 0 : index
    %1810 = vector.load %arg25[%1809, %c0_446] : memref<128x16xf32, #tpu.memory_space<vmem>>, vector<32x16xf32>
    tpu.vector_store %arg25[%1809, %c0_446], %1782 {strides = array<i32>} : memref<128x16xf32, #tpu.memory_space<vmem>>, vector<32x16xf32>,
    %1811 = arith.index_cast %1748 : i32 to index
    %c0_447 = arith.constant 0 : index
    %1812 = vector.load %arg26[%1811, %c0_447] : memref<128x16xf32, #tpu.memory_space<vmem>>, vector<32x16xf32>
    tpu.vector_store %arg26[%1811, %c0_447], %1808 {strides = array<i32>} : memref<128x16xf32, #tpu.memory_space<vmem>>, vector<32x16xf32>,
    %c2_i32_448 = arith.constant 2 : i32
    %c32_i32_449 = arith.constant 32 : i32
    %1813 = arith.muli %c2_i32_448, %c32_i32_449 : i32
    %1814 = tpu.assume_multiple %1813, 32 : i32
    %1815 = arith.index_cast %1814 : i32 to index
    %c0_450 = arith.constant 0 : index
    %1816 = vector.load %arg23[%1815, %c0_450] : memref<128x48xf32, #tpu.memory_space<vmem>>, vector<32x48xf32>
    %1817 = arith.index_cast %1814 : i32 to index
    %c0_451 = arith.constant 0 : index
    %1818 = vector.load %arg24[%1817, %c0_451] : memref<128x48xf32, #tpu.memory_space<vmem>>, vector<32x48xf32>
    %cst_452 = arith.constant dense<0.000000e+00> : vector<32x48xf32>
    %1819 = tpu.matmul %1782, %1669, %cst_452 {dimension_numbers = #tpu.dot_dimension_numbers<[1], [0], [0], [1], [0, 0, 1, 1], [], []>} : vector<32x16xf32>, vector<16x48xf32>, vector<32x48xf32> -> vector<32x48xf32>
    %1820 = arith.addf %1819, %1675 : vector<32x48xf32>
    %cst_453 = arith.constant dense<0.000000e+00> : vector<32x48xf32>
    %1821 = tpu.matmul %1808, %1671, %cst_453 {dimension_numbers = #tpu.dot_dimension_numbers<[1], [0], [0], [1], [0, 0, 1, 1], [], []>} : vector<32x16xf32>, vector<16x48xf32>, vector<32x48xf32> -> vector<32x48xf32>
    %1822 = arith.addf %1821, %1679 : vector<32x48xf32>
    %1823 = vector.extract_strided_slice %1816 {offsets = [0, 0], sizes = [32, 16], strides = [1, 1]} : vector<32x48xf32> to vector<32x16xf32>
    %1824 = vector.extract_strided_slice %1820 {offsets = [0, 0], sizes = [32, 16], strides = [1, 1]} : vector<32x48xf32> to vector<32x16xf32>
    %1825 = arith.addf %1823, %1824 : vector<32x16xf32>
    %1826 = arith.negf %1825 : vector<32x16xf32>
    %1827 = math.exp %1826 : vector<32x16xf32>
    %cst_454 = arith.constant 1.000000e+00 : f32
    %1828 = vector.broadcast %cst_454 : f32 to vector<32x16xf32>
    %1829 = arith.addf %1828, %1827 : vector<32x16xf32>
    %1830 = arith.divf %1828, %1829 : vector<32x16xf32>
    %1831 = vector.extract_strided_slice %1816 {offsets = [0, 16], sizes = [32, 16], strides = [1, 1]} : vector<32x48xf32> to vector<32x16xf32>
    %1832 = vector.extract_strided_slice %1820 {offsets = [0, 16], sizes = [32, 16], strides = [1, 1]} : vector<32x48xf32> to vector<32x16xf32>
    %1833 = arith.addf %1831, %1832 : vector<32x16xf32>
    %1834 = arith.negf %1833 : vector<32x16xf32>
    %1835 = math.exp %1834 : vector<32x16xf32>
    %cst_455 = arith.constant 1.000000e+00 : f32
    %1836 = vector.broadcast %cst_455 : f32 to vector<32x16xf32>
    %1837 = arith.addf %1836, %1835 : vector<32x16xf32>
    %1838 = arith.divf %1836, %1837 : vector<32x16xf32>
    %1839 = vector.extract_strided_slice %1816 {offsets = [0, 32], sizes = [32, 16], strides = [1, 1]} : vector<32x48xf32> to vector<32x16xf32>
    %1840 = vector.extract_strided_slice %1820 {offsets = [0, 32], sizes = [32, 16], strides = [1, 1]} : vector<32x48xf32> to vector<32x16xf32>
    %1841 = arith.mulf %1830, %1840 : vector<32x16xf32>
    %1842 = arith.addf %1839, %1841 : vector<32x16xf32>
    %1843 = math.tanh %1842 : vector<32x16xf32>
    %cst_456 = arith.constant 1.000000e+00 : f32
    %1844 = vector.broadcast %cst_456 : f32 to vector<32x16xf32>
    %1845 = arith.subf %1844, %1838 : vector<32x16xf32>
    %1846 = arith.mulf %1845, %1843 : vector<32x16xf32>
    %1847 = arith.mulf %1838, %1782 : vector<32x16xf32>
    %1848 = arith.addf %1846, %1847 : vector<32x16xf32>
    %1849 = vector.extract_strided_slice %1818 {offsets = [0, 0], sizes = [32, 16], strides = [1, 1]} : vector<32x48xf32> to vector<32x16xf32>
    %1850 = vector.extract_strided_slice %1822 {offsets = [0, 0], sizes = [32, 16], strides = [1, 1]} : vector<32x48xf32> to vector<32x16xf32>
    %1851 = arith.addf %1849, %1850 : vector<32x16xf32>
    %1852 = arith.negf %1851 : vector<32x16xf32>
    %1853 = math.exp %1852 : vector<32x16xf32>
    %cst_457 = arith.constant 1.000000e+00 : f32
    %1854 = vector.broadcast %cst_457 : f32 to vector<32x16xf32>
    %1855 = arith.addf %1854, %1853 : vector<32x16xf32>
    %1856 = arith.divf %1854, %1855 : vector<32x16xf32>
    %1857 = vector.extract_strided_slice %1818 {offsets = [0, 16], sizes = [32, 16], strides = [1, 1]} : vector<32x48xf32> to vector<32x16xf32>
    %1858 = vector.extract_strided_slice %1822 {offsets = [0, 16], sizes = [32, 16], strides = [1, 1]} : vector<32x48xf32> to vector<32x16xf32>
    %1859 = arith.addf %1857, %1858 : vector<32x16xf32>
    %1860 = arith.negf %1859 : vector<32x16xf32>
    %1861 = math.exp %1860 : vector<32x16xf32>
    %cst_458 = arith.constant 1.000000e+00 : f32
    %1862 = vector.broadcast %cst_458 : f32 to vector<32x16xf32>
    %1863 = arith.addf %1862, %1861 : vector<32x16xf32>
    %1864 = arith.divf %1862, %1863 : vector<32x16xf32>
    %1865 = vector.extract_strided_slice %1818 {offsets = [0, 32], sizes = [32, 16], strides = [1, 1]} : vector<32x48xf32> to vector<32x16xf32>
    %1866 = vector.extract_strided_slice %1822 {offsets = [0, 32], sizes = [32, 16], strides = [1, 1]} : vector<32x48xf32> to vector<32x16xf32>
    %1867 = arith.mulf %1856, %1866 : vector<32x16xf32>
    %1868 = arith.addf %1865, %1867 : vector<32x16xf32>
    %1869 = math.tanh %1868 : vector<32x16xf32>
    %cst_459 = arith.constant 1.000000e+00 : f32
    %1870 = vector.broadcast %cst_459 : f32 to vector<32x16xf32>
    %1871 = arith.subf %1870, %1864 : vector<32x16xf32>
    %1872 = arith.mulf %1871, %1869 : vector<32x16xf32>
    %1873 = arith.mulf %1864, %1808 : vector<32x16xf32>
    %1874 = arith.addf %1872, %1873 : vector<32x16xf32>
    %1875 = arith.index_cast %1814 : i32 to index
    %c0_460 = arith.constant 0 : index
    %1876 = vector.load %arg25[%1875, %c0_460] : memref<128x16xf32, #tpu.memory_space<vmem>>, vector<32x16xf32>
    tpu.vector_store %arg25[%1875, %c0_460], %1848 {strides = array<i32>} : memref<128x16xf32, #tpu.memory_space<vmem>>, vector<32x16xf32>,
    %1877 = arith.index_cast %1814 : i32 to index
    %c0_461 = arith.constant 0 : index
    %1878 = vector.load %arg26[%1877, %c0_461] : memref<128x16xf32, #tpu.memory_space<vmem>>, vector<32x16xf32>
    tpu.vector_store %arg26[%1877, %c0_461], %1874 {strides = array<i32>} : memref<128x16xf32, #tpu.memory_space<vmem>>, vector<32x16xf32>,
    %c3_i32_462 = arith.constant 3 : i32
    %c32_i32_463 = arith.constant 32 : i32
    %1879 = arith.muli %c3_i32_462, %c32_i32_463 : i32
    %1880 = tpu.assume_multiple %1879, 32 : i32
    %1881 = arith.index_cast %1880 : i32 to index
    %c0_464 = arith.constant 0 : index
    %1882 = vector.load %arg23[%1881, %c0_464] : memref<128x48xf32, #tpu.memory_space<vmem>>, vector<32x48xf32>
    %1883 = arith.index_cast %1880 : i32 to index
    %c0_465 = arith.constant 0 : index
    %1884 = vector.load %arg24[%1883, %c0_465] : memref<128x48xf32, #tpu.memory_space<vmem>>, vector<32x48xf32>
    %cst_466 = arith.constant dense<0.000000e+00> : vector<32x48xf32>
    %1885 = tpu.matmul %1848, %1669, %cst_466 {dimension_numbers = #tpu.dot_dimension_numbers<[1], [0], [0], [1], [0, 0, 1, 1], [], []>} : vector<32x16xf32>, vector<16x48xf32>, vector<32x48xf32> -> vector<32x48xf32>
    %1886 = arith.addf %1885, %1675 : vector<32x48xf32>
    %cst_467 = arith.constant dense<0.000000e+00> : vector<32x48xf32>
    %1887 = tpu.matmul %1874, %1671, %cst_467 {dimension_numbers = #tpu.dot_dimension_numbers<[1], [0], [0], [1], [0, 0, 1, 1], [], []>} : vector<32x16xf32>, vector<16x48xf32>, vector<32x48xf32> -> vector<32x48xf32>
    %1888 = arith.addf %1887, %1679 : vector<32x48xf32>
    %1889 = vector.extract_strided_slice %1882 {offsets = [0, 0], sizes = [32, 16], strides = [1, 1]} : vector<32x48xf32> to vector<32x16xf32>
    %1890 = vector.extract_strided_slice %1886 {offsets = [0, 0], sizes = [32, 16], strides = [1, 1]} : vector<32x48xf32> to vector<32x16xf32>
    %1891 = arith.addf %1889, %1890 : vector<32x16xf32>
    %1892 = arith.negf %1891 : vector<32x16xf32>
    %1893 = math.exp %1892 : vector<32x16xf32>
    %cst_468 = arith.constant 1.000000e+00 : f32
    %1894 = vector.broadcast %cst_468 : f32 to vector<32x16xf32>
    %1895 = arith.addf %1894, %1893 : vector<32x16xf32>
    %1896 = arith.divf %1894, %1895 : vector<32x16xf32>
    %1897 = vector.extract_strided_slice %1882 {offsets = [0, 16], sizes = [32, 16], strides = [1, 1]} : vector<32x48xf32> to vector<32x16xf32>
    %1898 = vector.extract_strided_slice %1886 {offsets = [0, 16], sizes = [32, 16], strides = [1, 1]} : vector<32x48xf32> to vector<32x16xf32>
    %1899 = arith.addf %1897, %1898 : vector<32x16xf32>
    %1900 = arith.negf %1899 : vector<32x16xf32>
    %1901 = math.exp %1900 : vector<32x16xf32>
    %cst_469 = arith.constant 1.000000e+00 : f32
    %1902 = vector.broadcast %cst_469 : f32 to vector<32x16xf32>
    %1903 = arith.addf %1902, %1901 : vector<32x16xf32>
    %1904 = arith.divf %1902, %1903 : vector<32x16xf32>
    %1905 = vector.extract_strided_slice %1882 {offsets = [0, 32], sizes = [32, 16], strides = [1, 1]} : vector<32x48xf32> to vector<32x16xf32>
    %1906 = vector.extract_strided_slice %1886 {offsets = [0, 32], sizes = [32, 16], strides = [1, 1]} : vector<32x48xf32> to vector<32x16xf32>
    %1907 = arith.mulf %1896, %1906 : vector<32x16xf32>
    %1908 = arith.addf %1905, %1907 : vector<32x16xf32>
    %1909 = math.tanh %1908 : vector<32x16xf32>
    %cst_470 = arith.constant 1.000000e+00 : f32
    %1910 = vector.broadcast %cst_470 : f32 to vector<32x16xf32>
    %1911 = arith.subf %1910, %1904 : vector<32x16xf32>
    %1912 = arith.mulf %1911, %1909 : vector<32x16xf32>
    %1913 = arith.mulf %1904, %1848 : vector<32x16xf32>
    %1914 = arith.addf %1912, %1913 : vector<32x16xf32>
    %1915 = vector.extract_strided_slice %1884 {offsets = [0, 0], sizes = [32, 16], strides = [1, 1]} : vector<32x48xf32> to vector<32x16xf32>
    %1916 = vector.extract_strided_slice %1888 {offsets = [0, 0], sizes = [32, 16], strides = [1, 1]} : vector<32x48xf32> to vector<32x16xf32>
    %1917 = arith.addf %1915, %1916 : vector<32x16xf32>
    %1918 = arith.negf %1917 : vector<32x16xf32>
    %1919 = math.exp %1918 : vector<32x16xf32>
    %cst_471 = arith.constant 1.000000e+00 : f32
    %1920 = vector.broadcast %cst_471 : f32 to vector<32x16xf32>
    %1921 = arith.addf %1920, %1919 : vector<32x16xf32>
    %1922 = arith.divf %1920, %1921 : vector<32x16xf32>
    %1923 = vector.extract_strided_slice %1884 {offsets = [0, 16], sizes = [32, 16], strides = [1, 1]} : vector<32x48xf32> to vector<32x16xf32>
    %1924 = vector.extract_strided_slice %1888 {offsets = [0, 16], sizes = [32, 16], strides = [1, 1]} : vector<32x48xf32> to vector<32x16xf32>
    %1925 = arith.addf %1923, %1924 : vector<32x16xf32>
    %1926 = arith.negf %1925 : vector<32x16xf32>
    %1927 = math.exp %1926 : vector<32x16xf32>
    %cst_472 = arith.constant 1.000000e+00 : f32
    %1928 = vector.broadcast %cst_472 : f32 to vector<32x16xf32>
    %1929 = arith.addf %1928, %1927 : vector<32x16xf32>
    %1930 = arith.divf %1928, %1929 : vector<32x16xf32>
    %1931 = vector.extract_strided_slice %1884 {offsets = [0, 32], sizes = [32, 16], strides = [1, 1]} : vector<32x48xf32> to vector<32x16xf32>
    %1932 = vector.extract_strided_slice %1888 {offsets = [0, 32], sizes = [32, 16], strides = [1, 1]} : vector<32x48xf32> to vector<32x16xf32>
    %1933 = arith.mulf %1922, %1932 : vector<32x16xf32>
    %1934 = arith.addf %1931, %1933 : vector<32x16xf32>
    %1935 = math.tanh %1934 : vector<32x16xf32>
    %cst_473 = arith.constant 1.000000e+00 : f32
    %1936 = vector.broadcast %cst_473 : f32 to vector<32x16xf32>
    %1937 = arith.subf %1936, %1930 : vector<32x16xf32>
    %1938 = arith.mulf %1937, %1935 : vector<32x16xf32>
    %1939 = arith.mulf %1930, %1874 : vector<32x16xf32>
    %1940 = arith.addf %1938, %1939 : vector<32x16xf32>
    %1941 = arith.index_cast %1880 : i32 to index
    %c0_474 = arith.constant 0 : index
    %1942 = vector.load %arg25[%1941, %c0_474] : memref<128x16xf32, #tpu.memory_space<vmem>>, vector<32x16xf32>
    tpu.vector_store %arg25[%1941, %c0_474], %1914 {strides = array<i32>} : memref<128x16xf32, #tpu.memory_space<vmem>>, vector<32x16xf32>,
    %1943 = arith.index_cast %1880 : i32 to index
    %c0_475 = arith.constant 0 : index
    %1944 = vector.load %arg26[%1943, %c0_475] : memref<128x16xf32, #tpu.memory_space<vmem>>, vector<32x16xf32>
    tpu.vector_store %arg26[%1943, %c0_475], %1940 {strides = array<i32>} : memref<128x16xf32, #tpu.memory_space<vmem>>, vector<32x16xf32>,
    %c4_i32_476 = arith.constant 4 : i32
    %c120 = arith.constant 120 : index
    %c0_477 = arith.constant 0 : index
    %1945 = vector.load %arg17[%c120, %c0_477] : memref<128x32xf32, #tpu.memory_space<vmem>>, vector<8x32xf32>
    %c0_478 = arith.constant 0 : index
    %c0_479 = arith.constant 0 : index
    %1946 = vector.load %arg14[%c0_478, %c0_479] : memref<8x128xf32, #tpu.memory_space<vmem>>, vector<8x32xf32>
    tpu.vector_store %arg14[%c0_478, %c0_479], %1945 {strides = array<i32>} : memref<8x128xf32, #tpu.memory_space<vmem>>, vector<8x32xf32>,
    %c120_480 = arith.constant 120 : index
    %c0_481 = arith.constant 0 : index
    %1947 = vector.load %arg21[%c120_480, %c0_481] : memref<128x16xf32, #tpu.memory_space<vmem>>, vector<8x16xf32>
    %c0_482 = arith.constant 0 : index
    %c32 = arith.constant 32 : index
    %1948 = vector.load %arg14[%c0_482, %c32] : memref<8x128xf32, #tpu.memory_space<vmem>>, vector<8x16xf32>
    tpu.vector_store %arg14[%c0_482, %c32], %1947 {strides = array<i32>} : memref<8x128xf32, #tpu.memory_space<vmem>>, vector<8x16xf32>,
    %c120_483 = arith.constant 120 : index
    %c0_484 = arith.constant 0 : index
    %1949 = vector.load %arg25[%c120_483, %c0_484] : memref<128x16xf32, #tpu.memory_space<vmem>>, vector<8x16xf32>
    %c0_485 = arith.constant 0 : index
    %c48 = arith.constant 48 : index
    %1950 = vector.load %arg14[%c0_485, %c48] : memref<8x128xf32, #tpu.memory_space<vmem>>, vector<8x16xf32>
    tpu.vector_store %arg14[%c0_485, %c48], %1949 {strides = array<i32>} : memref<8x128xf32, #tpu.memory_space<vmem>>, vector<8x16xf32>,
    %c120_486 = arith.constant 120 : index
    %c0_487 = arith.constant 0 : index
    %1951 = vector.load %arg18[%c120_486, %c0_487] : memref<128x32xf32, #tpu.memory_space<vmem>>, vector<8x32xf32>
    %c0_488 = arith.constant 0 : index
    %c64 = arith.constant 64 : index
    %1952 = vector.load %arg14[%c0_488, %c64] : memref<8x128xf32, #tpu.memory_space<vmem>>, vector<8x32xf32>
    tpu.vector_store %arg14[%c0_488, %c64], %1951 {strides = array<i32>} : memref<8x128xf32, #tpu.memory_space<vmem>>, vector<8x32xf32>,
    %c120_489 = arith.constant 120 : index
    %c0_490 = arith.constant 0 : index
    %1953 = vector.load %arg22[%c120_489, %c0_490] : memref<128x16xf32, #tpu.memory_space<vmem>>, vector<8x16xf32>
    %c0_491 = arith.constant 0 : index
    %c96 = arith.constant 96 : index
    %1954 = vector.load %arg14[%c0_491, %c96] : memref<8x128xf32, #tpu.memory_space<vmem>>, vector<8x16xf32>
    tpu.vector_store %arg14[%c0_491, %c96], %1953 {strides = array<i32>} : memref<8x128xf32, #tpu.memory_space<vmem>>, vector<8x16xf32>,
    %c120_492 = arith.constant 120 : index
    %c0_493 = arith.constant 0 : index
    %1955 = vector.load %arg26[%c120_492, %c0_493] : memref<128x16xf32, #tpu.memory_space<vmem>>, vector<8x16xf32>
    %c0_494 = arith.constant 0 : index
    %c112 = arith.constant 112 : index
    %1956 = vector.load %arg14[%c0_494, %c112] : memref<8x128xf32, #tpu.memory_space<vmem>>, vector<8x16xf32>
    tpu.vector_store %arg14[%c0_494, %c112], %1955 {strides = array<i32>} : memref<8x128xf32, #tpu.memory_space<vmem>>, vector<8x16xf32>,
    return
  }
}

</mosaic_0001>

<bundles_post_ra>
// kernel: tpu_custom_call.1
= control target key start
LH: loop header
LB: loop body
LE: loop exit
PB: predicated region body
PF: predicated region fallthrough
CT: control target
= control target key end

     0   :  { %v11119_v3 = vmov 0.0|0.0   ;;  %vm11120_vm0 = vmmov 0   ;;  %v11121_v9 = vmov 0.0   ;;  %v11122_v14 = vmov 0   ;;  %s13365_s0 = inlined_call_operand.vmem [shape: f32[128,1], index: 0, kind: input, shape index: {}]   ;;  %s13366_s1 = inlined_call_operand.vmem [shape: f32[128,1], index: 1, kind: input, shape index: {}]   ;;  %s13367_s2 = inlined_call_operand.vmem [shape: f32[2,1,96], index: 2, kind: input, shape index: {}]   ;;  %s13368_s3 = inlined_call_operand.vmem [shape: f32[2,32,96], index: 3, kind: input, shape index: {}]   ;;  %s13369_s4 = inlined_call_operand.vmem [shape: f32[2,1,96], index: 4, kind: input, shape index: {}]   ;;  %s13370_s5 = inlined_call_operand.vmem [shape: f32[2,1,96], index: 5, kind: input, shape index: {}]   ;;  %s13371_s6 = inlined_call_operand.vmem [shape: f32[2,32,48], index: 6, kind: input, shape index: {}]   ;;  %s13372_s7 = inlined_call_operand.vmem [shape: f32[2,16,48], index: 7, kind: input, shape index: {}]   ;;  %s13373_s8 = inlined_call_operand.vmem [shape: f32[2,1,48], index: 8, kind: input, shape index: {}]   ;;  %s13374_s9 = inlined_call_operand.vmem [shape: f32[2,1,48], index: 9, kind: input, shape index: {}]   ;;  %s13375_s10 = inlined_call_operand.vmem [shape: f32[2,16,48], index: 10, kind: input, shape index: {}]   ;;  %s13376_s11 = inlined_call_operand.vmem [shape: f32[2,16,48], index: 11, kind: input, shape index: {}]   ;;  %s13377_s12 = inlined_call_operand.vmem [shape: f32[2,1,48], index: 12, kind: input, shape index: {}]   ;;  %s13378_s13 = inlined_call_operand.vmem [shape: f32[2,1,48], index: 13, kind: input, shape index: {}]   ;;  %s13379_s14 = inlined_call_operand.hbm [shape: f32[8,128], index: 14, kind: output, shape index: {}]  }
   0x1   :  { %v367_v0 = vld [vmem:[%s13368_s3] sm:$0xff]  ;;  %v368_v1 = vld [vmem:[%s13368_s3 + $0x8] sm:$0xff]  ;;  %10179 = vmatprep.subr.bf16.mxu0 %v11119_v3  ;;  %10185 = vmatprep.subr.bf16.mxu1 %v11119_v3  ;;  %v369_v6 = vld [vmem:[%s13368_s3 + $0x10] sm:$0xff] }
   0x2   :  { %v8896_v2 = vld [vmem:[%s13368_s3 + $0x20] sm:$0xff]  ;;  %v11214_v4 = vpack.c.bf16 %v368_v1, %v367_v0  ;;  %v8897_v5 = vld [vmem:[%s13368_s3 + $0x28] sm:$0xff]  ;;  %v370_v7 = vld [vmem:[%s13368_s3 + $0x18] sm:$0xff]  ;;  %9523 = vmatprep.mubr.msk.f32.mxu0 %vm11120_vm0, %v11121_v9  ;;  %9534 = vmatprep.mubr.msk.f32.mxu1 %vm11120_vm0, %v11121_v9 }
   0x3   :  { %v11226_v8 = vpack.c.bf16 %v8897_v5, %v8896_v2  ;;  %v8898_v10 = vld [vmem:[%s13368_s3 + $0x30] sm:$0xff]  ;;  %v8899_v11 = vld [vmem:[%s13368_s3 + $0x38] sm:$0xff]  ;;  %v48_v12 = vld [vmem:[%s13365_s0] sm:$0xff]  ;;  %v11242_v13 = vpack.c.bf16 %v370_v7, %v369_v6  ;;  %10501 = vset.pattern.permute.xlu0 %v11122_v14 }
   0x4   :  { %10181 = vmatpush3.bf16.msra.mxu0 %v11214_v4  ;;  %v11246_v15 = vpack.c.bf16 %v8899_v11, %v8898_v10 }
   0x5   :  { %10182 = vmatprep.subr.bf16.mxu0 %v11119_v3  ;;  %10187 = vmatpush3.bf16.msra.mxu1 %v11226_v8 }
   0x6   :  { %19 = vsyncpa [#allocation15], 0  ;;  %10188 = vmatprep.subr.bf16.mxu1 %v11119_v3  ;;  %84 = vperm.xlu0 %10501, %v48_v12   ;;  %v64_v16 = vld [vmem:[%s13366_s1] sm:$0xff]  ;;  %vm206_vm1 = vcmask 785408   ;;  %s11123_s28 = smov 64   ;;  %s11124_s29 = smov 96  }
   0x7   :  { %10502 = vset.pattern.permute.xlu1 %v11122_v14  ;;  %v11273_v17 = vld [vmem:[%s13367_s2] ss:$0 sm:$0xff]  ;;  %v11284_v21 = vld [vmem:[%s13367_s2 + $0x1] ss:$0 sm:$0xff]  ;;  %v49_v2 = vld [vmem:[%s13365_s0 + $0x8] sm:$0xff]  ;;  %vm393_vm2 = vcmask 261120  }
   0x8   :  { %10184 = vmatpush3.bf16.msra.mxu0 %v11242_v13  ;;  %v11278_v18 = vld [vmem:[%s13369_s4] ss:$0 sm:$0xff]  ;;  %v11290_v23 = vld [vmem:[%s13369_s4 + $0x1] ss:$0 sm:$0xff]  ;;  %v65_v6 = vld [vmem:[%s13366_s1 + $0x8] sm:$0xff]  ;;  %vm4015_vm3 = vcmask 392192  }
   0x9   :  { %10190 = vmatpush3.bf16.msra.mxu1 %v11246_v15  ;;  %10191 = vmatprep.subr.bf16.mxu0 %v11119_v3  ;;  %v11299_v27 = vld [vmem:[%s13370_s5] ss:$0 sm:$0xff]  ;;  %v11304_v29 = vld [vmem:[%s13370_s5 + $0x1] ss:$0 sm:$0xff]  ;;  %s11125_s30 = smov 32   ;;  %s11126_s3 = smov 112  }
   0xa   :  { %229 = vperm.xlu0 %10501, %v64_v16   ;;  %10197 = vmatprep.subr.bf16.mxu1 %v11119_v3  ;;  %vm4278_vm4 = vcmask 130048   ;;  %vm8846_vm5 = vcmask 392448   ;;  %vm8853_vm6 = vcmask 523648   ;;  %vm8860_vm7 = vcmask 785920  }
   0xb   :  { %9524 = vmatmul.mubr.f32.vlgmr.msra.gmra.mrb[0].mxu0 %v11121_v9  ;;  %vm8867_vm8 = vcmask 917248   ;;  %vm8874_vm9 = vcmask 1048448  }
   0xc   :  { %9535 = vmatmul.mubr.f32.vlgmr.msra.gmra.mrb[0].mxu1 %v11121_v9  ;;  %10193 = vmatpush3.bf16.msra.mxu0 %v11214_v4 }
   0xd   :  { %10194 = vmatprep.subr.bf16.mxu0 %v11119_v3  ;;  %10199 = vmatpush3.bf16.msra.mxu1 %v11226_v8 }
   0xe   :  { %9545 = vmatprep.mubr.msk.f32.mxu0 %vm11120_vm0, %v11121_v9  ;;  %10200 = vmatprep.subr.bf16.mxu1 %v11119_v3 }
   0xf   :  { %9556 = vmatprep.mubr.msk.f32.mxu1 %vm11120_vm0, %v11121_v9 }
  0x10   :  { %10196 = vmatpush3.bf16.msra.mxu0 %v11242_v13 }
  0x11   :  { %10202 = vmatpush3.bf16.msra.mxu1 %v11246_v15  ;;  %10203 = vmatprep.subr.bf16.mxu0 %v11119_v3 }
  0x12   :  { %10209 = vmatprep.subr.bf16.mxu1 %v11119_v3 }
  0x85   :  { %v85_v19 = vpop.permute.xlu0 %84 }
  0x86   :  { %v168_v20 = vmul.f32 %v11273_v17, %v85_v19 }
  0x88   :  { %v190_v22 = vadd.f32 %v11278_v18, %v168_v20 }
  0x89   :  { %v230_v24 = vpop.permute.xlu0 %229 }
  0x8a   :  { %207 = vst.msk [vmem:[#allocation2] sm:$0xff] %vm206_vm1, %v190_v22  ;;  %v313_v25 = vmul.f32 %v11284_v21, %v230_v24 }
  0x8c   :  { %v335_v26 = vadd.f32 %v11290_v23, %v313_v25 }
  0x8e   :  { %351 = vst.msk [vmem:[#allocation3] sm:$0xff] %vm206_vm1, %v335_v26 }
  0x91   :  { %v391_v35 = vld [vmem:[#allocation2] sm:$0xff] }
  0x95   :  { %v392_v37 = vld [vmem:[#allocation3] sm:$0xff] }
  0xde   :  { %v463_v28 = vpop.f32.mrb[0].mxu0 }
  0xdf   :  { %v464_v30 = vadd.f32 %v11299_v27, %v463_v28  ;;  %v9525_v31 = vpop.f32.mrb[1].mxu0  ;;  %v533_v32 = vpop.f32.mrb[0].mxu1 }
  0xe0   :  { %v9536_v33 = vpop.f32.mrb[1].mxu1  ;;  %v534_v34 = vadd.f32 %v11304_v29, %v533_v32 }
  0xe1   :  { %545 = vrot.lane.b32.xlu1 %v464_v30, %s11123_s28  ;;  %v537_v36 = vadd.f32 %v464_v30, %v391_v35 }
  0xe2   :  { %v563_v39 = vadd.f32 %v534_v34, %v392_v37 }
  0xe3   :  { %v8903_v38 = vmul.f32 -1.442695, %v537_v36 }
  0xe4   :  { %v8904_v40 = vmul.f32 -1.442695, %v563_v39 }
  0xe5   :  { %571 = vrot.lane.b32.xlu1 %v534_v34, %s11123_s28  ;;  %10503 = vpow2.f32 %v8903_v38 }
  0xe6   :  { %10505 = vpow2.f32 %v8904_v40 }
  0xef   :  { %v10504_v41 = vpop.eup %10503 }
  0xf0   :  { %v541_v42 = vadd.f32 1.0, %v10504_v41  ;;  %v10506_v43 = vpop.eup %10505 }
  0xf1   :  { %v567_v44 = vadd.f32 1.0, %v10506_v43 }
  0xf2   :  { %10507 = vrcp.f32 %v541_v42 }
  0xf3   :  { %10509 = vrcp.f32 %v567_v44 }
  0xfc   :  { %v10508_v45 = vpop.eup %10507 }
  0xfd   :  { %v10510_v48 = vpop.eup %10509  ;;  %v555_v57 = vsub.f32 1.0, %v10508_v45  ;;  %v561_v59 = vmul.f32 0.0, %v10508_v45 }
  0xfe   :  { %v581_v62 = vsub.f32 1.0, %v10510_v48  ;;  %v587_v0 = vmul.f32 0.0, %v10510_v48 }
 0x153   :  { %v546_v46 = vpop.permute.xlu1 %545 }
 0x154   :  { %v548_v47 = vmul.f32 %v10508_v45, %v546_v46 }
 0x156   :  { %550 = vrot.lane.b32.xlu0 %v548_v47, %s11123_s28 }
 0x157   :  { %v572_v49 = vpop.permute.xlu1 %571 }
 0x158   :  { %v574_v50 = vmul.f32 %v10510_v48, %v572_v49 }
 0x15a   :  { %576 = vrot.lane.b32.xlu1 %v574_v50, %s11123_s28 }
 0x1c8   :  { %v551_v51 = vpop.permute.xlu0 %550 }
 0x1c9   :  { %v553_v52 = vadd.f32 %v551_v51, %v391_v35 }
 0x1cb   :  { %10511 = vtanh.f32 %v553_v52 }
 0x1cc   :  { %v577_v53 = vpop.permute.xlu1 %576 }
 0x1cd   :  { %v579_v54 = vadd.f32 %v577_v53, %v392_v37 }
 0x1cf   :  { %10513 = vtanh.f32 %v579_v54 }
 0x1d5   :  { %v10512_v55 = vpop.eup %10511 }
 0x1d6   :  { %557 = vrot.lane.b32.xlu0 %v10512_v55, %s11124_s29 }
 0x1d9   :  { %v10514_v56 = vpop.eup %10513 }
 0x1da   :  { %583 = vrot.lane.b32.xlu1 %v10514_v56, %s11124_s29 }
 0x248   :  { %v558_v58 = vpop.permute.xlu0 %557 }
 0x249   :  { %v560_v60 = vmul.f32 %v558_v58, %v555_v57 }
 0x24b   :  { %v11314_v61 = vadd.f32 %v561_v59, %v560_v60 }
 0x24c   :  { %v584_v63 = vpop.permute.xlu1 %583 }
 0x24d   :  { %v586_v1 = vmul.f32 %v584_v63, %v581_v62  ;;  %590 = vrot.lane.b32.xlu0 %v11314_v61, %s11124_s29  ;;  %v50_v63 = vld [vmem:[%s13365_s0 + $0x10] sm:$0xff] }
 0x24f   :  { %v11321_v5 = vadd.f32 %v587_v0, %v586_v1 }
 0x251   :  { %595 = vrot.lane.b32.xlu1 %v11321_v5, %s11124_s29  ;;  %89 = vperm.xlu0 %10501, %v49_v2  }
 0x255   :  { %234 = vperm.xlu1 %10502, %v65_v6  }
 0x2bf   :  { %v591_v7 = vpop.permute.xlu0 %590 }
 0x2c0   :  { %593 = vst.msk [vmem:[#allocation4] sm:$0xff] %vm393_vm2, %v591_v7  ;;  %9546 = vmatmul.mubr.msk.f32.vlgmr.msra.gmra.mrb[2].mxu0 %vm393_vm2, %v591_v7 }
 0x2c1   :  { %10205 = vmatpush3.bf16.msra.mxu0 %v11214_v4  ;;  %9567 = vmatprep.mubr.msk.f32.mxu0 %vm11120_vm0, %v11121_v9 }
 0x2c2   :  { %10206 = vmatprep.subr.bf16.mxu0 %v11119_v3 }
 0x2c3   :  { %v596_v10 = vpop.permute.xlu1 %595 }
 0x2c4   :  { %598 = vst.msk [vmem:[#allocation5] sm:$0xff] %vm393_vm2, %v596_v10  ;;  %9557 = vmatmul.mubr.msk.f32.vlgmr.msra.gmra.mrb[2].mxu1 %vm393_vm2, %v596_v10 }
 0x2c5   :  { %10208 = vmatpush3.bf16.msra.mxu0 %v11242_v13  ;;  %10211 = vmatpush3.bf16.msra.mxu1 %v11226_v8 }
 0x2c6   :  { %10212 = vmatprep.subr.bf16.mxu1 %v11119_v3  ;;  %9578 = vmatprep.mubr.msk.f32.mxu1 %vm11120_vm0, %v11121_v9 }
 0x2c7   :  { %10215 = vmatprep.subr.bf16.mxu0 %v11119_v3 }
 0x2c9   :  { %10214 = vmatpush3.bf16.msra.mxu1 %v11246_v15 }
 0x2ca   :  { %10221 = vmatprep.subr.bf16.mxu1 %v11119_v3 }
 0x2d0   :  { %v90_v11 = vpop.permute.xlu0 %89 }
 0x2d1   :  { %v169_v12 = vmul.f32 %v11273_v17, %v90_v11 }
 0x2d3   :  { %v191_v14 = vadd.f32 %v11278_v18, %v169_v12 }
 0x2d4   :  { %v235_v16 = vpop.permute.xlu1 %234 }
 0x2d5   :  { %208 = vst.msk [vmem:[#allocation2 + $0x8] sm:$0xff] %vm206_vm1, %v191_v14  ;;  %v314_v19 = vmul.f32 %v11284_v21, %v235_v16 }
 0x2d7   :  { %v336_v20 = vadd.f32 %v11290_v23, %v314_v19 }
 0x2d9   :  { %352 = vst.msk [vmem:[#allocation3 + $0x8] sm:$0xff] %vm206_vm1, %v336_v20 }
 0x2dc   :  { %v600_v31 = vld [vmem:[#allocation2 + $0x8] sm:$0xff] }
 0x2e0   :  { %v602_v33 = vld [vmem:[#allocation3 + $0x8] sm:$0xff] }
 0x393   :  { %v671_v22 = vpop.f32.mrb[2].mxu0 }
 0x394   :  { %v672_v24 = vadd.f32 %v11299_v27, %v671_v22  ;;  %v9547_v25 = vpop.f32.mrb[3].mxu0 }
 0x396   :  { %755 = vrot.lane.b32.xlu0 %v672_v24, %s11123_s28  ;;  %v747_v32 = vadd.f32 %v672_v24, %v600_v31 }
 0x397   :  { %v743_v26 = vpop.f32.mrb[2].mxu1 }
 0x398   :  { %v744_v28 = vadd.f32 %v11304_v29, %v743_v26  ;;  %v9558_v30 = vpop.f32.mrb[3].mxu1  ;;  %v8907_v34 = vmul.f32 -1.442695, %v747_v32 }
 0x39a   :  { %781 = vrot.lane.b32.xlu1 %v744_v28, %s11123_s28  ;;  %v773_v35 = vadd.f32 %v744_v28, %v602_v33  ;;  %10515 = vpow2.f32 %v8907_v34 }
 0x39c   :  { %v8908_v36 = vmul.f32 -1.442695, %v773_v35 }
 0x39e   :  { %10517 = vpow2.f32 %v8908_v36 }
 0x3a4   :  { %v10516_v37 = vpop.eup %10515 }
 0x3a5   :  { %v751_v38 = vadd.f32 1.0, %v10516_v37 }
 0x3a7   :  { %10519 = vrcp.f32 %v751_v38 }
 0x3a8   :  { %v10518_v39 = vpop.eup %10517 }
 0x3a9   :  { %v777_v40 = vadd.f32 1.0, %v10518_v39 }
 0x3ab   :  { %10521 = vrcp.f32 %v777_v40 }
 0x3b1   :  { %v10520_v41 = vpop.eup %10519 }
 0x3b2   :  { %v765_v53 = vsub.f32 1.0, %v10520_v41  ;;  %v771_v55 = vmul.f32 %v10520_v41, %v11314_v61  ;;  %v66_v61 = vld [vmem:[%s13366_s1 + $0x10] sm:$0xff] }
 0x3b5   :  { %v10522_v44 = vpop.eup %10521 }
 0x3b6   :  { %v791_v58 = vsub.f32 1.0, %v10522_v44  ;;  %v797_v60 = vmul.f32 %v10522_v44, %v11321_v5 }
 0x408   :  { %v756_v42 = vpop.permute.xlu0 %755 }
 0x409   :  { %v758_v43 = vmul.f32 %v10520_v41, %v756_v42 }
 0x40b   :  { %760 = vrot.lane.b32.xlu0 %v758_v43, %s11123_s28 }
 0x40c   :  { %v782_v45 = vpop.permute.xlu1 %781 }
 0x40d   :  { %v784_v46 = vmul.f32 %v10522_v44, %v782_v45 }
 0x40f   :  { %786 = vrot.lane.b32.xlu1 %v784_v46, %s11123_s28 }
 0x47d   :  { %v761_v47 = vpop.permute.xlu0 %760 }
 0x47e   :  { %v763_v48 = vadd.f32 %v761_v47, %v600_v31 }
 0x480   :  { %10523 = vtanh.f32 %v763_v48 }
 0x481   :  { %v787_v49 = vpop.permute.xlu1 %786 }
 0x482   :  { %v789_v50 = vadd.f32 %v787_v49, %v602_v33 }
 0x484   :  { %10525 = vtanh.f32 %v789_v50 }
 0x48a   :  { %v10524_v51 = vpop.eup %10523 }
 0x48b   :  { %767 = vrot.lane.b32.xlu0 %v10524_v51, %s11124_s29 }
 0x48e   :  { %v10526_v52 = vpop.eup %10525 }
 0x48f   :  { %793 = vrot.lane.b32.xlu1 %v10526_v52, %s11124_s29 }
 0x4fd   :  { %v768_v54 = vpop.permute.xlu0 %767 }
 0x4fe   :  { %v770_v56 = vmul.f32 %v768_v54, %v765_v53 }
 0x500   :  { %v11359_v57 = vadd.f32 %v771_v55, %v770_v56 }
 0x501   :  { %v794_v59 = vpop.permute.xlu1 %793 }
 0x502   :  { %v796_v62 = vmul.f32 %v794_v59, %v791_v58  ;;  %800 = vrot.lane.b32.xlu0 %v11359_v57, %s11124_s29  ;;  %v51_v59 = vld [vmem:[%s13365_s0 + $0x18] sm:$0xff] }
 0x504   :  { %v11367_v0 = vadd.f32 %v797_v60, %v796_v62 }
 0x506   :  { %806 = vrot.lane.b32.xlu1 %v11367_v0, %s11124_s29  ;;  %94 = vperm.xlu0 %10501, %v50_v63  }
 0x50a   :  { %239 = vperm.xlu1 %10502, %v66_v61  }
 0x574   :  { %v801_v1 = vpop.permute.xlu0 %800 }
 0x575   :  { %804 = vst.msk [vmem:[#allocation4 + $0x8] sm:$0xff] %vm393_vm2, %v801_v1  ;;  %9568 = vmatmul.mubr.msk.f32.vlgmr.msra.gmra.mrb[4].mxu0 %vm393_vm2, %v801_v1 }
 0x576   :  { %10217 = vmatpush3.bf16.msra.mxu0 %v11214_v4  ;;  %9589 = vmatprep.mubr.msk.f32.mxu0 %vm11120_vm0, %v11121_v9 }
 0x577   :  { %10218 = vmatprep.subr.bf16.mxu0 %v11119_v3 }
 0x578   :  { %v807_v2 = vpop.permute.xlu1 %806 }
 0x579   :  { %810 = vst.msk [vmem:[#allocation5 + $0x8] sm:$0xff] %vm393_vm2, %v807_v2  ;;  %9579 = vmatmul.mubr.msk.f32.vlgmr.msra.gmra.mrb[4].mxu1 %vm393_vm2, %v807_v2 }
 0x57a   :  { %10220 = vmatpush3.bf16.msra.mxu0 %v11242_v13  ;;  %10223 = vmatpush3.bf16.msra.mxu1 %v11226_v8 }
 0x57b   :  { %10224 = vmatprep.subr.bf16.mxu1 %v11119_v3  ;;  %9600 = vmatprep.mubr.msk.f32.mxu1 %vm11120_vm0, %v11121_v9 }
 0x57c   :  { %10227 = vmatprep.subr.bf16.mxu0 %v11119_v3 }
 0x57e   :  { %10226 = vmatpush3.bf16.msra.mxu1 %v11246_v15 }
 0x57f   :  { %10233 = vmatprep.subr.bf16.mxu1 %v11119_v3 }
 0x585   :  { %v95_v5 = vpop.permute.xlu0 %94 }
 0x586   :  { %v170_v6 = vmul.f32 %v11273_v17, %v95_v5 }
 0x588   :  { %v192_v7 = vadd.f32 %v11278_v18, %v170_v6 }
 0x589   :  { %v240_v10 = vpop.permute.xlu1 %239 }
 0x58a   :  { %209 = vst.msk [vmem:[#allocation2 + $0x10] sm:$0xff] %vm206_vm1, %v192_v7  ;;  %v315_v11 = vmul.f32 %v11284_v21, %v240_v10 }
 0x58c   :  { %v337_v12 = vadd.f32 %v11290_v23, %v315_v11 }
 0x58e   :  { %353 = vst.msk [vmem:[#allocation3 + $0x10] sm:$0xff] %vm206_vm1, %v337_v12 }
 0x591   :  { %v812_v25 = vld [vmem:[#allocation2 + $0x10] sm:$0xff] }
 0x595   :  { %v814_v28 = vld [vmem:[#allocation3 + $0x10] sm:$0xff] }
 0x648   :  { %v883_v14 = vpop.f32.mrb[4].mxu0 }
 0x649   :  { %v884_v16 = vadd.f32 %v11299_v27, %v883_v14  ;;  %v9569_v19 = vpop.f32.mrb[5].mxu0 }
 0x64b   :  { %967 = vrot.lane.b32.xlu0 %v884_v16, %s11123_s28  ;;  %v959_v26 = vadd.f32 %v884_v16, %v812_v25 }
 0x64c   :  { %v955_v20 = vpop.f32.mrb[4].mxu1 }
 0x64d   :  { %v956_v22 = vadd.f32 %v11304_v29, %v955_v20  ;;  %v9580_v24 = vpop.f32.mrb[5].mxu1  ;;  %v8911_v30 = vmul.f32 -1.442695, %v959_v26 }
 0x64f   :  { %993 = vrot.lane.b32.xlu1 %v956_v22, %s11123_s28  ;;  %v985_v31 = vadd.f32 %v956_v22, %v814_v28  ;;  %10527 = vpow2.f32 %v8911_v30 }
 0x651   :  { %v8912_v32 = vmul.f32 -1.442695, %v985_v31 }
 0x653   :  { %10529 = vpow2.f32 %v8912_v32 }
 0x659   :  { %v10528_v33 = vpop.eup %10527 }
 0x65a   :  { %v963_v34 = vadd.f32 1.0, %v10528_v33 }
 0x65c   :  { %10531 = vrcp.f32 %v963_v34 }
 0x65d   :  { %v10530_v35 = vpop.eup %10529 }
 0x65e   :  { %v989_v36 = vadd.f32 1.0, %v10530_v35 }
 0x660   :  { %10533 = vrcp.f32 %v989_v36 }
 0x666   :  { %v10532_v37 = vpop.eup %10531 }
 0x667   :  { %v977_v49 = vsub.f32 1.0, %v10532_v37  ;;  %v983_v51 = vmul.f32 %v10532_v37, %v11359_v57  ;;  %v67_v57 = vld [vmem:[%s13366_s1 + $0x18] sm:$0xff] }
 0x66a   :  { %v10534_v40 = vpop.eup %10533 }
 0x66b   :  { %v1003_v54 = vsub.f32 1.0, %v10534_v40  ;;  %v1009_v56 = vmul.f32 %v10534_v40, %v11367_v0 }
 0x6bd   :  { %v968_v38 = vpop.permute.xlu0 %967 }
 0x6be   :  { %v970_v39 = vmul.f32 %v10532_v37, %v968_v38 }
 0x6c0   :  { %972 = vrot.lane.b32.xlu0 %v970_v39, %s11123_s28 }
 0x6c1   :  { %v994_v41 = vpop.permute.xlu1 %993 }
 0x6c2   :  { %v996_v42 = vmul.f32 %v10534_v40, %v994_v41 }
 0x6c4   :  { %998 = vrot.lane.b32.xlu1 %v996_v42, %s11123_s28 }
 0x732   :  { %v973_v43 = vpop.permute.xlu0 %972 }
 0x733   :  { %v975_v44 = vadd.f32 %v973_v43, %v812_v25 }
 0x735   :  { %10535 = vtanh.f32 %v975_v44 }
 0x736   :  { %v999_v45 = vpop.permute.xlu1 %998 }
 0x737   :  { %v1001_v46 = vadd.f32 %v999_v45, %v814_v28 }
 0x739   :  { %10537 = vtanh.f32 %v1001_v46 }
 0x73f   :  { %v10536_v47 = vpop.eup %10535 }
 0x740   :  { %979 = vrot.lane.b32.xlu0 %v10536_v47, %s11124_s29 }
 0x743   :  { %v10538_v48 = vpop.eup %10537 }
 0x744   :  { %1005 = vrot.lane.b32.xlu1 %v10538_v48, %s11124_s29 }
 0x7b2   :  { %v980_v50 = vpop.permute.xlu0 %979 }
 0x7b3   :  { %v982_v52 = vmul.f32 %v980_v50, %v977_v49 }
 0x7b5   :  { %v11405_v53 = vadd.f32 %v983_v51, %v982_v52 }
 0x7b6   :  { %v1006_v55 = vpop.permute.xlu1 %1005 }
 0x7b7   :  { %v1008_v58 = vmul.f32 %v1006_v55, %v1003_v54  ;;  %1012 = vrot.lane.b32.xlu0 %v11405_v53, %s11124_s29  ;;  %v52_v55 = vld [vmem:[%s13365_s0 + $0x20] sm:$0xff] }
 0x7b9   :  { %v11413_v60 = vadd.f32 %v1009_v56, %v1008_v58 }
 0x7bb   :  { %1018 = vrot.lane.b32.xlu1 %v11413_v60, %s11124_s29  ;;  %99 = vperm.xlu0 %10501, %v51_v59  }
 0x7bf   :  { %244 = vperm.xlu1 %10502, %v67_v57  }
 0x829   :  { %v1013_v62 = vpop.permute.xlu0 %1012 }
 0x82a   :  { %1016 = vst.msk [vmem:[#allocation4 + $0x10] sm:$0xff] %vm393_vm2, %v1013_v62  ;;  %9590 = vmatmul.mubr.msk.f32.vlgmr.msra.gmra.mrb[6].mxu0 %vm393_vm2, %v1013_v62 }
 0x82b   :  { %10229 = vmatpush3.bf16.msra.mxu0 %v11214_v4  ;;  %9611 = vmatprep.mubr.msk.f32.mxu0 %vm11120_vm0, %v11121_v9 }
 0x82c   :  { %10230 = vmatprep.subr.bf16.mxu0 %v11119_v3 }
 0x82d   :  { %v1019_v63 = vpop.permute.xlu1 %1018 }
 0x82e   :  { %1022 = vst.msk [vmem:[#allocation5 + $0x10] sm:$0xff] %vm393_vm2, %v1019_v63  ;;  %9601 = vmatmul.mubr.msk.f32.vlgmr.msra.gmra.mrb[6].mxu1 %vm393_vm2, %v1019_v63 }
 0x82f   :  { %10232 = vmatpush3.bf16.msra.mxu0 %v11242_v13  ;;  %10235 = vmatpush3.bf16.msra.mxu1 %v11226_v8 }
 0x830   :  { %10236 = vmatprep.subr.bf16.mxu1 %v11119_v3  ;;  %9622 = vmatprep.mubr.msk.f32.mxu1 %vm11120_vm0, %v11121_v9 }
 0x831   :  { %10239 = vmatprep.subr.bf16.mxu0 %v11119_v3 }
 0x833   :  { %10238 = vmatpush3.bf16.msra.mxu1 %v11246_v15 }
 0x834   :  { %10245 = vmatprep.subr.bf16.mxu1 %v11119_v3 }
 0x83a   :  { %v100_v0 = vpop.permute.xlu0 %99 }
 0x83b   :  { %v171_v61 = vmul.f32 %v11273_v17, %v100_v0 }
 0x83d   :  { %v193_v1 = vadd.f32 %v11278_v18, %v171_v61 }
 0x83e   :  { %v245_v2 = vpop.permute.xlu1 %244 }
 0x83f   :  { %210 = vst.msk [vmem:[#allocation2 + $0x18] sm:$0xff] %vm206_vm1, %v193_v1  ;;  %v316_v5 = vmul.f32 %v11284_v21, %v245_v2 }
 0x841   :  { %v338_v6 = vadd.f32 %v11290_v23, %v316_v5 }
 0x843   :  { %354 = vst.msk [vmem:[#allocation3 + $0x18] sm:$0xff] %vm206_vm1, %v338_v6 }
 0x846   :  { %v1024_v19 = vld [vmem:[#allocation2 + $0x18] sm:$0xff] }
 0x84a   :  { %v1026_v22 = vld [vmem:[#allocation3 + $0x18] sm:$0xff] }
 0x8fd   :  { %v1095_v7 = vpop.f32.mrb[6].mxu0 }
 0x8fe   :  { %v1096_v10 = vadd.f32 %v11299_v27, %v1095_v7  ;;  %v9591_v11 = vpop.f32.mrb[7].mxu0 }
 0x900   :  { %1179 = vrot.lane.b32.xlu0 %v1096_v10, %s11123_s28  ;;  %v1171_v20 = vadd.f32 %v1096_v10, %v1024_v19 }
 0x901   :  { %v1167_v12 = vpop.f32.mrb[6].mxu1 }
 0x902   :  { %v1168_v14 = vadd.f32 %v11304_v29, %v1167_v12  ;;  %v9602_v16 = vpop.f32.mrb[7].mxu1  ;;  %v8915_v24 = vmul.f32 -1.442695, %v1171_v20 }
 0x904   :  { %1205 = vrot.lane.b32.xlu1 %v1168_v14, %s11123_s28  ;;  %v1197_v25 = vadd.f32 %v1168_v14, %v1026_v22  ;;  %10539 = vpow2.f32 %v8915_v24 }
 0x906   :  { %v8916_v26 = vmul.f32 -1.442695, %v1197_v25 }
 0x908   :  { %10541 = vpow2.f32 %v8916_v26 }
 0x90e   :  { %v10540_v28 = vpop.eup %10539 }
 0x90f   :  { %v1175_v30 = vadd.f32 1.0, %v10540_v28 }
 0x911   :  { %10543 = vrcp.f32 %v1175_v30 }
 0x912   :  { %v10542_v31 = vpop.eup %10541 }
 0x913   :  { %v1201_v32 = vadd.f32 1.0, %v10542_v31 }
 0x915   :  { %10545 = vrcp.f32 %v1201_v32 }
 0x91b   :  { %v10544_v33 = vpop.eup %10543 }
 0x91c   :  { %v1189_v45 = vsub.f32 1.0, %v10544_v33  ;;  %v1195_v47 = vmul.f32 %v10544_v33, %v11405_v53  ;;  %v68_v53 = vld [vmem:[%s13366_s1 + $0x20] sm:$0xff] }
 0x91f   :  { %v10546_v36 = vpop.eup %10545 }
 0x920   :  { %v1215_v50 = vsub.f32 1.0, %v10546_v36  ;;  %v1221_v52 = vmul.f32 %v10546_v36, %v11413_v60 }
 0x972   :  { %v1180_v34 = vpop.permute.xlu0 %1179 }
 0x973   :  { %v1182_v35 = vmul.f32 %v10544_v33, %v1180_v34 }
 0x975   :  { %1184 = vrot.lane.b32.xlu0 %v1182_v35, %s11123_s28 }
 0x976   :  { %v1206_v37 = vpop.permute.xlu1 %1205 }
 0x977   :  { %v1208_v38 = vmul.f32 %v10546_v36, %v1206_v37 }
 0x979   :  { %1210 = vrot.lane.b32.xlu1 %v1208_v38, %s11123_s28 }
 0x9e7   :  { %v1185_v39 = vpop.permute.xlu0 %1184 }
 0x9e8   :  { %v1187_v40 = vadd.f32 %v1185_v39, %v1024_v19 }
 0x9ea   :  { %10547 = vtanh.f32 %v1187_v40 }
 0x9eb   :  { %v1211_v41 = vpop.permute.xlu1 %1210 }
 0x9ec   :  { %v1213_v42 = vadd.f32 %v1211_v41, %v1026_v22 }
 0x9ee   :  { %10549 = vtanh.f32 %v1213_v42 }
 0x9f4   :  { %v10548_v43 = vpop.eup %10547 }
 0x9f5   :  { %1191 = vrot.lane.b32.xlu0 %v10548_v43, %s11124_s29 }
 0x9f8   :  { %v10550_v44 = vpop.eup %10549 }
 0x9f9   :  { %1217 = vrot.lane.b32.xlu1 %v10550_v44, %s11124_s29 }
 0xa67   :  { %v1192_v46 = vpop.permute.xlu0 %1191 }
 0xa68   :  { %v1194_v48 = vmul.f32 %v1192_v46, %v1189_v45 }
 0xa6a   :  { %v11451_v49 = vadd.f32 %v1195_v47, %v1194_v48 }
 0xa6b   :  { %v1218_v51 = vpop.permute.xlu1 %1217 }
 0xa6c   :  { %v1220_v54 = vmul.f32 %v1218_v51, %v1215_v50  ;;  %1224 = vrot.lane.b32.xlu0 %v11451_v49, %s11124_s29  ;;  %v53_v51 = vld [vmem:[%s13365_s0 + $0x28] sm:$0xff] }
 0xa6e   :  { %v11459_v56 = vadd.f32 %v1221_v52, %v1220_v54 }
 0xa70   :  { %1230 = vrot.lane.b32.xlu1 %v11459_v56, %s11124_s29  ;;  %104 = vperm.xlu0 %10501, %v52_v55  }
 0xa74   :  { %249 = vperm.xlu1 %10502, %v68_v53  }
 0xade   :  { %v1225_v58 = vpop.permute.xlu0 %1224 }
 0xadf   :  { %1228 = vst.msk [vmem:[#allocation4 + $0x18] sm:$0xff] %vm393_vm2, %v1225_v58  ;;  %9612 = vmatmul.mubr.msk.f32.vlgmr.msra.gmra.mrb[8].mxu0 %vm393_vm2, %v1225_v58 }
 0xae0   :  { %10241 = vmatpush3.bf16.msra.mxu0 %v11214_v4  ;;  %9633 = vmatprep.mubr.msk.f32.mxu0 %vm11120_vm0, %v11121_v9 }
 0xae1   :  { %10242 = vmatprep.subr.bf16.mxu0 %v11119_v3 }
 0xae2   :  { %v1231_v59 = vpop.permute.xlu1 %1230 }
 0xae3   :  { %1234 = vst.msk [vmem:[#allocation5 + $0x18] sm:$0xff] %vm393_vm2, %v1231_v59  ;;  %9623 = vmatmul.mubr.msk.f32.vlgmr.msra.gmra.mrb[8].mxu1 %vm393_vm2, %v1231_v59 }
 0xae4   :  { %10244 = vmatpush3.bf16.msra.mxu0 %v11242_v13  ;;  %10247 = vmatpush3.bf16.msra.mxu1 %v11226_v8 }
 0xae5   :  { %10248 = vmatprep.subr.bf16.mxu1 %v11119_v3  ;;  %9644 = vmatprep.mubr.msk.f32.mxu1 %vm11120_vm0, %v11121_v9 }
 0xae6   :  { %10251 = vmatprep.subr.bf16.mxu0 %v11119_v3 }
 0xae8   :  { %10250 = vmatpush3.bf16.msra.mxu1 %v11246_v15 }
 0xae9   :  { %10257 = vmatprep.subr.bf16.mxu1 %v11119_v3 }
 0xaef   :  { %v105_v60 = vpop.permute.xlu0 %104 }
 0xaf0   :  { %v172_v57 = vmul.f32 %v11273_v17, %v105_v60 }
 0xaf2   :  { %v194_v62 = vadd.f32 %v11278_v18, %v172_v57 }
 0xaf3   :  { %v250_v63 = vpop.permute.xlu1 %249 }
 0xaf4   :  { %211 = vst.msk [vmem:[#allocation2 + $0x20] sm:$0xff] %vm206_vm1, %v194_v62  ;;  %v317_v0 = vmul.f32 %v11284_v21, %v250_v63 }
 0xaf6   :  { %v339_v61 = vadd.f32 %v11290_v23, %v317_v0 }
 0xaf8   :  { %355 = vst.msk [vmem:[#allocation3 + $0x20] sm:$0xff] %vm206_vm1, %v339_v61 }
 0xafb   :  { %v1236_v11 = vld [vmem:[#allocation2 + $0x20] sm:$0xff] }
 0xaff   :  { %v1238_v14 = vld [vmem:[#allocation3 + $0x20] sm:$0xff] }
 0xbb2   :  { %v1307_v1 = vpop.f32.mrb[8].mxu0 }
 0xbb3   :  { %v1308_v2 = vadd.f32 %v11299_v27, %v1307_v1  ;;  %v9613_v5 = vpop.f32.mrb[9].mxu0 }
 0xbb5   :  { %1391 = vrot.lane.b32.xlu0 %v1308_v2, %s11123_s28  ;;  %v1383_v12 = vadd.f32 %v1308_v2, %v1236_v11 }
 0xbb6   :  { %v1379_v6 = vpop.f32.mrb[8].mxu1 }
 0xbb7   :  { %v1380_v7 = vadd.f32 %v11304_v29, %v1379_v6  ;;  %v9624_v10 = vpop.f32.mrb[9].mxu1  ;;  %v8919_v16 = vmul.f32 -1.442695, %v1383_v12 }
 0xbb9   :  { %1417 = vrot.lane.b32.xlu1 %v1380_v7, %s11123_s28  ;;  %v1409_v19 = vadd.f32 %v1380_v7, %v1238_v14  ;;  %10551 = vpow2.f32 %v8919_v16 }
 0xbbb   :  { %v8920_v20 = vmul.f32 -1.442695, %v1409_v19 }
 0xbbd   :  { %10553 = vpow2.f32 %v8920_v20 }
 0xbc3   :  { %v10552_v22 = vpop.eup %10551 }
 0xbc4   :  { %v1387_v24 = vadd.f32 1.0, %v10552_v22 }
 0xbc6   :  { %10555 = vrcp.f32 %v1387_v24 }
 0xbc7   :  { %v10554_v25 = vpop.eup %10553 }
 0xbc8   :  { %v1413_v26 = vadd.f32 1.0, %v10554_v25 }
 0xbca   :  { %10557 = vrcp.f32 %v1413_v26 }
 0xbd0   :  { %v10556_v28 = vpop.eup %10555 }
 0xbd1   :  { %v1401_v41 = vsub.f32 1.0, %v10556_v28  ;;  %v1407_v43 = vmul.f32 %v10556_v28, %v11451_v49  ;;  %v69_v49 = vld [vmem:[%s13366_s1 + $0x28] sm:$0xff] }
 0xbd4   :  { %v10558_v32 = vpop.eup %10557 }
 0xbd5   :  { %v1427_v46 = vsub.f32 1.0, %v10558_v32  ;;  %v1433_v48 = vmul.f32 %v10558_v32, %v11459_v56 }
 0xc27   :  { %v1392_v30 = vpop.permute.xlu0 %1391 }
 0xc28   :  { %v1394_v31 = vmul.f32 %v10556_v28, %v1392_v30 }
 0xc2a   :  { %1396 = vrot.lane.b32.xlu0 %v1394_v31, %s11123_s28 }
 0xc2b   :  { %v1418_v33 = vpop.permute.xlu1 %1417 }
 0xc2c   :  { %v1420_v34 = vmul.f32 %v10558_v32, %v1418_v33 }
 0xc2e   :  { %1422 = vrot.lane.b32.xlu1 %v1420_v34, %s11123_s28 }
 0xc9c   :  { %v1397_v35 = vpop.permute.xlu0 %1396 }
 0xc9d   :  { %v1399_v36 = vadd.f32 %v1397_v35, %v1236_v11 }
 0xc9f   :  { %10559 = vtanh.f32 %v1399_v36 }
 0xca0   :  { %v1423_v37 = vpop.permute.xlu1 %1422 }
 0xca1   :  { %v1425_v38 = vadd.f32 %v1423_v37, %v1238_v14 }
 0xca3   :  { %10561 = vtanh.f32 %v1425_v38 }
 0xca9   :  { %v10560_v39 = vpop.eup %10559 }
 0xcaa   :  { %1403 = vrot.lane.b32.xlu0 %v10560_v39, %s11124_s29 }
 0xcad   :  { %v10562_v40 = vpop.eup %10561 }
 0xcae   :  { %1429 = vrot.lane.b32.xlu1 %v10562_v40, %s11124_s29 }
 0xd1c   :  { %v1404_v42 = vpop.permute.xlu0 %1403 }
 0xd1d   :  { %v1406_v44 = vmul.f32 %v1404_v42, %v1401_v41 }
 0xd1f   :  { %v11497_v45 = vadd.f32 %v1407_v43, %v1406_v44 }
 0xd20   :  { %v1430_v47 = vpop.permute.xlu1 %1429 }
 0xd21   :  { %v1432_v50 = vmul.f32 %v1430_v47, %v1427_v46  ;;  %1436 = vrot.lane.b32.xlu0 %v11497_v45, %s11124_s29  ;;  %v54_v47 = vld [vmem:[%s13365_s0 + $0x30] sm:$0xff] }
 0xd23   :  { %v11505_v52 = vadd.f32 %v1433_v48, %v1432_v50 }
 0xd25   :  { %1442 = vrot.lane.b32.xlu1 %v11505_v52, %s11124_s29  ;;  %109 = vperm.xlu0 %10501, %v53_v51  }
 0xd29   :  { %254 = vperm.xlu1 %10502, %v69_v49  }
 0xd93   :  { %v1437_v54 = vpop.permute.xlu0 %1436 }
 0xd94   :  { %1440 = vst.msk [vmem:[#allocation4 + $0x20] sm:$0xff] %vm393_vm2, %v1437_v54  ;;  %9634 = vmatmul.mubr.msk.f32.vlgmr.msra.gmra.mrb[10].mxu0 %vm393_vm2, %v1437_v54 }
 0xd95   :  { %10253 = vmatpush3.bf16.msra.mxu0 %v11214_v4  ;;  %9655 = vmatprep.mubr.msk.f32.mxu0 %vm11120_vm0, %v11121_v9 }
 0xd96   :  { %10254 = vmatprep.subr.bf16.mxu0 %v11119_v3 }
 0xd97   :  { %v1443_v55 = vpop.permute.xlu1 %1442 }
 0xd98   :  { %1446 = vst.msk [vmem:[#allocation5 + $0x20] sm:$0xff] %vm393_vm2, %v1443_v55  ;;  %9645 = vmatmul.mubr.msk.f32.vlgmr.msra.gmra.mrb[10].mxu1 %vm393_vm2, %v1443_v55 }
 0xd99   :  { %10256 = vmatpush3.bf16.msra.mxu0 %v11242_v13  ;;  %10259 = vmatpush3.bf16.msra.mxu1 %v11226_v8 }
 0xd9a   :  { %10260 = vmatprep.subr.bf16.mxu1 %v11119_v3  ;;  %9666 = vmatprep.mubr.msk.f32.mxu1 %vm11120_vm0, %v11121_v9 }
 0xd9b   :  { %10263 = vmatprep.subr.bf16.mxu0 %v11119_v3 }
 0xd9d   :  { %10262 = vmatpush3.bf16.msra.mxu1 %v11246_v15 }
 0xd9e   :  { %10269 = vmatprep.subr.bf16.mxu1 %v11119_v3 }
 0xda4   :  { %v110_v56 = vpop.permute.xlu0 %109 }
 0xda5   :  { %v173_v53 = vmul.f32 %v11273_v17, %v110_v56 }
 0xda7   :  { %v195_v58 = vadd.f32 %v11278_v18, %v173_v53 }
 0xda8   :  { %v255_v59 = vpop.permute.xlu1 %254 }
 0xda9   :  { %212 = vst.msk [vmem:[#allocation2 + $0x28] sm:$0xff] %vm206_vm1, %v195_v58  ;;  %v318_v60 = vmul.f32 %v11284_v21, %v255_v59 }
 0xdab   :  { %v340_v57 = vadd.f32 %v11290_v23, %v318_v60 }
 0xdad   :  { %356 = vst.msk [vmem:[#allocation3 + $0x28] sm:$0xff] %vm206_vm1, %v340_v57 }
 0xdb0   :  { %v1448_v5 = vld [vmem:[#allocation2 + $0x28] sm:$0xff] }
 0xdb4   :  { %v1450_v7 = vld [vmem:[#allocation3 + $0x28] sm:$0xff] }
 0xe67   :  { %v1519_v62 = vpop.f32.mrb[10].mxu0 }
 0xe68   :  { %v1520_v63 = vadd.f32 %v11299_v27, %v1519_v62  ;;  %v9635_v0 = vpop.f32.mrb[11].mxu0 }
 0xe6a   :  { %1603 = vrot.lane.b32.xlu0 %v1520_v63, %s11123_s28  ;;  %v1595_v6 = vadd.f32 %v1520_v63, %v1448_v5 }
 0xe6b   :  { %v1591_v61 = vpop.f32.mrb[10].mxu1 }
 0xe6c   :  { %v1592_v1 = vadd.f32 %v11304_v29, %v1591_v61  ;;  %v9646_v2 = vpop.f32.mrb[11].mxu1  ;;  %v8923_v10 = vmul.f32 -1.442695, %v1595_v6 }
 0xe6e   :  { %1629 = vrot.lane.b32.xlu1 %v1592_v1, %s11123_s28  ;;  %v1621_v11 = vadd.f32 %v1592_v1, %v1450_v7  ;;  %10563 = vpow2.f32 %v8923_v10 }
 0xe70   :  { %v8924_v12 = vmul.f32 -1.442695, %v1621_v11 }
 0xe72   :  { %10565 = vpow2.f32 %v8924_v12 }
 0xe78   :  { %v10564_v14 = vpop.eup %10563 }
 0xe79   :  { %v1599_v16 = vadd.f32 1.0, %v10564_v14 }
 0xe7b   :  { %10567 = vrcp.f32 %v1599_v16 }
 0xe7c   :  { %v10566_v19 = vpop.eup %10565 }
 0xe7d   :  { %v1625_v20 = vadd.f32 1.0, %v10566_v19 }
 0xe7f   :  { %10569 = vrcp.f32 %v1625_v20 }
 0xe85   :  { %v10568_v22 = vpop.eup %10567 }
 0xe86   :  { %v1613_v37 = vsub.f32 1.0, %v10568_v22  ;;  %v1619_v39 = vmul.f32 %v10568_v22, %v11497_v45  ;;  %v70_v45 = vld [vmem:[%s13366_s1 + $0x30] sm:$0xff] }
 0xe89   :  { %v10570_v26 = vpop.eup %10569 }
 0xe8a   :  { %v1639_v42 = vsub.f32 1.0, %v10570_v26  ;;  %v1645_v44 = vmul.f32 %v10570_v26, %v11505_v52 }
 0xedc   :  { %v1604_v24 = vpop.permute.xlu0 %1603 }
 0xedd   :  { %v1606_v25 = vmul.f32 %v10568_v22, %v1604_v24 }
 0xedf   :  { %1608 = vrot.lane.b32.xlu0 %v1606_v25, %s11123_s28 }
 0xee0   :  { %v1630_v28 = vpop.permute.xlu1 %1629 }
 0xee1   :  { %v1632_v30 = vmul.f32 %v10570_v26, %v1630_v28 }
 0xee3   :  { %1634 = vrot.lane.b32.xlu1 %v1632_v30, %s11123_s28 }
 0xf51   :  { %v1609_v31 = vpop.permute.xlu0 %1608 }
 0xf52   :  { %v1611_v32 = vadd.f32 %v1609_v31, %v1448_v5 }
 0xf54   :  { %10571 = vtanh.f32 %v1611_v32 }
 0xf55   :  { %v1635_v33 = vpop.permute.xlu1 %1634 }
 0xf56   :  { %v1637_v34 = vadd.f32 %v1635_v33, %v1450_v7 }
 0xf58   :  { %10573 = vtanh.f32 %v1637_v34 }
 0xf5e   :  { %v10572_v35 = vpop.eup %10571 }
 0xf5f   :  { %1615 = vrot.lane.b32.xlu0 %v10572_v35, %s11124_s29 }
 0xf62   :  { %v10574_v36 = vpop.eup %10573 }
 0xf63   :  { %1641 = vrot.lane.b32.xlu1 %v10574_v36, %s11124_s29  ;;  %v55_v36 = vld [vmem:[%s13365_s0 + $0x38] sm:$0xff] }
 0xfd1   :  { %v1616_v38 = vpop.permute.xlu0 %1615 }
 0xfd2   :  { %v1618_v40 = vmul.f32 %v1616_v38, %v1613_v37  ;;  %v71_v38 = vld [vmem:[%s13366_s1 + $0x38] sm:$0xff] }
 0xfd4   :  { %v11543_v41 = vadd.f32 %v1619_v39, %v1618_v40 }
 0xfd5   :  { %v1642_v43 = vpop.permute.xlu1 %1641 }
 0xfd6   :  { %v1644_v46 = vmul.f32 %v1642_v43, %v1639_v42  ;;  %1648 = vrot.lane.b32.xlu0 %v11543_v41, %s11124_s29  ;;  %v11623_v42 = vld [vmem:[%s13367_s2] ss:$0 sm:$0xff] }
 0xfd8   :  { %v11551_v48 = vadd.f32 %v1645_v44, %v1644_v46  ;;  %v11629_v44 = vld [vmem:[%s13369_s4] ss:$0 sm:$0xff] }
 0xfda   :  { %1654 = vrot.lane.b32.xlu1 %v11551_v48, %s11124_s29  ;;  %114 = vperm.xlu0 %10501, %v54_v47  }
 0xfde   :  { %259 = vperm.xlu1 %10502, %v70_v45  }
0x1048   :  { %v1649_v50 = vpop.permute.xlu0 %1648 }
0x1049   :  { %1652 = vst.msk [vmem:[#allocation4 + $0x28] sm:$0xff] %vm393_vm2, %v1649_v50  ;;  %9656 = vmatmul.mubr.msk.f32.vlgmr.msra.gmra.mrb[12].mxu0 %vm393_vm2, %v1649_v50  ;;  %v11642_v50 = vld [vmem:[%s13369_s4 + $0x1] ss:$0 sm:$0xff] }
0x104a   :  { %10265 = vmatpush3.bf16.msra.mxu0 %v11214_v4  ;;  %9677 = vmatprep.mubr.msk.f32.mxu0 %vm11120_vm0, %v11121_v9 }
0x104b   :  { %10266 = vmatprep.subr.bf16.mxu0 %v11119_v3 }
0x104c   :  { %v1655_v51 = vpop.permute.xlu1 %1654 }
0x104d   :  { %1658 = vst.msk [vmem:[#allocation5 + $0x28] sm:$0xff] %vm393_vm2, %v1655_v51  ;;  %9667 = vmatmul.mubr.msk.f32.vlgmr.msra.gmra.mrb[12].mxu1 %vm393_vm2, %v1655_v51 }
0x104e   :  { %10268 = vmatpush3.bf16.msra.mxu0 %v11242_v13  ;;  %10271 = vmatpush3.bf16.msra.mxu1 %v11226_v8 }
0x104f   :  { %10272 = vmatprep.subr.bf16.mxu1 %v11119_v3  ;;  %9688 = vmatprep.mubr.msk.f32.mxu1 %vm11120_vm0, %v11121_v9 }
0x1050   :  { %10275 = vmatprep.subr.bf16.mxu0 %v11119_v3 }
0x1052   :  { %10274 = vmatpush3.bf16.msra.mxu1 %v11246_v15 }
0x1053   :  { %10281 = vmatprep.subr.bf16.mxu1 %v11119_v3 }
0x1059   :  { %v115_v52 = vpop.permute.xlu0 %114 }
0x105a   :  { %v174_v49 = vmul.f32 %v11273_v17, %v115_v52 }
0x105c   :  { %v196_v54 = vadd.f32 %v11278_v18, %v174_v49  ;;  %v11649_v49 = vld [vmem:[%s13370_s5] ss:$0 sm:$0xff] }
0x105d   :  { %v260_v55 = vpop.permute.xlu1 %259 }
0x105e   :  { %213 = vst.msk [vmem:[#allocation2 + $0x30] sm:$0xff] %vm206_vm1, %v196_v54  ;;  %v319_v56 = vmul.f32 %v11284_v21, %v260_v55 }
0x1060   :  { %v341_v53 = vadd.f32 %v11290_v23, %v319_v56 }
0x1062   :  { %357 = vst.msk [vmem:[#allocation3 + $0x30] sm:$0xff] %vm206_vm1, %v341_v53  ;;  %v11656_v53 = vld [vmem:[%s13370_s5 + $0x1] ss:$0 sm:$0xff] }
0x1065   :  { %v1660_v18 = vld [vmem:[#allocation2 + $0x30] sm:$0xff] }
0x1069   :  { %v1662_v0 = vld [vmem:[#allocation3 + $0x30] sm:$0xff] }
0x111c   :  { %v1731_v58 = vpop.f32.mrb[12].mxu0 }
0x111d   :  { %v1732_v59 = vadd.f32 %v11299_v27, %v1731_v58  ;;  %v9657_v60 = vpop.f32.mrb[13].mxu0 }
0x111f   :  { %1815 = vrot.lane.b32.xlu0 %v1732_v59, %s11123_s28  ;;  %v1807_v63 = vadd.f32 %v1732_v59, %v1660_v18 }
0x1120   :  { %v1803_v57 = vpop.f32.mrb[12].mxu1 }
0x1121   :  { %v1804_v17 = vadd.f32 %v11304_v29, %v1803_v57  ;;  %v9668_v62 = vpop.f32.mrb[13].mxu1  ;;  %v8927_v21 = vmul.f32 -1.442695, %v1807_v63 }
0x1123   :  { %1841 = vrot.lane.b32.xlu1 %v1804_v17, %s11123_s28  ;;  %v1833_v61 = vadd.f32 %v1804_v17, %v1662_v0  ;;  %10575 = vpow2.f32 %v8927_v21 }
0x1125   :  { %v8928_v23 = vmul.f32 -1.442695, %v1833_v61 }
0x1127   :  { %10577 = vpow2.f32 %v8928_v23 }
0x112d   :  { %v10576_v1 = vpop.eup %10575 }
0x112e   :  { %v1811_v2 = vadd.f32 1.0, %v10576_v1 }
0x1130   :  { %10579 = vrcp.f32 %v1811_v2 }
0x1131   :  { %v10578_v27 = vpop.eup %10577 }
0x1132   :  { %v1837_v5 = vadd.f32 1.0, %v10578_v27 }
0x1134   :  { %10581 = vrcp.f32 %v1837_v5 }
0x113a   :  { %v10580_v6 = vpop.eup %10579 }
0x113b   :  { %v1825_v25 = vsub.f32 1.0, %v10580_v6  ;;  %v1831_v28 = vmul.f32 %v10580_v6, %v11543_v41 }
0x113e   :  { %v10582_v10 = vpop.eup %10581 }
0x113f   :  { %v1851_v32 = vsub.f32 1.0, %v10582_v10  ;;  %v1857_v34 = vmul.f32 %v10582_v10, %v11551_v48  ;;  %v11636_v48 = vld [vmem:[%s13367_s2 + $0x1] ss:$0 sm:$0xff] }
0x1191   :  { %v1816_v7 = vpop.permute.xlu0 %1815 }
0x1192   :  { %v1818_v29 = vmul.f32 %v10580_v6, %v1816_v7 }
0x1194   :  { %1820 = vrot.lane.b32.xlu0 %v1818_v29, %s11123_s28 }
0x1195   :  { %v1842_v11 = vpop.permute.xlu1 %1841 }
0x1196   :  { %v1844_v12 = vmul.f32 %v10582_v10, %v1842_v11 }
0x1198   :  { %1846 = vrot.lane.b32.xlu1 %v1844_v12, %s11123_s28 }
0x1206   :  { %v1821_v14 = vpop.permute.xlu0 %1820 }
0x1207   :  { %v1823_v16 = vadd.f32 %v1821_v14, %v1660_v18 }
0x1209   :  { %10583 = vtanh.f32 %v1823_v16 }
0x120a   :  { %v1847_v19 = vpop.permute.xlu1 %1846 }
0x120b   :  { %v1849_v20 = vadd.f32 %v1847_v19, %v1662_v0 }
0x120d   :  { %10585 = vtanh.f32 %v1849_v20 }
0x1213   :  { %v10584_v22 = vpop.eup %10583 }
0x1214   :  { %1827 = vrot.lane.b32.xlu0 %v10584_v22, %s11124_s29 }
0x1217   :  { %v10586_v24 = vpop.eup %10585 }
0x1218   :  { %1853 = vrot.lane.b32.xlu1 %v10586_v24, %s11124_s29 }
0x1286   :  { %v1828_v26 = vpop.permute.xlu0 %1827 }
0x1287   :  { %v1830_v30 = vmul.f32 %v1828_v26, %v1825_v25 }
0x1289   :  { %v11589_v31 = vadd.f32 %v1831_v28, %v1830_v30 }
0x128a   :  { %v1854_v33 = vpop.permute.xlu1 %1853 }
0x128b   :  { %v1856_v35 = vmul.f32 %v1854_v33, %v1851_v32  ;;  %1860 = vrot.lane.b32.xlu0 %v11589_v31, %s11124_s29  ;;  %v56_v33 = vld [vmem:[%s13365_s0 + $0x40] sm:$0xff] }
0x128d   :  { %v11597_v37 = vadd.f32 %v1857_v34, %v1856_v35 }
0x128f   :  { %1866 = vrot.lane.b32.xlu1 %v11597_v37, %s11124_s29  ;;  %119 = vperm.xlu0 %10501, %v55_v36  }
0x1293   :  { %264 = vperm.xlu1 %10502, %v71_v38  }
0x12fd   :  { %v1861_v39 = vpop.permute.xlu0 %1860 }
0x12fe   :  { %1864 = vst.msk [vmem:[#allocation4 + $0x30] sm:$0xff] %vm393_vm2, %v1861_v39  ;;  %9678 = vmatmul.mubr.msk.f32.vlgmr.msra.gmra.mrb[14].mxu0 %vm393_vm2, %v1861_v39 }
0x12ff   :  { %10277 = vmatpush3.bf16.msra.mxu0 %v11214_v4  ;;  %9699 = vmatprep.mubr.msk.f32.mxu0 %vm11120_vm0, %v11121_v9 }
0x1300   :  { %10278 = vmatprep.subr.bf16.mxu0 %v11119_v3 }
0x1301   :  { %v1867_v40 = vpop.permute.xlu1 %1866 }
0x1302   :  { %1870 = vst.msk [vmem:[#allocation5 + $0x30] sm:$0xff] %vm393_vm2, %v1867_v40  ;;  %9689 = vmatmul.mubr.msk.f32.vlgmr.msra.gmra.mrb[14].mxu1 %vm393_vm2, %v1867_v40 }
0x1303   :  { %10280 = vmatpush3.bf16.msra.mxu0 %v11242_v13  ;;  %10283 = vmatpush3.bf16.msra.mxu1 %v11226_v8 }
0x1304   :  { %10284 = vmatprep.subr.bf16.mxu1 %v11119_v3  ;;  %9710 = vmatprep.mubr.msk.f32.mxu1 %vm11120_vm0, %v11121_v9 }
0x1305   :  { %10287 = vmatprep.subr.bf16.mxu0 %v11119_v3 }
0x1307   :  { %10286 = vmatpush3.bf16.msra.mxu1 %v11246_v15 }
0x1308   :  { %10293 = vmatprep.subr.bf16.mxu1 %v11119_v3 }
0x130e   :  { %v120_v41 = vpop.permute.xlu0 %119 }
0x130f   :  { %v175_v43 = vmul.f32 %v11623_v42, %v120_v41 }
0x1311   :  { %v197_v46 = vadd.f32 %v11629_v44, %v175_v43 }
0x1312   :  { %v265_v47 = vpop.permute.xlu1 %264 }
0x1313   :  { %214 = vst.msk [vmem:[#allocation2 + $0x38] sm:$0xff] %vm206_vm1, %v197_v46  ;;  %v320_v45 = vmul.f32 %v11636_v48, %v265_v47 }
0x1315   :  { %v342_v51 = vadd.f32 %v11642_v50, %v320_v45 }
0x1317   :  { %358 = vst.msk [vmem:[#allocation3 + $0x38] sm:$0xff] %vm206_vm1, %v342_v51 }
0x131a   :  { %v1872_v60 = vld [vmem:[#allocation2 + $0x38] sm:$0xff] }
0x131e   :  { %v1874_v17 = vld [vmem:[#allocation3 + $0x38] sm:$0xff] }
0x13d1   :  { %v1943_v52 = vpop.f32.mrb[14].mxu0 }
0x13d2   :  { %v1944_v54 = vadd.f32 %v11649_v49, %v1943_v52  ;;  %v9679_v55 = vpop.f32.mrb[15].mxu0 }
0x13d4   :  { %2027 = vrot.lane.b32.xlu0 %v1944_v54, %s11123_s28  ;;  %v2019_v57 = vadd.f32 %v1944_v54, %v1872_v60 }
0x13d5   :  { %v2015_v56 = vpop.f32.mrb[14].mxu1 }
0x13d6   :  { %v2016_v58 = vadd.f32 %v11656_v53, %v2015_v56  ;;  %v9690_v59 = vpop.f32.mrb[15].mxu1  ;;  %v8931_v62 = vmul.f32 -1.442695, %v2019_v57 }
0x13d8   :  { %2053 = vrot.lane.b32.xlu1 %v2016_v58, %s11123_s28  ;;  %v2045_v18 = vadd.f32 %v2016_v58, %v1874_v17  ;;  %10587 = vpow2.f32 %v8931_v62 }
0x13da   :  { %v8932_v63 = vmul.f32 -1.442695, %v2045_v18 }
0x13dc   :  { %10589 = vpow2.f32 %v8932_v63 }
0x13e2   :  { %v10588_v0 = vpop.eup %10587 }
0x13e3   :  { %v2023_v21 = vadd.f32 1.0, %v10588_v0 }
0x13e5   :  { %10591 = vrcp.f32 %v2023_v21 }
0x13e6   :  { %v10590_v61 = vpop.eup %10589 }
0x13e7   :  { %v2049_v23 = vadd.f32 1.0, %v10590_v61 }
0x13e9   :  { %10593 = vrcp.f32 %v2049_v23 }
0x13ef   :  { %v10592_v1 = vpop.eup %10591 }
0x13f0   :  { %v2037_v19 = vsub.f32 1.0, %v10592_v1  ;;  %v2043_v22 = vmul.f32 %v10592_v1, %v11589_v31  ;;  %v72_v31 = vld [vmem:[%s13366_s1 + $0x40] sm:$0xff] }
0x13f3   :  { %v10594_v5 = vpop.eup %10593 }
0x13f4   :  { %v2063_v26 = vsub.f32 1.0, %v10594_v5  ;;  %v2069_v30 = vmul.f32 %v10594_v5, %v11597_v37 }
0x1446   :  { %v2028_v2 = vpop.permute.xlu0 %2027 }
0x1447   :  { %v2030_v27 = vmul.f32 %v10592_v1, %v2028_v2 }
0x1449   :  { %2032 = vrot.lane.b32.xlu0 %v2030_v27, %s11123_s28 }
0x144a   :  { %v2054_v6 = vpop.permute.xlu1 %2053 }
0x144b   :  { %v2056_v7 = vmul.f32 %v10594_v5, %v2054_v6 }
0x144d   :  { %2058 = vrot.lane.b32.xlu1 %v2056_v7, %s11123_s28 }
0x14bb   :  { %v2033_v29 = vpop.permute.xlu0 %2032 }
0x14bc   :  { %v2035_v10 = vadd.f32 %v2033_v29, %v1872_v60 }
0x14be   :  { %10595 = vtanh.f32 %v2035_v10 }
0x14bf   :  { %v2059_v11 = vpop.permute.xlu1 %2058 }
0x14c0   :  { %v2061_v12 = vadd.f32 %v2059_v11, %v1874_v17 }
0x14c2   :  { %10597 = vtanh.f32 %v2061_v12 }
0x14c8   :  { %v10596_v14 = vpop.eup %10595 }
0x14c9   :  { %2039 = vrot.lane.b32.xlu0 %v10596_v14, %s11124_s29 }
0x14cc   :  { %v10598_v16 = vpop.eup %10597 }
0x14cd   :  { %2065 = vrot.lane.b32.xlu1 %v10598_v16, %s11124_s29 }
0x153b   :  { %v2040_v20 = vpop.permute.xlu0 %2039 }
0x153c   :  { %v2042_v24 = vmul.f32 %v2040_v20, %v2037_v19 }
0x153e   :  { %v11665_v25 = vadd.f32 %v2043_v22, %v2042_v24 }
0x153f   :  { %v2066_v28 = vpop.permute.xlu1 %2065 }
0x1540   :  { %v2068_v32 = vmul.f32 %v2066_v28, %v2063_v26  ;;  %2072 = vrot.lane.b32.xlu0 %v11665_v25, %s11124_s29  ;;  %v57_v28 = vld [vmem:[%s13365_s0 + $0x48] sm:$0xff] }
0x1542   :  { %v11673_v34 = vadd.f32 %v2069_v30, %v2068_v32 }
0x1544   :  { %2078 = vrot.lane.b32.xlu1 %v11673_v34, %s11124_s29  ;;  %124 = vperm.xlu0 %10501, %v56_v33  }
0x1548   :  { %269 = vperm.xlu1 %10502, %v72_v31  }
0x15b2   :  { %v2073_v35 = vpop.permute.xlu0 %2072 }
0x15b3   :  { %2076 = vst.msk [vmem:[#allocation4 + $0x38] sm:$0xff] %vm393_vm2, %v2073_v35  ;;  %9700 = vmatmul.mubr.msk.f32.vlgmr.msra.gmra.mrb[16].mxu0 %vm393_vm2, %v2073_v35 }
0x15b4   :  { %10289 = vmatpush3.bf16.msra.mxu0 %v11214_v4  ;;  %9721 = vmatprep.mubr.msk.f32.mxu0 %vm11120_vm0, %v11121_v9 }
0x15b5   :  { %10290 = vmatprep.subr.bf16.mxu0 %v11119_v3 }
0x15b6   :  { %v2079_v36 = vpop.permute.xlu1 %2078 }
0x15b7   :  { %2082 = vst.msk [vmem:[#allocation5 + $0x38] sm:$0xff] %vm393_vm2, %v2079_v36  ;;  %9711 = vmatmul.mubr.msk.f32.vlgmr.msra.gmra.mrb[16].mxu1 %vm393_vm2, %v2079_v36 }
0x15b8   :  { %10292 = vmatpush3.bf16.msra.mxu0 %v11242_v13  ;;  %10295 = vmatpush3.bf16.msra.mxu1 %v11226_v8 }
0x15b9   :  { %10296 = vmatprep.subr.bf16.mxu1 %v11119_v3  ;;  %9732 = vmatprep.mubr.msk.f32.mxu1 %vm11120_vm0, %v11121_v9 }
0x15ba   :  { %10299 = vmatprep.subr.bf16.mxu0 %v11119_v3 }
0x15bc   :  { %10298 = vmatpush3.bf16.msra.mxu1 %v11246_v15 }
0x15bd   :  { %10305 = vmatprep.subr.bf16.mxu1 %v11119_v3 }
0x15c3   :  { %v125_v37 = vpop.permute.xlu0 %124 }
0x15c4   :  { %v176_v38 = vmul.f32 %v11623_v42, %v125_v37 }
0x15c6   :  { %v198_v39 = vadd.f32 %v11629_v44, %v176_v38 }
0x15c7   :  { %v270_v40 = vpop.permute.xlu1 %269 }
0x15c8   :  { %215 = vst.msk [vmem:[#allocation2 + $0x40] sm:$0xff] %vm206_vm1, %v198_v39  ;;  %v321_v41 = vmul.f32 %v11636_v48, %v270_v40 }
0x15ca   :  { %v343_v43 = vadd.f32 %v11642_v50, %v321_v41 }
0x15cc   :  { %359 = vst.msk [vmem:[#allocation3 + $0x40] sm:$0xff] %vm206_vm1, %v343_v43 }
0x15cf   :  { %v2084_v55 = vld [vmem:[#allocation2 + $0x40] sm:$0xff] }
0x15d3   :  { %v2086_v58 = vld [vmem:[#allocation3 + $0x40] sm:$0xff] }
0x1686   :  { %v2155_v46 = vpop.f32.mrb[16].mxu0 }
0x1687   :  { %v2156_v47 = vadd.f32 %v11649_v49, %v2155_v46  ;;  %v9701_v45 = vpop.f32.mrb[17].mxu0 }
0x1689   :  { %2239 = vrot.lane.b32.xlu0 %v2156_v47, %s11123_s28  ;;  %v2231_v56 = vadd.f32 %v2156_v47, %v2084_v55 }
0x168a   :  { %v2227_v51 = vpop.f32.mrb[16].mxu1 }
0x168b   :  { %v2228_v52 = vadd.f32 %v11656_v53, %v2227_v51  ;;  %v9712_v54 = vpop.f32.mrb[17].mxu1  ;;  %v8935_v59 = vmul.f32 -1.442695, %v2231_v56 }
0x168d   :  { %2265 = vrot.lane.b32.xlu1 %v2228_v52, %s11123_s28  ;;  %v2257_v60 = vadd.f32 %v2228_v52, %v2086_v58  ;;  %10599 = vpow2.f32 %v8935_v59 }
0x168f   :  { %v8936_v57 = vmul.f32 -1.442695, %v2257_v60 }
0x1691   :  { %10601 = vpow2.f32 %v8936_v57 }
0x1697   :  { %v10600_v17 = vpop.eup %10599 }
0x1698   :  { %v2235_v62 = vadd.f32 1.0, %v10600_v17 }
0x169a   :  { %10603 = vrcp.f32 %v2235_v62 }
0x169b   :  { %v10602_v18 = vpop.eup %10601 }
0x169c   :  { %v2261_v63 = vadd.f32 1.0, %v10602_v18 }
0x169e   :  { %10605 = vrcp.f32 %v2261_v63 }
0x16a4   :  { %v10604_v0 = vpop.eup %10603 }
0x16a5   :  { %v2249_v11 = vsub.f32 1.0, %v10604_v0  ;;  %v2255_v14 = vmul.f32 %v10604_v0, %v11665_v25  ;;  %v73_v25 = vld [vmem:[%s13366_s1 + $0x48] sm:$0xff] }
0x16a8   :  { %v10606_v23 = vpop.eup %10605 }
0x16a9   :  { %v2275_v20 = vsub.f32 1.0, %v10606_v23  ;;  %v2281_v24 = vmul.f32 %v10606_v23, %v11673_v34 }
0x16fb   :  { %v2240_v21 = vpop.permute.xlu0 %2239 }
0x16fc   :  { %v2242_v61 = vmul.f32 %v10604_v0, %v2240_v21 }
0x16fe   :  { %2244 = vrot.lane.b32.xlu0 %v2242_v61, %s11123_s28 }
0x16ff   :  { %v2266_v1 = vpop.permute.xlu1 %2265 }
0x1700   :  { %v2268_v2 = vmul.f32 %v10606_v23, %v2266_v1 }
0x1702   :  { %2270 = vrot.lane.b32.xlu1 %v2268_v2, %s11123_s28 }
0x1770   :  { %v2245_v27 = vpop.permute.xlu0 %2244 }
0x1771   :  { %v2247_v5 = vadd.f32 %v2245_v27, %v2084_v55 }
0x1773   :  { %10607 = vtanh.f32 %v2247_v5 }
0x1774   :  { %v2271_v6 = vpop.permute.xlu1 %2270 }
0x1775   :  { %v2273_v7 = vadd.f32 %v2271_v6, %v2086_v58 }
0x1777   :  { %10609 = vtanh.f32 %v2273_v7 }
0x177d   :  { %v10608_v29 = vpop.eup %10607 }
0x177e   :  { %2251 = vrot.lane.b32.xlu0 %v10608_v29, %s11124_s29 }
0x1781   :  { %v10610_v10 = vpop.eup %10609 }
0x1782   :  { %2277 = vrot.lane.b32.xlu1 %v10610_v10, %s11124_s29 }
0x17f0   :  { %v2252_v12 = vpop.permute.xlu0 %2251 }
0x17f1   :  { %v2254_v16 = vmul.f32 %v2252_v12, %v2249_v11 }
0x17f3   :  { %v11711_v19 = vadd.f32 %v2255_v14, %v2254_v16 }
0x17f4   :  { %v2278_v22 = vpop.permute.xlu1 %2277 }
0x17f5   :  { %v2280_v26 = vmul.f32 %v2278_v22, %v2275_v20  ;;  %2284 = vrot.lane.b32.xlu0 %v11711_v19, %s11124_s29  ;;  %v58_v22 = vld [vmem:[%s13365_s0 + $0x50] sm:$0xff] }
0x17f7   :  { %v11719_v30 = vadd.f32 %v2281_v24, %v2280_v26 }
0x17f9   :  { %2290 = vrot.lane.b32.xlu1 %v11719_v30, %s11124_s29  ;;  %129 = vperm.xlu0 %10501, %v57_v28  }
0x17fd   :  { %274 = vperm.xlu1 %10502, %v73_v25  }
0x1867   :  { %v2285_v32 = vpop.permute.xlu0 %2284 }
0x1868   :  { %2288 = vst.msk [vmem:[#allocation4 + $0x40] sm:$0xff] %vm393_vm2, %v2285_v32  ;;  %9722 = vmatmul.mubr.msk.f32.vlgmr.msra.gmra.mrb[18].mxu0 %vm393_vm2, %v2285_v32 }
0x1869   :  { %10301 = vmatpush3.bf16.msra.mxu0 %v11214_v4  ;;  %9743 = vmatprep.mubr.msk.f32.mxu0 %vm11120_vm0, %v11121_v9 }
0x186a   :  { %10302 = vmatprep.subr.bf16.mxu0 %v11119_v3 }
0x186b   :  { %v2291_v33 = vpop.permute.xlu1 %2290 }
0x186c   :  { %2294 = vst.msk [vmem:[#allocation5 + $0x40] sm:$0xff] %vm393_vm2, %v2291_v33  ;;  %9733 = vmatmul.mubr.msk.f32.vlgmr.msra.gmra.mrb[18].mxu1 %vm393_vm2, %v2291_v33 }
0x186d   :  { %10304 = vmatpush3.bf16.msra.mxu0 %v11242_v13  ;;  %10307 = vmatpush3.bf16.msra.mxu1 %v11226_v8 }
0x186e   :  { %10308 = vmatprep.subr.bf16.mxu1 %v11119_v3  ;;  %9754 = vmatprep.mubr.msk.f32.mxu1 %vm11120_vm0, %v11121_v9 }
0x186f   :  { %10311 = vmatprep.subr.bf16.mxu0 %v11119_v3 }
0x1871   :  { %10310 = vmatpush3.bf16.msra.mxu1 %v11246_v15 }
0x1872   :  { %10317 = vmatprep.subr.bf16.mxu1 %v11119_v3 }
0x1878   :  { %v130_v34 = vpop.permute.xlu0 %129 }
0x1879   :  { %v177_v31 = vmul.f32 %v11623_v42, %v130_v34 }
0x187b   :  { %v199_v35 = vadd.f32 %v11629_v44, %v177_v31 }
0x187c   :  { %v275_v36 = vpop.permute.xlu1 %274 }
0x187d   :  { %216 = vst.msk [vmem:[#allocation2 + $0x48] sm:$0xff] %vm206_vm1, %v199_v35  ;;  %v322_v37 = vmul.f32 %v11636_v48, %v275_v36 }
0x187f   :  { %v344_v38 = vadd.f32 %v11642_v50, %v322_v37 }
0x1881   :  { %360 = vst.msk [vmem:[#allocation3 + $0x48] sm:$0xff] %vm206_vm1, %v344_v38 }
0x1884   :  { %v2296_v45 = vld [vmem:[#allocation2 + $0x48] sm:$0xff] }
0x1888   :  { %v2298_v52 = vld [vmem:[#allocation3 + $0x48] sm:$0xff] }
0x193b   :  { %v2367_v39 = vpop.f32.mrb[18].mxu0 }
0x193c   :  { %v2368_v40 = vadd.f32 %v11649_v49, %v2367_v39  ;;  %v9723_v41 = vpop.f32.mrb[19].mxu0 }
0x193e   :  { %2451 = vrot.lane.b32.xlu0 %v2368_v40, %s11123_s28  ;;  %v2443_v51 = vadd.f32 %v2368_v40, %v2296_v45 }
0x193f   :  { %v2439_v43 = vpop.f32.mrb[18].mxu1 }
0x1940   :  { %v2440_v46 = vadd.f32 %v11656_v53, %v2439_v43  ;;  %v9734_v47 = vpop.f32.mrb[19].mxu1  ;;  %v8939_v54 = vmul.f32 -1.442695, %v2443_v51 }
0x1942   :  { %2477 = vrot.lane.b32.xlu1 %v2440_v46, %s11123_s28  ;;  %v2469_v55 = vadd.f32 %v2440_v46, %v2298_v52  ;;  %10611 = vpow2.f32 %v8939_v54 }
0x1944   :  { %v8940_v56 = vmul.f32 -1.442695, %v2469_v55 }
0x1946   :  { %10613 = vpow2.f32 %v8940_v56 }
0x194c   :  { %v10612_v58 = vpop.eup %10611 }
0x194d   :  { %v2447_v59 = vadd.f32 1.0, %v10612_v58 }
0x194f   :  { %10615 = vrcp.f32 %v2447_v59 }
0x1950   :  { %v10614_v60 = vpop.eup %10613 }
0x1951   :  { %v2473_v57 = vadd.f32 1.0, %v10614_v60 }
0x1953   :  { %10617 = vrcp.f32 %v2473_v57 }
0x1959   :  { %v10616_v17 = vpop.eup %10615 }
0x195a   :  { %v2461_v6 = vsub.f32 1.0, %v10616_v17  ;;  %v2467_v29 = vmul.f32 %v10616_v17, %v11711_v19  ;;  %v74_v19 = vld [vmem:[%s13366_s1 + $0x50] sm:$0xff] }
0x195d   :  { %v10618_v63 = vpop.eup %10617 }
0x195e   :  { %v2487_v12 = vsub.f32 1.0, %v10618_v63  ;;  %v2493_v16 = vmul.f32 %v10618_v63, %v11719_v30 }
0x19b0   :  { %v2452_v62 = vpop.permute.xlu0 %2451 }
0x19b1   :  { %v2454_v18 = vmul.f32 %v10616_v17, %v2452_v62 }
0x19b3   :  { %2456 = vrot.lane.b32.xlu0 %v2454_v18, %s11123_s28 }
0x19b4   :  { %v2478_v0 = vpop.permute.xlu1 %2477 }
0x19b5   :  { %v2480_v21 = vmul.f32 %v10618_v63, %v2478_v0 }
0x19b7   :  { %2482 = vrot.lane.b32.xlu1 %v2480_v21, %s11123_s28 }
0x1a25   :  { %v2457_v61 = vpop.permute.xlu0 %2456 }
0x1a26   :  { %v2459_v23 = vadd.f32 %v2457_v61, %v2296_v45 }
0x1a28   :  { %10619 = vtanh.f32 %v2459_v23 }
0x1a29   :  { %v2483_v1 = vpop.permute.xlu1 %2482 }
0x1a2a   :  { %v2485_v2 = vadd.f32 %v2483_v1, %v2298_v52 }
0x1a2c   :  { %10621 = vtanh.f32 %v2485_v2 }
0x1a32   :  { %v10620_v27 = vpop.eup %10619 }
0x1a33   :  { %2463 = vrot.lane.b32.xlu0 %v10620_v27, %s11124_s29 }
0x1a36   :  { %v10622_v5 = vpop.eup %10621 }
0x1a37   :  { %2489 = vrot.lane.b32.xlu1 %v10622_v5, %s11124_s29 }
0x1aa5   :  { %v2464_v7 = vpop.permute.xlu0 %2463 }
0x1aa6   :  { %v2466_v10 = vmul.f32 %v2464_v7, %v2461_v6 }
0x1aa8   :  { %v11757_v11 = vadd.f32 %v2467_v29, %v2466_v10 }
0x1aa9   :  { %v2490_v14 = vpop.permute.xlu1 %2489 }
0x1aaa   :  { %v2492_v20 = vmul.f32 %v2490_v14, %v2487_v12  ;;  %2496 = vrot.lane.b32.xlu0 %v11757_v11, %s11124_s29  ;;  %v59_v14 = vld [vmem:[%s13365_s0 + $0x58] sm:$0xff] }
0x1aac   :  { %v11765_v24 = vadd.f32 %v2493_v16, %v2492_v20 }
0x1aae   :  { %2502 = vrot.lane.b32.xlu1 %v11765_v24, %s11124_s29  ;;  %134 = vperm.xlu0 %10501, %v58_v22  }
0x1ab2   :  { %279 = vperm.xlu1 %10502, %v74_v19  }
0x1b1c   :  { %v2497_v26 = vpop.permute.xlu0 %2496 }
0x1b1d   :  { %2500 = vst.msk [vmem:[#allocation4 + $0x48] sm:$0xff] %vm393_vm2, %v2497_v26  ;;  %9744 = vmatmul.mubr.msk.f32.vlgmr.msra.gmra.mrb[20].mxu0 %vm393_vm2, %v2497_v26 }
0x1b1e   :  { %10313 = vmatpush3.bf16.msra.mxu0 %v11214_v4  ;;  %9765 = vmatprep.mubr.msk.f32.mxu0 %vm11120_vm0, %v11121_v9 }
0x1b1f   :  { %10314 = vmatprep.subr.bf16.mxu0 %v11119_v3 }
0x1b20   :  { %v2503_v28 = vpop.permute.xlu1 %2502 }
0x1b21   :  { %2506 = vst.msk [vmem:[#allocation5 + $0x48] sm:$0xff] %vm393_vm2, %v2503_v28  ;;  %9755 = vmatmul.mubr.msk.f32.vlgmr.msra.gmra.mrb[20].mxu1 %vm393_vm2, %v2503_v28 }
0x1b22   :  { %10316 = vmatpush3.bf16.msra.mxu0 %v11242_v13  ;;  %10319 = vmatpush3.bf16.msra.mxu1 %v11226_v8 }
0x1b23   :  { %10320 = vmatprep.subr.bf16.mxu1 %v11119_v3  ;;  %9776 = vmatprep.mubr.msk.f32.mxu1 %vm11120_vm0, %v11121_v9 }
0x1b24   :  { %10323 = vmatprep.subr.bf16.mxu0 %v11119_v3 }
0x1b26   :  { %10322 = vmatpush3.bf16.msra.mxu1 %v11246_v15 }
0x1b27   :  { %10329 = vmatprep.subr.bf16.mxu1 %v11119_v3 }
0x1b2d   :  { %v135_v30 = vpop.permute.xlu0 %134 }
0x1b2e   :  { %v178_v25 = vmul.f32 %v11623_v42, %v135_v30 }
0x1b30   :  { %v200_v32 = vadd.f32 %v11629_v44, %v178_v25 }
0x1b31   :  { %v280_v33 = vpop.permute.xlu1 %279 }
0x1b32   :  { %217 = vst.msk [vmem:[#allocation2 + $0x50] sm:$0xff] %vm206_vm1, %v200_v32  ;;  %v323_v34 = vmul.f32 %v11636_v48, %v280_v33 }
0x1b34   :  { %v345_v31 = vadd.f32 %v11642_v50, %v323_v34 }
0x1b36   :  { %361 = vst.msk [vmem:[#allocation3 + $0x50] sm:$0xff] %vm206_vm1, %v345_v31 }
0x1b39   :  { %v2508_v41 = vld [vmem:[#allocation2 + $0x50] sm:$0xff] }
0x1b3d   :  { %v2510_v46 = vld [vmem:[#allocation3 + $0x50] sm:$0xff] }
0x1bf0   :  { %v2579_v35 = vpop.f32.mrb[20].mxu0 }
0x1bf1   :  { %v2580_v36 = vadd.f32 %v11649_v49, %v2579_v35  ;;  %v9745_v37 = vpop.f32.mrb[21].mxu0 }
0x1bf3   :  { %2663 = vrot.lane.b32.xlu0 %v2580_v36, %s11123_s28  ;;  %v2655_v43 = vadd.f32 %v2580_v36, %v2508_v41 }
0x1bf4   :  { %v2651_v38 = vpop.f32.mrb[20].mxu1 }
0x1bf5   :  { %v2652_v39 = vadd.f32 %v11656_v53, %v2651_v38  ;;  %v9756_v40 = vpop.f32.mrb[21].mxu1  ;;  %v8943_v47 = vmul.f32 -1.442695, %v2655_v43 }
0x1bf7   :  { %2689 = vrot.lane.b32.xlu1 %v2652_v39, %s11123_s28  ;;  %v2681_v45 = vadd.f32 %v2652_v39, %v2510_v46  ;;  %10623 = vpow2.f32 %v8943_v47 }
0x1bf9   :  { %v8944_v51 = vmul.f32 -1.442695, %v2681_v45 }
0x1bfb   :  { %10625 = vpow2.f32 %v8944_v51 }
0x1c01   :  { %v10624_v52 = vpop.eup %10623 }
0x1c02   :  { %v2659_v54 = vadd.f32 1.0, %v10624_v52 }
0x1c04   :  { %10627 = vrcp.f32 %v2659_v54 }
0x1c05   :  { %v10626_v55 = vpop.eup %10625 }
0x1c06   :  { %v2685_v56 = vadd.f32 1.0, %v10626_v55 }
0x1c08   :  { %10629 = vrcp.f32 %v2685_v56 }
0x1c0e   :  { %v10628_v58 = vpop.eup %10627 }
0x1c0f   :  { %v2673_v1 = vsub.f32 1.0, %v10628_v58  ;;  %v2679_v27 = vmul.f32 %v10628_v58, %v11757_v11  ;;  %v75_v11 = vld [vmem:[%s13366_s1 + $0x58] sm:$0xff] }
0x1c12   :  { %v10630_v57 = vpop.eup %10629 }
0x1c13   :  { %v2699_v7 = vsub.f32 1.0, %v10630_v57  ;;  %v2705_v10 = vmul.f32 %v10630_v57, %v11765_v24 }
0x1c65   :  { %v2664_v59 = vpop.permute.xlu0 %2663 }
0x1c66   :  { %v2666_v60 = vmul.f32 %v10628_v58, %v2664_v59 }
0x1c68   :  { %2668 = vrot.lane.b32.xlu0 %v2666_v60, %s11123_s28 }
0x1c69   :  { %v2690_v17 = vpop.permute.xlu1 %2689 }
0x1c6a   :  { %v2692_v62 = vmul.f32 %v10630_v57, %v2690_v17 }
0x1c6c   :  { %2694 = vrot.lane.b32.xlu1 %v2692_v62, %s11123_s28 }
0x1cda   :  { %v2669_v18 = vpop.permute.xlu0 %2668 }
0x1cdb   :  { %v2671_v63 = vadd.f32 %v2669_v18, %v2508_v41 }
0x1cdd   :  { %10631 = vtanh.f32 %v2671_v63 }
0x1cde   :  { %v2695_v0 = vpop.permute.xlu1 %2694 }
0x1cdf   :  { %v2697_v21 = vadd.f32 %v2695_v0, %v2510_v46 }
0x1ce1   :  { %10633 = vtanh.f32 %v2697_v21 }
0x1ce7   :  { %v10632_v61 = vpop.eup %10631 }
0x1ce8   :  { %2675 = vrot.lane.b32.xlu0 %v10632_v61, %s11124_s29 }
0x1ceb   :  { %v10634_v23 = vpop.eup %10633 }
0x1cec   :  { %2701 = vrot.lane.b32.xlu1 %v10634_v23, %s11124_s29 }
0x1d5a   :  { %v2676_v2 = vpop.permute.xlu0 %2675 }
0x1d5b   :  { %v2678_v5 = vmul.f32 %v2676_v2, %v2673_v1 }
0x1d5d   :  { %v11803_v6 = vadd.f32 %v2679_v27, %v2678_v5 }
0x1d5e   :  { %v2702_v29 = vpop.permute.xlu1 %2701 }
0x1d5f   :  { %v2704_v12 = vmul.f32 %v2702_v29, %v2699_v7  ;;  %2708 = vrot.lane.b32.xlu0 %v11803_v6, %s11124_s29  ;;  %v60_v29 = vld [vmem:[%s13365_s0 + $0x60] sm:$0xff] }
0x1d61   :  { %v11811_v16 = vadd.f32 %v2705_v10, %v2704_v12 }
0x1d63   :  { %2714 = vrot.lane.b32.xlu1 %v11811_v16, %s11124_s29  ;;  %139 = vperm.xlu0 %10501, %v59_v14  }
0x1d67   :  { %284 = vperm.xlu1 %10502, %v75_v11  }
0x1dd1   :  { %v2709_v20 = vpop.permute.xlu0 %2708 }
0x1dd2   :  { %2712 = vst.msk [vmem:[#allocation4 + $0x50] sm:$0xff] %vm393_vm2, %v2709_v20  ;;  %9766 = vmatmul.mubr.msk.f32.vlgmr.msra.gmra.mrb[22].mxu0 %vm393_vm2, %v2709_v20 }
0x1dd3   :  { %10325 = vmatpush3.bf16.msra.mxu0 %v11214_v4  ;;  %9787 = vmatprep.mubr.msk.f32.mxu0 %vm11120_vm0, %v11121_v9 }
0x1dd4   :  { %10326 = vmatprep.subr.bf16.mxu0 %v11119_v3 }
0x1dd5   :  { %v2715_v22 = vpop.permute.xlu1 %2714 }
0x1dd6   :  { %2718 = vst.msk [vmem:[#allocation5 + $0x50] sm:$0xff] %vm393_vm2, %v2715_v22  ;;  %9777 = vmatmul.mubr.msk.f32.vlgmr.msra.gmra.mrb[22].mxu1 %vm393_vm2, %v2715_v22 }
0x1dd7   :  { %10328 = vmatpush3.bf16.msra.mxu0 %v11242_v13  ;;  %10331 = vmatpush3.bf16.msra.mxu1 %v11226_v8 }
0x1dd8   :  { %10332 = vmatprep.subr.bf16.mxu1 %v11119_v3  ;;  %9798 = vmatprep.mubr.msk.f32.mxu1 %vm11120_vm0, %v11121_v9 }
0x1dd9   :  { %10335 = vmatprep.subr.bf16.mxu0 %v11119_v3 }
0x1ddb   :  { %10334 = vmatpush3.bf16.msra.mxu1 %v11246_v15 }
0x1ddc   :  { %10341 = vmatprep.subr.bf16.mxu1 %v11119_v3 }
0x1de2   :  { %v140_v24 = vpop.permute.xlu0 %139 }
0x1de3   :  { %v179_v19 = vmul.f32 %v11623_v42, %v140_v24 }
0x1de5   :  { %v201_v26 = vadd.f32 %v11629_v44, %v179_v19 }
0x1de6   :  { %v285_v28 = vpop.permute.xlu1 %284 }
0x1de7   :  { %218 = vst.msk [vmem:[#allocation2 + $0x58] sm:$0xff] %vm206_vm1, %v201_v26  ;;  %v324_v30 = vmul.f32 %v11636_v48, %v285_v28 }
0x1de9   :  { %v346_v25 = vadd.f32 %v11642_v50, %v324_v30 }
0x1deb   :  { %362 = vst.msk [vmem:[#allocation3 + $0x58] sm:$0xff] %vm206_vm1, %v346_v25 }
0x1dee   :  { %v2720_v37 = vld [vmem:[#allocation2 + $0x58] sm:$0xff] }
0x1df2   :  { %v2722_v39 = vld [vmem:[#allocation3 + $0x58] sm:$0xff] }
0x1ea5   :  { %v2791_v32 = vpop.f32.mrb[22].mxu0 }
0x1ea6   :  { %v2792_v33 = vadd.f32 %v11649_v49, %v2791_v32  ;;  %v9767_v34 = vpop.f32.mrb[23].mxu0 }
0x1ea8   :  { %2875 = vrot.lane.b32.xlu0 %v2792_v33, %s11123_s28  ;;  %v2867_v38 = vadd.f32 %v2792_v33, %v2720_v37 }
0x1ea9   :  { %v2863_v31 = vpop.f32.mrb[22].mxu1 }
0x1eaa   :  { %v2864_v35 = vadd.f32 %v11656_v53, %v2863_v31  ;;  %v9778_v36 = vpop.f32.mrb[23].mxu1  ;;  %v8947_v40 = vmul.f32 -1.442695, %v2867_v38 }
0x1eac   :  { %2901 = vrot.lane.b32.xlu1 %v2864_v35, %s11123_s28  ;;  %v2893_v41 = vadd.f32 %v2864_v35, %v2722_v39  ;;  %10635 = vpow2.f32 %v8947_v40 }
0x1eae   :  { %v8948_v43 = vmul.f32 -1.442695, %v2893_v41 }
0x1eb0   :  { %10637 = vpow2.f32 %v8948_v43 }
0x1eb6   :  { %v10636_v46 = vpop.eup %10635 }
0x1eb7   :  { %v2871_v47 = vadd.f32 1.0, %v10636_v46 }
0x1eb9   :  { %10639 = vrcp.f32 %v2871_v47 }
0x1eba   :  { %v10638_v45 = vpop.eup %10637 }
0x1ebb   :  { %v2897_v51 = vadd.f32 1.0, %v10638_v45 }
0x1ebd   :  { %10641 = vrcp.f32 %v2897_v51 }
0x1ec3   :  { %v10640_v52 = vpop.eup %10639 }
0x1ec4   :  { %v2885_v0 = vsub.f32 1.0, %v10640_v52  ;;  %v2891_v61 = vmul.f32 %v10640_v52, %v11803_v6  ;;  %v76_v6 = vld [vmem:[%s13366_s1 + $0x60] sm:$0xff] }
0x1ec7   :  { %v10642_v56 = vpop.eup %10641 }
0x1ec8   :  { %v2911_v2 = vsub.f32 1.0, %v10642_v56  ;;  %v2917_v5 = vmul.f32 %v10642_v56, %v11811_v16 }
0x1f1a   :  { %v2876_v54 = vpop.permute.xlu0 %2875 }
0x1f1b   :  { %v2878_v55 = vmul.f32 %v10640_v52, %v2876_v54 }
0x1f1d   :  { %2880 = vrot.lane.b32.xlu0 %v2878_v55, %s11123_s28 }
0x1f1e   :  { %v2902_v58 = vpop.permute.xlu1 %2901 }
0x1f1f   :  { %v2904_v59 = vmul.f32 %v10642_v56, %v2902_v58 }
0x1f21   :  { %2906 = vrot.lane.b32.xlu1 %v2904_v59, %s11123_s28 }
0x1f8f   :  { %v2881_v60 = vpop.permute.xlu0 %2880 }
0x1f90   :  { %v2883_v57 = vadd.f32 %v2881_v60, %v2720_v37 }
0x1f92   :  { %10643 = vtanh.f32 %v2883_v57 }
0x1f93   :  { %v2907_v17 = vpop.permute.xlu1 %2906 }
0x1f94   :  { %v2909_v62 = vadd.f32 %v2907_v17, %v2722_v39 }
0x1f96   :  { %10645 = vtanh.f32 %v2909_v62 }
0x1f9c   :  { %v10644_v18 = vpop.eup %10643 }
0x1f9d   :  { %2887 = vrot.lane.b32.xlu0 %v10644_v18, %s11124_s29 }
0x1fa0   :  { %v10646_v63 = vpop.eup %10645 }
0x1fa1   :  { %2913 = vrot.lane.b32.xlu1 %v10646_v63, %s11124_s29 }
0x200f   :  { %v2888_v21 = vpop.permute.xlu0 %2887 }
0x2010   :  { %v2890_v23 = vmul.f32 %v2888_v21, %v2885_v0 }
0x2012   :  { %v11849_v1 = vadd.f32 %v2891_v61, %v2890_v23 }
0x2013   :  { %v2914_v27 = vpop.permute.xlu1 %2913 }
0x2014   :  { %v2916_v7 = vmul.f32 %v2914_v27, %v2911_v2  ;;  %2920 = vrot.lane.b32.xlu0 %v11849_v1, %s11124_s29  ;;  %v61_v27 = vld [vmem:[%s13365_s0 + $0x68] sm:$0xff] }
0x2016   :  { %v11857_v10 = vadd.f32 %v2917_v5, %v2916_v7 }
0x2018   :  { %2926 = vrot.lane.b32.xlu1 %v11857_v10, %s11124_s29  ;;  %144 = vperm.xlu0 %10501, %v60_v29  }
0x201c   :  { %289 = vperm.xlu1 %10502, %v76_v6  }
0x2086   :  { %v2921_v12 = vpop.permute.xlu0 %2920 }
0x2087   :  { %2924 = vst.msk [vmem:[#allocation4 + $0x58] sm:$0xff] %vm393_vm2, %v2921_v12  ;;  %9788 = vmatmul.mubr.msk.f32.vlgmr.msra.gmra.mrb[24].mxu0 %vm393_vm2, %v2921_v12 }
0x2088   :  { %10337 = vmatpush3.bf16.msra.mxu0 %v11214_v4  ;;  %9809 = vmatprep.mubr.msk.f32.mxu0 %vm11120_vm0, %v11121_v9 }
0x2089   :  { %10338 = vmatprep.subr.bf16.mxu0 %v11119_v3 }
0x208a   :  { %v2927_v14 = vpop.permute.xlu1 %2926 }
0x208b   :  { %2930 = vst.msk [vmem:[#allocation5 + $0x58] sm:$0xff] %vm393_vm2, %v2927_v14  ;;  %9799 = vmatmul.mubr.msk.f32.vlgmr.msra.gmra.mrb[24].mxu1 %vm393_vm2, %v2927_v14 }
0x208c   :  { %10340 = vmatpush3.bf16.msra.mxu0 %v11242_v13  ;;  %10343 = vmatpush3.bf16.msra.mxu1 %v11226_v8 }
0x208d   :  { %10344 = vmatprep.subr.bf16.mxu1 %v11119_v3  ;;  %9820 = vmatprep.mubr.msk.f32.mxu1 %vm11120_vm0, %v11121_v9 }
0x208e   :  { %10347 = vmatprep.subr.bf16.mxu0 %v11119_v3 }
0x2090   :  { %10346 = vmatpush3.bf16.msra.mxu1 %v11246_v15 }
0x2091   :  { %10353 = vmatprep.subr.bf16.mxu1 %v11119_v3 }
0x2097   :  { %v145_v16 = vpop.permute.xlu0 %144 }
0x2098   :  { %v180_v11 = vmul.f32 %v11623_v42, %v145_v16 }
0x209a   :  { %v202_v20 = vadd.f32 %v11629_v44, %v180_v11 }
0x209b   :  { %v290_v22 = vpop.permute.xlu1 %289 }
0x209c   :  { %219 = vst.msk [vmem:[#allocation2 + $0x60] sm:$0xff] %vm206_vm1, %v202_v20  ;;  %v325_v24 = vmul.f32 %v11636_v48, %v290_v22 }
0x209e   :  { %v347_v19 = vadd.f32 %v11642_v50, %v325_v24 }
0x20a0   :  { %363 = vst.msk [vmem:[#allocation3 + $0x60] sm:$0xff] %vm206_vm1, %v347_v19 }
0x20a3   :  { %v2932_v34 = vld [vmem:[#allocation2 + $0x60] sm:$0xff] }
0x20a7   :  { %v2934_v35 = vld [vmem:[#allocation3 + $0x60] sm:$0xff] }
0x215a   :  { %v3003_v26 = vpop.f32.mrb[24].mxu0 }
0x215b   :  { %v3004_v28 = vadd.f32 %v11649_v49, %v3003_v26  ;;  %v9789_v30 = vpop.f32.mrb[25].mxu0 }
0x215d   :  { %3087 = vrot.lane.b32.xlu0 %v3004_v28, %s11123_s28  ;;  %v3079_v31 = vadd.f32 %v3004_v28, %v2932_v34 }
0x215e   :  { %v3075_v25 = vpop.f32.mrb[24].mxu1 }
0x215f   :  { %v3076_v32 = vadd.f32 %v11656_v53, %v3075_v25  ;;  %v9800_v33 = vpop.f32.mrb[25].mxu1  ;;  %v8951_v36 = vmul.f32 -1.442695, %v3079_v31 }
0x2161   :  { %3113 = vrot.lane.b32.xlu1 %v3076_v32, %s11123_s28  ;;  %v3105_v37 = vadd.f32 %v3076_v32, %v2934_v35  ;;  %10647 = vpow2.f32 %v8951_v36 }
0x2163   :  { %v8952_v38 = vmul.f32 -1.442695, %v3105_v37 }
0x2165   :  { %10649 = vpow2.f32 %v8952_v38 }
0x216b   :  { %v10648_v39 = vpop.eup %10647 }
0x216c   :  { %v3083_v40 = vadd.f32 1.0, %v10648_v39 }
0x216e   :  { %10651 = vrcp.f32 %v3083_v40 }
0x216f   :  { %v10650_v41 = vpop.eup %10649 }
0x2170   :  { %v3109_v43 = vadd.f32 1.0, %v10650_v41 }
0x2172   :  { %10653 = vrcp.f32 %v3109_v43 }
0x2178   :  { %v10652_v46 = vpop.eup %10651 }
0x2179   :  { %v3097_v17 = vsub.f32 1.0, %v10652_v46  ;;  %v3103_v18 = vmul.f32 %v10652_v46, %v11849_v1  ;;  %v77_v1 = vld [vmem:[%s13366_s1 + $0x68] sm:$0xff] }
0x217c   :  { %v10654_v51 = vpop.eup %10653 }
0x217d   :  { %v3123_v21 = vsub.f32 1.0, %v10654_v51  ;;  %v3129_v23 = vmul.f32 %v10654_v51, %v11857_v10 }
0x21cf   :  { %v3088_v47 = vpop.permute.xlu0 %3087 }
0x21d0   :  { %v3090_v45 = vmul.f32 %v10652_v46, %v3088_v47 }
0x21d2   :  { %3092 = vrot.lane.b32.xlu0 %v3090_v45, %s11123_s28 }
0x21d3   :  { %v3114_v52 = vpop.permute.xlu1 %3113 }
0x21d4   :  { %v3116_v54 = vmul.f32 %v10654_v51, %v3114_v52 }
0x21d6   :  { %3118 = vrot.lane.b32.xlu1 %v3116_v54, %s11123_s28 }
0x2244   :  { %v3093_v55 = vpop.permute.xlu0 %3092 }
0x2245   :  { %v3095_v56 = vadd.f32 %v3093_v55, %v2932_v34 }
0x2247   :  { %10655 = vtanh.f32 %v3095_v56 }
0x2248   :  { %v3119_v58 = vpop.permute.xlu1 %3118 }
0x2249   :  { %v3121_v59 = vadd.f32 %v3119_v58, %v2934_v35 }
0x224b   :  { %10657 = vtanh.f32 %v3121_v59 }
0x2251   :  { %v10656_v60 = vpop.eup %10655 }
0x2252   :  { %3099 = vrot.lane.b32.xlu0 %v10656_v60, %s11124_s29 }
0x2255   :  { %v10658_v57 = vpop.eup %10657 }
0x2256   :  { %3125 = vrot.lane.b32.xlu1 %v10658_v57, %s11124_s29  ;;  %v62_v57 = vld [vmem:[%s13365_s0 + $0x70] sm:$0xff] }
0x22c4   :  { %v3100_v62 = vpop.permute.xlu0 %3099 }
0x22c5   :  { %v3102_v63 = vmul.f32 %v3100_v62, %v3097_v17  ;;  %v78_v62 = vld [vmem:[%s13366_s1 + $0x70] sm:$0xff] }
0x22c7   :  { %v11895_v0 = vadd.f32 %v3103_v18, %v3102_v63 }
0x22c8   :  { %v3126_v61 = vpop.permute.xlu1 %3125 }
0x22c9   :  { %v3128_v2 = vmul.f32 %v3126_v61, %v3123_v21  ;;  %3132 = vrot.lane.b32.xlu0 %v11895_v0, %s11124_s29 }
0x22cb   :  { %v11903_v5 = vadd.f32 %v3129_v23, %v3128_v2  ;;  %v11992_v23 = vld [vmem:[%s13369_s4 + $0x1] ss:$0 sm:$0xff] }
0x22cd   :  { %3138 = vrot.lane.b32.xlu1 %v11903_v5, %s11124_s29  ;;  %149 = vperm.xlu0 %10501, %v61_v27  }
0x22d1   :  { %294 = vperm.xlu1 %10502, %v77_v1  }
0x233b   :  { %v3133_v7 = vpop.permute.xlu0 %3132 }
0x233c   :  { %3136 = vst.msk [vmem:[#allocation4 + $0x60] sm:$0xff] %vm393_vm2, %v3133_v7  ;;  %9810 = vmatmul.mubr.msk.f32.vlgmr.msra.gmra.mrb[26].mxu0 %vm393_vm2, %v3133_v7 }
0x233d   :  { %10349 = vmatpush3.bf16.msra.mxu0 %v11214_v4  ;;  %9831 = vmatprep.mubr.msk.f32.mxu0 %vm11120_vm0, %v11121_v9 }
0x233e   :  { %10350 = vmatprep.subr.bf16.mxu0 %v11119_v3 }
0x233f   :  { %v3139_v29 = vpop.permute.xlu1 %3138 }
0x2340   :  { %3142 = vst.msk [vmem:[#allocation5 + $0x60] sm:$0xff] %vm393_vm2, %v3139_v29  ;;  %9821 = vmatmul.mubr.msk.f32.vlgmr.msra.gmra.mrb[26].mxu1 %vm393_vm2, %v3139_v29 }
0x2341   :  { %10352 = vmatpush3.bf16.msra.mxu0 %v11242_v13  ;;  %10355 = vmatpush3.bf16.msra.mxu1 %v11226_v8 }
0x2342   :  { %10356 = vmatprep.subr.bf16.mxu1 %v11119_v3  ;;  %9842 = vmatprep.mubr.msk.f32.mxu1 %vm11120_vm0, %v11121_v9 }
0x2343   :  { %10359 = vmatprep.subr.bf16.mxu0 %v11119_v3 }
0x2345   :  { %10358 = vmatpush3.bf16.msra.mxu1 %v11246_v15 }
0x2346   :  { %10365 = vmatprep.subr.bf16.mxu1 %v11119_v3 }
0x234c   :  { %v150_v10 = vpop.permute.xlu0 %149 }
0x234d   :  { %v181_v6 = vmul.f32 %v11623_v42, %v150_v10  ;;  %v12006_v10 = vld [vmem:[%s13370_s5 + $0x1] ss:$0 sm:$0xff] }
0x234f   :  { %v203_v12 = vadd.f32 %v11629_v44, %v181_v6 }
0x2350   :  { %v295_v14 = vpop.permute.xlu1 %294 }
0x2351   :  { %220 = vst.msk [vmem:[#allocation2 + $0x68] sm:$0xff] %vm206_vm1, %v203_v12  ;;  %v326_v16 = vmul.f32 %v11636_v48, %v295_v14 }
0x2353   :  { %v348_v11 = vadd.f32 %v11642_v50, %v326_v16 }
0x2355   :  { %364 = vst.msk [vmem:[#allocation3 + $0x68] sm:$0xff] %vm206_vm1, %v348_v11 }
0x2358   :  { %v3144_v44 = vld [vmem:[#allocation2 + $0x68] sm:$0xff] }
0x235c   :  { %v3146_v30 = vld [vmem:[#allocation3 + $0x68] sm:$0xff] }
0x240f   :  { %v3215_v20 = vpop.f32.mrb[26].mxu0 }
0x2410   :  { %v3216_v22 = vadd.f32 %v11649_v49, %v3215_v20  ;;  %v9811_v24 = vpop.f32.mrb[27].mxu0 }
0x2412   :  { %3299 = vrot.lane.b32.xlu0 %v3216_v22, %s11123_s28  ;;  %v3291_v28 = vadd.f32 %v3216_v22, %v3144_v44 }
0x2413   :  { %v3287_v19 = vpop.f32.mrb[26].mxu1 }
0x2414   :  { %v3288_v42 = vadd.f32 %v11656_v53, %v3287_v19  ;;  %v9822_v26 = vpop.f32.mrb[27].mxu1  ;;  %v8955_v48 = vmul.f32 -1.442695, %v3291_v28 }
0x2416   :  { %3325 = vrot.lane.b32.xlu1 %v3288_v42, %s11123_s28  ;;  %v3317_v25 = vadd.f32 %v3288_v42, %v3146_v30  ;;  %10659 = vpow2.f32 %v8955_v48 }
0x2418   :  { %v8956_v50 = vmul.f32 -1.442695, %v3317_v25 }
0x241a   :  { %10661 = vpow2.f32 %v8956_v50 }
0x2420   :  { %v10660_v32 = vpop.eup %10659 }
0x2421   :  { %v3295_v33 = vadd.f32 1.0, %v10660_v32 }
0x2423   :  { %10663 = vrcp.f32 %v3295_v33 }
0x2424   :  { %v10662_v49 = vpop.eup %10661 }
0x2425   :  { %v3321_v34 = vadd.f32 1.0, %v10662_v49 }
0x2427   :  { %10665 = vrcp.f32 %v3321_v34 }
0x242d   :  { %v10664_v31 = vpop.eup %10663 }
0x242e   :  { %v3309_v45 = vsub.f32 1.0, %v10664_v31  ;;  %v3315_v52 = vmul.f32 %v10664_v31, %v11895_v0  ;;  %v11973_v0 = vld [vmem:[%s13367_s2] ss:$0 sm:$0xff] }
0x2431   :  { %v10666_v36 = vpop.eup %10665 }
0x2432   :  { %v3335_v56 = vsub.f32 1.0, %v10666_v36  ;;  %v3341_v59 = vmul.f32 %v10666_v36, %v11903_v5  ;;  %v11999_v5 = vld [vmem:[%s13370_s5] ss:$0 sm:$0xff] }
0x2484   :  { %v3300_v35 = vpop.permute.xlu0 %3299 }
0x2485   :  { %v3302_v53 = vmul.f32 %v10664_v31, %v3300_v35 }
0x2487   :  { %3304 = vrot.lane.b32.xlu0 %v3302_v53, %s11123_s28  ;;  %v3811_v53 = vld [vmem:[%s13371_s6] sm:$0xff] }
0x2488   :  { %v3326_v37 = vpop.permute.xlu1 %3325 }
0x2489   :  { %v3328_v38 = vmul.f32 %v10666_v36, %v3326_v37  ;;  %v3812_v36 = vld [vmem:[%s13371_s6 + $0x8] sm:$0xff] }
0x248a   :  { %v10371_v37 = vpack.c.bf16 %v3812_v36, %v3811_v53 }
0x248b   :  { %3330 = vrot.lane.b32.xlu1 %v3328_v38, %s11123_s28 }
0x24f9   :  { %v3305_v39 = vpop.permute.xlu0 %3304 }
0x24fa   :  { %v3307_v40 = vadd.f32 %v3305_v39, %v3144_v44  ;;  %v8982_v39 = vld [vmem:[%s13371_s6 + $0x20] sm:$0xff] }
0x24fc   :  { %10667 = vtanh.f32 %v3307_v40  ;;  %v8983_v40 = vld [vmem:[%s13371_s6 + $0x28] sm:$0xff] }
0x24fd   :  { %v3331_v41 = vpop.permute.xlu1 %3330 }
0x24fe   :  { %v3333_v43 = vadd.f32 %v3331_v41, %v3146_v30  ;;  %v10379_v41 = vpack.c.bf16 %v8983_v40, %v8982_v39 }
0x2500   :  { %10669 = vtanh.f32 %v3333_v43 }
0x2506   :  { %v10668_v46 = vpop.eup %10667 }
0x2507   :  { %3311 = vrot.lane.b32.xlu0 %v10668_v46, %s11124_s29 }
0x250a   :  { %v10670_v47 = vpop.eup %10669 }
0x250b   :  { %3337 = vrot.lane.b32.xlu1 %v10670_v47, %s11124_s29 }
0x2579   :  { %v3312_v51 = vpop.permute.xlu0 %3311 }
0x257a   :  { %v3314_v54 = vmul.f32 %v3312_v51, %v3309_v45 }
0x257c   :  { %v11941_v55 = vadd.f32 %v3315_v52, %v3314_v54 }
0x257d   :  { %v3338_v58 = vpop.permute.xlu1 %3337 }
0x257e   :  { %v3340_v60 = vmul.f32 %v3338_v58, %v3335_v56  ;;  %3344 = vrot.lane.b32.xlu0 %v11941_v55, %s11124_s29 }
0x2580   :  { %v11949_v17 = vadd.f32 %v3341_v59, %v3340_v60  ;;  %v63_v59 = vld [vmem:[%s13365_s0 + $0x78] sm:$0xff] }
0x2582   :  { %3350 = vrot.lane.b32.xlu1 %v11949_v17, %s11124_s29  ;;  %154 = vperm.xlu0 %10501, %v62_v57   ;;  %v3813_v57 = vld [vmem:[%s13371_s6 + $0x10] sm:$0xff] }
0x2586   :  { %299 = vperm.xlu1 %10502, %v78_v62  }
0x25f0   :  { %v3345_v18 = vpop.permute.xlu0 %3344 }
0x25f1   :  { %3348 = vst.msk [vmem:[#allocation4 + $0x68] sm:$0xff] %vm393_vm2, %v3345_v18  ;;  %9832 = vmatmul.mubr.msk.f32.vlgmr.msra.gmra.mrb[28].mxu0 %vm393_vm2, %v3345_v18 }
0x25f2   :  { %10361 = vmatpush3.bf16.msra.mxu0 %v11214_v4  ;;  %9853 = vmatprep.mubr.msk.f32.mxu0 %vm11120_vm0, %v11121_v9 }
0x25f3   :  { %10362 = vmatprep.subr.bf16.mxu0 %v11119_v3 }
0x25f4   :  { %v3351_v63 = vpop.permute.xlu1 %3350 }
0x25f5   :  { %3354 = vst.msk [vmem:[#allocation5 + $0x68] sm:$0xff] %vm393_vm2, %v3351_v63  ;;  %9843 = vmatmul.mubr.msk.f32.vlgmr.msra.gmra.mrb[28].mxu1 %vm393_vm2, %v3351_v63  ;;  %v8984_v63 = vld [vmem:[%s13371_s6 + $0x30] sm:$0xff] }
0x25f6   :  { %10364 = vmatpush3.bf16.msra.mxu0 %v11242_v13  ;;  %10367 = vmatpush3.bf16.msra.mxu1 %v11226_v8  ;;  %v11979_v13 = vld [vmem:[%s13369_s4] ss:$0 sm:$0xff] }
0x25f7   :  { %10368 = vmatprep.subr.bf16.mxu1 %v11119_v3  ;;  %9864 = vmatprep.mubr.msk.f32.mxu1 %vm11120_vm0, %v11121_v9 }
0x25f8   :  { %10372 = vmatprep.subr.bf16.mxu0 %v10371_v37 }
0x25fa   :  { %10370 = vmatpush3.bf16.msra.mxu1 %v11246_v15  ;;  %v11986_v15 = vld [vmem:[%s13367_s2 + $0x1] ss:$0 sm:$0xff] }
0x25fb   :  { %10380 = vmatprep.subr.bf16.mxu1 %v10379_v41 }
0x25fc   :  { %v3808_v53 = vld [vmem:[#allocation5 + $0x68] sm:$0xff] }
0x2601   :  { %v155_v4 = vpop.permute.xlu0 %154 }
0x2602   :  { %v182_v21 = vmul.f32 %v11973_v0, %v155_v4  ;;  %v8985_v4 = vld [vmem:[%s13371_s6 + $0x38] sm:$0xff] }
0x2604   :  { %v204_v3 = vadd.f32 %v11979_v13, %v182_v21  ;;  %v3779_v21 = vld [vmem:[#allocation4] sm:$0xff] }
0x2605   :  { %v300_v8 = vpop.permute.xlu1 %299 }
0x2606   :  { %221 = vst.msk [vmem:[#allocation2 + $0x70] sm:$0xff] %vm206_vm1, %v204_v3  ;;  %v327_v61 = vmul.f32 %v11986_v15, %v300_v8  ;;  %v10383_v3 = vpack.c.bf16 %v8985_v4, %v8984_v63 }
0x2608   :  { %v349_v2 = vadd.f32 %v11992_v23, %v327_v61  ;;  %v3795_v61 = vld [vmem:[#allocation5] sm:$0xff] }
0x260a   :  { %365 = vst.msk [vmem:[#allocation3 + $0x70] sm:$0xff] %vm206_vm1, %v349_v2  ;;  %v3780_v2 = vld [vmem:[#allocation4 + $0x8] sm:$0xff] }
0x260d   :  { %v3356_v14 = vld [vmem:[#allocation2 + $0x70] sm:$0xff] }
0x2611   :  { %v3358_v11 = vld [vmem:[#allocation3 + $0x70] sm:$0xff] }
0x26c4   :  { %v3427_v27 = vpop.f32.mrb[28].mxu0 }
0x26c5   :  { %v3428_v1 = vadd.f32 %v11999_v5, %v3427_v27  ;;  %v9833_v7 = vpop.f32.mrb[29].mxu0  ;;  %v3781_v27 = vld [vmem:[#allocation4 + $0x10] sm:$0xff] }
0x26c6   :  { %v3796_v7 = vld [vmem:[#allocation5 + $0x8] sm:$0xff] }
0x26c7   :  { %3511 = vrot.lane.b32.xlu0 %v3428_v1, %s11123_s28  ;;  %v3503_v16 = vadd.f32 %v3428_v1, %v3356_v14  ;;  %v3782_v1 = vld [vmem:[#allocation4 + $0x18] sm:$0xff] }
0x26c8   :  { %v3499_v29 = vpop.f32.mrb[28].mxu1 }
0x26c9   :  { %v3500_v6 = vadd.f32 %v12006_v10, %v3499_v29  ;;  %v9844_v12 = vpop.f32.mrb[29].mxu1  ;;  %v8959_v20 = vmul.f32 -1.442695, %v3503_v16  ;;  %v3783_v29 = vld [vmem:[#allocation4 + $0x20] sm:$0xff]  ;;  %v3785_v16 = vld [vmem:[#allocation4 + $0x30] sm:$0xff] }
0x26ca   :  { %v3784_v12 = vld [vmem:[#allocation4 + $0x28] sm:$0xff] }
0x26cb   :  { %3537 = vrot.lane.b32.xlu1 %v3500_v6, %s11123_s28  ;;  %v3529_v22 = vadd.f32 %v3500_v6, %v3358_v11  ;;  %10671 = vpow2.f32 %v8959_v20  ;;  %v3797_v6 = vld [vmem:[#allocation5 + $0x10] sm:$0xff] }
0x26cd   :  { %v8960_v24 = vmul.f32 -1.442695, %v3529_v22 }
0x26cf   :  { %10673 = vpow2.f32 %v8960_v24 }
0x26d5   :  { %v10672_v19 = vpop.eup %10671 }
0x26d6   :  { %v3507_v42 = vadd.f32 1.0, %v10672_v19  ;;  %v3786_v19 = vld [vmem:[#allocation4 + $0x38] sm:$0xff] }
0x26d8   :  { %10675 = vrcp.f32 %v3507_v42  ;;  %v3800_v42 = vld [vmem:[#allocation5 + $0x28] sm:$0xff] }
0x26d9   :  { %v10674_v26 = vpop.eup %10673 }
0x26da   :  { %v3533_v44 = vadd.f32 1.0, %v10674_v26  ;;  %v3801_v26 = vld [vmem:[#allocation5 + $0x30] sm:$0xff] }
0x26dc   :  { %10677 = vrcp.f32 %v3533_v44 }
0x26e2   :  { %v10676_v28 = vpop.eup %10675 }
0x26e3   :  { %v3521_v43 = vsub.f32 1.0, %v10676_v28  ;;  %v3527_v47 = vmul.f32 %v10676_v28, %v11941_v55  ;;  %v79_v55 = vld [vmem:[%s13366_s1 + $0x78] sm:$0xff] }
0x26e6   :  { %v10678_v25 = vpop.eup %10677 }
0x26e7   :  { %v3547_v52 = vsub.f32 1.0, %v10678_v25  ;;  %v3553_v56 = vmul.f32 %v10678_v25, %v11949_v17  ;;  %v3814_v17 = vld [vmem:[%s13371_s6 + $0x18] sm:$0xff] }
0x26e8   :  { %v10375_v62 = vpack.c.bf16 %v3814_v17, %v3813_v57 }
0x2739   :  { %v3512_v30 = vpop.permute.xlu0 %3511 }
0x273a   :  { %v3514_v48 = vmul.f32 %v10676_v28, %v3512_v30  ;;  %v3787_v28 = vld [vmem:[#allocation4 + $0x40] sm:$0xff] }
0x273c   :  { %3516 = vrot.lane.b32.xlu0 %v3514_v48, %s11123_s28  ;;  %v3802_v48 = vld [vmem:[#allocation5 + $0x38] sm:$0xff] }
0x273d   :  { %v3538_v50 = vpop.permute.xlu1 %3537 }
0x273e   :  { %v3540_v32 = vmul.f32 %v10678_v25, %v3538_v50  ;;  %v3789_v25 = vld [vmem:[#allocation4 + $0x50] sm:$0xff]  ;;  %v3803_v50 = vld [vmem:[#allocation5 + $0x40] sm:$0xff] }
0x2740   :  { %3542 = vrot.lane.b32.xlu1 %v3540_v32, %s11123_s28  ;;  %v3790_v32 = vld [vmem:[#allocation4 + $0x58] sm:$0xff] }
0x27ae   :  { %v3517_v33 = vpop.permute.xlu0 %3516 }
0x27af   :  { %v3519_v49 = vadd.f32 %v3517_v33, %v3356_v14  ;;  %v3798_v14 = vld [vmem:[#allocation5 + $0x18] sm:$0xff]  ;;  %v3805_v33 = vld [vmem:[#allocation5 + $0x50] sm:$0xff] }
0x27b1   :  { %10679 = vtanh.f32 %v3519_v49  ;;  %v3792_v49 = vld [vmem:[#allocation4 + $0x68] sm:$0xff] }
0x27b2   :  { %v3543_v34 = vpop.permute.xlu1 %3542 }
0x27b3   :  { %v3545_v31 = vadd.f32 %v3543_v34, %v3358_v11  ;;  %v3799_v11 = vld [vmem:[#allocation5 + $0x20] sm:$0xff]  ;;  %v3806_v34 = vld [vmem:[#allocation5 + $0x58] sm:$0xff] }
0x27b5   :  { %10681 = vtanh.f32 %v3545_v31 }
0x27bb   :  { %v10680_v35 = vpop.eup %10679 }
0x27bc   :  { %3523 = vrot.lane.b32.xlu0 %v10680_v35, %s11124_s29  ;;  %v3807_v35 = vld [vmem:[#allocation5 + $0x60] sm:$0xff] }
0x27bf   :  { %v10682_v38 = vpop.eup %10681 }
0x27c0   :  { %3549 = vrot.lane.b32.xlu1 %v10682_v38, %s11124_s29 }
0x282e   :  { %v3524_v46 = vpop.permute.xlu0 %3523 }
0x282f   :  { %v3526_v45 = vmul.f32 %v3524_v46, %v3521_v43  ;;  %v12105_v46 = vld [vmem:[%s13373_s8] ss:$0 sm:$0xff] }
0x2831   :  { %v12027_v51 = vadd.f32 %v3527_v47, %v3526_v45 }
0x2832   :  { %v3550_v54 = vpop.permute.xlu1 %3549 }
0x2833   :  { %v3552_v58 = vmul.f32 %v3550_v54, %v3547_v52  ;;  %3556 = vrot.lane.b32.xlu0 %v12027_v51, %s11124_s29 }
0x2835   :  { %v12035_v60 = vadd.f32 %v3553_v56, %v3552_v58 }
0x2837   :  { %3562 = vrot.lane.b32.xlu1 %v12035_v60, %s11124_s29  ;;  %159 = vperm.xlu0 %10501, %v63_v59  }
0x283b   :  { %304 = vperm.xlu1 %10502, %v79_v55  }
0x28a5   :  { %v3557_v18 = vpop.permute.xlu0 %3556 }
0x28a6   :  { %3560 = vst.msk [vmem:[#allocation4 + $0x70] sm:$0xff] %vm393_vm2, %v3557_v18  ;;  %9854 = vmatmul.mubr.msk.f32.vlgmr.msra.gmra.mrb[30].mxu0 %vm393_vm2, %v3557_v18 }
0x28a7   :  { %10374 = vmatpush3.bf16.msra.mxu0 %v10371_v37  ;;  %9875 = vmatprep.mubr.msk.f32.mxu0 %vm393_vm2, %v3779_v21 }
0x28a8   :  { %10376 = vmatprep.subr.bf16.mxu0 %v10375_v62 }
0x28a9   :  { %v3563_v8 = vpop.permute.xlu1 %3562 }
0x28aa   :  { %3566 = vst.msk [vmem:[#allocation5 + $0x70] sm:$0xff] %vm393_vm2, %v3563_v8  ;;  %9865 = vmatmul.mubr.msk.f32.vlgmr.msra.gmra.mrb[30].mxu1 %vm393_vm2, %v3563_v8 }
0x28ab   :  { %10378 = vmatpush3.bf16.msra.mxu0 %v10375_v62  ;;  %10382 = vmatpush3.bf16.msra.mxu1 %v10379_v41 }
0x28ac   :  { %9907 = vmatprep.mubr.msk.f32.mxu1 %vm393_vm2, %v3795_v61  ;;  %10384 = vmatprep.subr.bf16.mxu1 %v10383_v3 }
0x28ad   :  { %v3793_v31 = vld [vmem:[#allocation4 + $0x70] sm:$0xff] }
0x28ae   :  { %9876 = vmatmul.mubr.msk.f32.vlgmr.msra.gmra.mrb[32].mxu0 %vm393_vm2, %v3780_v2 }
0x28af   :  { %9878 = vmatprep.mubr.msk.f32.mxu0 %vm393_vm2, %v3781_v27  ;;  %10386 = vmatpush3.bf16.msra.mxu1 %v10383_v3 }
0x28b1   :  { %v3809_v36 = vld [vmem:[#allocation5 + $0x70] sm:$0xff] }
0x28b2   :  { %9879 = vmatmul.mubr.msk.f32.gmra.mrb[34].mxu0 %vm393_vm2, %v3782_v1  ;;  %9908 = vmatmul.mubr.msk.f32.vlgmr.msra.gmra.mrb[32].mxu1 %vm393_vm2, %v3796_v7 }
0x28b3   :  { %9881 = vmatprep.mubr.msk.f32.mxu0 %vm393_vm2, %v3783_v29  ;;  %9910 = vmatprep.mubr.msk.f32.mxu1 %vm393_vm2, %v3797_v6 }
0x28b6   :  { %9882 = vmatmul.mubr.msk.f32.gmra.mrb[36].mxu0 %vm393_vm2, %v3784_v12  ;;  %9911 = vmatmul.mubr.msk.f32.gmra.mrb[34].mxu1 %vm393_vm2, %v3798_v14  ;;  %v160_v20 = vpop.permute.xlu0 %159 }
0x28b7   :  { %9884 = vmatprep.mubr.msk.f32.mxu0 %vm393_vm2, %v3785_v16  ;;  %9913 = vmatprep.mubr.msk.f32.mxu1 %vm393_vm2, %v3799_v11  ;;  %v183_v22 = vmul.f32 %v11973_v0, %v160_v20 }
0x28b9   :  { %v205_v24 = vadd.f32 %v11979_v13, %v183_v22  ;;  %v3788_v13 = vld [vmem:[#allocation4 + $0x48] sm:$0xff] }
0x28ba   :  { %9885 = vmatmul.mubr.msk.f32.gmra.mrb[38].mxu0 %vm393_vm2, %v3786_v19  ;;  %9914 = vmatmul.mubr.msk.f32.gmra.mrb[36].mxu1 %vm393_vm2, %v3800_v42  ;;  %v305_v44 = vpop.permute.xlu1 %304 }
0x28bb   :  { %222 = vst.msk [vmem:[#allocation2 + $0x78] sm:$0xff] %vm206_vm1, %v205_v24  ;;  %9916 = vmatprep.mubr.msk.f32.mxu1 %vm393_vm2, %v3801_v26  ;;  %v328_v30 = vmul.f32 %v11986_v15, %v305_v44  ;;  %9887 = vmatprep.mubr.msk.f32.mxu0 %vm393_vm2, %v3787_v28  ;;  %v3804_v15 = vld [vmem:[#allocation5 + $0x48] sm:$0xff] }
0x28bd   :  { %v350_v0 = vadd.f32 %v11992_v23, %v328_v30  ;;  %v3791_v23 = vld [vmem:[#allocation4 + $0x60] sm:$0xff] }
0x28be   :  { %9888 = vmatmul.mubr.msk.f32.gmra.mrb[40].mxu0 %vm393_vm2, %v3788_v13  ;;  %9917 = vmatmul.mubr.msk.f32.gmra.mrb[38].mxu1 %vm393_vm2, %v3802_v48 }
0x28bf   :  { %366 = vst.msk [vmem:[#allocation3 + $0x78] sm:$0xff] %vm206_vm1, %v350_v0  ;;  %9890 = vmatprep.mubr.msk.f32.mxu0 %vm393_vm2, %v3789_v25  ;;  %9919 = vmatprep.mubr.msk.f32.mxu1 %vm393_vm2, %v3803_v50 }
0x28c2   :  { %9891 = vmatmul.mubr.msk.f32.gmra.mrb[42].mxu0 %vm393_vm2, %v3790_v32  ;;  %9920 = vmatmul.mubr.msk.f32.gmra.mrb[40].mxu1 %vm393_vm2, %v3804_v15 }
0x28c3   :  { %9893 = vmatprep.mubr.msk.f32.mxu0 %vm393_vm2, %v3791_v23  ;;  %9922 = vmatprep.mubr.msk.f32.mxu1 %vm393_vm2, %v3805_v33 }
0x28c6   :  { %9894 = vmatmul.mubr.msk.f32.gmra.mrb[44].mxu0 %vm393_vm2, %v3792_v49  ;;  %9923 = vmatmul.mubr.msk.f32.gmra.mrb[42].mxu1 %vm393_vm2, %v3806_v34 }
0x28c7   :  { %9896 = vmatprep.mubr.msk.f32.mxu0 %vm393_vm2, %v3793_v31  ;;  %9925 = vmatprep.mubr.msk.f32.mxu1 %vm393_vm2, %v3807_v35 }
0x28ca   :  { %9926 = vmatmul.mubr.msk.f32.gmra.mrb[44].mxu1 %vm393_vm2, %v3808_v53 }
0x28cb   :  { %9928 = vmatprep.mubr.msk.f32.mxu1 %vm393_vm2, %v3809_v36 }
0x2979   :  { %v3639_v37 = vpop.f32.mrb[30].mxu0 }
0x297a   :  { %v12095_v38 = vadd.f32 %v11999_v5, %v3639_v37  ;;  %v9855_v39 = vpop.f32.mrb[31].mxu0 }
0x297c   :  { %3723 = vrot.lane.b32.xlu0 %v12095_v38, %s11123_s28 }
0x297d   :  { %v3711_v40 = vpop.f32.mrb[30].mxu1 }
0x297e   :  { %v12100_v41 = vadd.f32 %v12006_v10, %v3711_v40  ;;  %v9866_v43 = vpop.f32.mrb[31].mxu1  ;;  %v12114_v10 = vld [vmem:[%s13373_s8 + $0x1] ss:$0 sm:$0xff] }
0x297f   :  { %v3568_v43 = vld [vmem:[#allocation2 + $0x78] sm:$0xff] }
0x2980   :  { %3749 = vrot.lane.b32.xlu1 %v12100_v41, %s11123_s28 }
0x2981   :  { %v9877_v47 = vpop.f32.mrb[32].mxu0 }
0x2982   :  { %v3942_v5 = vadd.f32 %v9877_v47, %v12105_v46  ;;  %v3936_v45 = vpop.f32.mrb[33].mxu0  ;;  %v3715_v47 = vadd.f32 %v12095_v38, %v3568_v43 }
0x2983   :  { %v3937_v52 = vadd.f32 %v12105_v46, %v3936_v45 }
0x2984   :  { %4017 = vst.msk [vmem:[#allocation6 + $0x8] sm:$0xff] %vm4015_vm3, %v3942_v5  ;;  %v3570_v5 = vld [vmem:[#allocation3 + $0x78] sm:$0xff]  ;;  %v8963_v45 = vmul.f32 -1.442695, %v3715_v47 }
0x2985   :  { %4016 = vst.msk [vmem:[#allocation6] sm:$0xff] %vm4015_vm3, %v3937_v52  ;;  %v9880_v54 = vpop.f32.mrb[34].mxu0  ;;  %v9909_v56 = vpop.f32.mrb[32].mxu1  ;;  %v3741_v52 = vadd.f32 %v12100_v41, %v3570_v5 }
0x2986   :  { %v3952_v58 = vadd.f32 %v9880_v54, %v12105_v46  ;;  %v4165_v59 = vadd.f32 %v9909_v56, %v12114_v10  ;;  %v3946_v55 = vpop.f32.mrb[35].mxu0  ;;  %v4159_v57 = vpop.f32.mrb[33].mxu1  ;;  %10683 = vpow2.f32 %v8963_v45 }
0x2987   :  { %v3947_v17 = vadd.f32 %v12105_v46, %v3946_v55  ;;  %v4160_v62 = vadd.f32 %v12114_v10, %v4159_v57  ;;  %v8964_v54 = vmul.f32 -1.442695, %v3741_v52 }
0x2988   :  { %4019 = vst.msk [vmem:[#allocation6 + $0x18] sm:$0xff] %vm4015_vm3, %v3952_v58  ;;  %4239 = vst.msk [vmem:[#allocation7 + $0x8] sm:$0xff] %vm4015_vm3, %v4165_v59 }
0x2989   :  { %4018 = vst.msk [vmem:[#allocation6 + $0x10] sm:$0xff] %vm4015_vm3, %v3947_v17  ;;  %4238 = vst.msk [vmem:[#allocation7] sm:$0xff] %vm4015_vm3, %v4160_v62  ;;  %v9883_v18 = vpop.f32.mrb[36].mxu0  ;;  %v9912_v63 = vpop.f32.mrb[34].mxu1  ;;  %10685 = vpow2.f32 %v8964_v54 }
0x298a   :  { %v3962_v4 = vadd.f32 %v9883_v18, %v12105_v46  ;;  %v4175_v21 = vadd.f32 %v9912_v63, %v12114_v10  ;;  %v3956_v3 = vpop.f32.mrb[37].mxu0  ;;  %v4169_v8 = vpop.f32.mrb[35].mxu1 }
0x298b   :  { %v3957_v61 = vadd.f32 %v12105_v46, %v3956_v3  ;;  %v4170_v2 = vadd.f32 %v12114_v10, %v4169_v8  ;;  %v4254_v8 = vld [vmem:[%s13372_s7] sm:$0xff] }
0x298c   :  { %4021 = vst.msk [vmem:[#allocation6 + $0x28] sm:$0xff] %vm4015_vm3, %v3962_v4  ;;  %4241 = vst.msk [vmem:[#allocation7 + $0x18] sm:$0xff] %vm4015_vm3, %v4175_v21 }
0x298d   :  { %4020 = vst.msk [vmem:[#allocation6 + $0x20] sm:$0xff] %vm4015_vm3, %v3957_v61  ;;  %4240 = vst.msk [vmem:[#allocation7 + $0x10] sm:$0xff] %vm4015_vm3, %v4170_v2  ;;  %v9886_v27 = vpop.f32.mrb[38].mxu0  ;;  %v9915_v1 = vpop.f32.mrb[36].mxu1  ;;  %v4255_v61 = vld [vmem:[%s13372_s7 + $0x8] sm:$0xff]  ;;  %v9004_v2 = vld [vmem:[%s13372_s7 + $0x10] sm:$0xff] }
0x298e   :  { %v3972_v7 = vadd.f32 %v9886_v27, %v12105_v46  ;;  %v4185_v29 = vadd.f32 %v9915_v1, %v12114_v10  ;;  %v3966_v6 = vpop.f32.mrb[39].mxu0  ;;  %v4179_v12 = vpop.f32.mrb[37].mxu1  ;;  %v12183_v27 = vpack.c.bf16 %v4255_v61, %v4254_v8  ;;  %v9005_v1 = vld [vmem:[%s13372_s7 + $0x18] sm:$0xff] }
0x298f   :  { %v3967_v14 = vadd.f32 %v12105_v46, %v3966_v6  ;;  %v4180_v16 = vadd.f32 %v12114_v10, %v4179_v12 }
0x2990   :  { %4023 = vst.msk [vmem:[#allocation6 + $0x38] sm:$0xff] %vm4015_vm3, %v3972_v7  ;;  %4243 = vst.msk [vmem:[#allocation7 + $0x28] sm:$0xff] %vm4015_vm3, %v4185_v29  ;;  %v10684_v56 = vpop.eup %10683  ;;  %v12188_v7 = vpack.c.bf16 %v9005_v1, %v9004_v2  ;;  %10388 = vmatprep.subr.bf16.mxu0 %v12183_v27  ;;  %v4276_v54 = vld [vmem:[#allocation7] sm:$0xff] }
0x2991   :  { %4022 = vst.msk [vmem:[#allocation6 + $0x30] sm:$0xff] %vm4015_vm3, %v3967_v14  ;;  %4242 = vst.msk [vmem:[#allocation7 + $0x20] sm:$0xff] %vm4015_vm3, %v4180_v16  ;;  %v9889_v11 = vpop.f32.mrb[40].mxu0  ;;  %v9918_v20 = vpop.f32.mrb[38].mxu1  ;;  %v3719_v58 = vadd.f32 1.0, %v10684_v56  ;;  %10390 = vmatpush3.bf16.msra.mxu0 %v12183_v27 }
0x2992   :  { %v3982_v22 = vadd.f32 %v9889_v11, %v12105_v46  ;;  %v4195_v24 = vadd.f32 %v9918_v20, %v12114_v10  ;;  %v3976_v19 = vpop.f32.mrb[41].mxu0  ;;  %v4189_v42 = vpop.f32.mrb[39].mxu1  ;;  %10392 = vmatprep.subr.bf16.mxu1 %v12188_v7  ;;  %10396 = vmatprep.subr.bf16.mxu0 %v12183_v27 }
0x2993   :  { %v3977_v26 = vadd.f32 %v12105_v46, %v3976_v19  ;;  %v4190_v44 = vadd.f32 %v12114_v10, %v4189_v42  ;;  %v10686_v59 = vpop.eup %10685  ;;  %10687 = vrcp.f32 %v3719_v58  ;;  %10394 = vmatpush3.bf16.msra.mxu1 %v12188_v7 }
0x2994   :  { %4025 = vst.msk [vmem:[#allocation6 + $0x48] sm:$0xff] %vm4015_vm3, %v3982_v22  ;;  %4245 = vst.msk [vmem:[#allocation7 + $0x38] sm:$0xff] %vm4015_vm3, %v4195_v24  ;;  %v3745_v55 = vadd.f32 1.0, %v10686_v59  ;;  %10400 = vmatprep.subr.bf16.mxu1 %v12188_v7 }
0x2995   :  { %4024 = vst.msk [vmem:[#allocation6 + $0x40] sm:$0xff] %vm4015_vm3, %v3977_v26  ;;  %4244 = vst.msk [vmem:[#allocation7 + $0x30] sm:$0xff] %vm4015_vm3, %v4190_v44  ;;  %v9892_v28 = vpop.f32.mrb[42].mxu0  ;;  %v9921_v30 = vpop.f32.mrb[40].mxu1 }
0x2996   :  { %v3992_v0 = vadd.f32 %v9892_v28, %v12105_v46  ;;  %v4205_v13 = vadd.f32 %v9921_v30, %v12114_v10  ;;  %v3986_v48 = vpop.f32.mrb[43].mxu0  ;;  %v4199_v25 = vpop.f32.mrb[41].mxu1  ;;  %10689 = vrcp.f32 %v3745_v55 }
0x2997   :  { %v3987_v50 = vadd.f32 %v12105_v46, %v3986_v48  ;;  %v4200_v32 = vadd.f32 %v12114_v10, %v4199_v25 }
0x2998   :  { %4027 = vst.msk [vmem:[#allocation6 + $0x58] sm:$0xff] %vm4015_vm3, %v3992_v0  ;;  %4247 = vst.msk [vmem:[#allocation7 + $0x48] sm:$0xff] %vm4015_vm3, %v4205_v13 }
0x2999   :  { %4026 = vst.msk [vmem:[#allocation6 + $0x50] sm:$0xff] %vm4015_vm3, %v3987_v50  ;;  %4246 = vst.msk [vmem:[#allocation7 + $0x40] sm:$0xff] %vm4015_vm3, %v4200_v32  ;;  %v9895_v15 = vpop.f32.mrb[44].mxu0  ;;  %v9924_v23 = vpop.f32.mrb[42].mxu1  ;;  %v12220_v50 = vld [vmem:[%s13374_s9] ss:$0 sm:$0xff] }
0x299a   :  { %v4002_v33 = vadd.f32 %v9895_v15, %v12105_v46  ;;  %v4215_v49 = vadd.f32 %v9924_v23, %v12114_v10  ;;  %v3996_v34 = vpop.f32.mrb[45].mxu0  ;;  %v4209_v31 = vpop.f32.mrb[43].mxu1 }
0x299b   :  { %v3997_v35 = vadd.f32 %v12105_v46, %v3996_v34  ;;  %v4210_v53 = vadd.f32 %v12114_v10, %v4209_v31 }
0x299c   :  { %4029 = vst.msk [vmem:[#allocation6 + $0x68] sm:$0xff] %vm4015_vm3, %v4002_v33  ;;  %4249 = vst.msk [vmem:[#allocation7 + $0x58] sm:$0xff] %vm4015_vm3, %v4215_v49 }
0x299d   :  { %4028 = vst.msk [vmem:[#allocation6 + $0x60] sm:$0xff] %vm4015_vm3, %v3997_v35  ;;  %4248 = vst.msk [vmem:[#allocation7 + $0x50] sm:$0xff] %vm4015_vm3, %v4210_v53  ;;  %v9927_v36 = vpop.f32.mrb[44].mxu1  ;;  %v10688_v57 = vpop.eup %10687  ;;  %v12231_v35 = vld [vmem:[%s13374_s9 + $0x1] ss:$0 sm:$0xff] }
0x299e   :  { %v4225_v37 = vadd.f32 %v9927_v36, %v12114_v10  ;;  %v4219_v39 = vpop.f32.mrb[45].mxu1  ;;  %v3733_v12 = vsub.f32 1.0, %v10688_v57  ;;  %v3739_v16 = vmul.f32 %v10688_v57, %v12027_v51 }
0x299f   :  { %v4220_v40 = vadd.f32 %v12114_v10, %v4219_v39  ;;  %v4275_v39 = vld [vmem:[#allocation6 + $0x8] sm:$0xff] }
0x29a0   :  { %4251 = vst.msk [vmem:[#allocation7 + $0x68] sm:$0xff] %vm4015_vm3, %v4225_v37  ;;  %v10690_v18 = vpop.eup %10689 }
0x29a1   :  { %4250 = vst.msk [vmem:[#allocation7 + $0x60] sm:$0xff] %vm4015_vm3, %v4220_v40  ;;  %v3759_v22 = vsub.f32 1.0, %v10690_v18  ;;  %v3765_v19 = vmul.f32 %v10690_v18, %v12035_v60 }
0x29ee   :  { %v3724_v17 = vpop.permute.xlu0 %3723 }
0x29ef   :  { %v3726_v62 = vmul.f32 %v10688_v57, %v3724_v17 }
0x29f1   :  { %3728 = vrot.lane.b32.xlu0 %v3726_v62, %s11123_s28 }
0x29f2   :  { %v3750_v38 = vpop.permute.xlu1 %3749 }
0x29f3   :  { %v3752_v63 = vmul.f32 %v10690_v18, %v3750_v38 }
0x29f5   :  { %3754 = vrot.lane.b32.xlu1 %v3752_v63, %s11123_s28 }
0x2a63   :  { %v3729_v41 = vpop.permute.xlu0 %3728 }
0x2a64   :  { %v3731_v4 = vadd.f32 %v3729_v41, %v3568_v43  ;;  %v4274_v43 = vld [vmem:[#allocation6] sm:$0xff] }
0x2a66   :  { %10691 = vtanh.f32 %v3731_v4 }
0x2a67   :  { %v3755_v21 = vpop.permute.xlu1 %3754 }
0x2a68   :  { %v3757_v3 = vadd.f32 %v3755_v21, %v3570_v5  ;;  %v4277_v5 = vld [vmem:[#allocation7 + $0x8] sm:$0xff] }
0x2a6a   :  { %10693 = vtanh.f32 %v3757_v3 }
0x2a70   :  { %v10692_v29 = vpop.eup %10691 }
0x2a71   :  { %3735 = vrot.lane.b32.xlu0 %v10692_v29, %s11124_s29 }
0x2a74   :  { %v10694_v6 = vpop.eup %10693 }
0x2a75   :  { %3761 = vrot.lane.b32.xlu1 %v10694_v6, %s11124_s29 }
0x2ae3   :  { %v3736_v14 = vpop.permute.xlu0 %3735 }
0x2ae4   :  { %v3738_v11 = vmul.f32 %v3736_v14, %v3733_v12 }
0x2ae6   :  { %v3740_v20 = vadd.f32 %v3739_v16, %v3738_v11 }
0x2ae7   :  { %v3762_v24 = vpop.permute.xlu1 %3761 }
0x2ae8   :  { %v3764_v42 = vmul.f32 %v3762_v24, %v3759_v22  ;;  %3768 = vrot.lane.b32.xlu0 %v3740_v20, %s11124_s29 }
0x2aea   :  { %v3766_v26 = vadd.f32 %v3765_v19, %v3764_v42 }
0x2aec   :  { %3774 = vrot.lane.b32.xlu1 %v3766_v26, %s11124_s29 }
0x2b5a   :  { %v3769_v44 = vpop.permute.xlu0 %3768 }
0x2b5b   :  { %3772 = vst.msk [vmem:[#allocation4 + $0x78] sm:$0xff] %vm393_vm2, %v3769_v44 }
0x2b5e   :  { %v3775_v28 = vpop.permute.xlu1 %3774 }
0x2b5f   :  { %3778 = vst.msk [vmem:[#allocation5 + $0x78] sm:$0xff] %vm393_vm2, %v3775_v28 }
0x2b62   :  { %v3794_v30 = vld [vmem:[#allocation4 + $0x78] sm:$0xff] }
0x2b63   :  { %v8839_v51 = vld [vmem:[#allocation4 + $0x78] sm:$0xff]  ;;  %9897 = vmatmul.mubr.msk.f32.gmra.mrb[46].mxu0 %vm393_vm2, %v3794_v30 }
0x2b64   :  { %8840 = vst.msk [vmem:[#allocation14] sm:$0xff] %vm393_vm2, %v8839_v51  ;;  %9935 = vmatprep.mubr.f32.mxu0 %v11121_v9 }
0x2b66   :  { %v3810_v60 = vld [vmem:[#allocation5 + $0x78] sm:$0xff] }
0x2b67   :  { %9929 = vmatmul.mubr.msk.f32.gmra.mrb[46].mxu1 %vm393_vm2, %v3810_v60  ;;  %9936 = vmatmul.mubr.f32.vlgmr.msra.gmra.mrb[48].mxu0 %v11121_v9 }
0x2b68   :  { %9942 = vmatprep.mubr.f32.mxu1 %v11121_v9  ;;  %10398 = vmatpush3.bf16.msra.mxu0 %v12183_v27 }
0x2b69   :  { %10404 = vmatprep.subr.bf16.mxu0 %v12183_v27 }
0x2b6b   :  { %9943 = vmatmul.mubr.f32.vlgmr.msra.gmra.mrb[48].mxu1 %v11121_v9 }
0x2b6c   :  { %10402 = vmatpush3.bf16.msra.mxu1 %v12188_v7 }
0x2b6d   :  { %10408 = vmatprep.subr.bf16.mxu1 %v12188_v7 }
0x2c36   :  { %v9898_v0 = vpop.f32.mrb[46].mxu0 }
0x2c37   :  { %v4012_v13 = vadd.f32 %v9898_v0, %v12105_v46  ;;  %v4006_v48 = vpop.f32.mrb[47].mxu0 }
0x2c38   :  { %v4007_v25 = vadd.f32 %v12105_v46, %v4006_v48 }
0x2c39   :  { %4031 = vst.msk [vmem:[#allocation6 + $0x78] sm:$0xff] %vm4015_vm3, %v4012_v13 }
0x2c3a   :  { %4030 = vst.msk [vmem:[#allocation6 + $0x70] sm:$0xff] %vm4015_vm3, %v4007_v25  ;;  %v9930_v32 = vpop.f32.mrb[46].mxu1  ;;  %v9937_v15 = vpop.f32.mrb[48].mxu0 }
0x2c3b   :  { %v4235_v23 = vadd.f32 %v9930_v32, %v12114_v10  ;;  %v4353_v33 = vadd.f32 %v9937_v15, %v12220_v50  ;;  %v4229_v49 = vpop.f32.mrb[47].mxu1  ;;  %v4347_v34 = vpop.f32.mrb[49].mxu0 }
0x2c3c   :  { %v4230_v31 = vadd.f32 %v12114_v10, %v4229_v49  ;;  %v4348_v46 = vadd.f32 %v12220_v50, %v4347_v34 }
0x2c3d   :  { %4253 = vst.msk [vmem:[#allocation7 + $0x78] sm:$0xff] %vm4015_vm3, %v4235_v23  ;;  %4449 = vrot.lane.b32.xlu1 %v4353_v33, %s11124_s29  ;;  %v4432_v40 = vadd.f32 %v4353_v33, %v4275_v39 }
0x2c3e   :  { %4252 = vst.msk [vmem:[#allocation7 + $0x70] sm:$0xff] %vm4015_vm3, %v4230_v31  ;;  %v9944_v53 = vpop.f32.mrb[48].mxu1  ;;  %4447 = vrot.lane.b32.xlu0 %v4348_v46, %s11124_s29  ;;  %v4431_v47 = vadd.f32 %v4348_v46, %v4274_v43 }
0x2c3f   :  { %v4428_v36 = vadd.f32 %v9944_v53, %v12231_v35  ;;  %v4422_v37 = vpop.f32.mrb[49].mxu1  ;;  %v9010_v45 = vmul.f32 -1.442695, %v4432_v40 }
0x2c40   :  { %v4423_v10 = vadd.f32 %v12231_v35, %v4422_v37  ;;  %v9009_v56 = vmul.f32 -1.442695, %v4431_v47 }
0x2c41   :  { %4501 = vrot.lane.b32.xlu1 %v4428_v36, %s11124_s29  ;;  %v4484_v52 = vadd.f32 %v4428_v36, %v4277_v5  ;;  %10695 = vpow2.f32 %v9010_v45 }
0x2c42   :  { %4499 = vrot.lane.b32.xlu0 %v4423_v10, %s11124_s29  ;;  %v4483_v58 = vadd.f32 %v4423_v10, %v4276_v54  ;;  %10697 = vpow2.f32 %v9009_v56 }
0x2c43   :  { %v9012_v59 = vmul.f32 -1.442695, %v4484_v52 }
0x2c44   :  { %v9011_v55 = vmul.f32 -1.442695, %v4483_v58 }
0x2c45   :  { %10699 = vpow2.f32 %v9012_v59 }
0x2c46   :  { %10701 = vpow2.f32 %v9011_v55 }
0x2c4b   :  { %v10696_v57 = vpop.eup %10695 }
0x2c4c   :  { %v10698_v17 = vpop.eup %10697  ;;  %v4440_v62 = vadd.f32 1.0, %v10696_v57 }
0x2c4d   :  { %v4439_v38 = vadd.f32 1.0, %v10698_v17 }
0x2c4e   :  { %10703 = vrcp.f32 %v4440_v62 }
0x2c4f   :  { %v10700_v18 = vpop.eup %10699  ;;  %10705 = vrcp.f32 %v4439_v38 }
0x2c50   :  { %v10702_v63 = vpop.eup %10701  ;;  %v4492_v41 = vadd.f32 1.0, %v10700_v18 }
0x2c51   :  { %v4491_v4 = vadd.f32 1.0, %v10702_v63  ;;  %v4557_v63 = vld [vmem:[#allocation6 + $0x18] sm:$0xff] }
0x2c52   :  { %10707 = vrcp.f32 %v4492_v41 }
0x2c53   :  { %10709 = vrcp.f32 %v4491_v4  ;;  %v4556_v4 = vld [vmem:[#allocation6 + $0x10] sm:$0xff] }
0x2c58   :  { %v10704_v21 = vpop.eup %10703 }
0x2c59   :  { %v10706_v8 = vpop.eup %10705  ;;  %v4468_v13 = vsub.f32 1.0, %v10704_v21  ;;  %v4480_v32 = vmul.f32 0.0, %v10704_v21 }
0x2c5a   :  { %v4467_v25 = vsub.f32 1.0, %v10706_v8  ;;  %v4479_v33 = vmul.f32 0.0, %v10706_v8 }
0x2c5c   :  { %v10708_v29 = vpop.eup %10707 }
0x2c5d   :  { %v10710_v12 = vpop.eup %10709  ;;  %v4520_v31 = vsub.f32 1.0, %v10708_v29  ;;  %v4532_v37 = vmul.f32 0.0, %v10708_v29 }
0x2c5e   :  { %v4519_v36 = vsub.f32 1.0, %v10710_v12  ;;  %v4531_v40 = vmul.f32 0.0, %v10710_v12 }
0x2caf   :  { %v4450_v3 = vpop.permute.xlu1 %4449 }
0x2cb0   :  { %v4454_v61 = vmul.f32 %v10704_v21, %v4450_v3  ;;  %v4448_v2 = vpop.permute.xlu0 %4447  ;;  %v4560_v3 = vld [vmem:[#allocation7 + $0x18] sm:$0xff] }
0x2cb1   :  { %v4453_v1 = vmul.f32 %v10706_v8, %v4448_v2  ;;  %v4559_v2 = vld [vmem:[#allocation7 + $0x10] sm:$0xff] }
0x2cb2   :  { %4459 = vrot.lane.b32.xlu1 %v4454_v61, %s11125_s30 }
0x2cb3   :  { %v4502_v6 = vpop.permute.xlu1 %4501  ;;  %4457 = vrot.lane.b32.xlu0 %v4453_v1, %s11125_s30 }
0x2cb4   :  { %v4506_v14 = vmul.f32 %v10708_v29, %v4502_v6  ;;  %v4500_v16 = vpop.permute.xlu0 %4499 }
0x2cb5   :  { %v4505_v11 = vmul.f32 %v10710_v12, %v4500_v16 }
0x2cb6   :  { %4511 = vrot.lane.b32.xlu1 %v4506_v14, %s11125_s30 }
0x2cb7   :  { %4509 = vrot.lane.b32.xlu0 %v4505_v11, %s11125_s30 }
0x2d24   :  { %v4460_v20 = vpop.permute.xlu1 %4459 }
0x2d25   :  { %v4464_v22 = vadd.f32 %v4460_v20, %v4275_v39  ;;  %v4458_v24 = vpop.permute.xlu0 %4457 }
0x2d26   :  { %v4463_v19 = vadd.f32 %v4458_v24, %v4274_v43 }
0x2d27   :  { %10711 = vtanh.f32 %v4464_v22 }
0x2d28   :  { %10713 = vtanh.f32 %v4463_v19  ;;  %v4512_v42 = vpop.permute.xlu1 %4511 }
0x2d29   :  { %v4516_v26 = vadd.f32 %v4512_v42, %v4277_v5  ;;  %v4510_v44 = vpop.permute.xlu0 %4509 }
0x2d2a   :  { %v4515_v28 = vadd.f32 %v4510_v44, %v4276_v54 }
0x2d2b   :  { %10715 = vtanh.f32 %v4516_v26 }
0x2d2c   :  { %10717 = vtanh.f32 %v4515_v28 }
0x2d31   :  { %v10712_v30 = vpop.eup %10711 }
0x2d32   :  { %v10714_v51 = vpop.eup %10713  ;;  %4473 = vrot.lane.b32.xlu1 %v10712_v30, %s11126_s3 }
0x2d33   :  { %4471 = vrot.lane.b32.xlu0 %v10714_v51, %s11126_s3 }
0x2d35   :  { %v10716_v60 = vpop.eup %10715 }
0x2d36   :  { %v10718_v0 = vpop.eup %10717  ;;  %4525 = vrot.lane.b32.xlu1 %v10716_v60, %s11126_s3 }
0x2d37   :  { %4523 = vrot.lane.b32.xlu0 %v10718_v0, %s11126_s3 }
0x2da4   :  { %v4474_v48 = vpop.permute.xlu1 %4473 }
0x2da5   :  { %v4478_v15 = vmul.f32 %v4474_v48, %v4468_v13  ;;  %v4472_v23 = vpop.permute.xlu0 %4471 }
0x2da6   :  { %v4477_v49 = vmul.f32 %v4472_v23, %v4467_v25 }
0x2da7   :  { %v12249_v34 = vadd.f32 %v4480_v32, %v4478_v15 }
0x2da8   :  { %v12251_v46 = vadd.f32 %v4479_v33, %v4477_v49  ;;  %v4526_v53 = vpop.permute.xlu1 %4525 }
0x2da9   :  { %v4530_v10 = vmul.f32 %v4526_v53, %v4520_v31  ;;  %4539 = vrot.lane.b32.xlu1 %v12249_v34, %s11126_s3  ;;  %v4524_v39 = vpop.permute.xlu0 %4523 }
0x2daa   :  { %v4529_v43 = vmul.f32 %v4524_v39, %v4519_v36  ;;  %4537 = vrot.lane.b32.xlu0 %v12251_v46, %s11126_s3 }
0x2dab   :  { %v12257_v47 = vadd.f32 %v4532_v37, %v4530_v10 }
0x2dac   :  { %v12259_v5 = vadd.f32 %v4531_v40, %v4529_v43 }
0x2dad   :  { %4549 = vrot.lane.b32.xlu1 %v12257_v47, %s11126_s3 }
0x2dae   :  { %4547 = vrot.lane.b32.xlu0 %v12259_v5, %s11126_s3 }
0x2e1b   :  { %v4540_v45 = vpop.permute.xlu1 %4539 }
0x2e1c   :  { %4544 = vst.msk [vmem:[#allocation8 + $0x8] sm:$0xff] %vm4278_vm4, %v4540_v45  ;;  %v4538_v52 = vpop.permute.xlu0 %4537 }
0x2e1d   :  { %4543 = vst.msk [vmem:[#allocation8] sm:$0xff] %vm4278_vm4, %v4538_v52  ;;  %9949 = vmatprep.mubr.msk.f32.mxu0 %vm4278_vm4, %v4538_v52 }
0x2e1e   :  { %9950 = vmatmul.mubr.msk.f32.vlgmr.msra.gmra.mrb[50].mxu0 %vm4278_vm4, %v4540_v45 }
0x2e1f   :  { %v4550_v54 = vpop.permute.xlu1 %4549  ;;  %10406 = vmatpush3.bf16.msra.mxu0 %v12183_v27 }
0x2e20   :  { %4554 = vst.msk [vmem:[#allocation9 + $0x8] sm:$0xff] %vm4278_vm4, %v4550_v54  ;;  %v4548_v56 = vpop.permute.xlu0 %4547  ;;  %10412 = vmatprep.subr.bf16.mxu0 %v12183_v27 }
0x2e21   :  { %4553 = vst.msk [vmem:[#allocation9] sm:$0xff] %vm4278_vm4, %v4548_v56  ;;  %9956 = vmatprep.mubr.msk.f32.mxu1 %vm4278_vm4, %v4548_v56 }
0x2e22   :  { %9957 = vmatmul.mubr.msk.f32.vlgmr.msra.gmra.mrb[50].mxu1 %vm4278_vm4, %v4550_v54 }
0x2e23   :  { %10410 = vmatpush3.bf16.msra.mxu1 %v12188_v7 }
0x2e24   :  { %10416 = vmatprep.subr.bf16.mxu1 %v12188_v7 }
0x2ef1   :  { %v9951_v58 = vpop.f32.mrb[50].mxu0 }
0x2ef2   :  { %v4637_v59 = vadd.f32 %v9951_v58, %v12220_v50  ;;  %v4631_v55 = vpop.f32.mrb[51].mxu0 }
0x2ef3   :  { %v4632_v57 = vadd.f32 %v12220_v50, %v4631_v55 }
0x2ef4   :  { %4737 = vrot.lane.b32.xlu1 %v4637_v59, %s11124_s29  ;;  %v4720_v41 = vadd.f32 %v4637_v59, %v4557_v63 }
0x2ef5   :  { %4735 = vrot.lane.b32.xlu0 %v4632_v57, %s11124_s29  ;;  %v9958_v17 = vpop.f32.mrb[50].mxu1  ;;  %v4719_v21 = vadd.f32 %v4632_v57, %v4556_v4 }
0x2ef6   :  { %v4716_v62 = vadd.f32 %v9958_v17, %v12231_v35  ;;  %v4710_v18 = vpop.f32.mrb[51].mxu1  ;;  %v9018_v8 = vmul.f32 -1.442695, %v4720_v41 }
0x2ef7   :  { %v4711_v38 = vadd.f32 %v12231_v35, %v4710_v18  ;;  %v9017_v1 = vmul.f32 -1.442695, %v4719_v21 }
0x2ef8   :  { %4789 = vrot.lane.b32.xlu1 %v4716_v62, %s11124_s29  ;;  %v4772_v61 = vadd.f32 %v4716_v62, %v4560_v3  ;;  %10719 = vpow2.f32 %v9018_v8 }
0x2ef9   :  { %4787 = vrot.lane.b32.xlu0 %v4711_v38, %s11124_s29  ;;  %v4771_v29 = vadd.f32 %v4711_v38, %v4559_v2  ;;  %10721 = vpow2.f32 %v9017_v1 }
0x2efa   :  { %v9020_v6 = vmul.f32 -1.442695, %v4772_v61 }
0x2efb   :  { %v9019_v12 = vmul.f32 -1.442695, %v4771_v29 }
0x2efc   :  { %10723 = vpow2.f32 %v9020_v6 }
0x2efd   :  { %10725 = vpow2.f32 %v9019_v12 }
0x2f02   :  { %v10720_v14 = vpop.eup %10719 }
0x2f03   :  { %v10722_v16 = vpop.eup %10721  ;;  %v4728_v11 = vadd.f32 1.0, %v10720_v14 }
0x2f04   :  { %v4727_v22 = vadd.f32 1.0, %v10722_v16 }
0x2f05   :  { %10727 = vrcp.f32 %v4728_v11 }
0x2f06   :  { %v10724_v20 = vpop.eup %10723  ;;  %10729 = vrcp.f32 %v4727_v22 }
0x2f07   :  { %v10726_v24 = vpop.eup %10725  ;;  %v4780_v19 = vadd.f32 1.0, %v10724_v20 }
0x2f08   :  { %v4779_v42 = vadd.f32 1.0, %v10726_v24  ;;  %v4847_v24 = vld [vmem:[#allocation6 + $0x28] sm:$0xff] }
0x2f09   :  { %10731 = vrcp.f32 %v4780_v19 }
0x2f0a   :  { %10733 = vrcp.f32 %v4779_v42  ;;  %v4846_v42 = vld [vmem:[#allocation6 + $0x20] sm:$0xff] }
0x2f0f   :  { %v10728_v26 = vpop.eup %10727 }
0x2f10   :  { %v10730_v28 = vpop.eup %10729  ;;  %v4756_v52 = vsub.f32 1.0, %v10728_v26  ;;  %v4768_v58 = vmul.f32 %v10728_v26, %v12249_v34 }
0x2f11   :  { %v4755_v56 = vsub.f32 1.0, %v10730_v28  ;;  %v4767_v57 = vmul.f32 %v10730_v28, %v12251_v46 }
0x2f13   :  { %v10732_v0 = vpop.eup %10731 }
0x2f14   :  { %v10734_v48 = vpop.eup %10733  ;;  %v4808_v18 = vsub.f32 1.0, %v10732_v0 }
0x2f15   :  { %v4807_v41 = vsub.f32 1.0, %v10734_v48  ;;  %v4819_v34 = vmul.f32 %v10734_v48, %v12259_v5 }
0x2f66   :  { %v4738_v44 = vpop.permute.xlu1 %4737 }
0x2f67   :  { %v4742_v30 = vmul.f32 %v10728_v26, %v4738_v44  ;;  %v4736_v51 = vpop.permute.xlu0 %4735  ;;  %v4850_v44 = vld [vmem:[#allocation7 + $0x28] sm:$0xff] }
0x2f68   :  { %v4741_v60 = vmul.f32 %v10730_v28, %v4736_v51  ;;  %v4849_v51 = vld [vmem:[#allocation7 + $0x20] sm:$0xff] }
0x2f69   :  { %4747 = vrot.lane.b32.xlu1 %v4742_v30, %s11125_s30 }
0x2f6a   :  { %v4790_v13 = vpop.permute.xlu1 %4789  ;;  %4745 = vrot.lane.b32.xlu0 %v4741_v60, %s11125_s30 }
0x2f6b   :  { %v4794_v25 = vmul.f32 %v10732_v0, %v4790_v13  ;;  %v4788_v32 = vpop.permute.xlu0 %4787 }
0x2f6c   :  { %v4793_v15 = vmul.f32 %v10734_v48, %v4788_v32 }
0x2f6d   :  { %4799 = vrot.lane.b32.xlu1 %v4794_v25, %s11125_s30 }
0x2f6e   :  { %4797 = vrot.lane.b32.xlu0 %v4793_v15, %s11125_s30 }
0x2fdb   :  { %v4748_v23 = vpop.permute.xlu1 %4747 }
0x2fdc   :  { %v4752_v33 = vadd.f32 %v4748_v23, %v4557_v63  ;;  %v4746_v49 = vpop.permute.xlu0 %4745 }
0x2fdd   :  { %v4751_v31 = vadd.f32 %v4746_v49, %v4556_v4  ;;  %v4820_v4 = vmul.f32 %v10732_v0, %v12257_v47 }
0x2fde   :  { %10735 = vtanh.f32 %v4752_v33 }
0x2fdf   :  { %10737 = vtanh.f32 %v4751_v31  ;;  %v4800_v53 = vpop.permute.xlu1 %4799 }
0x2fe0   :  { %v4804_v36 = vadd.f32 %v4800_v53, %v4560_v3  ;;  %v4798_v37 = vpop.permute.xlu0 %4797 }
0x2fe1   :  { %v4803_v10 = vadd.f32 %v4798_v37, %v4559_v2 }
0x2fe2   :  { %10739 = vtanh.f32 %v4804_v36 }
0x2fe3   :  { %10741 = vtanh.f32 %v4803_v10 }
0x2fe8   :  { %v10736_v39 = vpop.eup %10735 }
0x2fe9   :  { %v10738_v40 = vpop.eup %10737  ;;  %4761 = vrot.lane.b32.xlu1 %v10736_v39, %s11126_s3 }
0x2fea   :  { %4759 = vrot.lane.b32.xlu0 %v10738_v40, %s11126_s3 }
0x2fec   :  { %v10740_v43 = vpop.eup %10739 }
0x2fed   :  { %v10742_v45 = vpop.eup %10741  ;;  %4813 = vrot.lane.b32.xlu1 %v10740_v43, %s11126_s3 }
0x2fee   :  { %4811 = vrot.lane.b32.xlu0 %v10742_v45, %s11126_s3 }
0x305b   :  { %v4762_v54 = vpop.permute.xlu1 %4761 }
0x305c   :  { %v4766_v59 = vmul.f32 %v4762_v54, %v4756_v52  ;;  %v4760_v55 = vpop.permute.xlu0 %4759 }
0x305d   :  { %v4765_v17 = vmul.f32 %v4760_v55, %v4755_v56 }
0x305e   :  { %v12295_v62 = vadd.f32 %v4768_v58, %v4766_v59 }
0x305f   :  { %v12297_v38 = vadd.f32 %v4767_v57, %v4765_v17  ;;  %v4814_v63 = vpop.permute.xlu1 %4813 }
0x3060   :  { %v4818_v21 = vmul.f32 %v4814_v63, %v4808_v18  ;;  %4827 = vrot.lane.b32.xlu1 %v12295_v62, %s11126_s3  ;;  %v4812_v3 = vpop.permute.xlu0 %4811 }
0x3061   :  { %v4817_v8 = vmul.f32 %v4812_v3, %v4807_v41  ;;  %4825 = vrot.lane.b32.xlu0 %v12297_v38, %s11126_s3 }
0x3062   :  { %v12305_v46 = vadd.f32 %v4820_v4, %v4818_v21 }
0x3063   :  { %v12307_v61 = vadd.f32 %v4819_v34, %v4817_v8 }
0x3064   :  { %4838 = vrot.lane.b32.xlu1 %v12305_v46, %s11126_s3 }
0x3065   :  { %4836 = vrot.lane.b32.xlu0 %v12307_v61, %s11126_s3 }
0x30d2   :  { %v4828_v47 = vpop.permute.xlu1 %4827 }
0x30d3   :  { %4833 = vst.msk [vmem:[#allocation8 + $0x18] sm:$0xff] %vm4278_vm4, %v4828_v47  ;;  %v4826_v2 = vpop.permute.xlu0 %4825 }
0x30d4   :  { %4832 = vst.msk [vmem:[#allocation8 + $0x10] sm:$0xff] %vm4278_vm4, %v4826_v2  ;;  %9963 = vmatprep.mubr.msk.f32.mxu0 %vm4278_vm4, %v4826_v2 }
0x30d5   :  { %9964 = vmatmul.mubr.msk.f32.vlgmr.msra.gmra.mrb[52].mxu0 %vm4278_vm4, %v4828_v47 }
0x30d6   :  { %v4839_v5 = vpop.permute.xlu1 %4838  ;;  %10414 = vmatpush3.bf16.msra.mxu0 %v12183_v27 }
0x30d7   :  { %4844 = vst.msk [vmem:[#allocation9 + $0x18] sm:$0xff] %vm4278_vm4, %v4839_v5  ;;  %v4837_v1 = vpop.permute.xlu0 %4836  ;;  %10420 = vmatprep.subr.bf16.mxu0 %v12183_v27 }
0x30d8   :  { %4843 = vst.msk [vmem:[#allocation9 + $0x10] sm:$0xff] %vm4278_vm4, %v4837_v1  ;;  %9970 = vmatprep.mubr.msk.f32.mxu1 %vm4278_vm4, %v4837_v1 }
0x30d9   :  { %9971 = vmatmul.mubr.msk.f32.vlgmr.msra.gmra.mrb[52].mxu1 %vm4278_vm4, %v4839_v5 }
0x30da   :  { %10418 = vmatpush3.bf16.msra.mxu1 %v12188_v7 }
0x30db   :  { %10424 = vmatprep.subr.bf16.mxu1 %v12188_v7 }
0x31a8   :  { %v9965_v29 = vpop.f32.mrb[52].mxu0 }
0x31a9   :  { %v4927_v6 = vadd.f32 %v9965_v29, %v12220_v50  ;;  %v4921_v12 = vpop.f32.mrb[53].mxu0 }
0x31aa   :  { %v4922_v14 = vadd.f32 %v12220_v50, %v4921_v12 }
0x31ab   :  { %5027 = vrot.lane.b32.xlu1 %v4927_v6, %s11124_s29  ;;  %v5010_v19 = vadd.f32 %v4927_v6, %v4847_v24 }
0x31ac   :  { %5025 = vrot.lane.b32.xlu0 %v4922_v14, %s11124_s29  ;;  %v9972_v16 = vpop.f32.mrb[52].mxu1  ;;  %v5009_v26 = vadd.f32 %v4922_v14, %v4846_v42 }
0x31ad   :  { %v5006_v11 = vadd.f32 %v9972_v16, %v12231_v35  ;;  %v5000_v20 = vpop.f32.mrb[53].mxu1  ;;  %v9026_v28 = vmul.f32 -1.442695, %v5010_v19 }
0x31ae   :  { %v5001_v22 = vadd.f32 %v12231_v35, %v5000_v20  ;;  %v9025_v60 = vmul.f32 -1.442695, %v5009_v26 }
0x31af   :  { %5079 = vrot.lane.b32.xlu1 %v5006_v11, %s11124_s29  ;;  %v5062_v30 = vadd.f32 %v5006_v11, %v4850_v44  ;;  %10743 = vpow2.f32 %v9026_v28 }
0x31b0   :  { %5077 = vrot.lane.b32.xlu0 %v5001_v22, %s11124_s29  ;;  %v5061_v0 = vadd.f32 %v5001_v22, %v4849_v51  ;;  %10745 = vpow2.f32 %v9025_v60 }
0x31b1   :  { %v9028_v13 = vmul.f32 -1.442695, %v5062_v30 }
0x31b2   :  { %v9027_v48 = vmul.f32 -1.442695, %v5061_v0 }
0x31b3   :  { %10747 = vpow2.f32 %v9028_v13 }
0x31b4   :  { %10749 = vpow2.f32 %v9027_v48 }
0x31b9   :  { %v10744_v25 = vpop.eup %10743 }
0x31ba   :  { %v10746_v32 = vpop.eup %10745  ;;  %v5018_v15 = vadd.f32 1.0, %v10744_v25 }
0x31bb   :  { %v5017_v33 = vadd.f32 1.0, %v10746_v32 }
0x31bc   :  { %10751 = vrcp.f32 %v5018_v15 }
0x31bd   :  { %v10748_v23 = vpop.eup %10747  ;;  %10753 = vrcp.f32 %v5017_v33 }
0x31be   :  { %v10750_v49 = vpop.eup %10749  ;;  %v5070_v31 = vadd.f32 1.0, %v10748_v23 }
0x31bf   :  { %v5069_v53 = vadd.f32 1.0, %v10750_v49  ;;  %v5137_v49 = vld [vmem:[#allocation6 + $0x38] sm:$0xff] }
0x31c0   :  { %10755 = vrcp.f32 %v5070_v31 }
0x31c1   :  { %10757 = vrcp.f32 %v5069_v53  ;;  %v5136_v53 = vld [vmem:[#allocation6 + $0x30] sm:$0xff] }
0x31c6   :  { %v10752_v36 = vpop.eup %10751 }
0x31c7   :  { %v10754_v10 = vpop.eup %10753  ;;  %v5046_v2 = vsub.f32 1.0, %v10752_v36  ;;  %v5058_v29 = vmul.f32 %v10752_v36, %v12295_v62 }
0x31c8   :  { %v5045_v1 = vsub.f32 1.0, %v10754_v10  ;;  %v5057_v14 = vmul.f32 %v10754_v10, %v12297_v38 }
0x31ca   :  { %v10756_v45 = vpop.eup %10755 }
0x31cb   :  { %v10758_v54 = vpop.eup %10757  ;;  %v5098_v20 = vsub.f32 1.0, %v10756_v45 }
0x31cc   :  { %v5097_v19 = vsub.f32 1.0, %v10758_v54  ;;  %v5109_v62 = vmul.f32 %v10758_v54, %v12307_v61 }
0x321d   :  { %v5028_v37 = vpop.permute.xlu1 %5027 }
0x321e   :  { %v5032_v39 = vmul.f32 %v10752_v36, %v5028_v37  ;;  %v5026_v40 = vpop.permute.xlu0 %5025  ;;  %v5140_v37 = vld [vmem:[#allocation7 + $0x38] sm:$0xff] }
0x321f   :  { %v5031_v43 = vmul.f32 %v10754_v10, %v5026_v40  ;;  %v5139_v40 = vld [vmem:[#allocation7 + $0x30] sm:$0xff] }
0x3220   :  { %5037 = vrot.lane.b32.xlu1 %v5032_v39, %s11125_s30 }
0x3221   :  { %v5080_v52 = vpop.permute.xlu1 %5079  ;;  %5035 = vrot.lane.b32.xlu0 %v5031_v43, %s11125_s30 }
0x3222   :  { %v5084_v56 = vmul.f32 %v10756_v45, %v5080_v52  ;;  %v5078_v58 = vpop.permute.xlu0 %5077 }
0x3223   :  { %v5083_v59 = vmul.f32 %v10758_v54, %v5078_v58 }
0x3224   :  { %5089 = vrot.lane.b32.xlu1 %v5084_v56, %s11125_s30 }
0x3225   :  { %5087 = vrot.lane.b32.xlu0 %v5083_v59, %s11125_s30 }
0x3292   :  { %v5038_v55 = vpop.permute.xlu1 %5037 }
0x3293   :  { %v5042_v57 = vadd.f32 %v5038_v55, %v4847_v24  ;;  %v5036_v17 = vpop.permute.xlu0 %5035 }
0x3294   :  { %v5041_v18 = vadd.f32 %v5036_v17, %v4846_v42  ;;  %v5110_v42 = vmul.f32 %v10756_v45, %v12305_v46 }
0x3295   :  { %10759 = vtanh.f32 %v5042_v57 }
0x3296   :  { %10761 = vtanh.f32 %v5041_v18  ;;  %v5090_v63 = vpop.permute.xlu1 %5089 }
0x3297   :  { %v5094_v41 = vadd.f32 %v5090_v63, %v4850_v44  ;;  %v5088_v4 = vpop.permute.xlu0 %5087 }
0x3298   :  { %v5093_v21 = vadd.f32 %v5088_v4, %v4849_v51 }
0x3299   :  { %10763 = vtanh.f32 %v5094_v41 }
0x329a   :  { %10765 = vtanh.f32 %v5093_v21 }
0x329f   :  { %v10760_v3 = vpop.eup %10759 }
0x32a0   :  { %v10762_v34 = vpop.eup %10761  ;;  %5051 = vrot.lane.b32.xlu1 %v10760_v3, %s11126_s3 }
0x32a1   :  { %5049 = vrot.lane.b32.xlu0 %v10762_v34, %s11126_s3 }
0x32a3   :  { %v10764_v8 = vpop.eup %10763 }
0x32a4   :  { %v10766_v47 = vpop.eup %10765  ;;  %5103 = vrot.lane.b32.xlu1 %v10764_v8, %s11126_s3 }
0x32a5   :  { %5101 = vrot.lane.b32.xlu0 %v10766_v47, %s11126_s3 }
0x3312   :  { %v5052_v5 = vpop.permute.xlu1 %5051 }
0x3313   :  { %v5056_v6 = vmul.f32 %v5052_v5, %v5046_v2  ;;  %v5050_v12 = vpop.permute.xlu0 %5049 }
0x3314   :  { %v5055_v16 = vmul.f32 %v5050_v12, %v5045_v1 }
0x3315   :  { %v12343_v11 = vadd.f32 %v5058_v29, %v5056_v6 }
0x3316   :  { %v12345_v22 = vadd.f32 %v5057_v14, %v5055_v16  ;;  %v5104_v24 = vpop.permute.xlu1 %5103 }
0x3317   :  { %v5108_v26 = vmul.f32 %v5104_v24, %v5098_v20  ;;  %5117 = vrot.lane.b32.xlu1 %v12343_v11, %s11126_s3  ;;  %v5102_v44 = vpop.permute.xlu0 %5101 }
0x3318   :  { %v5107_v28 = vmul.f32 %v5102_v44, %v5097_v19  ;;  %5115 = vrot.lane.b32.xlu0 %v12345_v22, %s11126_s3 }
0x3319   :  { %v12353_v38 = vadd.f32 %v5110_v42, %v5108_v26 }
0x331a   :  { %v12355_v30 = vadd.f32 %v5109_v62, %v5107_v28 }
0x331b   :  { %5128 = vrot.lane.b32.xlu1 %v12353_v38, %s11126_s3 }
0x331c   :  { %5126 = vrot.lane.b32.xlu0 %v12355_v30, %s11126_s3 }
0x3389   :  { %v5118_v46 = vpop.permute.xlu1 %5117 }
0x338a   :  { %5123 = vst.msk [vmem:[#allocation8 + $0x28] sm:$0xff] %vm4278_vm4, %v5118_v46  ;;  %v5116_v51 = vpop.permute.xlu0 %5115 }
0x338b   :  { %5122 = vst.msk [vmem:[#allocation8 + $0x20] sm:$0xff] %vm4278_vm4, %v5116_v51  ;;  %9977 = vmatprep.mubr.msk.f32.mxu0 %vm4278_vm4, %v5116_v51 }
0x338c   :  { %9978 = vmatmul.mubr.msk.f32.vlgmr.msra.gmra.mrb[54].mxu0 %vm4278_vm4, %v5118_v46 }
0x338d   :  { %v5129_v61 = vpop.permute.xlu1 %5128  ;;  %10422 = vmatpush3.bf16.msra.mxu0 %v12183_v27 }
0x338e   :  { %5134 = vst.msk [vmem:[#allocation9 + $0x28] sm:$0xff] %vm4278_vm4, %v5129_v61  ;;  %v5127_v60 = vpop.permute.xlu0 %5126  ;;  %10428 = vmatprep.subr.bf16.mxu0 %v12183_v27 }
0x338f   :  { %5133 = vst.msk [vmem:[#allocation9 + $0x20] sm:$0xff] %vm4278_vm4, %v5127_v60  ;;  %9984 = vmatprep.mubr.msk.f32.mxu1 %vm4278_vm4, %v5127_v60 }
0x3390   :  { %9985 = vmatmul.mubr.msk.f32.vlgmr.msra.gmra.mrb[54].mxu1 %vm4278_vm4, %v5129_v61 }
0x3391   :  { %10426 = vmatpush3.bf16.msra.mxu1 %v12188_v7 }
0x3392   :  { %10432 = vmatprep.subr.bf16.mxu1 %v12188_v7 }
0x345f   :  { %v9979_v0 = vpop.f32.mrb[54].mxu0 }
0x3460   :  { %v5217_v13 = vadd.f32 %v9979_v0, %v12220_v50  ;;  %v5211_v48 = vpop.f32.mrb[55].mxu0 }
0x3461   :  { %v5212_v25 = vadd.f32 %v12220_v50, %v5211_v48 }
0x3462   :  { %5317 = vrot.lane.b32.xlu1 %v5217_v13, %s11124_s29  ;;  %v5300_v31 = vadd.f32 %v5217_v13, %v5137_v49 }
0x3463   :  { %5315 = vrot.lane.b32.xlu0 %v5212_v25, %s11124_s29  ;;  %v9986_v32 = vpop.f32.mrb[54].mxu1  ;;  %v5299_v36 = vadd.f32 %v5212_v25, %v5136_v53 }
0x3464   :  { %v5296_v15 = vadd.f32 %v9986_v32, %v12231_v35  ;;  %v5290_v23 = vpop.f32.mrb[55].mxu1  ;;  %v9034_v10 = vmul.f32 -1.442695, %v5300_v31 }
0x3465   :  { %v5291_v33 = vadd.f32 %v12231_v35, %v5290_v23  ;;  %v9033_v43 = vmul.f32 -1.442695, %v5299_v36 }
0x3466   :  { %5369 = vrot.lane.b32.xlu1 %v5296_v15, %s11124_s29  ;;  %v5352_v39 = vadd.f32 %v5296_v15, %v5140_v37  ;;  %10767 = vpow2.f32 %v9034_v10 }
0x3467   :  { %5367 = vrot.lane.b32.xlu0 %v5291_v33, %s11124_s29  ;;  %v5351_v45 = vadd.f32 %v5291_v33, %v5139_v40  ;;  %10769 = vpow2.f32 %v9033_v43 }
0x3468   :  { %v9036_v52 = vmul.f32 -1.442695, %v5352_v39 }
0x3469   :  { %v9035_v54 = vmul.f32 -1.442695, %v5351_v45 }
0x346a   :  { %10771 = vpow2.f32 %v9036_v52 }
0x346b   :  { %10773 = vpow2.f32 %v9035_v54 }
0x3470   :  { %v10768_v56 = vpop.eup %10767 }
0x3471   :  { %v10770_v58 = vpop.eup %10769  ;;  %v5308_v59 = vadd.f32 1.0, %v10768_v56 }
0x3472   :  { %v5307_v57 = vadd.f32 1.0, %v10770_v58 }
0x3473   :  { %10775 = vrcp.f32 %v5308_v59 }
0x3474   :  { %v10772_v55 = vpop.eup %10771  ;;  %10777 = vrcp.f32 %v5307_v57 }
0x3475   :  { %v10774_v17 = vpop.eup %10773  ;;  %v5360_v18 = vadd.f32 1.0, %v10772_v55 }
0x3476   :  { %v5359_v63 = vadd.f32 1.0, %v10774_v17  ;;  %v5427_v17 = vld [vmem:[#allocation6 + $0x48] sm:$0xff] }
0x3477   :  { %10779 = vrcp.f32 %v5360_v18 }
0x3478   :  { %10781 = vrcp.f32 %v5359_v63  ;;  %v5426_v63 = vld [vmem:[#allocation6 + $0x40] sm:$0xff] }
0x347d   :  { %v10776_v41 = vpop.eup %10775 }
0x347e   :  { %v10778_v21 = vpop.eup %10777  ;;  %v5336_v51 = vsub.f32 1.0, %v10776_v41  ;;  %v5348_v0 = vmul.f32 %v10776_v41, %v12343_v11 }
0x347f   :  { %v5335_v60 = vsub.f32 1.0, %v10778_v21  ;;  %v5347_v25 = vmul.f32 %v10778_v21, %v12345_v22 }
0x3481   :  { %v10780_v47 = vpop.eup %10779 }
0x3482   :  { %v10782_v5 = vpop.eup %10781  ;;  %v5388_v23 = vsub.f32 1.0, %v10780_v47 }
0x3483   :  { %v5387_v31 = vsub.f32 1.0, %v10782_v5  ;;  %v5399_v11 = vmul.f32 %v10782_v5, %v12355_v30 }
0x34d4   :  { %v5318_v4 = vpop.permute.xlu1 %5317 }
0x34d5   :  { %v5322_v3 = vmul.f32 %v10776_v41, %v5318_v4  ;;  %v5316_v34 = vpop.permute.xlu0 %5315  ;;  %v5430_v4 = vld [vmem:[#allocation7 + $0x48] sm:$0xff] }
0x34d6   :  { %v5321_v8 = vmul.f32 %v10778_v21, %v5316_v34 }
0x34d7   :  { %5327 = vrot.lane.b32.xlu1 %v5322_v3, %s11125_s30  ;;  %v5429_v3 = vld [vmem:[#allocation7 + $0x40] sm:$0xff] }
0x34d8   :  { %v5370_v2 = vpop.permute.xlu1 %5369  ;;  %5325 = vrot.lane.b32.xlu0 %v5321_v8, %s11125_s30 }
0x34d9   :  { %v5374_v1 = vmul.f32 %v10780_v47, %v5370_v2  ;;  %v5368_v29 = vpop.permute.xlu0 %5367 }
0x34da   :  { %v5373_v6 = vmul.f32 %v10782_v5, %v5368_v29 }
0x34db   :  { %5379 = vrot.lane.b32.xlu1 %v5374_v1, %s11125_s30 }
0x34dc   :  { %5377 = vrot.lane.b32.xlu0 %v5373_v6, %s11125_s30 }
0x3549   :  { %v5328_v12 = vpop.permute.xlu1 %5327 }
0x354a   :  { %v5332_v14 = vadd.f32 %v5328_v12, %v5137_v49  ;;  %v5326_v16 = vpop.permute.xlu0 %5325 }
0x354b   :  { %v5331_v20 = vadd.f32 %v5326_v16, %v5136_v53  ;;  %v5400_v53 = vmul.f32 %v10780_v47, %v12353_v38 }
0x354c   :  { %10783 = vtanh.f32 %v5332_v14 }
0x354d   :  { %10785 = vtanh.f32 %v5331_v20  ;;  %v5380_v24 = vpop.permute.xlu1 %5379 }
0x354e   :  { %v5384_v19 = vadd.f32 %v5380_v24, %v5140_v37  ;;  %v5378_v42 = vpop.permute.xlu0 %5377 }
0x354f   :  { %v5383_v26 = vadd.f32 %v5378_v42, %v5139_v40 }
0x3550   :  { %10787 = vtanh.f32 %v5384_v19 }
0x3551   :  { %10789 = vtanh.f32 %v5383_v26 }
0x3556   :  { %v10784_v44 = vpop.eup %10783 }
0x3557   :  { %v10786_v62 = vpop.eup %10785  ;;  %5341 = vrot.lane.b32.xlu1 %v10784_v44, %s11126_s3 }
0x3558   :  { %5339 = vrot.lane.b32.xlu0 %v10786_v62, %s11126_s3 }
0x355a   :  { %v10788_v28 = vpop.eup %10787 }
0x355b   :  { %v10790_v46 = vpop.eup %10789  ;;  %5393 = vrot.lane.b32.xlu1 %v10788_v28, %s11126_s3 }
0x355c   :  { %5391 = vrot.lane.b32.xlu0 %v10790_v46, %s11126_s3 }
0x35c9   :  { %v5342_v61 = vpop.permute.xlu1 %5341 }
0x35ca   :  { %v5346_v13 = vmul.f32 %v5342_v61, %v5336_v51  ;;  %v5340_v48 = vpop.permute.xlu0 %5339 }
0x35cb   :  { %v5345_v32 = vmul.f32 %v5340_v48, %v5335_v60 }
0x35cc   :  { %v12391_v15 = vadd.f32 %v5348_v0, %v5346_v13 }
0x35cd   :  { %v12393_v33 = vadd.f32 %v5347_v25, %v5345_v32  ;;  %v5394_v49 = vpop.permute.xlu1 %5393 }
0x35ce   :  { %v5398_v36 = vmul.f32 %v5394_v49, %v5388_v23  ;;  %5407 = vrot.lane.b32.xlu1 %v12391_v15, %s11126_s3  ;;  %v5392_v37 = vpop.permute.xlu0 %5391 }
0x35cf   :  { %v5397_v10 = vmul.f32 %v5392_v37, %v5387_v31  ;;  %5405 = vrot.lane.b32.xlu0 %v12393_v33, %s11126_s3 }
0x35d0   :  { %v12401_v22 = vadd.f32 %v5400_v53, %v5398_v36 }
0x35d1   :  { %v12403_v39 = vadd.f32 %v5399_v11, %v5397_v10 }
0x35d2   :  { %5418 = vrot.lane.b32.xlu1 %v12401_v22, %s11126_s3 }
0x35d3   :  { %5416 = vrot.lane.b32.xlu0 %v12403_v39, %s11126_s3 }
0x3640   :  { %v5408_v38 = vpop.permute.xlu1 %5407 }
0x3641   :  { %5413 = vst.msk [vmem:[#allocation8 + $0x38] sm:$0xff] %vm4278_vm4, %v5408_v38  ;;  %v5406_v40 = vpop.permute.xlu0 %5405 }
0x3642   :  { %5412 = vst.msk [vmem:[#allocation8 + $0x30] sm:$0xff] %vm4278_vm4, %v5406_v40  ;;  %9991 = vmatprep.mubr.msk.f32.mxu0 %vm4278_vm4, %v5406_v40 }
0x3643   :  { %9992 = vmatmul.mubr.msk.f32.vlgmr.msra.gmra.mrb[56].mxu0 %vm4278_vm4, %v5408_v38 }
0x3644   :  { %v5419_v30 = vpop.permute.xlu1 %5418  ;;  %10430 = vmatpush3.bf16.msra.mxu0 %v12183_v27 }
0x3645   :  { %5424 = vst.msk [vmem:[#allocation9 + $0x38] sm:$0xff] %vm4278_vm4, %v5419_v30  ;;  %v5417_v43 = vpop.permute.xlu0 %5416  ;;  %10436 = vmatprep.subr.bf16.mxu0 %v12183_v27 }
0x3646   :  { %5423 = vst.msk [vmem:[#allocation9 + $0x30] sm:$0xff] %vm4278_vm4, %v5417_v43  ;;  %9998 = vmatprep.mubr.msk.f32.mxu1 %vm4278_vm4, %v5417_v43 }
0x3647   :  { %9999 = vmatmul.mubr.msk.f32.vlgmr.msra.gmra.mrb[56].mxu1 %vm4278_vm4, %v5419_v30 }
0x3648   :  { %10434 = vmatpush3.bf16.msra.mxu1 %v12188_v7 }
0x3649   :  { %10440 = vmatprep.subr.bf16.mxu1 %v12188_v7 }
0x3716   :  { %v9993_v45 = vpop.f32.mrb[56].mxu0 }
0x3717   :  { %v5507_v52 = vadd.f32 %v9993_v45, %v12220_v50  ;;  %v5501_v54 = vpop.f32.mrb[57].mxu0 }
0x3718   :  { %v5502_v56 = vadd.f32 %v12220_v50, %v5501_v54 }
0x3719   :  { %5607 = vrot.lane.b32.xlu1 %v5507_v52, %s11124_s29  ;;  %v5590_v18 = vadd.f32 %v5507_v52, %v5427_v17 }
0x371a   :  { %5605 = vrot.lane.b32.xlu0 %v5502_v56, %s11124_s29  ;;  %v10000_v58 = vpop.f32.mrb[56].mxu1  ;;  %v5589_v41 = vadd.f32 %v5502_v56, %v5426_v63 }
0x371b   :  { %v5586_v59 = vadd.f32 %v10000_v58, %v12231_v35  ;;  %v5580_v55 = vpop.f32.mrb[57].mxu1  ;;  %v9042_v50 = vmul.f32 -1.442695, %v5590_v18 }
0x371c   :  { %v5581_v57 = vadd.f32 %v12231_v35, %v5580_v55  ;;  %v9041_v34 = vmul.f32 -1.442695, %v5589_v41 }
0x371d   :  { %5659 = vrot.lane.b32.xlu1 %v5586_v59, %s11124_s29  ;;  %v5642_v21 = vadd.f32 %v5586_v59, %v5430_v4  ;;  %10791 = vpow2.f32 %v9042_v50 }
0x371e   :  { %5657 = vrot.lane.b32.xlu0 %v5581_v57, %s11124_s29  ;;  %v5641_v8 = vadd.f32 %v5581_v57, %v5429_v3  ;;  %10793 = vpow2.f32 %v9041_v34  ;;  %v12472_v34 = vld [vmem:[%s13374_s9] ss:$0 sm:$0xff] }
0x371f   :  { %v9044_v47 = vmul.f32 -1.442695, %v5642_v21 }
0x3720   :  { %v9043_v2 = vmul.f32 -1.442695, %v5641_v8 }
0x3721   :  { %10795 = vpow2.f32 %v9044_v47 }
0x3722   :  { %10797 = vpow2.f32 %v9043_v2 }
0x3727   :  { %v10792_v35 = vpop.eup %10791 }
0x3728   :  { %v10794_v5 = vpop.eup %10793  ;;  %v5598_v1 = vadd.f32 1.0, %v10792_v35 }
0x3729   :  { %v5597_v6 = vadd.f32 1.0, %v10794_v5  ;;  %v12481_v5 = vld [vmem:[%s13374_s9 + $0x1] ss:$0 sm:$0xff] }
0x372a   :  { %10799 = vrcp.f32 %v5598_v1 }
0x372b   :  { %v10796_v29 = vpop.eup %10795  ;;  %10801 = vrcp.f32 %v5597_v6 }
0x372c   :  { %v10798_v12 = vpop.eup %10797  ;;  %v5650_v14 = vadd.f32 1.0, %v10796_v29 }
0x372d   :  { %v5649_v16 = vadd.f32 1.0, %v10798_v12  ;;  %v5717_v12 = vld [vmem:[#allocation6 + $0x58] sm:$0xff] }
0x372e   :  { %10803 = vrcp.f32 %v5650_v14 }
0x372f   :  { %10805 = vrcp.f32 %v5649_v16  ;;  %v5716_v16 = vld [vmem:[#allocation6 + $0x50] sm:$0xff] }
0x3734   :  { %v10800_v20 = vpop.eup %10799 }
0x3735   :  { %v10802_v19 = vpop.eup %10801  ;;  %v5626_v10 = vsub.f32 1.0, %v10800_v20  ;;  %v5638_v30 = vmul.f32 %v10800_v20, %v12391_v15 }
0x3736   :  { %v5625_v40 = vsub.f32 1.0, %v10802_v19  ;;  %v5637_v52 = vmul.f32 %v10802_v19, %v12393_v33 }
0x3738   :  { %v10804_v62 = vpop.eup %10803 }
0x3739   :  { %v10806_v46 = vpop.eup %10805  ;;  %v5678_v58 = vsub.f32 1.0, %v10804_v62 }
0x373a   :  { %v5677_v57 = vsub.f32 1.0, %v10806_v46  ;;  %v5689_v15 = vmul.f32 %v10806_v46, %v12403_v39 }
0x378b   :  { %v5608_v24 = vpop.permute.xlu1 %5607 }
0x378c   :  { %v5612_v42 = vmul.f32 %v10800_v20, %v5608_v24  ;;  %v5606_v26 = vpop.permute.xlu0 %5605  ;;  %v5720_v24 = vld [vmem:[#allocation7 + $0x58] sm:$0xff] }
0x378d   :  { %v5611_v44 = vmul.f32 %v10802_v19, %v5606_v26  ;;  %v5719_v26 = vld [vmem:[#allocation7 + $0x50] sm:$0xff] }
0x378e   :  { %5617 = vrot.lane.b32.xlu1 %v5612_v42, %s11125_s30 }
0x378f   :  { %v5660_v28 = vpop.permute.xlu1 %5659  ;;  %5615 = vrot.lane.b32.xlu0 %v5611_v44, %s11125_s30 }
0x3790   :  { %v5664_v51 = vmul.f32 %v10804_v62, %v5660_v28  ;;  %v5658_v61 = vpop.permute.xlu0 %5657 }
0x3791   :  { %v5663_v60 = vmul.f32 %v10806_v46, %v5658_v61 }
0x3792   :  { %5669 = vrot.lane.b32.xlu1 %v5664_v51, %s11125_s30 }
0x3793   :  { %5667 = vrot.lane.b32.xlu0 %v5663_v60, %s11125_s30 }
0x3800   :  { %v5618_v0 = vpop.permute.xlu1 %5617 }
0x3801   :  { %v5622_v13 = vadd.f32 %v5618_v0, %v5427_v17  ;;  %v5616_v48 = vpop.permute.xlu0 %5615  ;;  %v5690_v17 = vmul.f32 %v10804_v62, %v12401_v22 }
0x3802   :  { %v5621_v25 = vadd.f32 %v5616_v48, %v5426_v63 }
0x3803   :  { %10807 = vtanh.f32 %v5622_v13 }
0x3804   :  { %10809 = vtanh.f32 %v5621_v25  ;;  %v5670_v32 = vpop.permute.xlu1 %5669 }
0x3805   :  { %v5674_v23 = vadd.f32 %v5670_v32, %v5430_v4  ;;  %v5668_v49 = vpop.permute.xlu0 %5667 }
0x3806   :  { %v5673_v31 = vadd.f32 %v5668_v49, %v5429_v3 }
0x3807   :  { %10811 = vtanh.f32 %v5674_v23 }
0x3808   :  { %10813 = vtanh.f32 %v5673_v31 }
0x380d   :  { %v10808_v53 = vpop.eup %10807 }
0x380e   :  { %v10810_v36 = vpop.eup %10809  ;;  %5631 = vrot.lane.b32.xlu1 %v10808_v53, %s11126_s3 }
0x380f   :  { %5629 = vrot.lane.b32.xlu0 %v10810_v36, %s11126_s3 }
0x3811   :  { %v10812_v37 = vpop.eup %10811 }
0x3812   :  { %v10814_v11 = vpop.eup %10813  ;;  %5683 = vrot.lane.b32.xlu1 %v10812_v37, %s11126_s3 }
0x3813   :  { %5681 = vrot.lane.b32.xlu0 %v10814_v11, %s11126_s3 }
0x3880   :  { %v5632_v38 = vpop.permute.xlu1 %5631 }
0x3881   :  { %v5636_v43 = vmul.f32 %v5632_v38, %v5626_v10  ;;  %v5630_v45 = vpop.permute.xlu0 %5629 }
0x3882   :  { %v5635_v54 = vmul.f32 %v5630_v45, %v5625_v40 }
0x3883   :  { %v12439_v56 = vadd.f32 %v5638_v30, %v5636_v43 }
0x3884   :  { %v12441_v59 = vadd.f32 %v5637_v52, %v5635_v54  ;;  %v5684_v55 = vpop.permute.xlu1 %5683 }
0x3885   :  { %v5688_v18 = vmul.f32 %v5684_v55, %v5678_v58  ;;  %5697 = vrot.lane.b32.xlu1 %v12439_v56, %s11126_s3  ;;  %v5682_v63 = vpop.permute.xlu0 %5681 }
0x3886   :  { %v5687_v41 = vmul.f32 %v5682_v63, %v5677_v57  ;;  %5695 = vrot.lane.b32.xlu0 %v12441_v59, %s11126_s3 }
0x3887   :  { %v12449_v33 = vadd.f32 %v5690_v17, %v5688_v18 }
0x3888   :  { %v12451_v4 = vadd.f32 %v5689_v15, %v5687_v41 }
0x3889   :  { %5708 = vrot.lane.b32.xlu1 %v12449_v33, %s11126_s3 }
0x388a   :  { %5706 = vrot.lane.b32.xlu0 %v12451_v4, %s11126_s3 }
0x38f7   :  { %v5698_v22 = vpop.permute.xlu1 %5697 }
0x38f8   :  { %5703 = vst.msk [vmem:[#allocation8 + $0x48] sm:$0xff] %vm4278_vm4, %v5698_v22  ;;  %v5696_v50 = vpop.permute.xlu0 %5695 }
0x38f9   :  { %5702 = vst.msk [vmem:[#allocation8 + $0x40] sm:$0xff] %vm4278_vm4, %v5696_v50  ;;  %10005 = vmatprep.mubr.msk.f32.mxu0 %vm4278_vm4, %v5696_v50 }
0x38fa   :  { %10006 = vmatmul.mubr.msk.f32.vlgmr.msra.gmra.mrb[58].mxu0 %vm4278_vm4, %v5698_v22 }
0x38fb   :  { %v5709_v39 = vpop.permute.xlu1 %5708  ;;  %10438 = vmatpush3.bf16.msra.mxu0 %v12183_v27 }
0x38fc   :  { %5714 = vst.msk [vmem:[#allocation9 + $0x48] sm:$0xff] %vm4278_vm4, %v5709_v39  ;;  %v5707_v21 = vpop.permute.xlu0 %5706  ;;  %10444 = vmatprep.subr.bf16.mxu0 %v12183_v27 }
0x38fd   :  { %5713 = vst.msk [vmem:[#allocation9 + $0x40] sm:$0xff] %vm4278_vm4, %v5707_v21  ;;  %10012 = vmatprep.mubr.msk.f32.mxu1 %vm4278_vm4, %v5707_v21 }
0x38fe   :  { %10013 = vmatmul.mubr.msk.f32.vlgmr.msra.gmra.mrb[58].mxu1 %vm4278_vm4, %v5709_v39 }
0x38ff   :  { %10442 = vmatpush3.bf16.msra.mxu1 %v12188_v7 }
0x3900   :  { %10448 = vmatprep.subr.bf16.mxu1 %v12188_v7 }
0x39cd   :  { %v10007_v3 = vpop.f32.mrb[58].mxu0 }
0x39ce   :  { %v5797_v8 = vadd.f32 %v12472_v34, %v10007_v3  ;;  %v5791_v47 = vpop.f32.mrb[59].mxu0 }
0x39cf   :  { %v5792_v2 = vadd.f32 %v12472_v34, %v5791_v47 }
0x39d0   :  { %5897 = vrot.lane.b32.xlu1 %v5797_v8, %s11124_s29  ;;  %v5880_v14 = vadd.f32 %v5797_v8, %v5717_v12 }
0x39d1   :  { %5895 = vrot.lane.b32.xlu0 %v5792_v2, %s11124_s29  ;;  %v10014_v35 = vpop.f32.mrb[58].mxu1  ;;  %v5879_v20 = vadd.f32 %v5792_v2, %v5716_v16 }
0x39d2   :  { %v5876_v1 = vadd.f32 %v12481_v5, %v10014_v35  ;;  %v5870_v29 = vpop.f32.mrb[59].mxu1  ;;  %v9050_v19 = vmul.f32 -1.442695, %v5880_v14 }
0x39d3   :  { %v5871_v6 = vadd.f32 %v12481_v5, %v5870_v29  ;;  %v9049_v44 = vmul.f32 -1.442695, %v5879_v20 }
0x39d4   :  { %5949 = vrot.lane.b32.xlu1 %v5876_v1, %s11124_s29  ;;  %v5932_v42 = vadd.f32 %v5876_v1, %v5720_v24  ;;  %10815 = vpow2.f32 %v9050_v19 }
0x39d5   :  { %5947 = vrot.lane.b32.xlu0 %v5871_v6, %s11124_s29  ;;  %v5931_v62 = vadd.f32 %v5871_v6, %v5719_v26  ;;  %10817 = vpow2.f32 %v9049_v44 }
0x39d6   :  { %v9052_v28 = vmul.f32 -1.442695, %v5932_v42 }
0x39d7   :  { %v9051_v46 = vmul.f32 -1.442695, %v5931_v62 }
0x39d8   :  { %10819 = vpow2.f32 %v9052_v28 }
0x39d9   :  { %10821 = vpow2.f32 %v9051_v46 }
0x39de   :  { %v10816_v51 = vpop.eup %10815 }
0x39df   :  { %v10818_v61 = vpop.eup %10817  ;;  %v5888_v60 = vadd.f32 1.0, %v10816_v51 }
0x39e0   :  { %v5887_v13 = vadd.f32 1.0, %v10818_v61 }
0x39e1   :  { %10823 = vrcp.f32 %v5888_v60 }
0x39e2   :  { %v10820_v0 = vpop.eup %10819  ;;  %10825 = vrcp.f32 %v5887_v13 }
0x39e3   :  { %v10822_v48 = vpop.eup %10821  ;;  %v5940_v25 = vadd.f32 1.0, %v10820_v0 }
0x39e4   :  { %v5939_v32 = vadd.f32 1.0, %v10822_v48  ;;  %v6006_v48 = vld [vmem:[#allocation6 + $0x60] sm:$0xff] }
0x39e5   :  { %10827 = vrcp.f32 %v5940_v25 }
0x39e6   :  { %10829 = vrcp.f32 %v5939_v32  ;;  %v6010_v32 = vld [vmem:[#allocation7 + $0x68] sm:$0xff] }
0x39eb   :  { %v10824_v23 = vpop.eup %10823 }
0x39ec   :  { %v10826_v31 = vpop.eup %10825  ;;  %v5916_v50 = vsub.f32 1.0, %v10824_v23  ;;  %v5928_v3 = vmul.f32 %v10824_v23, %v12439_v56 }
0x39ed   :  { %v5915_v21 = vsub.f32 1.0, %v10826_v31  ;;  %v5927_v2 = vmul.f32 %v10826_v31, %v12441_v59 }
0x39ef   :  { %v10828_v11 = vpop.eup %10827 }
0x39f0   :  { %v10830_v38 = vpop.eup %10829  ;;  %v5968_v29 = vsub.f32 1.0, %v10828_v11 }
0x39f1   :  { %v5967_v14 = vsub.f32 1.0, %v10830_v38  ;;  %v5979_v56 = vmul.f32 %v10830_v38, %v12451_v4 }
0x3a42   :  { %v5898_v49 = vpop.permute.xlu1 %5897 }
0x3a43   :  { %v5902_v53 = vmul.f32 %v10824_v23, %v5898_v49  ;;  %v5896_v36 = vpop.permute.xlu0 %5895 }
0x3a44   :  { %v5901_v37 = vmul.f32 %v10826_v31, %v5896_v36  ;;  %v6009_v31 = vld [vmem:[#allocation7 + $0x60] sm:$0xff] }
0x3a45   :  { %5907 = vrot.lane.b32.xlu1 %v5902_v53, %s11125_s30 }
0x3a46   :  { %v5950_v10 = vpop.permute.xlu1 %5949  ;;  %5905 = vrot.lane.b32.xlu0 %v5901_v37, %s11125_s30 }
0x3a47   :  { %v5954_v40 = vmul.f32 %v10828_v11, %v5950_v10  ;;  %v5948_v30 = vpop.permute.xlu0 %5947 }
0x3a48   :  { %v5953_v43 = vmul.f32 %v10830_v38, %v5948_v30 }
0x3a49   :  { %5959 = vrot.lane.b32.xlu1 %v5954_v40, %s11125_s30 }
0x3a4a   :  { %5957 = vrot.lane.b32.xlu0 %v5953_v43, %s11125_s30 }
0x3ab7   :  { %v5908_v45 = vpop.permute.xlu1 %5907 }
0x3ab8   :  { %v5912_v52 = vadd.f32 %v5908_v45, %v5717_v12  ;;  %v5906_v54 = vpop.permute.xlu0 %5905 }
0x3ab9   :  { %v5911_v58 = vadd.f32 %v5906_v54, %v5716_v16  ;;  %v5980_v16 = vmul.f32 %v10828_v11, %v12449_v33 }
0x3aba   :  { %10831 = vtanh.f32 %v5912_v52 }
0x3abb   :  { %10833 = vtanh.f32 %v5911_v58  ;;  %v5960_v55 = vpop.permute.xlu1 %5959 }
0x3abc   :  { %v5964_v57 = vadd.f32 %v5960_v55, %v5720_v24  ;;  %v5958_v17 = vpop.permute.xlu0 %5957 }
0x3abd   :  { %v5963_v18 = vadd.f32 %v5958_v17, %v5719_v26 }
0x3abe   :  { %10835 = vtanh.f32 %v5964_v57 }
0x3abf   :  { %10837 = vtanh.f32 %v5963_v18 }
0x3ac4   :  { %v10832_v63 = vpop.eup %10831 }
0x3ac5   :  { %v10834_v15 = vpop.eup %10833  ;;  %5921 = vrot.lane.b32.xlu1 %v10832_v63, %s11126_s3 }
0x3ac6   :  { %5919 = vrot.lane.b32.xlu0 %v10834_v15, %s11126_s3 }
0x3ac8   :  { %v10836_v41 = vpop.eup %10835 }
0x3ac9   :  { %v10838_v22 = vpop.eup %10837  ;;  %5973 = vrot.lane.b32.xlu1 %v10836_v41, %s11126_s3 }
0x3aca   :  { %5971 = vrot.lane.b32.xlu0 %v10838_v22, %s11126_s3 }
0x3b37   :  { %v5922_v39 = vpop.permute.xlu1 %5921 }
0x3b38   :  { %v5926_v8 = vmul.f32 %v5922_v39, %v5916_v50  ;;  %v5920_v47 = vpop.permute.xlu0 %5919 }
0x3b39   :  { %v5925_v35 = vmul.f32 %v5920_v47, %v5915_v21 }
0x3b3a   :  { %v12497_v1 = vadd.f32 %v5928_v3, %v5926_v8 }
0x3b3b   :  { %v12499_v6 = vadd.f32 %v5927_v2, %v5925_v35  ;;  %v5974_v12 = vpop.permute.xlu1 %5973 }
0x3b3c   :  { %v5978_v20 = vmul.f32 %v5974_v12, %v5968_v29  ;;  %5987 = vrot.lane.b32.xlu1 %v12497_v1, %s11126_s3  ;;  %v5972_v24 = vpop.permute.xlu0 %5971 }
0x3b3d   :  { %v5977_v19 = vmul.f32 %v5972_v24, %v5967_v14  ;;  %5985 = vrot.lane.b32.xlu0 %v12499_v6, %s11126_s3 }
0x3b3e   :  { %v12507_v59 = vadd.f32 %v5980_v16, %v5978_v20 }
0x3b3f   :  { %v12509_v42 = vadd.f32 %v5979_v56, %v5977_v19  ;;  %v6617_v19 = vld [vmem:[%s13375_s10] sm:$0xff] }
0x3b40   :  { %5998 = vrot.lane.b32.xlu1 %v12507_v59, %s11126_s3 }
0x3b41   :  { %5996 = vrot.lane.b32.xlu0 %v12509_v42, %s11126_s3 }
0x3bae   :  { %v5988_v33 = vpop.permute.xlu1 %5987 }
0x3baf   :  { %5993 = vst.msk [vmem:[#allocation8 + $0x58] sm:$0xff] %vm4278_vm4, %v5988_v33  ;;  %v5986_v26 = vpop.permute.xlu0 %5985 }
0x3bb0   :  { %5992 = vst.msk [vmem:[#allocation8 + $0x50] sm:$0xff] %vm4278_vm4, %v5986_v26  ;;  %10019 = vmatprep.mubr.msk.f32.mxu0 %vm4278_vm4, %v5986_v26 }
0x3bb1   :  { %10020 = vmatmul.mubr.msk.f32.vlgmr.msra.gmra.mrb[60].mxu0 %vm4278_vm4, %v5988_v33  ;;  %v6618_v33 = vld [vmem:[%s13375_s10 + $0x8] sm:$0xff] }
0x3bb2   :  { %v5999_v4 = vpop.permute.xlu1 %5998  ;;  %10446 = vmatpush3.bf16.msra.mxu0 %v12183_v27  ;;  %v10451_v26 = vpack.c.bf16 %v6618_v33, %v6617_v19  ;;  %v12618_v33 = vld [vmem:[%s13377_s12] ss:$0 sm:$0xff] }
0x3bb3   :  { %6004 = vst.msk [vmem:[#allocation9 + $0x58] sm:$0xff] %vm4278_vm4, %v5999_v4  ;;  %v5997_v44 = vpop.permute.xlu0 %5996 }
0x3bb4   :  { %6003 = vst.msk [vmem:[#allocation9 + $0x50] sm:$0xff] %vm4278_vm4, %v5997_v44  ;;  %10026 = vmatprep.mubr.msk.f32.mxu1 %vm4278_vm4, %v5997_v44  ;;  %10452 = vmatprep.subr.bf16.mxu0 %v10451_v26  ;;  %v9087_v44 = vld [vmem:[%s13375_s10 + $0x18] sm:$0xff] }
0x3bb5   :  { %10027 = vmatmul.mubr.msk.f32.vlgmr.msra.gmra.mrb[60].mxu1 %vm4278_vm4, %v5999_v4  ;;  %v9086_v4 = vld [vmem:[%s13375_s10 + $0x10] sm:$0xff] }
0x3bb6   :  { %10450 = vmatpush3.bf16.msra.mxu1 %v12188_v7  ;;  %v6007_v7 = vld [vmem:[#allocation6 + $0x68] sm:$0xff] }
0x3c84   :  { %v10021_v62 = vpop.f32.mrb[60].mxu0 }
0x3c85   :  { %v6087_v28 = vadd.f32 %v12472_v34, %v10021_v62  ;;  %v6081_v46 = vpop.f32.mrb[61].mxu0  ;;  %v10455_v62 = vpack.c.bf16 %v9087_v44, %v9086_v4 }
0x3c86   :  { %v6082_v51 = vadd.f32 %v12472_v34, %v6081_v46 }
0x3c87   :  { %6187 = vrot.lane.b32.xlu1 %v6087_v28, %s11124_s29  ;;  %v6170_v13 = vadd.f32 %v6087_v28, %v6007_v7  ;;  %10456 = vmatprep.subr.bf16.mxu1 %v10455_v62 }
0x3c88   :  { %6185 = vrot.lane.b32.xlu0 %v6082_v51, %s11124_s29  ;;  %v10028_v27 = vpop.f32.mrb[60].mxu1  ;;  %v6169_v25 = vadd.f32 %v6082_v51, %v6006_v48 }
0x3c89   :  { %v6166_v61 = vadd.f32 %v12481_v5, %v10028_v27  ;;  %v6160_v60 = vpop.f32.mrb[61].mxu1  ;;  %v9058_v23 = vmul.f32 -1.442695, %v6170_v13 }
0x3c8a   :  { %v6161_v0 = vadd.f32 %v12481_v5, %v6160_v60  ;;  %v9057_v53 = vmul.f32 -1.442695, %v6169_v25 }
0x3c8b   :  { %6239 = vrot.lane.b32.xlu1 %v6166_v61, %s11124_s29  ;;  %v6222_v49 = vadd.f32 %v6166_v61, %v6010_v32  ;;  %10839 = vpow2.f32 %v9058_v23 }
0x3c8c   :  { %6237 = vrot.lane.b32.xlu0 %v6161_v0, %s11124_s29  ;;  %v6221_v36 = vadd.f32 %v6161_v0, %v6009_v31  ;;  %10841 = vpow2.f32 %v9057_v53 }
0x3c8d   :  { %v9060_v37 = vmul.f32 -1.442695, %v6222_v49 }
0x3c8e   :  { %v9059_v11 = vmul.f32 -1.442695, %v6221_v36 }
0x3c8f   :  { %10843 = vpow2.f32 %v9060_v37 }
0x3c90   :  { %10845 = vpow2.f32 %v9059_v11 }
0x3c95   :  { %v10840_v10 = vpop.eup %10839 }
0x3c96   :  { %v10842_v38 = vpop.eup %10841  ;;  %v6178_v40 = vadd.f32 1.0, %v10840_v10 }
0x3c97   :  { %v6177_v43 = vadd.f32 1.0, %v10842_v38 }
0x3c98   :  { %10847 = vrcp.f32 %v6178_v40  ;;  %v6586_v40 = vld [vmem:[#allocation8 + $0x8] sm:$0xff] }
0x3c99   :  { %v10844_v30 = vpop.eup %10843  ;;  %10849 = vrcp.f32 %v6177_v43  ;;  %v6601_v43 = vld [vmem:[#allocation9] sm:$0xff] }
0x3c9a   :  { %v10846_v45 = vpop.eup %10845  ;;  %v6230_v52 = vadd.f32 1.0, %v10844_v30  ;;  %v6587_v30 = vld [vmem:[#allocation8 + $0x10] sm:$0xff] }
0x3c9b   :  { %v6229_v54 = vadd.f32 1.0, %v10846_v45  ;;  %v6588_v45 = vld [vmem:[#allocation8 + $0x18] sm:$0xff] }
0x3c9c   :  { %10851 = vrcp.f32 %v6230_v52  ;;  %v6602_v52 = vld [vmem:[#allocation9 + $0x8] sm:$0xff] }
0x3c9d   :  { %10853 = vrcp.f32 %v6229_v54  ;;  %v6589_v54 = vld [vmem:[#allocation8 + $0x20] sm:$0xff] }
0x3ca2   :  { %v10848_v58 = vpop.eup %10847 }
0x3ca3   :  { %v10850_v57 = vpop.eup %10849  ;;  %v6206_v28 = vsub.f32 1.0, %v10848_v58  ;;  %v6218_v27 = vmul.f32 %v10848_v58, %v12497_v1 }
0x3ca4   :  { %v6205_v51 = vsub.f32 1.0, %v10850_v57  ;;  %v6217_v0 = vmul.f32 %v10850_v57, %v12499_v6 }
0x3ca6   :  { %v10852_v15 = vpop.eup %10851 }
0x3ca7   :  { %v10854_v22 = vpop.eup %10853  ;;  %v6270_v49 = vmul.f32 %v10852_v15, %v12507_v59 }
0x3ca8   :  { %v6257_v23 = vsub.f32 1.0, %v10854_v22  ;;  %v6269_v1 = vmul.f32 %v10854_v22, %v12509_v42  ;;  %v6585_v42 = vld [vmem:[#allocation8] sm:$0xff] }
0x3cf9   :  { %v6188_v55 = vpop.permute.xlu1 %6187 }
0x3cfa   :  { %v6192_v17 = vmul.f32 %v10848_v58, %v6188_v55  ;;  %v6186_v18 = vpop.permute.xlu0 %6185  ;;  %v6603_v58 = vld [vmem:[#allocation9 + $0x10] sm:$0xff]  ;;  %v6590_v55 = vld [vmem:[#allocation8 + $0x28] sm:$0xff] }
0x3cfb   :  { %v6191_v63 = vmul.f32 %v10850_v57, %v6186_v18  ;;  %v6604_v57 = vld [vmem:[#allocation9 + $0x18] sm:$0xff]  ;;  %v6605_v18 = vld [vmem:[#allocation9 + $0x20] sm:$0xff] }
0x3cfc   :  { %6197 = vrot.lane.b32.xlu1 %v6192_v17, %s11125_s30  ;;  %v6591_v17 = vld [vmem:[#allocation8 + $0x30] sm:$0xff] }
0x3cfd   :  { %v6240_v41 = vpop.permute.xlu1 %6239  ;;  %6195 = vrot.lane.b32.xlu0 %v6191_v63, %s11125_s30  ;;  %v6592_v63 = vld [vmem:[#allocation8 + $0x38] sm:$0xff] }
0x3cfe   :  { %v6244_v50 = vmul.f32 %v10852_v15, %v6240_v41  ;;  %v6238_v39 = vpop.permute.xlu0 %6237  ;;  %v6593_v41 = vld [vmem:[#allocation8 + $0x40] sm:$0xff] }
0x3cff   :  { %v6243_v21 = vmul.f32 %v10854_v22, %v6238_v39  ;;  %v6607_v22 = vld [vmem:[#allocation9 + $0x30] sm:$0xff]  ;;  %v6608_v39 = vld [vmem:[#allocation9 + $0x38] sm:$0xff] }
0x3d00   :  { %6249 = vrot.lane.b32.xlu1 %v6244_v50, %s11125_s30  ;;  %v6594_v50 = vld [vmem:[#allocation8 + $0x48] sm:$0xff] }
0x3d01   :  { %6247 = vrot.lane.b32.xlu0 %v6243_v21, %s11125_s30  ;;  %v6595_v21 = vld [vmem:[#allocation8 + $0x50] sm:$0xff] }
0x3d6e   :  { %v6198_v3 = vpop.permute.xlu1 %6197 }
0x3d6f   :  { %v6202_v8 = vadd.f32 %v6198_v3, %v6007_v7  ;;  %v6196_v47 = vpop.permute.xlu0 %6195  ;;  %v6609_v3 = vld [vmem:[#allocation9 + $0x40] sm:$0xff] }
0x3d70   :  { %v6201_v2 = vadd.f32 %v6196_v47, %v6006_v48  ;;  %v6258_v48 = vsub.f32 1.0, %v10852_v15  ;;  %v6606_v15 = vld [vmem:[#allocation9 + $0x28] sm:$0xff] }
0x3d71   :  { %10855 = vtanh.f32 %v6202_v8  ;;  %v6596_v8 = vld [vmem:[#allocation8 + $0x58] sm:$0xff]  ;;  %v6610_v47 = vld [vmem:[#allocation9 + $0x48] sm:$0xff] }
0x3d72   :  { %10857 = vtanh.f32 %v6201_v2  ;;  %v6250_v35 = vpop.permute.xlu1 %6249 }
0x3d73   :  { %v6254_v29 = vadd.f32 %v6250_v35, %v6010_v32  ;;  %v6248_v12 = vpop.permute.xlu0 %6247  ;;  %v6611_v35 = vld [vmem:[#allocation9 + $0x50] sm:$0xff] }
0x3d74   :  { %v6253_v14 = vadd.f32 %v6248_v12, %v6009_v31  ;;  %v6612_v12 = vld [vmem:[#allocation9 + $0x58] sm:$0xff] }
0x3d75   :  { %10859 = vtanh.f32 %v6254_v29 }
0x3d76   :  { %10861 = vtanh.f32 %v6253_v14 }
0x3d7b   :  { %v10856_v16 = vpop.eup %10855 }
0x3d7c   :  { %v10858_v20 = vpop.eup %10857  ;;  %6211 = vrot.lane.b32.xlu1 %v10856_v16, %s11126_s3 }
0x3d7d   :  { %6209 = vrot.lane.b32.xlu0 %v10858_v20, %s11126_s3 }
0x3d7f   :  { %v10860_v24 = vpop.eup %10859 }
0x3d80   :  { %v10862_v56 = vpop.eup %10861  ;;  %6263 = vrot.lane.b32.xlu1 %v10860_v24, %s11126_s3 }
0x3d81   :  { %6261 = vrot.lane.b32.xlu0 %v10862_v56, %s11126_s3 }
0x3dee   :  { %v6212_v46 = vpop.permute.xlu1 %6211 }
0x3def   :  { %v6216_v61 = vmul.f32 %v6212_v46, %v6206_v28  ;;  %v6210_v60 = vpop.permute.xlu0 %6209 }
0x3df0   :  { %v6215_v7 = vmul.f32 %v6210_v60, %v6205_v51 }
0x3df1   :  { %v12555_v13 = vadd.f32 %v6218_v27, %v6216_v61  ;;  %v12635_v27 = vld [vmem:[%s13377_s12 + $0x1] ss:$0 sm:$0xff] }
0x3df2   :  { %v12557_v25 = vadd.f32 %v6217_v0, %v6215_v7  ;;  %v6264_v32 = vpop.permute.xlu1 %6263 }
0x3df3   :  { %v6268_v31 = vmul.f32 %v6264_v32, %v6258_v48  ;;  %6277 = vrot.lane.b32.xlu1 %v12555_v13, %s11126_s3  ;;  %v6262_v53 = vpop.permute.xlu0 %6261 }
0x3df4   :  { %v6267_v36 = vmul.f32 %v6262_v53, %v6257_v23  ;;  %6275 = vrot.lane.b32.xlu0 %v12557_v25, %s11126_s3 }
0x3df5   :  { %v12565_v6 = vadd.f32 %v6270_v49, %v6268_v31 }
0x3df6   :  { %v12567_v37 = vadd.f32 %v6269_v1, %v6267_v36 }
0x3df7   :  { %6288 = vrot.lane.b32.xlu1 %v12565_v6, %s11126_s3 }
0x3df8   :  { %6286 = vrot.lane.b32.xlu0 %v12567_v37, %s11126_s3 }
0x3e65   :  { %v6278_v59 = vpop.permute.xlu1 %6277 }
0x3e66   :  { %6283 = vst.msk [vmem:[#allocation8 + $0x68] sm:$0xff] %vm4278_vm4, %v6278_v59  ;;  %v6276_v11 = vpop.permute.xlu0 %6275 }
0x3e67   :  { %6282 = vst.msk [vmem:[#allocation8 + $0x60] sm:$0xff] %vm4278_vm4, %v6276_v11  ;;  %10033 = vmatprep.mubr.msk.f32.mxu0 %vm4278_vm4, %v6276_v11 }
0x3e68   :  { %10034 = vmatmul.mubr.msk.f32.vlgmr.msra.gmra.mrb[62].mxu0 %vm4278_vm4, %v6278_v59 }
0x3e69   :  { %v6289_v10 = vpop.permute.xlu1 %6288  ;;  %10454 = vmatpush3.bf16.msra.mxu0 %v10451_v26  ;;  %10047 = vmatprep.mubr.msk.f32.mxu0 %vm4278_vm4, %v6585_v42 }
0x3e6a   :  { %6294 = vst.msk [vmem:[#allocation9 + $0x68] sm:$0xff] %vm4278_vm4, %v6289_v10  ;;  %v6287_v38 = vpop.permute.xlu0 %6286 }
0x3e6b   :  { %6293 = vst.msk [vmem:[#allocation9 + $0x60] sm:$0xff] %vm4278_vm4, %v6287_v38  ;;  %10040 = vmatprep.mubr.msk.f32.mxu1 %vm4278_vm4, %v6287_v38 }
0x3e6c   :  { %10041 = vmatmul.mubr.msk.f32.vlgmr.msra.gmra.mrb[62].mxu1 %vm4278_vm4, %v6289_v10  ;;  %10048 = vmatmul.mubr.msk.f32.vlgmr.msra.gmra.mrb[64].mxu0 %vm4278_vm4, %v6586_v40 }
0x3e6d   :  { %10050 = vmatprep.mubr.msk.f32.mxu0 %vm4278_vm4, %v6587_v30  ;;  %10458 = vmatpush3.bf16.msra.mxu1 %v10455_v62  ;;  %v6598_v29 = vld [vmem:[#allocation8 + $0x68] sm:$0xff] }
0x3e6e   :  { %10075 = vmatprep.mubr.msk.f32.mxu1 %vm4278_vm4, %v6601_v43  ;;  %v6597_v2 = vld [vmem:[#allocation8 + $0x60] sm:$0xff] }
0x3e70   :  { %10051 = vmatmul.mubr.msk.f32.gmra.mrb[66].mxu0 %vm4278_vm4, %v6588_v45  ;;  %10076 = vmatmul.mubr.msk.f32.vlgmr.msra.gmra.mrb[64].mxu1 %vm4278_vm4, %v6602_v52 }
0x3e71   :  { %10053 = vmatprep.mubr.msk.f32.mxu0 %vm4278_vm4, %v6589_v54  ;;  %10078 = vmatprep.mubr.msk.f32.mxu1 %vm4278_vm4, %v6603_v58  ;;  %v6614_v16 = vld [vmem:[#allocation9 + $0x68] sm:$0xff] }
0x3e72   :  { %v6613_v14 = vld [vmem:[#allocation9 + $0x60] sm:$0xff] }
0x3e74   :  { %10054 = vmatmul.mubr.msk.f32.gmra.mrb[68].mxu0 %vm4278_vm4, %v6590_v55  ;;  %10079 = vmatmul.mubr.msk.f32.gmra.mrb[66].mxu1 %vm4278_vm4, %v6604_v57 }
0x3e75   :  { %10056 = vmatprep.mubr.msk.f32.mxu0 %vm4278_vm4, %v6591_v17  ;;  %10081 = vmatprep.mubr.msk.f32.mxu1 %vm4278_vm4, %v6605_v18 }
0x3e78   :  { %10057 = vmatmul.mubr.msk.f32.gmra.mrb[70].mxu0 %vm4278_vm4, %v6592_v63  ;;  %10082 = vmatmul.mubr.msk.f32.gmra.mrb[68].mxu1 %vm4278_vm4, %v6606_v15 }
0x3e79   :  { %10059 = vmatprep.mubr.msk.f32.mxu0 %vm4278_vm4, %v6593_v41  ;;  %10084 = vmatprep.mubr.msk.f32.mxu1 %vm4278_vm4, %v6607_v22 }
0x3e7c   :  { %10060 = vmatmul.mubr.msk.f32.gmra.mrb[72].mxu0 %vm4278_vm4, %v6594_v50  ;;  %10085 = vmatmul.mubr.msk.f32.gmra.mrb[70].mxu1 %vm4278_vm4, %v6608_v39 }
0x3e7d   :  { %10062 = vmatprep.mubr.msk.f32.mxu0 %vm4278_vm4, %v6595_v21  ;;  %10087 = vmatprep.mubr.msk.f32.mxu1 %vm4278_vm4, %v6609_v3 }
0x3e80   :  { %10063 = vmatmul.mubr.msk.f32.gmra.mrb[74].mxu0 %vm4278_vm4, %v6596_v8  ;;  %10088 = vmatmul.mubr.msk.f32.gmra.mrb[72].mxu1 %vm4278_vm4, %v6610_v47 }
0x3e81   :  { %10065 = vmatprep.mubr.msk.f32.mxu0 %vm4278_vm4, %v6597_v2  ;;  %10090 = vmatprep.mubr.msk.f32.mxu1 %vm4278_vm4, %v6611_v35 }
0x3e84   :  { %10066 = vmatmul.mubr.msk.f32.gmra.mrb[76].mxu0 %vm4278_vm4, %v6598_v29  ;;  %10091 = vmatmul.mubr.msk.f32.gmra.mrb[74].mxu1 %vm4278_vm4, %v6612_v12 }
0x3e85   :  { %10093 = vmatprep.mubr.msk.f32.mxu1 %vm4278_vm4, %v6613_v14 }
0x3e88   :  { %10094 = vmatmul.mubr.msk.f32.gmra.mrb[76].mxu1 %vm4278_vm4, %v6614_v16 }
0x3f3b   :  { %v10035_v20 = vpop.f32.mrb[62].mxu0 }
0x3f3c   :  { %v12610_v24 = vadd.f32 %v12472_v34, %v10035_v20  ;;  %v6371_v56 = vpop.f32.mrb[63].mxu0 }
0x3f3d   :  { %v12613_v19 = vadd.f32 %v12472_v34, %v6371_v56 }
0x3f3e   :  { %6477 = vrot.lane.b32.xlu1 %v12610_v24, %s11124_s29 }
0x3f3f   :  { %v10049_v26 = vpop.f32.mrb[64].mxu0  ;;  %6475 = vrot.lane.b32.xlu0 %v12613_v19, %s11124_s29  ;;  %v10042_v4 = vpop.f32.mrb[62].mxu1 }
0x3f40   :  { %v6746_v44 = vadd.f32 %v10049_v26, %v12618_v33  ;;  %v12626_v62 = vadd.f32 %v12481_v5, %v10042_v4  ;;  %v6450_v34 = vpop.f32.mrb[63].mxu1  ;;  %v6740_v28 = vpop.f32.mrb[65].mxu0 }
0x3f41   :  { %v12629_v46 = vadd.f32 %v12481_v5, %v6450_v34  ;;  %v6741_v51 = vadd.f32 %v12618_v33, %v6740_v28 }
0x3f42   :  { %6820 = vst.msk [vmem:[#allocation10 + $0x8] sm:$0xff] %vm4015_vm3, %v6746_v44  ;;  %6529 = vrot.lane.b32.xlu1 %v12626_v62, %s11124_s29 }
0x3f43   :  { %6819 = vst.msk [vmem:[#allocation10] sm:$0xff] %vm4015_vm3, %v6741_v51  ;;  %v10052_v61 = vpop.f32.mrb[66].mxu0  ;;  %v10077_v60 = vpop.f32.mrb[64].mxu1  ;;  %6527 = vrot.lane.b32.xlu0 %v12629_v46, %s11124_s29  ;;  %v6297_v51 = vld [vmem:[#allocation6 + $0x78] sm:$0xff] }
0x3f44   :  { %v6756_v5 = vadd.f32 %v10052_v61, %v12618_v33  ;;  %v6966_v0 = vadd.f32 %v10077_v60, %v12635_v27  ;;  %v6750_v7 = vpop.f32.mrb[67].mxu0  ;;  %v6960_v48 = vpop.f32.mrb[65].mxu1  ;;  %v6460_v61 = vadd.f32 %v12610_v24, %v6297_v51  ;;  %v6296_v60 = vld [vmem:[#allocation6 + $0x70] sm:$0xff] }
0x3f45   :  { %v6751_v32 = vadd.f32 %v12618_v33, %v6750_v7  ;;  %v6961_v23 = vadd.f32 %v12635_v27, %v6960_v48 }
0x3f46   :  { %6822 = vst.msk [vmem:[#allocation10 + $0x18] sm:$0xff] %vm4015_vm3, %v6756_v5  ;;  %7040 = vst.msk [vmem:[#allocation11 + $0x8] sm:$0xff] %vm4015_vm3, %v6966_v0  ;;  %v6459_v5 = vadd.f32 %v12613_v19, %v6296_v60  ;;  %v6300_v0 = vld [vmem:[#allocation7 + $0x78] sm:$0xff]  ;;  %v9066_v7 = vmul.f32 -1.442695, %v6460_v61 }
0x3f47   :  { %6821 = vst.msk [vmem:[#allocation10 + $0x10] sm:$0xff] %vm4015_vm3, %v6751_v32  ;;  %7039 = vst.msk [vmem:[#allocation11] sm:$0xff] %vm4015_vm3, %v6961_v23  ;;  %v10055_v49 = vpop.f32.mrb[68].mxu0  ;;  %v10080_v31 = vpop.f32.mrb[66].mxu1  ;;  %v6512_v48 = vadd.f32 %v12626_v62, %v6300_v0  ;;  %v6299_v32 = vld [vmem:[#allocation7 + $0x70] sm:$0xff] }
0x3f48   :  { %v6766_v53 = vadd.f32 %v10055_v49, %v12618_v33  ;;  %v6976_v1 = vadd.f32 %v10080_v31, %v12635_v27  ;;  %v6760_v36 = vpop.f32.mrb[69].mxu0  ;;  %v6970_v59 = vpop.f32.mrb[67].mxu1  ;;  %v9065_v23 = vmul.f32 -1.442695, %v6459_v5  ;;  %v6511_v49 = vadd.f32 %v12629_v46, %v6299_v32 }
0x3f49   :  { %v6761_v11 = vadd.f32 %v12618_v33, %v6760_v36  ;;  %v6971_v42 = vadd.f32 %v12635_v27, %v6970_v59  ;;  %10863 = vpow2.f32 %v9066_v7  ;;  %v9068_v31 = vmul.f32 -1.442695, %v6512_v48 }
0x3f4a   :  { %6824 = vst.msk [vmem:[#allocation10 + $0x28] sm:$0xff] %vm4015_vm3, %v6766_v53  ;;  %7042 = vst.msk [vmem:[#allocation11 + $0x18] sm:$0xff] %vm4015_vm3, %v6976_v1  ;;  %10865 = vpow2.f32 %v9065_v23  ;;  %v9067_v53 = vmul.f32 -1.442695, %v6511_v49 }
0x3f4b   :  { %6823 = vst.msk [vmem:[#allocation10 + $0x20] sm:$0xff] %vm4015_vm3, %v6761_v11  ;;  %7041 = vst.msk [vmem:[#allocation11 + $0x10] sm:$0xff] %vm4015_vm3, %v6971_v42  ;;  %v10058_v10 = vpop.f32.mrb[70].mxu0  ;;  %v10083_v38 = vpop.f32.mrb[68].mxu1  ;;  %10867 = vpow2.f32 %v9068_v31 }
0x3f4c   :  { %v6776_v40 = vadd.f32 %v10058_v10, %v12618_v33  ;;  %v6986_v30 = vadd.f32 %v10083_v38, %v12635_v27  ;;  %v6770_v43 = vpop.f32.mrb[71].mxu0  ;;  %v6980_v45 = vpop.f32.mrb[69].mxu1  ;;  %10869 = vpow2.f32 %v9067_v53 }
0x3f4d   :  { %v6771_v52 = vadd.f32 %v12618_v33, %v6770_v43  ;;  %v6981_v54 = vadd.f32 %v12635_v27, %v6980_v45 }
0x3f4e   :  { %6826 = vst.msk [vmem:[#allocation10 + $0x38] sm:$0xff] %vm4015_vm3, %v6776_v40  ;;  %7044 = vst.msk [vmem:[#allocation11 + $0x28] sm:$0xff] %vm4015_vm3, %v6986_v30 }
0x3f4f   :  { %6825 = vst.msk [vmem:[#allocation10 + $0x30] sm:$0xff] %vm4015_vm3, %v6771_v52  ;;  %7043 = vst.msk [vmem:[#allocation11 + $0x20] sm:$0xff] %vm4015_vm3, %v6981_v54  ;;  %v10061_v58 = vpop.f32.mrb[72].mxu0  ;;  %v10086_v55 = vpop.f32.mrb[70].mxu1 }
0x3f50   :  { %v6786_v57 = vadd.f32 %v10061_v58, %v12618_v33  ;;  %v6996_v17 = vadd.f32 %v10086_v55, %v12635_v27  ;;  %v6780_v18 = vpop.f32.mrb[73].mxu0  ;;  %v6990_v63 = vpop.f32.mrb[71].mxu1 }
0x3f51   :  { %v6781_v15 = vadd.f32 %v12618_v33, %v6780_v18  ;;  %v6991_v41 = vadd.f32 %v12635_v27, %v6990_v63 }
0x3f52   :  { %6828 = vst.msk [vmem:[#allocation10 + $0x48] sm:$0xff] %vm4015_vm3, %v6786_v57  ;;  %7046 = vst.msk [vmem:[#allocation11 + $0x38] sm:$0xff] %vm4015_vm3, %v6996_v17 }
0x3f53   :  { %6827 = vst.msk [vmem:[#allocation10 + $0x40] sm:$0xff] %vm4015_vm3, %v6781_v15  ;;  %7045 = vst.msk [vmem:[#allocation11 + $0x30] sm:$0xff] %vm4015_vm3, %v6991_v41  ;;  %v10064_v22 = vpop.f32.mrb[74].mxu0  ;;  %v10089_v50 = vpop.f32.mrb[72].mxu1 }
0x3f54   :  { %v6796_v39 = vadd.f32 %v10064_v22, %v12618_v33  ;;  %v7006_v21 = vadd.f32 %v10089_v50, %v12635_v27  ;;  %v6790_v3 = vpop.f32.mrb[75].mxu0  ;;  %v7000_v8 = vpop.f32.mrb[73].mxu1 }
0x3f55   :  { %v6791_v47 = vadd.f32 %v12618_v33, %v6790_v3  ;;  %v7001_v2 = vadd.f32 %v12635_v27, %v7000_v8  ;;  %v10864_v1 = vpop.eup %10863  ;;  %v9107_v3 = vld [vmem:[%s13376_s11 + $0x18] sm:$0xff]  ;;  %v7055_v8 = vld [vmem:[%s13376_s11] sm:$0xff] }
0x3f56   :  { %6830 = vst.msk [vmem:[#allocation10 + $0x58] sm:$0xff] %vm4015_vm3, %v6796_v39  ;;  %7048 = vst.msk [vmem:[#allocation11 + $0x48] sm:$0xff] %vm4015_vm3, %v7006_v21  ;;  %v10866_v36 = vpop.eup %10865  ;;  %v6468_v24 = vadd.f32 1.0, %v10864_v1  ;;  %v9106_v21 = vld [vmem:[%s13376_s11 + $0x10] sm:$0xff] }
0x3f57   :  { %6829 = vst.msk [vmem:[#allocation10 + $0x50] sm:$0xff] %vm4015_vm3, %v6791_v47  ;;  %7047 = vst.msk [vmem:[#allocation11 + $0x40] sm:$0xff] %vm4015_vm3, %v7001_v2  ;;  %v10067_v35 = vpop.f32.mrb[76].mxu0  ;;  %v10092_v29 = vpop.f32.mrb[74].mxu1  ;;  %v6467_v11 = vadd.f32 1.0, %v10866_v36  ;;  %v12712_v47 = vpack.c.bf16 %v9107_v3, %v9106_v21  ;;  %v7056_v2 = vld [vmem:[%s13376_s11 + $0x8] sm:$0xff] }
0x3f58   :  { %v6806_v12 = vadd.f32 %v10067_v35, %v12618_v33  ;;  %v7016_v14 = vadd.f32 %v10092_v29, %v12635_v27  ;;  %v6800_v16 = vpop.f32.mrb[77].mxu0  ;;  %v7010_v20 = vpop.f32.mrb[75].mxu1  ;;  %10871 = vrcp.f32 %v6468_v24  ;;  %v12717_v35 = vpack.c.bf16 %v7056_v2, %v7055_v8  ;;  %v12791_v21 = vld [vmem:[#allocation10 + $0x8] sm:$0xff]  ;;  %v12794_v8 = vld [vmem:[#allocation10 + $0x18] sm:$0xff] }
0x3f59   :  { %v6801_v56 = vadd.f32 %v12618_v33, %v6800_v16  ;;  %v7011_v26 = vadd.f32 %v12635_v27, %v7010_v20  ;;  %v10868_v59 = vpop.eup %10867  ;;  %10873 = vrcp.f32 %v6467_v11  ;;  %10464 = vmatprep.subr.bf16.mxu1 %v12712_v47 }
0x3f5a   :  { %6832 = vst.msk [vmem:[#allocation10 + $0x68] sm:$0xff] %vm4015_vm3, %v6806_v12  ;;  %7050 = vst.msk [vmem:[#allocation11 + $0x58] sm:$0xff] %vm4015_vm3, %v7016_v14  ;;  %v10870_v19 = vpop.eup %10869  ;;  %v6520_v42 = vadd.f32 1.0, %v10868_v59  ;;  %10466 = vmatpush3.bf16.msra.mxu1 %v12712_v47  ;;  %10460 = vmatprep.subr.bf16.mxu0 %v12717_v35 }
0x3f5b   :  { %6831 = vst.msk [vmem:[#allocation10 + $0x60] sm:$0xff] %vm4015_vm3, %v6801_v56  ;;  %7049 = vst.msk [vmem:[#allocation11 + $0x50] sm:$0xff] %vm4015_vm3, %v7011_v26  ;;  %v10095_v4 = vpop.f32.mrb[76].mxu1  ;;  %v6519_v62 = vadd.f32 1.0, %v10870_v19  ;;  %10462 = vmatpush3.bf16.msra.mxu0 %v12717_v35  ;;  %10472 = vmatprep.subr.bf16.mxu1 %v12712_v47 }
0x3f5c   :  { %v7026_v44 = vadd.f32 %v10095_v4, %v12635_v27  ;;  %v7020_v34 = vpop.f32.mrb[77].mxu1  ;;  %10875 = vrcp.f32 %v6520_v42  ;;  %10468 = vmatprep.subr.bf16.mxu0 %v12717_v35 }
0x3f5d   :  { %v7021_v28 = vadd.f32 %v12635_v27, %v7020_v34  ;;  %10877 = vrcp.f32 %v6519_v62 }
0x3f5e   :  { %7052 = vst.msk [vmem:[#allocation11 + $0x68] sm:$0xff] %vm4015_vm3, %v7026_v44 }
0x3f5f   :  { %7051 = vst.msk [vmem:[#allocation11 + $0x60] sm:$0xff] %vm4015_vm3, %v7021_v28 }
0x3f62   :  { %v10872_v10 = vpop.eup %10871 }
0x3f63   :  { %v10874_v38 = vpop.eup %10873  ;;  %v6496_v20 = vsub.f32 1.0, %v10872_v10  ;;  %v6508_v4 = vmul.f32 %v10872_v10, %v12555_v13 }
0x3f64   :  { %v6495_v26 = vsub.f32 1.0, %v10874_v38  ;;  %v6507_v28 = vmul.f32 %v10874_v38, %v12557_v25 }
0x3f66   :  { %v10876_v45 = vpop.eup %10875 }
0x3f67   :  { %v10878_v54 = vpop.eup %10877  ;;  %v6560_v48 = vmul.f32 %v10876_v45, %v12565_v6 }
0x3f68   :  { %v6547_v7 = vsub.f32 1.0, %v10878_v54  ;;  %v6559_v49 = vmul.f32 %v10878_v54, %v12567_v37 }
0x3fb0   :  { %v6478_v46 = vpop.permute.xlu1 %6477 }
0x3fb1   :  { %v6482_v40 = vmul.f32 %v10872_v10, %v6478_v46  ;;  %v6476_v30 = vpop.permute.xlu0 %6475  ;;  %v12762_v46 = vld [vmem:[%s13378_s13] ss:$0 sm:$0xff] }
0x3fb2   :  { %v6481_v43 = vmul.f32 %v10874_v38, %v6476_v30 }
0x3fb3   :  { %6487 = vrot.lane.b32.xlu1 %v6482_v40, %s11125_s30 }
0x3fb4   :  { %v6530_v52 = vpop.permute.xlu1 %6529  ;;  %6485 = vrot.lane.b32.xlu0 %v6481_v43, %s11125_s30 }
0x3fb5   :  { %v6534_v58 = vmul.f32 %v10876_v45, %v6530_v52  ;;  %v6528_v55 = vpop.permute.xlu0 %6527 }
0x3fb6   :  { %v6533_v57 = vmul.f32 %v10878_v54, %v6528_v55 }
0x3fb7   :  { %6539 = vrot.lane.b32.xlu1 %v6534_v58, %s11125_s30 }
0x3fb8   :  { %6537 = vrot.lane.b32.xlu0 %v6533_v57, %s11125_s30 }
0x4025   :  { %v6488_v17 = vpop.permute.xlu1 %6487 }
0x4026   :  { %v6492_v18 = vadd.f32 %v6488_v17, %v6297_v51  ;;  %v6486_v63 = vpop.permute.xlu0 %6485 }
0x4027   :  { %v6491_v15 = vadd.f32 %v6486_v63, %v6296_v60  ;;  %v6548_v60 = vsub.f32 1.0, %v10876_v45 }
0x4028   :  { %10879 = vtanh.f32 %v6492_v18 }
0x4029   :  { %10881 = vtanh.f32 %v6491_v15  ;;  %v6540_v41 = vpop.permute.xlu1 %6539 }
0x402a   :  { %v6544_v22 = vadd.f32 %v6540_v41, %v6300_v0  ;;  %v6538_v50 = vpop.permute.xlu0 %6537 }
0x402b   :  { %v6543_v39 = vadd.f32 %v6538_v50, %v6299_v32 }
0x402c   :  { %10883 = vtanh.f32 %v6544_v22 }
0x402d   :  { %10885 = vtanh.f32 %v6543_v39 }
0x4032   :  { %v10880_v29 = vpop.eup %10879 }
0x4033   :  { %v10882_v12 = vpop.eup %10881  ;;  %6501 = vrot.lane.b32.xlu1 %v10880_v29, %s11126_s3  ;;  %v12797_v29 = vld [vmem:[#allocation11 + $0x8] sm:$0xff] }
0x4034   :  { %6499 = vrot.lane.b32.xlu0 %v10882_v12, %s11126_s3 }
0x4036   :  { %v10884_v14 = vpop.eup %10883 }
0x4037   :  { %v10886_v16 = vpop.eup %10885  ;;  %6553 = vrot.lane.b32.xlu1 %v10884_v14, %s11126_s3 }
0x4038   :  { %6551 = vrot.lane.b32.xlu0 %v10886_v16, %s11126_s3  ;;  %v12800_v16 = vld [vmem:[#allocation10] sm:$0xff] }
0x40a5   :  { %v6502_v56 = vpop.permute.xlu1 %6501 }
0x40a6   :  { %v6506_v44 = vmul.f32 %v6502_v56, %v6496_v20  ;;  %v6500_v34 = vpop.permute.xlu0 %6499 }
0x40a7   :  { %v6505_v51 = vmul.f32 %v6500_v34, %v6495_v26  ;;  %v12803_v26 = vld [vmem:[#allocation10 + $0x10] sm:$0xff]  ;;  %v12806_v34 = vld [vmem:[#allocation11] sm:$0xff] }
0x40a8   :  { %v6510_v61 = vadd.f32 %v6508_v4, %v6506_v44 }
0x40a9   :  { %v6509_v5 = vadd.f32 %v6507_v28, %v6505_v51  ;;  %v6554_v0 = vpop.permute.xlu1 %6553 }
0x40aa   :  { %v6558_v32 = vmul.f32 %v6554_v0, %v6548_v60  ;;  %6567 = vrot.lane.b32.xlu1 %v6510_v61, %s11126_s3  ;;  %v6552_v23 = vpop.permute.xlu0 %6551  ;;  %v12809_v61 = vld [vmem:[#allocation11 + $0x18] sm:$0xff] }
0x40ab   :  { %v6557_v31 = vmul.f32 %v6552_v23, %v6547_v7  ;;  %6565 = vrot.lane.b32.xlu0 %v6509_v5, %s11126_s3  ;;  %v12812_v7 = vld [vmem:[#allocation11 + $0x10] sm:$0xff] }
0x40ac   :  { %v6562_v13 = vadd.f32 %v6560_v48, %v6558_v32 }
0x40ad   :  { %v6561_v53 = vadd.f32 %v6559_v49, %v6557_v31 }
0x40ae   :  { %6578 = vrot.lane.b32.xlu1 %v6562_v13, %s11126_s3 }
0x40af   :  { %6576 = vrot.lane.b32.xlu0 %v6561_v53, %s11126_s3 }
0x411c   :  { %v6568_v25 = vpop.permute.xlu1 %6567 }
0x411d   :  { %6573 = vst.msk [vmem:[#allocation8 + $0x78] sm:$0xff] %vm4278_vm4, %v6568_v25  ;;  %v6566_v1 = vpop.permute.xlu0 %6565 }
0x411e   :  { %6572 = vst.msk [vmem:[#allocation8 + $0x70] sm:$0xff] %vm4278_vm4, %v6566_v1 }
0x4120   :  { %v6579_v6 = vpop.permute.xlu1 %6578 }
0x4121   :  { %6584 = vst.msk [vmem:[#allocation9 + $0x78] sm:$0xff] %vm4278_vm4, %v6579_v6  ;;  %v6577_v36 = vpop.permute.xlu0 %6576 }
0x4122   :  { %6583 = vst.msk [vmem:[#allocation9 + $0x70] sm:$0xff] %vm4278_vm4, %v6577_v36 }
0x4124   :  { %v6600_v24 = vld [vmem:[#allocation8 + $0x78] sm:$0xff] }
0x4125   :  { %v6599_v37 = vld [vmem:[#allocation8 + $0x70] sm:$0xff] }
0x4126   :  { %10068 = vmatprep.mubr.msk.f32.mxu0 %vm4278_vm4, %v6599_v37 }
0x4127   :  { %10069 = vmatmul.mubr.msk.f32.gmra.mrb[78].mxu0 %vm4278_vm4, %v6600_v24 }
0x4128   :  { %10103 = vmatprep.mubr.f32.mxu0 %v11121_v9  ;;  %v6616_v11 = vld [vmem:[#allocation9 + $0x78] sm:$0xff] }
0x4129   :  { %v6615_v59 = vld [vmem:[#allocation9 + $0x70] sm:$0xff] }
0x412a   :  { %10096 = vmatprep.mubr.msk.f32.mxu1 %vm4278_vm4, %v6615_v59 }
0x412b   :  { %10097 = vmatmul.mubr.msk.f32.gmra.mrb[78].mxu1 %vm4278_vm4, %v6616_v11  ;;  %10104 = vmatmul.mubr.f32.vlgmr.msra.gmra.mrb[80].mxu0 %v11121_v9 }
0x412c   :  { %10106 = vmatprep.mubr.f32.mxu0 %v11121_v9  ;;  %10113 = vmatprep.mubr.f32.mxu1 %v11121_v9 }
0x412d   :  { %10470 = vmatpush3.bf16.msra.mxu0 %v12717_v35 }
0x412e   :  { %10476 = vmatprep.subr.bf16.mxu0 %v12717_v35 }
0x412f   :  { %10107 = vmatmul.mubr.f32.gmra.mrb[82].mxu0 %v11121_v9  ;;  %10114 = vmatmul.mubr.f32.vlgmr.msra.gmra.mrb[80].mxu1 %v11121_v9 }
0x4130   :  { %10116 = vmatprep.mubr.f32.mxu1 %v11121_v9  ;;  %10474 = vmatpush3.bf16.msra.mxu1 %v12712_v47 }
0x4131   :  { %10480 = vmatprep.subr.bf16.mxu1 %v12712_v47 }
0x4133   :  { %10117 = vmatmul.mubr.f32.gmra.mrb[82].mxu1 %v11121_v9 }
0x41fa   :  { %v10070_v19 = vpop.f32.mrb[78].mxu0 }
0x41fb   :  { %v6816_v42 = vadd.f32 %v10070_v19, %v12618_v33  ;;  %v6810_v62 = vpop.f32.mrb[79].mxu0 }
0x41fc   :  { %v6811_v10 = vadd.f32 %v12618_v33, %v6810_v62  ;;  %v12772_v33 = vld [vmem:[%s13378_s13 + $0x1] ss:$0 sm:$0xff] }
0x41fd   :  { %6834 = vst.msk [vmem:[#allocation10 + $0x78] sm:$0xff] %vm4015_vm3, %v6816_v42 }
0x41fe   :  { %6833 = vst.msk [vmem:[#allocation10 + $0x70] sm:$0xff] %vm4015_vm3, %v6811_v10  ;;  %v10098_v38 = vpop.f32.mrb[78].mxu1  ;;  %v10105_v40 = vpop.f32.mrb[80].mxu0 }
0x41ff   :  { %v7036_v30 = vadd.f32 %v10098_v38, %v12635_v27  ;;  %v7155_v9 = vadd.f32 %v10105_v40, %v12762_v46  ;;  %v7030_v43 = vpop.f32.mrb[79].mxu1  ;;  %v7149_v45 = vpop.f32.mrb[81].mxu0 }
0x4200   :  { %v7031_v52 = vadd.f32 %v12635_v27, %v7030_v43  ;;  %v7150_v63 = vadd.f32 %v12762_v46, %v7149_v45 }
0x4201   :  { %7054 = vst.msk [vmem:[#allocation11 + $0x78] sm:$0xff] %vm4015_vm3, %v7036_v30  ;;  %7287 = vrot.lane.b32.xlu1 %v7155_v9, %s11124_s29  ;;  %v7254_v3 = vadd.f32 %v7155_v9, %v12791_v21 }
0x4202   :  { %7053 = vst.msk [vmem:[#allocation11 + $0x70] sm:$0xff] %vm4015_vm3, %v7031_v52  ;;  %v10108_v54 = vpop.f32.mrb[82].mxu0  ;;  %v10115_v58 = vpop.f32.mrb[80].mxu1  ;;  %v7253_v20 = vadd.f32 %v7150_v63, %v12800_v16 }
0x4203   :  { %v7165_v55 = vadd.f32 %v10108_v54, %v12762_v46  ;;  %v7240_v57 = vadd.f32 %v10115_v58, %v12772_v33  ;;  %v7159_v17 = vpop.f32.mrb[83].mxu0  ;;  %v7234_v18 = vpop.f32.mrb[81].mxu1  ;;  %v9112_v12 = vmul.f32 -1.442695, %v7254_v3 }
0x4204   :  { %v7160_v15 = vadd.f32 %v12762_v46, %v7159_v17  ;;  %v7235_v22 = vadd.f32 %v12772_v33, %v7234_v18  ;;  %v9111_v28 = vmul.f32 -1.442695, %v7253_v20 }
0x4205   :  { %7291 = vrot.lane.b32.xlu1 %v7165_v55, %s11124_s29  ;;  %7391 = vrot.lane.b32.xlu0 %v7240_v57, %s11124_s29  ;;  %v7256_v2 = vadd.f32 %v7165_v55, %v12794_v8  ;;  %v7358_v14 = vadd.f32 %v7240_v57, %v12797_v29  ;;  %10887 = vpow2.f32 %v9112_v12 }
0x4206   :  { %v10118_v27 = vpop.f32.mrb[82].mxu1  ;;  %v7255_v44 = vadd.f32 %v7160_v15, %v12803_v26  ;;  %v7357_v51 = vadd.f32 %v7235_v22, %v12806_v34 }
0x4207   :  { %v7244_v41 = vpop.f32.mrb[83].mxu1  ;;  %v7250_v50 = vadd.f32 %v10118_v27, %v12772_v33  ;;  %v9114_v56 = vmul.f32 -1.442695, %v7256_v2  ;;  %v9116_v4 = vmul.f32 -1.442695, %v7358_v14 }
0x4208   :  { %v7245_v39 = vadd.f32 %v12772_v33, %v7244_v41  ;;  %v9113_v60 = vmul.f32 -1.442695, %v7255_v44  ;;  %v9115_v0 = vmul.f32 -1.442695, %v7357_v51 }
0x4209   :  { %7289 = vrot.lane.b32.xlu1 %v7160_v15, %s11124_s29  ;;  %7285 = vrot.lane.b32.xlu0 %v7150_v63, %s11124_s29  ;;  %10889 = vpow2.f32 %v9114_v56  ;;  %v7360_v5 = vadd.f32 %v7250_v50, %v12809_v61 }
0x420a   :  { %10891 = vpow2.f32 %v9116_v4  ;;  %v7359_v32 = vadd.f32 %v7245_v39, %v12812_v7 }
0x420b   :  { %10893 = vpow2.f32 %v9111_v28  ;;  %v9118_v48 = vmul.f32 -1.442695, %v7360_v5 }
0x420c   :  { %10895 = vpow2.f32 %v9113_v60  ;;  %v9117_v49 = vmul.f32 -1.442695, %v7359_v32 }
0x420d   :  { %7395 = vrot.lane.b32.xlu1 %v7250_v50, %s11124_s29  ;;  %7389 = vrot.lane.b32.xlu0 %v7235_v22, %s11124_s29  ;;  %10897 = vpow2.f32 %v9115_v0 }
0x420e   :  { %10899 = vpow2.f32 %v9118_v48 }
0x420f   :  { %v10888_v23 = vpop.eup %10887  ;;  %10901 = vpow2.f32 %v9117_v49 }
0x4210   :  { %v7270_v13 = vadd.f32 1.0, %v10888_v23 }
0x4211   :  { %7393 = vrot.lane.b32.xlu0 %v7245_v39, %s11124_s29 }
0x4212   :  { %10903 = vrcp.f32 %v7270_v13 }
0x4213   :  { %v10890_v31 = vpop.eup %10889 }
0x4214   :  { %v10892_v53 = vpop.eup %10891  ;;  %v7272_v25 = vadd.f32 1.0, %v10890_v31 }
0x4215   :  { %v10894_v1 = vpop.eup %10893  ;;  %v7374_v6 = vadd.f32 1.0, %v10892_v53 }
0x4216   :  { %v10896_v36 = vpop.eup %10895  ;;  %v7269_v37 = vadd.f32 1.0, %v10894_v1  ;;  %10905 = vrcp.f32 %v7272_v25 }
0x4217   :  { %v10898_v24 = vpop.eup %10897  ;;  %10907 = vrcp.f32 %v7374_v6  ;;  %v7271_v59 = vadd.f32 1.0, %v10896_v36 }
0x4218   :  { %v10900_v11 = vpop.eup %10899  ;;  %10909 = vrcp.f32 %v7269_v37  ;;  %v7373_v19 = vadd.f32 1.0, %v10898_v24 }
0x4219   :  { %10911 = vrcp.f32 %v7271_v59  ;;  %v7376_v42 = vadd.f32 1.0, %v10900_v11  ;;  %v10902_v62 = vpop.eup %10901 }
0x421a   :  { %10913 = vrcp.f32 %v7373_v19  ;;  %v7375_v30 = vadd.f32 1.0, %v10902_v62 }
0x421b   :  { %10915 = vrcp.f32 %v7376_v42 }
0x421c   :  { %v12815_v10 = vpop.eup %10903  ;;  %10917 = vrcp.f32 %v7375_v30 }
0x421d   :  { %v7350_v6 = vmul.f32 0.0, %v12815_v10 }
0x4220   :  { %v12818_v9 = vpop.eup %10905 }
0x4221   :  { %v12821_v43 = vpop.eup %10907  ;;  %v7328_v24 = vsub.f32 1.0, %v12818_v9  ;;  %v7352_v19 = vmul.f32 0.0, %v12818_v9 }
0x4222   :  { %v12825_v55 = vpop.eup %10909  ;;  %v7430_v11 = vsub.f32 1.0, %v12821_v43 }
0x4223   :  { %v12829_v57 = vpop.eup %10911 }
0x4224   :  { %v12833_v15 = vpop.eup %10913 }
0x4225   :  { %v12837_v41 = vpop.eup %10915 }
0x4226   :  { %v12843_v2 = vpop.eup %10917 }
0x4273   :  { %v7288_v38 = vpop.permute.xlu1 %7287 }
0x4274   :  { %v7298_v40 = vmul.f32 %v12815_v10, %v7288_v38  ;;  %v7454_v38 = vmul.f32 0.0, %v12821_v43 }
0x4276   :  { %7307 = vrot.lane.b32.xlu1 %v7298_v40, %s11125_s30 }
0x4277   :  { %v7292_v45 = vpop.permute.xlu1 %7291  ;;  %v7392_v52 = vpop.permute.xlu0 %7391 }
0x4278   :  { %v7300_v54 = vmul.f32 %v12818_v9, %v7292_v45  ;;  %v7402_v58 = vmul.f32 %v12821_v43, %v7392_v52 }
0x427a   :  { %7311 = vrot.lane.b32.xlu1 %v7300_v54, %s11125_s30  ;;  %7411 = vrot.lane.b32.xlu0 %v7402_v58, %s11125_s30  ;;  %v7325_v54 = vsub.f32 1.0, %v12825_v55  ;;  %v7351_v58 = vmul.f32 0.0, %v12829_v57 }
0x427b   :  { %v7290_v17 = vpop.permute.xlu1 %7289  ;;  %v7286_v18 = vpop.permute.xlu0 %7285 }
0x427c   :  { %v7299_v27 = vmul.f32 %v12829_v57, %v7290_v17  ;;  %v7297_v63 = vmul.f32 %v12825_v55, %v7286_v18  ;;  %v7349_v18 = vmul.f32 0.0, %v12825_v55  ;;  %v7453_v55 = vmul.f32 0.0, %v12833_v15 }
0x427e   :  { %7309 = vrot.lane.b32.xlu1 %v7299_v27, %s11125_s30  ;;  %7305 = vrot.lane.b32.xlu0 %v7297_v63, %s11125_s30  ;;  %v7432_v63 = vsub.f32 1.0, %v12837_v41 }
0x427f   :  { %v7396_v22 = vpop.permute.xlu1 %7395  ;;  %v7390_v50 = vpop.permute.xlu0 %7389 }
0x4280   :  { %v7404_v39 = vmul.f32 %v12837_v41, %v7396_v22  ;;  %v7401_v3 = vmul.f32 %v12833_v15, %v7390_v50 }
0x4282   :  { %7415 = vrot.lane.b32.xlu1 %v7404_v39, %s11125_s30  ;;  %7409 = vrot.lane.b32.xlu0 %v7401_v3, %s11125_s30  ;;  %v7456_v39 = vmul.f32 0.0, %v12837_v41  ;;  %v7455_v41 = vmul.f32 0.0, %v12843_v2 }
0x4283   :  { %v7394_v12 = vpop.permute.xlu0 %7393 }
0x4284   :  { %v7403_v14 = vmul.f32 %v12843_v2, %v7394_v12 }
0x4286   :  { %7413 = vrot.lane.b32.xlu0 %v7403_v14, %s11125_s30 }
0x42e8   :  { %v7308_v20 = vpop.permute.xlu1 %7307 }
0x42e9   :  { %v7318_v56 = vadd.f32 %v7308_v20, %v12791_v21 }
0x42eb   :  { %10919 = vtanh.f32 %v7318_v56 }
0x42ec   :  { %v7312_v4 = vpop.permute.xlu1 %7311  ;;  %v7412_v44 = vpop.permute.xlu0 %7411 }
0x42ed   :  { %v7320_v28 = vadd.f32 %v7312_v4, %v12794_v8  ;;  %v7422_v51 = vadd.f32 %v7412_v44, %v12797_v29  ;;  %v7431_v4 = vsub.f32 1.0, %v12843_v2 }
0x42ef   :  { %10921 = vtanh.f32 %v7320_v28 }
0x42f0   :  { %10923 = vtanh.f32 %v7422_v51  ;;  %v7310_v60 = vpop.permute.xlu1 %7309  ;;  %v7306_v5 = vpop.permute.xlu0 %7305 }
0x42f1   :  { %v7319_v0 = vadd.f32 %v7310_v60, %v12803_v26  ;;  %v7317_v48 = vadd.f32 %v7306_v5, %v12800_v16 }
0x42f3   :  { %10925 = vtanh.f32 %v7319_v0 }
0x42f4   :  { %10927 = vtanh.f32 %v7317_v48  ;;  %v7416_v32 = vpop.permute.xlu1 %7415  ;;  %v7410_v23 = vpop.permute.xlu0 %7409 }
0x42f5   :  { %v10920_v21 = vpop.eup %10919  ;;  %v7424_v49 = vadd.f32 %v7416_v32, %v12809_v61  ;;  %v7421_v31 = vadd.f32 %v7410_v23, %v12806_v34 }
0x42f6   :  { %7335 = vrot.lane.b32.xlu1 %v10920_v21, %s11126_s3 }
0x42f7   :  { %10929 = vtanh.f32 %v7424_v49 }
0x42f8   :  { %10931 = vtanh.f32 %v7421_v31  ;;  %v7414_v8 = vpop.permute.xlu0 %7413 }
0x42f9   :  { %v10922_v29 = vpop.eup %10921  ;;  %v7423_v13 = vadd.f32 %v7414_v8, %v12812_v7  ;;  %v7326_v7 = vsub.f32 1.0, %v12815_v10  ;;  %v7327_v10 = vsub.f32 1.0, %v12829_v57  ;;  %v7429_v57 = vsub.f32 1.0, %v12833_v15 }
0x42fa   :  { %v10924_v26 = vpop.eup %10923  ;;  %7339 = vrot.lane.b32.xlu1 %v10922_v29, %s11126_s3 }
0x42fb   :  { %10933 = vtanh.f32 %v7423_v13  ;;  %7439 = vrot.lane.b32.xlu0 %v10924_v26, %s11126_s3 }
0x42fd   :  { %v10926_v16 = vpop.eup %10925 }
0x42fe   :  { %v10928_v53 = vpop.eup %10927  ;;  %7337 = vrot.lane.b32.xlu1 %v10926_v16, %s11126_s3 }
0x42ff   :  { %7333 = vrot.lane.b32.xlu0 %v10928_v53, %s11126_s3 }
0x4301   :  { %v10930_v34 = vpop.eup %10929 }
0x4302   :  { %v10932_v61 = vpop.eup %10931  ;;  %7443 = vrot.lane.b32.xlu1 %v10930_v34, %s11126_s3 }
0x4303   :  { %7437 = vrot.lane.b32.xlu0 %v10932_v61, %s11126_s3 }
0x4305   :  { %v10934_v25 = vpop.eup %10933 }
0x4307   :  { %7441 = vrot.lane.b32.xlu0 %v10934_v25, %s11126_s3 }
0x4368   :  { %v7336_v1 = vpop.permute.xlu1 %7335 }
0x4369   :  { %v7346_v36 = vmul.f32 %v7336_v1, %v7326_v7 }
0x436b   :  { %v12865_v37 = vadd.f32 %v7350_v6, %v7346_v36 }
0x436c   :  { %v7340_v59 = vpop.permute.xlu1 %7339 }
0x436d   :  { %v7348_v42 = vmul.f32 %v7340_v59, %v7328_v24  ;;  %v7440_v62 = vpop.permute.xlu0 %7439  ;;  %7467 = vrot.lane.b32.xlu1 %v12865_v37, %s11126_s3  ;;  %v12939_v24 = vld [vmem:[#allocation10 + $0x28] sm:$0xff] }
0x436e   :  { %v7450_v40 = vmul.f32 %v7440_v62, %v7430_v11  ;;  %v12942_v11 = vld [vmem:[#allocation10 + $0x38] sm:$0xff] }
0x436f   :  { %v12873_v30 = vadd.f32 %v7352_v19, %v7348_v42  ;;  %v12945_v42 = vld [vmem:[#allocation11 + $0x28] sm:$0xff] }
0x4370   :  { %v12876_v45 = vadd.f32 %v7454_v38, %v7450_v40  ;;  %v7338_v52 = vpop.permute.xlu1 %7337  ;;  %v12948_v40 = vld [vmem:[#allocation10 + $0x20] sm:$0xff] }
0x4371   :  { %v7347_v9 = vmul.f32 %v7338_v52, %v7327_v10  ;;  %v7334_v17 = vpop.permute.xlu0 %7333  ;;  %7471 = vrot.lane.b32.xlu1 %v12873_v30, %s11126_s3 }
0x4372   :  { %v7345_v43 = vmul.f32 %v7334_v17, %v7325_v54  ;;  %7487 = vrot.lane.b32.xlu0 %v12876_v45, %s11126_s3  ;;  %v12951_v54 = vld [vmem:[#allocation10 + $0x30] sm:$0xff]  ;;  %v12954_v17 = vld [vmem:[#allocation11 + $0x20] sm:$0xff] }
0x4373   :  { %v12885_v27 = vadd.f32 %v7351_v58, %v7347_v9 }
0x4374   :  { %v12888_v22 = vadd.f32 %v7349_v18, %v7345_v43  ;;  %v7444_v50 = vpop.permute.xlu1 %7443 }
0x4375   :  { %v7452_v3 = vmul.f32 %v7444_v50, %v7432_v63  ;;  %v7438_v12 = vpop.permute.xlu0 %7437  ;;  %7469 = vrot.lane.b32.xlu1 %v12885_v27, %s11126_s3  ;;  %v12957_v63 = vld [vmem:[#allocation11 + $0x38] sm:$0xff] }
0x4376   :  { %v7449_v14 = vmul.f32 %v7438_v12, %v7429_v57  ;;  %7465 = vrot.lane.b32.xlu0 %v12888_v22, %s11126_s3 }
0x4377   :  { %v12897_v20 = vadd.f32 %v7456_v39, %v7452_v3  ;;  %v12960_v3 = vld [vmem:[#allocation11 + $0x30] sm:$0xff] }
0x4378   :  { %v12899_v56 = vadd.f32 %v7453_v55, %v7449_v14 }
0x4379   :  { %v7442_v44 = vpop.permute.xlu0 %7441  ;;  %7491 = vrot.lane.b32.xlu1 %v12897_v20, %s11126_s3 }
0x437a   :  { %v7451_v28 = vmul.f32 %v7442_v44, %v7431_v4  ;;  %7485 = vrot.lane.b32.xlu0 %v12899_v56, %s11126_s3 }
0x437c   :  { %v12907_v15 = vadd.f32 %v7455_v41, %v7451_v28 }
0x437e   :  { %7489 = vrot.lane.b32.xlu0 %v12907_v15, %s11126_s3 }
0x43df   :  { %v7468_v51 = vpop.permute.xlu1 %7467 }
0x43e3   :  { %v7472_v60 = vpop.permute.xlu1 %7471 }
0x43e4   :  { %v7488_v5 = vpop.permute.xlu0 %7487 }
0x43e7   :  { %v7470_v0 = vpop.permute.xlu1 %7469 }
0x43e8   :  { %v7466_v48 = vpop.permute.xlu0 %7465 }
0x43e9   :  { %10123 = vmatprep.mubr.msk.f32.mxu0 %vm4278_vm4, %v7466_v48 }
0x43ea   :  { %10124 = vmatmul.mubr.msk.f32.vlgmr.msra.gmra.mrb[84].mxu0 %vm4278_vm4, %v7468_v51 }
0x43eb   :  { %10126 = vmatprep.mubr.msk.f32.mxu0 %vm4278_vm4, %v7470_v0  ;;  %v7492_v2 = vpop.permute.xlu1 %7491  ;;  %10478 = vmatpush3.bf16.msra.mxu0 %v12717_v35 }
0x43ec   :  { %v7486_v32 = vpop.permute.xlu0 %7485  ;;  %10484 = vmatprep.subr.bf16.mxu0 %v12717_v35 }
0x43ed   :  { %10133 = vmatprep.mubr.msk.f32.mxu1 %vm4278_vm4, %v7486_v32 }
0x43ee   :  { %10127 = vmatmul.mubr.msk.f32.gmra.mrb[86].mxu0 %vm4278_vm4, %v7472_v60  ;;  %10134 = vmatmul.mubr.msk.f32.vlgmr.msra.gmra.mrb[84].mxu1 %vm4278_vm4, %v7488_v5 }
0x43ef   :  { %10482 = vmatpush3.bf16.msra.mxu1 %v12712_v47 }
0x43f0   :  { %v7490_v23 = vpop.permute.xlu0 %7489  ;;  %10488 = vmatprep.subr.bf16.mxu1 %v12712_v47 }
0x43f1   :  { %10136 = vmatprep.mubr.msk.f32.mxu1 %vm4278_vm4, %v7490_v23 }
0x43f2   :  { %10137 = vmatmul.mubr.msk.f32.gmra.mrb[86].mxu1 %vm4278_vm4, %v7492_v2 }
0x44bd   :  { %v10125_v21 = vpop.f32.mrb[84].mxu0 }
0x44be   :  { %v7591_v49 = vadd.f32 %v10125_v21, %v12762_v46  ;;  %v7585_v31 = vpop.f32.mrb[85].mxu0 }
0x44bf   :  { %v7586_v61 = vadd.f32 %v12762_v46, %v7585_v31 }
0x44c0   :  { %7731 = vrot.lane.b32.xlu1 %v7591_v49, %s11124_s29  ;;  %v7698_v59 = vadd.f32 %v7591_v49, %v12939_v24 }
0x44c1   :  { %v10128_v8 = vpop.f32.mrb[86].mxu0  ;;  %v10135_v29 = vpop.f32.mrb[84].mxu1  ;;  %v7697_v10 = vadd.f32 %v7586_v61, %v12948_v40 }
0x44c2   :  { %v7601_v13 = vadd.f32 %v10128_v8, %v12762_v46  ;;  %v7684_v26 = vadd.f32 %v10135_v29, %v12772_v33  ;;  %v7595_v16 = vpop.f32.mrb[87].mxu0  ;;  %v7678_v53 = vpop.f32.mrb[85].mxu1  ;;  %v9128_v62 = vmul.f32 -1.442695, %v7698_v59 }
0x44c3   :  { %v7596_v25 = vadd.f32 %v12762_v46, %v7595_v16  ;;  %v7679_v1 = vadd.f32 %v12772_v33, %v7678_v53  ;;  %v9127_v18 = vmul.f32 -1.442695, %v7697_v10 }
0x44c4   :  { %7735 = vrot.lane.b32.xlu1 %v7601_v13, %s11124_s29  ;;  %7835 = vrot.lane.b32.xlu0 %v7684_v26, %s11124_s29  ;;  %v7700_v19 = vadd.f32 %v7601_v13, %v12942_v11  ;;  %v7802_v38 = vadd.f32 %v7684_v26, %v12945_v42  ;;  %10935 = vpow2.f32 %v9128_v62 }
0x44c5   :  { %v10138_v34 = vpop.f32.mrb[86].mxu1  ;;  %v7699_v9 = vadd.f32 %v7596_v25, %v12951_v54  ;;  %v7801_v43 = vadd.f32 %v7679_v1, %v12954_v17 }
0x44c6   :  { %v7688_v7 = vpop.f32.mrb[87].mxu1  ;;  %v7694_v6 = vadd.f32 %v10138_v34, %v12772_v33  ;;  %v9130_v52 = vmul.f32 -1.442695, %v7700_v19  ;;  %v9132_v58 = vmul.f32 -1.442695, %v7802_v38 }
0x44c7   :  { %v7689_v36 = vadd.f32 %v12772_v33, %v7688_v7  ;;  %v9129_v50 = vmul.f32 -1.442695, %v7699_v9  ;;  %v9131_v39 = vmul.f32 -1.442695, %v7801_v43 }
0x44c8   :  { %7733 = vrot.lane.b32.xlu1 %v7596_v25, %s11124_s29  ;;  %7729 = vrot.lane.b32.xlu0 %v7586_v61, %s11124_s29  ;;  %10937 = vpow2.f32 %v9130_v52  ;;  %v7804_v57 = vadd.f32 %v7694_v6, %v12957_v63 }
0x44c9   :  { %10939 = vpow2.f32 %v9132_v58  ;;  %v7803_v55 = vadd.f32 %v7689_v36, %v12960_v3 }
0x44ca   :  { %10941 = vpow2.f32 %v9127_v18  ;;  %v9134_v12 = vmul.f32 -1.442695, %v7804_v57 }
0x44cb   :  { %10943 = vpow2.f32 %v9129_v50  ;;  %v9133_v4 = vmul.f32 -1.442695, %v7803_v55 }
0x44cc   :  { %7833 = vrot.lane.b32.xlu0 %v7679_v1, %s11124_s29  ;;  %7839 = vrot.lane.b32.xlu1 %v7694_v6, %s11124_s29  ;;  %10945 = vpow2.f32 %v9131_v39 }
0x44cd   :  { %10947 = vpow2.f32 %v9134_v12 }
0x44ce   :  { %v10936_v14 = vpop.eup %10935  ;;  %10949 = vpow2.f32 %v9133_v4 }
0x44cf   :  { %v7714_v41 = vadd.f32 1.0, %v10936_v14 }
0x44d0   :  { %7837 = vrot.lane.b32.xlu0 %v7689_v36, %s11124_s29 }
0x44d1   :  { %10951 = vrcp.f32 %v7714_v41 }
0x44d2   :  { %v10938_v44 = vpop.eup %10937 }
0x44d3   :  { %v10940_v28 = vpop.eup %10939  ;;  %v7716_v51 = vadd.f32 1.0, %v10938_v44 }
0x44d4   :  { %v10942_v60 = vpop.eup %10941  ;;  %v7818_v5 = vadd.f32 1.0, %v10940_v28 }
0x44d5   :  { %v10944_v0 = vpop.eup %10943  ;;  %v7713_v48 = vadd.f32 1.0, %v10942_v60  ;;  %10953 = vrcp.f32 %v7716_v51 }
0x44d6   :  { %v10946_v2 = vpop.eup %10945  ;;  %10955 = vrcp.f32 %v7818_v5  ;;  %v7715_v32 = vadd.f32 1.0, %v10944_v0 }
0x44d7   :  { %v10948_v23 = vpop.eup %10947  ;;  %10957 = vrcp.f32 %v7713_v48  ;;  %v7817_v21 = vadd.f32 1.0, %v10946_v2 }
0x44d8   :  { %10959 = vrcp.f32 %v7715_v32  ;;  %v7820_v49 = vadd.f32 1.0, %v10948_v23  ;;  %v10950_v31 = vpop.eup %10949 }
0x44d9   :  { %10961 = vrcp.f32 %v7817_v21  ;;  %v7819_v26 = vadd.f32 1.0, %v10950_v31 }
0x44da   :  { %10963 = vrcp.f32 %v7820_v49 }
0x44db   :  { %v12963_v8 = vpop.eup %10951  ;;  %10965 = vrcp.f32 %v7819_v26 }
0x44dc   :  { %v7794_v31 = vmul.f32 %v12963_v8, %v12865_v37 }
0x44df   :  { %v12966_v16 = vpop.eup %10953 }
0x44e0   :  { %v12969_v53 = vpop.eup %10955  ;;  %v7772_v26 = vsub.f32 1.0, %v12966_v16 }
0x44e1   :  { %v12973_v1 = vpop.eup %10957 }
0x44e2   :  { %v12977_v6 = vpop.eup %10959 }
0x44e3   :  { %v12981_v38 = vpop.eup %10961 }
0x44e4   :  { %v12985_v10 = vpop.eup %10963 }
0x44e5   :  { %v12991_v43 = vpop.eup %10965 }
0x4532   :  { %v7732_v29 = vpop.permute.xlu1 %7731 }
0x4533   :  { %v7742_v13 = vmul.f32 %v12963_v8, %v7732_v29 }
0x4535   :  { %7751 = vrot.lane.b32.xlu1 %v7742_v13, %s11125_s30 }
0x4536   :  { %v7736_v34 = vpop.permute.xlu1 %7735  ;;  %v7836_v61 = vpop.permute.xlu0 %7835 }
0x4537   :  { %v7744_v25 = vmul.f32 %v12966_v16, %v7736_v34  ;;  %v7846_v7 = vmul.f32 %v12969_v53, %v7836_v61  ;;  %v7874_v61 = vsub.f32 1.0, %v12969_v53 }
0x4539   :  { %7755 = vrot.lane.b32.xlu1 %v7744_v25, %s11125_s30  ;;  %7855 = vrot.lane.b32.xlu0 %v7846_v7, %s11125_s30  ;;  %v7796_v25 = vmul.f32 %v12966_v16, %v12873_v30  ;;  %v7795_v30 = vmul.f32 %v12977_v6, %v12885_v27  ;;  %v7873_v27 = vsub.f32 1.0, %v12981_v38 }
0x453a   :  { %v7734_v36 = vpop.permute.xlu1 %7733  ;;  %v7730_v59 = vpop.permute.xlu0 %7729 }
0x453b   :  { %v7743_v19 = vmul.f32 %v12977_v6, %v7734_v36  ;;  %v7741_v62 = vmul.f32 %v12973_v1, %v7730_v59  ;;  %v7898_v59 = vmul.f32 %v12969_v53, %v12876_v45  ;;  %v7793_v45 = vmul.f32 %v12973_v1, %v12888_v22 }
0x453c   :  { %v7897_v22 = vmul.f32 %v12981_v38, %v12899_v56 }
0x453d   :  { %7753 = vrot.lane.b32.xlu1 %v7743_v19, %s11125_s30  ;;  %7749 = vrot.lane.b32.xlu0 %v7741_v62, %s11125_s30  ;;  %v7771_v19 = vsub.f32 1.0, %v12977_v6  ;;  %v7900_v6 = vmul.f32 %v12985_v10, %v12897_v20  ;;  %v7899_v20 = vmul.f32 %v12991_v43, %v12907_v15 }
0x453e   :  { %v7840_v52 = vpop.permute.xlu1 %7839  ;;  %v7834_v58 = vpop.permute.xlu0 %7833 }
0x453f   :  { %v7848_v9 = vmul.f32 %v12985_v10, %v7840_v52  ;;  %v7845_v18 = vmul.f32 %v12981_v38, %v7834_v58  ;;  %v7769_v58 = vsub.f32 1.0, %v12973_v1 }
0x4541   :  { %7859 = vrot.lane.b32.xlu1 %v7848_v9, %s11125_s30  ;;  %7853 = vrot.lane.b32.xlu0 %v7845_v18, %s11125_s30 }
0x4542   :  { %v7838_v50 = vpop.permute.xlu0 %7837 }
0x4543   :  { %v7847_v57 = vmul.f32 %v12991_v43, %v7838_v50  ;;  %v7876_v50 = vsub.f32 1.0, %v12985_v10 }
0x4545   :  { %7857 = vrot.lane.b32.xlu0 %v7847_v57, %s11125_s30 }
0x45a7   :  { %v7752_v39 = vpop.permute.xlu1 %7751 }
0x45a8   :  { %v7762_v12 = vadd.f32 %v7752_v39, %v12939_v24 }
0x45aa   :  { %10967 = vtanh.f32 %v7762_v12 }
0x45ab   :  { %v7756_v55 = vpop.permute.xlu1 %7755  ;;  %v7856_v14 = vpop.permute.xlu0 %7855 }
0x45ac   :  { %v7764_v4 = vadd.f32 %v7756_v55, %v12942_v11  ;;  %v7866_v44 = vadd.f32 %v7856_v14, %v12945_v42 }
0x45ae   :  { %10969 = vtanh.f32 %v7764_v4 }
0x45af   :  { %10971 = vtanh.f32 %v7866_v44  ;;  %v7754_v41 = vpop.permute.xlu1 %7753  ;;  %v7750_v28 = vpop.permute.xlu0 %7749  ;;  %v7875_v44 = vsub.f32 1.0, %v12991_v43 }
0x45b0   :  { %v7763_v51 = vadd.f32 %v7754_v41, %v12951_v54  ;;  %v7761_v60 = vadd.f32 %v7750_v28, %v12948_v40 }
0x45b2   :  { %10973 = vtanh.f32 %v7763_v51 }
0x45b3   :  { %10975 = vtanh.f32 %v7761_v60  ;;  %v7860_v5 = vpop.permute.xlu1 %7859  ;;  %v7854_v0 = vpop.permute.xlu0 %7853 }
0x45b4   :  { %v10968_v24 = vpop.eup %10967  ;;  %v7868_v48 = vadd.f32 %v7860_v5, %v12957_v63  ;;  %v7865_v2 = vadd.f32 %v7854_v0, %v12954_v17 }
0x45b5   :  { %7779 = vrot.lane.b32.xlu1 %v10968_v24, %s11126_s3 }
0x45b6   :  { %10977 = vtanh.f32 %v7868_v48 }
0x45b7   :  { %10979 = vtanh.f32 %v7865_v2  ;;  %v7858_v11 = vpop.permute.xlu0 %7857 }
0x45b8   :  { %v10970_v42 = vpop.eup %10969  ;;  %v7867_v32 = vadd.f32 %v7858_v11, %v12960_v3  ;;  %v7770_v3 = vsub.f32 1.0, %v12963_v8 }
0x45b9   :  { %v10972_v54 = vpop.eup %10971  ;;  %7783 = vrot.lane.b32.xlu1 %v10970_v42, %s11126_s3 }
0x45ba   :  { %10981 = vtanh.f32 %v7867_v32  ;;  %7883 = vrot.lane.b32.xlu0 %v10972_v54, %s11126_s3 }
0x45bc   :  { %v10974_v40 = vpop.eup %10973 }
0x45bd   :  { %v10976_v23 = vpop.eup %10975  ;;  %7781 = vrot.lane.b32.xlu1 %v10974_v40, %s11126_s3 }
0x45be   :  { %7777 = vrot.lane.b32.xlu0 %v10976_v23, %s11126_s3 }
0x45c0   :  { %v10978_v17 = vpop.eup %10977 }
0x45c1   :  { %v10980_v63 = vpop.eup %10979  ;;  %7887 = vrot.lane.b32.xlu1 %v10978_v17, %s11126_s3 }
0x45c2   :  { %7881 = vrot.lane.b32.xlu0 %v10980_v63, %s11126_s3 }
0x45c4   :  { %v10982_v21 = vpop.eup %10981 }
0x45c6   :  { %7885 = vrot.lane.b32.xlu0 %v10982_v21, %s11126_s3 }
0x4627   :  { %v7780_v49 = vpop.permute.xlu1 %7779 }
0x4628   :  { %v7790_v29 = vmul.f32 %v7780_v49, %v7770_v3 }
0x462a   :  { %v13014_v13 = vadd.f32 %v7794_v31, %v7790_v29  ;;  %v13093_v31 = vld [vmem:[#allocation10 + $0x48] sm:$0xff]  ;;  %v13096_v29 = vld [vmem:[#allocation10 + $0x58] sm:$0xff] }
0x462b   :  { %v7784_v34 = vpop.permute.xlu1 %7783 }
0x462c   :  { %v7792_v7 = vmul.f32 %v7784_v34, %v7772_v26  ;;  %v7884_v36 = vpop.permute.xlu0 %7883  ;;  %7911 = vrot.lane.b32.xlu1 %v13014_v13, %s11126_s3  ;;  %v13099_v34 = vld [vmem:[#allocation11 + $0x48] sm:$0xff] }
0x462d   :  { %v7894_v37 = vmul.f32 %v7884_v36, %v7874_v61 }
0x462e   :  { %v13024_v8 = vadd.f32 %v7796_v25, %v7792_v7  ;;  %v13102_v7 = vld [vmem:[#allocation10 + $0x40] sm:$0xff] }
0x462f   :  { %v13027_v62 = vadd.f32 %v7898_v59, %v7894_v37  ;;  %v7782_v52 = vpop.permute.xlu1 %7781  ;;  %v13105_v59 = vld [vmem:[#allocation10 + $0x50] sm:$0xff] }
0x4630   :  { %v7791_v16 = vmul.f32 %v7782_v52, %v7771_v19  ;;  %v7778_v9 = vpop.permute.xlu0 %7777  ;;  %7915 = vrot.lane.b32.xlu1 %v13024_v8, %s11126_s3  ;;  %v13108_v52 = vld [vmem:[#allocation11 + $0x40] sm:$0xff] }
0x4631   :  { %v7789_v53 = vmul.f32 %v7778_v9, %v7769_v58  ;;  %7932 = vrot.lane.b32.xlu0 %v13027_v62, %s11126_s3 }
0x4632   :  { %v13038_v18 = vadd.f32 %v7795_v30, %v7791_v16  ;;  %v13111_v16 = vld [vmem:[#allocation11 + $0x58] sm:$0xff] }
0x4633   :  { %v13041_v57 = vadd.f32 %v7793_v45, %v7789_v53  ;;  %v7888_v39 = vpop.permute.xlu1 %7887 }
0x4634   :  { %v7896_v12 = vmul.f32 %v7888_v39, %v7876_v50  ;;  %v7882_v55 = vpop.permute.xlu0 %7881  ;;  %7913 = vrot.lane.b32.xlu1 %v13038_v18, %s11126_s3  ;;  %v13114_v50 = vld [vmem:[#allocation11 + $0x50] sm:$0xff] }
0x4635   :  { %v7893_v1 = vmul.f32 %v7882_v55, %v7873_v27  ;;  %7909 = vrot.lane.b32.xlu0 %v13041_v57, %s11126_s3 }
0x4636   :  { %v13052_v14 = vadd.f32 %v7900_v6, %v7896_v12 }
0x4637   :  { %v13054_v4 = vadd.f32 %v7897_v22, %v7893_v1 }
0x4638   :  { %v7886_v41 = vpop.permute.xlu0 %7885  ;;  %7936 = vrot.lane.b32.xlu1 %v13052_v14, %s11126_s3 }
0x4639   :  { %v7895_v10 = vmul.f32 %v7886_v41, %v7875_v44  ;;  %7930 = vrot.lane.b32.xlu0 %v13054_v4, %s11126_s3 }
0x463b   :  { %v13063_v56 = vadd.f32 %v7899_v20, %v7895_v10 }
0x463d   :  { %7934 = vrot.lane.b32.xlu0 %v13063_v56, %s11126_s3 }
0x469e   :  { %v7912_v38 = vpop.permute.xlu1 %7911 }
0x46a2   :  { %v7916_v28 = vpop.permute.xlu1 %7915 }
0x46a3   :  { %v7933_v51 = vpop.permute.xlu0 %7932 }
0x46a6   :  { %v7914_v60 = vpop.permute.xlu1 %7913 }
0x46a7   :  { %v7910_v5 = vpop.permute.xlu0 %7909 }
0x46a8   :  { %10143 = vmatprep.mubr.msk.f32.mxu0 %vm4278_vm4, %v7910_v5 }
0x46a9   :  { %10144 = vmatmul.mubr.msk.f32.vlgmr.msra.gmra.mrb[88].mxu0 %vm4278_vm4, %v7912_v38 }
0x46aa   :  { %10146 = vmatprep.mubr.msk.f32.mxu0 %vm4278_vm4, %v7914_v60  ;;  %v7937_v15 = vpop.permute.xlu1 %7936  ;;  %10486 = vmatpush3.bf16.msra.mxu0 %v12717_v35 }
0x46ab   :  { %v7931_v43 = vpop.permute.xlu0 %7930 }
0x46ac   :  { %10153 = vmatprep.mubr.msk.f32.mxu1 %vm4278_vm4, %v7931_v43 }
0x46ad   :  { %10147 = vmatmul.mubr.msk.f32.gmra.mrb[90].mxu0 %vm4278_vm4, %v7916_v28  ;;  %10154 = vmatmul.mubr.msk.f32.vlgmr.msra.gmra.mrb[88].mxu1 %vm4278_vm4, %v7933_v51 }
0x46ae   :  { %10490 = vmatpush3.bf16.msra.mxu1 %v12712_v47 }
0x46af   :  { %v7935_v0 = vpop.permute.xlu0 %7934 }
0x46b0   :  { %10156 = vmatprep.mubr.msk.f32.mxu1 %vm4278_vm4, %v7935_v0 }
0x46b1   :  { %10157 = vmatmul.mubr.msk.f32.gmra.mrb[90].mxu1 %vm4278_vm4, %v7937_v15 }
0x477c   :  { %v10145_v24 = vpop.f32.mrb[88].mxu0 }
0x477d   :  { %v8037_v48 = vadd.f32 %v10145_v24, %v12762_v46  ;;  %v8031_v2 = vpop.f32.mrb[89].mxu0 }
0x477e   :  { %v8032_v23 = vadd.f32 %v12762_v46, %v8031_v2 }
0x477f   :  { %8177 = vrot.lane.b32.xlu1 %v8037_v48, %s11124_s29 }
0x4780   :  { %v10148_v35 = vpop.f32.mrb[90].mxu0  ;;  %v10155_v11 = vpop.f32.mrb[88].mxu1  ;;  %v8143_v36 = vadd.f32 %v8032_v23, %v13102_v7 }
0x4781   :  { %v8047_v42 = vadd.f32 %v10148_v35, %v12762_v46  ;;  %v8130_v32 = vadd.f32 %v10155_v11, %v12772_v33  ;;  %v8041_v54 = vpop.f32.mrb[91].mxu0  ;;  %v8124_v40 = vpop.f32.mrb[89].mxu1 }
0x4782   :  { %v8042_v17 = vadd.f32 %v12762_v46, %v8041_v54  ;;  %v8125_v21 = vadd.f32 %v12772_v33, %v8124_v40  ;;  %v8144_v46 = vadd.f32 %v8037_v48, %v13093_v31  ;;  %v9143_v58 = vmul.f32 -1.442695, %v8143_v36 }
0x4783   :  { %8181 = vrot.lane.b32.xlu1 %v8047_v42, %s11124_s29  ;;  %8281 = vrot.lane.b32.xlu0 %v8130_v32, %s11124_s29  ;;  %v8146_v26 = vadd.f32 %v8047_v42, %v13096_v29  ;;  %v8248_v25 = vadd.f32 %v8130_v32, %v13099_v34 }
0x4784   :  { %v10158_v47 = vpop.f32.mrb[90].mxu1  ;;  %v9144_v61 = vmul.f32 -1.442695, %v8144_v46  ;;  %v8145_v19 = vadd.f32 %v8042_v17, %v13105_v59  ;;  %v8247_v30 = vadd.f32 %v8125_v21, %v13108_v52 }
0x4785   :  { %v8134_v63 = vpop.f32.mrb[91].mxu1  ;;  %v8140_v3 = vadd.f32 %v10158_v47, %v12772_v33  ;;  %v9148_v37 = vmul.f32 -1.442695, %v8248_v25 }
0x4786   :  { %v8135_v49 = vadd.f32 %v12772_v33, %v8134_v63  ;;  %v9146_v33 = vmul.f32 -1.442695, %v8146_v26  ;;  %10983 = vpow2.f32 %v9144_v61  ;;  %v9145_v9 = vmul.f32 -1.442695, %v8145_v19 }
0x4787   :  { %8179 = vrot.lane.b32.xlu1 %v8042_v17, %s11124_s29  ;;  %8175 = vrot.lane.b32.xlu0 %v8032_v23, %s11124_s29  ;;  %v8250_v45 = vadd.f32 %v8140_v3, %v13111_v16  ;;  %v9147_v53 = vmul.f32 -1.442695, %v8247_v30 }
0x4788   :  { %10985 = vpow2.f32 %v9146_v33  ;;  %v8249_v27 = vadd.f32 %v8135_v49, %v13114_v50 }
0x4789   :  { %10987 = vpow2.f32 %v9148_v37  ;;  %v9150_v39 = vmul.f32 -1.442695, %v8250_v45 }
0x478a   :  { %10989 = vpow2.f32 %v9143_v58  ;;  %v9149_v12 = vmul.f32 -1.442695, %v8249_v27 }
0x478b   :  { %8279 = vrot.lane.b32.xlu0 %v8125_v21, %s11124_s29  ;;  %8285 = vrot.lane.b32.xlu1 %v8140_v3, %s11124_s29  ;;  %10991 = vpow2.f32 %v9145_v9 }
0x478c   :  { %10993 = vpow2.f32 %v9147_v53 }
0x478d   :  { %10995 = vpow2.f32 %v9150_v39 }
0x478e   :  { %10997 = vpow2.f32 %v9149_v12 }
0x478f   :  { %8283 = vrot.lane.b32.xlu0 %v8135_v49, %s11124_s29 }
0x4790   :  { %v10984_v6 = vpop.eup %10983 }
0x4791   :  { %v8160_v22 = vadd.f32 1.0, %v10984_v6 }
0x4792   :  { %v10986_v55 = vpop.eup %10985 }
0x4793   :  { %v10988_v1 = vpop.eup %10987  ;;  %v8162_v44 = vadd.f32 1.0, %v10986_v55  ;;  %10999 = vrcp.f32 %v8160_v22 }
0x4794   :  { %v10990_v41 = vpop.eup %10989  ;;  %v8264_v20 = vadd.f32 1.0, %v10988_v1 }
0x4795   :  { %v10992_v10 = vpop.eup %10991  ;;  %v8159_v38 = vadd.f32 1.0, %v10990_v41  ;;  %11001 = vrcp.f32 %v8162_v44 }
0x4796   :  { %v10994_v28 = vpop.eup %10993  ;;  %11003 = vrcp.f32 %v8264_v20  ;;  %v8161_v51 = vadd.f32 1.0, %v10992_v10 }
0x4797   :  { %v10996_v60 = vpop.eup %10995  ;;  %11005 = vrcp.f32 %v8159_v38  ;;  %v8263_v5 = vadd.f32 1.0, %v10994_v28 }
0x4798   :  { %11007 = vrcp.f32 %v8161_v51  ;;  %v8266_v15 = vadd.f32 1.0, %v10996_v60  ;;  %v10998_v43 = vpop.eup %10997 }
0x4799   :  { %11009 = vrcp.f32 %v8263_v5  ;;  %v8265_v2 = vadd.f32 1.0, %v10998_v43 }
0x479a   :  { %11011 = vrcp.f32 %v8266_v15 }
0x479b   :  { %11013 = vrcp.f32 %v8265_v2 }
0x479d   :  { %v13117_v0 = vpop.eup %10999 }
0x479e   :  { %v8240_v51 = vmul.f32 %v13117_v0, %v13014_v13 }
0x479f   :  { %v13120_v35 = vpop.eup %11001 }
0x47a0   :  { %v13123_v11 = vpop.eup %11003  ;;  %v8218_v15 = vsub.f32 1.0, %v13120_v35 }
0x47a1   :  { %v13127_v47 = vpop.eup %11005 }
0x47a2   :  { %v13131_v23 = vpop.eup %11007 }
0x47a3   :  { %v13135_v49 = vpop.eup %11009 }
0x47a4   :  { %v13139_v46 = vpop.eup %11011 }
0x47a5   :  { %v13145_v33 = vpop.eup %11013 }
0x47f1   :  { %v8178_v24 = vpop.permute.xlu1 %8177 }
0x47f2   :  { %v8188_v48 = vmul.f32 %v13117_v0, %v8178_v24  ;;  %v8320_v24 = vsub.f32 1.0, %v13123_v11 }
0x47f4   :  { %8197 = vrot.lane.b32.xlu1 %v8188_v48, %s11125_s30  ;;  %v8242_v48 = vmul.f32 %v13120_v35, %v13024_v8  ;;  %v8241_v8 = vmul.f32 %v13131_v23, %v13038_v18  ;;  %v8319_v18 = vsub.f32 1.0, %v13135_v49 }
0x47f5   :  { %v8182_v42 = vpop.permute.xlu1 %8181  ;;  %v8282_v32 = vpop.permute.xlu0 %8281 }
0x47f6   :  { %v8190_v54 = vmul.f32 %v13120_v35, %v8182_v42  ;;  %v8292_v40 = vmul.f32 %v13123_v11, %v8282_v32  ;;  %v8344_v32 = vmul.f32 %v13123_v11, %v13027_v62  ;;  %v8239_v62 = vmul.f32 %v13127_v47, %v13041_v57 }
0x47f7   :  { %v8343_v57 = vmul.f32 %v13135_v49, %v13054_v4 }
0x47f8   :  { %8201 = vrot.lane.b32.xlu1 %v8190_v54, %s11125_s30  ;;  %8301 = vrot.lane.b32.xlu0 %v8292_v40, %s11125_s30  ;;  %v8217_v54 = vsub.f32 1.0, %v13131_v23 }
0x47f9   :  { %v8180_v17 = vpop.permute.xlu1 %8179  ;;  %v8176_v63 = vpop.permute.xlu0 %8175 }
0x47fa   :  { %v8189_v21 = vmul.f32 %v13131_v23, %v8180_v17  ;;  %v8187_v3 = vmul.f32 %v13127_v47, %v8176_v63  ;;  %v8215_v63 = vsub.f32 1.0, %v13127_v47  ;;  %v8346_v23 = vmul.f32 %v13139_v46, %v13052_v14 }
0x47fb   :  { %v8345_v14 = vmul.f32 %v13145_v33, %v13063_v56 }
0x47fc   :  { %8199 = vrot.lane.b32.xlu1 %v8189_v21, %s11125_s30  ;;  %8195 = vrot.lane.b32.xlu0 %v8187_v3, %s11125_s30 }
0x47fd   :  { %v8286_v26 = vpop.permute.xlu1 %8285  ;;  %v8280_v61 = vpop.permute.xlu0 %8279 }
0x47fe   :  { %v8294_v25 = vmul.f32 %v13139_v46, %v8286_v26  ;;  %v8291_v36 = vmul.f32 %v13135_v49, %v8280_v61  ;;  %v8322_v26 = vsub.f32 1.0, %v13139_v46 }
0x4800   :  { %8305 = vrot.lane.b32.xlu1 %v8294_v25, %s11125_s30  ;;  %8299 = vrot.lane.b32.xlu0 %v8291_v36, %s11125_s30 }
0x4801   :  { %v8284_v37 = vpop.permute.xlu0 %8283 }
0x4802   :  { %v8293_v19 = vmul.f32 %v13145_v33, %v8284_v37 }
0x4804   :  { %8303 = vrot.lane.b32.xlu0 %v8293_v19, %s11125_s30 }
0x4866   :  { %v8198_v58 = vpop.permute.xlu1 %8197 }
0x4867   :  { %v8208_v30 = vadd.f32 %v8198_v58, %v13093_v31 }
0x4869   :  { %11015 = vtanh.f32 %v8208_v30  ;;  %v8321_v30 = vsub.f32 1.0, %v13145_v33 }
0x486a   :  { %v8202_v9 = vpop.permute.xlu1 %8201  ;;  %v8302_v45 = vpop.permute.xlu0 %8301 }
0x486b   :  { %v8210_v53 = vadd.f32 %v8202_v9, %v13096_v29  ;;  %v8312_v39 = vadd.f32 %v8302_v45, %v13099_v34 }
0x486d   :  { %11017 = vtanh.f32 %v8210_v53 }
0x486e   :  { %11019 = vtanh.f32 %v8312_v39  ;;  %v8200_v27 = vpop.permute.xlu1 %8199  ;;  %v8196_v6 = vpop.permute.xlu0 %8195 }
0x486f   :  { %v8209_v12 = vadd.f32 %v8200_v27, %v13105_v59  ;;  %v8207_v55 = vadd.f32 %v8196_v6, %v13102_v7 }
0x4871   :  { %11021 = vtanh.f32 %v8209_v12 }
0x4872   :  { %11023 = vtanh.f32 %v8207_v55  ;;  %v8306_v22 = vpop.permute.xlu1 %8305  ;;  %v8300_v1 = vpop.permute.xlu0 %8299 }
0x4873   :  { %v11016_v31 = vpop.eup %11015  ;;  %v8314_v44 = vadd.f32 %v8306_v22, %v13111_v16  ;;  %v8311_v41 = vadd.f32 %v8300_v1, %v13108_v52 }
0x4874   :  { %8225 = vrot.lane.b32.xlu1 %v11016_v31, %s11126_s3  ;;  %v11093_v31 = vld [vmem:[%s13378_s13] ss:$0 sm:$0xff] }
0x4875   :  { %11025 = vtanh.f32 %v8314_v44 }
0x4876   :  { %11027 = vtanh.f32 %v8311_v41  ;;  %v8304_v29 = vpop.permute.xlu0 %8303 }
0x4877   :  { %v11018_v34 = vpop.eup %11017  ;;  %v8313_v20 = vadd.f32 %v8304_v29, %v13114_v50  ;;  %v8216_v50 = vsub.f32 1.0, %v13117_v0 }
0x4878   :  { %v11020_v59 = vpop.eup %11019  ;;  %8229 = vrot.lane.b32.xlu1 %v11018_v34, %s11126_s3 }
0x4879   :  { %11029 = vtanh.f32 %v8313_v20  ;;  %8329 = vrot.lane.b32.xlu0 %v11020_v59, %s11126_s3  ;;  %v11094_v20 = vld [vmem:[%s13378_s13 + $0x1] ss:$0 sm:$0xff]  ;;  %s11127_s13 = smov 48  }
0x487b   :  { %v11022_v7 = vpop.eup %11021 }
0x487c   :  { %v11024_v10 = vpop.eup %11023  ;;  %8227 = vrot.lane.b32.xlu1 %v11022_v7, %s11126_s3 }
0x487d   :  { %8223 = vrot.lane.b32.xlu0 %v11024_v10, %s11126_s3 }
0x487f   :  { %v11026_v52 = vpop.eup %11025 }
0x4880   :  { %v11028_v16 = vpop.eup %11027  ;;  %8333 = vrot.lane.b32.xlu1 %v11026_v52, %s11126_s3  ;;  %v13238_v52 = vld [vmem:[#allocation10 + $0x78] sm:$0xff] }
0x4881   :  { %8327 = vrot.lane.b32.xlu0 %v11028_v16, %s11126_s3 }
0x4883   :  { %v11030_v38 = vpop.eup %11029 }
0x4885   :  { %8331 = vrot.lane.b32.xlu0 %v11030_v38, %s11126_s3  ;;  %v13241_v38 = vld [vmem:[#allocation11 + $0x78] sm:$0xff] }
0x48e6   :  { %v8226_v28 = vpop.permute.xlu1 %8225 }
0x48e7   :  { %v8236_v60 = vmul.f32 %v8226_v28, %v8216_v50 }
0x48e9   :  { %v13168_v5 = vadd.f32 %v8240_v51, %v8236_v60  ;;  %v13244_v60 = vld [vmem:[#allocation10 + $0x68] sm:$0xff] }
0x48ea   :  { %v8230_v43 = vpop.permute.xlu1 %8229 }
0x48eb   :  { %v8238_v2 = vmul.f32 %v8230_v43, %v8218_v15  ;;  %v8330_v42 = vpop.permute.xlu0 %8329  ;;  %8357 = vrot.lane.b32.xlu1 %v13168_v5, %s11126_s3 }
0x48ec   :  { %v8340_v13 = vmul.f32 %v8330_v42, %v8320_v24 }
0x48ed   :  { %v13178_v0 = vadd.f32 %v8242_v48, %v8238_v2 }
0x48ee   :  { %v13181_v40 = vadd.f32 %v8344_v32, %v8340_v13  ;;  %v8228_v17 = vpop.permute.xlu1 %8227 }
0x48ef   :  { %v8237_v35 = vmul.f32 %v8228_v17, %v8217_v54  ;;  %v8224_v21 = vpop.permute.xlu0 %8223  ;;  %8361 = vrot.lane.b32.xlu1 %v13178_v0, %s11126_s3 }
0x48f0   :  { %v8235_v11 = vmul.f32 %v8224_v21, %v8215_v63  ;;  %8378 = vrot.lane.b32.xlu0 %v13181_v40, %s11126_s3 }
0x48f1   :  { %v13192_v3 = vadd.f32 %v8241_v8, %v8237_v35 }
0x48f2   :  { %v13195_v61 = vadd.f32 %v8239_v62, %v8235_v11  ;;  %v8334_v25 = vpop.permute.xlu1 %8333 }
0x48f3   :  { %v8342_v36 = vmul.f32 %v8334_v25, %v8322_v26  ;;  %v8328_v37 = vpop.permute.xlu0 %8327  ;;  %8359 = vrot.lane.b32.xlu1 %v13192_v3, %s11126_s3 }
0x48f4   :  { %v8339_v47 = vmul.f32 %v8328_v37, %v8319_v18  ;;  %8355 = vrot.lane.b32.xlu0 %v13195_v61, %s11126_s3 }
0x48f5   :  { %v13206_v19 = vadd.f32 %v8346_v23, %v8342_v36 }
0x48f6   :  { %v13208_v58 = vadd.f32 %v8343_v57, %v8339_v47  ;;  %v13264_v57 = vld [vmem:[#allocation10 + $0x60] sm:$0xff] }
0x48f7   :  { %v8332_v9 = vpop.permute.xlu0 %8331  ;;  %8382 = vrot.lane.b32.xlu1 %v13206_v19, %s11126_s3 }
0x48f8   :  { %v8341_v46 = vmul.f32 %v8332_v9, %v8321_v30  ;;  %8376 = vrot.lane.b32.xlu0 %v13208_v58, %s11126_s3  ;;  %v13267_v30 = vld [vmem:[#allocation11 + $0x60] sm:$0xff] }
0x48fa   :  { %v13217_v4 = vadd.f32 %v8345_v14, %v8341_v46  ;;  %v13270_v46 = vld [vmem:[#allocation11 + $0x68] sm:$0xff] }
0x48fc   :  { %8380 = vrot.lane.b32.xlu0 %v13217_v4, %s11126_s3 }
0x495d   :  { %v8358_v49 = vpop.permute.xlu1 %8357 }
0x4961   :  { %v8362_v45 = vpop.permute.xlu1 %8361 }
0x4962   :  { %v8379_v53 = vpop.permute.xlu0 %8378 }
0x4965   :  { %v8360_v39 = vpop.permute.xlu1 %8359 }
0x4966   :  { %v8356_v27 = vpop.permute.xlu0 %8355 }
0x4967   :  { %10163 = vmatprep.mubr.msk.f32.mxu0 %vm4278_vm4, %v8356_v27 }
0x4968   :  { %10164 = vmatmul.mubr.msk.f32.vlgmr.msra.gmra.mrb[92].mxu0 %vm4278_vm4, %v8358_v49 }
0x4969   :  { %10166 = vmatprep.mubr.msk.f32.mxu0 %vm4278_vm4, %v8360_v39  ;;  %v8383_v56 = vpop.permute.xlu1 %8382 }
0x496a   :  { %v8377_v33 = vpop.permute.xlu0 %8376 }
0x496b   :  { %10173 = vmatprep.mubr.msk.f32.mxu1 %vm4278_vm4, %v8377_v33 }
0x496c   :  { %10167 = vmatmul.mubr.msk.f32.gmra.mrb[94].mxu0 %vm4278_vm4, %v8362_v45  ;;  %10174 = vmatmul.mubr.msk.f32.vlgmr.msra.gmra.mrb[92].mxu1 %vm4278_vm4, %v8379_v53  ;;  %v13273_v45 = vld [vmem:[#allocation11 + $0x70] sm:$0xff] }
0x496e   :  { %v8381_v6 = vpop.permute.xlu0 %8380 }
0x496f   :  { %10176 = vmatprep.mubr.msk.f32.mxu1 %vm4278_vm4, %v8381_v6 }
0x4970   :  { %10177 = vmatmul.mubr.msk.f32.gmra.mrb[94].mxu1 %vm4278_vm4, %v8383_v56  ;;  %v13276_v56 = vld [vmem:[#allocation10 + $0x70] sm:$0xff] }
0x4a3b   :  { %v10165_v12 = vpop.f32.mrb[92].mxu0 }
0x4a3c   :  { %v8477_v55 = vpop.f32.mrb[93].mxu0  ;;  %v8483_v10 = vadd.f32 %v11093_v31, %v10165_v12 }
0x4a3d   :  { %v8478_v21 = vadd.f32 %v11093_v31, %v8477_v55 }
0x4a3e   :  { %v8590_v15 = vadd.f32 %v8483_v10, %v13244_v60 }
0x4a3f   :  { %v10168_v22 = vpop.f32.mrb[94].mxu0  ;;  %v10175_v1 = vpop.f32.mrb[92].mxu1  ;;  %v8589_v47 = vadd.f32 %v8478_v21, %v13264_v57 }
0x4a40   :  { %v8493_v44 = vadd.f32 %v11093_v31, %v10168_v22  ;;  %v8487_v41 = vpop.f32.mrb[95].mxu0  ;;  %v8570_v29 = vpop.f32.mrb[93].mxu1  ;;  %v9160_v24 = vmul.f32 -1.442695, %v8590_v15  ;;  %v8576_v25 = vadd.f32 %v11094_v20, %v10175_v1 }
0x4a41   :  { %v8488_v11 = vadd.f32 %v11093_v31, %v8487_v41  ;;  %v8571_v26 = vadd.f32 %v11094_v20, %v8570_v29  ;;  %v9159_v9 = vmul.f32 -1.442695, %v8589_v47 }
0x4a42   :  { %8627 = vrot.lane.b32.xlu0 %v8493_v44, %s11124_s29  ;;  %v8592_v16 = vadd.f32 %v8493_v44, %v13238_v52  ;;  %v8694_v49 = vadd.f32 %v8576_v25, %v13270_v46 }
0x4a43   :  { %v10178_v34 = vpop.f32.mrb[94].mxu1  ;;  %v8693_v14 = vadd.f32 %v8571_v26, %v13267_v30  ;;  %v8591_v33 = vadd.f32 %v8488_v11, %v13276_v56 }
0x4a44   :  { %v8586_v59 = vadd.f32 %v11094_v20, %v10178_v34  ;;  %v8580_v7 = vpop.f32.mrb[95].mxu1  ;;  %v9162_v50 = vmul.f32 -1.442695, %v8592_v16  ;;  %v9164_v27 = vmul.f32 -1.442695, %v8694_v49 }
0x4a45   :  { %v8581_v18 = vadd.f32 %v11094_v20, %v8580_v7  ;;  %v9163_v53 = vmul.f32 -1.442695, %v8693_v14  ;;  %v9161_v12 = vmul.f32 -1.442695, %v8591_v33 }
0x4a46   :  { %8731 = vrot.lane.b32.xlu1 %v8586_v59, %s11124_s29  ;;  %v8696_v28 = vadd.f32 %v8586_v59, %v13241_v38  ;;  %11031 = vpow2.f32 %v9162_v50 }
0x4a47   :  { %v8695_v39 = vadd.f32 %v8581_v18, %v13273_v45 }
0x4a48   :  { %v9166_v51 = vmul.f32 -1.442695, %v8696_v28 }
0x4a49   :  { %v9165_v6 = vmul.f32 -1.442695, %v8695_v39 }
0x4a4a   :  { %8623 = vrot.lane.b32.xlu1 %v8483_v10, %s11124_s29  ;;  %11033 = vpow2.f32 %v9166_v51 }
0x4a4b   :  { %11035 = vpow2.f32 %v9160_v24 }
0x4a50   :  { %v11032_v43 = vpop.eup %11031 }
0x4a51   :  { %v8608_v48 = vadd.f32 1.0, %v11032_v43 }
0x4a53   :  { %11037 = vrcp.f32 %v8608_v48 }
0x4a54   :  { %v11034_v2 = vpop.eup %11033 }
0x4a55   :  { %v8712_v42 = vadd.f32 1.0, %v11034_v2  ;;  %v11036_v32 = vpop.eup %11035 }
0x4a56   :  { %v8606_v63 = vadd.f32 1.0, %v11036_v32 }
0x4a57   :  { %11039 = vrcp.f32 %v8712_v42 }
0x4a58   :  { %11041 = vrcp.f32 %v8606_v63 }
0x4a59   :  { %11043 = vpow2.f32 %v9159_v9 }
0x4a5a   :  { %11045 = vpow2.f32 %v9163_v53 }
0x4a5b   :  { %11047 = vpow2.f32 %v9164_v27 }
0x4a5c   :  { %11049 = vpow2.f32 %v9165_v6 }
0x4a5d   :  { %v13247_v13 = vpop.eup %11037  ;;  %11051 = vpow2.f32 %v9161_v12 }
0x4a61   :  { %v13251_v8 = vpop.eup %11039 }
0x4a62   :  { %v13260_v36 = vpop.eup %11041  ;;  %v8768_v49 = vsub.f32 1.0, %v13251_v8  ;;  %v8792_v6 = vmul.f32 %v13251_v8, %v13206_v19 }
0x4a63   :  { %v11044_v55 = vpop.eup %11043 }
0x4a64   :  { %v8605_v22 = vadd.f32 1.0, %v11044_v55  ;;  %v11046_v1 = vpop.eup %11045 }
0x4a65   :  { %v11048_v31 = vpop.eup %11047  ;;  %v8709_v44 = vadd.f32 1.0, %v11046_v1 }
0x4a66   :  { %11053 = vrcp.f32 %v8605_v22  ;;  %v11050_v41 = vpop.eup %11049  ;;  %v8710_v29 = vadd.f32 1.0, %v11048_v31  ;;  %v8688_v22 = vmul.f32 %v13247_v13, %v13178_v0  ;;  %v8862_v31 = vld [vmem:[#allocation9 + $0x78] sm:$0xff] }
0x4a67   :  { %11055 = vrcp.f32 %v8709_v44  ;;  %v8711_v34 = vadd.f32 1.0, %v11050_v41  ;;  %v11052_v20 = vpop.eup %11051  ;;  %v8662_v41 = vsub.f32 1.0, %v13260_v36 }
0x4a68   :  { %11057 = vrcp.f32 %v8710_v29  ;;  %v8607_v7 = vadd.f32 1.0, %v11052_v20  ;;  %v8686_v20 = vmul.f32 %v13260_v36, %v13168_v5 }
0x4a69   :  { %11059 = vrcp.f32 %v8711_v34  ;;  %v8855_v34 = vld [vmem:[#allocation5 + $0x78] sm:$0xff] }
0x4a6a   :  { %11061 = vrcp.f32 %v8607_v7 }
0x4a70   :  { %v13279_v10 = vpop.eup %11053 }
0x4a71   :  { %v13284_v15 = vpop.eup %11055  ;;  %v8661_v7 = vsub.f32 1.0, %v13279_v10 }
0x4a72   :  { %v13288_v42 = vpop.eup %11057  ;;  %v8765_v5 = vsub.f32 1.0, %v13284_v15 }
0x4a73   :  { %v13291_v32 = vpop.eup %11059 }
0x4ab4   :  { %v8628_v54 = vpop.permute.xlu0 %8627 }
0x4ab5   :  { %v8636_v17 = vmul.f32 %v13247_v13, %v8628_v54 }
0x4ab7   :  { %8647 = vrot.lane.b32.xlu0 %v8636_v17, %s11125_s30 }
0x4ab8   :  { %v8732_v35 = vpop.permute.xlu1 %8731 }
0x4ab9   :  { %v8740_v62 = vmul.f32 %v13251_v8, %v8732_v35 }
0x4abb   :  { %8751 = vrot.lane.b32.xlu1 %v8740_v62, %s11125_s30  ;;  %8621 = vrot.lane.b32.xlu0 %v8478_v21, %s11124_s29 }
0x4abc   :  { %v8624_v23 = vpop.permute.xlu1 %8623 }
0x4abd   :  { %v8634_v37 = vmul.f32 %v13260_v36, %v8624_v23 }
0x4abf   :  { %8725 = vrot.lane.b32.xlu1 %v8571_v26, %s11124_s29  ;;  %8625 = vrot.lane.b32.xlu0 %v8488_v11, %s11124_s29 }
0x4ac3   :  { %8729 = vrot.lane.b32.xlu1 %v8581_v18, %s11124_s29  ;;  %8727 = vrot.lane.b32.xlu0 %v8576_v25, %s11124_s29 }
0x4ac7   :  { %8643 = vrot.lane.b32.xlu1 %v8634_v37, %s11125_s30 }
0x4b29   :  { %v8648_v59 = vpop.permute.xlu0 %8647 }
0x4b2a   :  { %v8656_v43 = vadd.f32 %v8648_v59, %v13238_v52  ;;  %v13297_v52 = vpop.eup %11061 }
0x4b2d   :  { %v8752_v16 = vpop.permute.xlu1 %8751  ;;  %v8622_v50 = vpop.permute.xlu0 %8621 }
0x4b2e   :  { %v8760_v28 = vadd.f32 %v8752_v16, %v13241_v38  ;;  %v8633_v51 = vmul.f32 %v13279_v10, %v8622_v50  ;;  %v8685_v50 = vmul.f32 %v13279_v10, %v13195_v61  ;;  %v8663_v61 = vsub.f32 1.0, %v13297_v52 }
0x4b2f   :  { %v8767_v10 = vsub.f32 1.0, %v13291_v32 }
0x4b30   :  { %11063 = vtanh.f32 %v8760_v28  ;;  %8641 = vrot.lane.b32.xlu0 %v8633_v51, %s11125_s30 }
0x4b31   :  { %v8726_v24 = vpop.permute.xlu1 %8725  ;;  %v8626_v48 = vpop.permute.xlu0 %8625  ;;  %11065 = vtanh.f32 %v8656_v43 }
0x4b32   :  { %v8737_v2 = vmul.f32 %v13284_v15, %v8726_v24  ;;  %v8635_v62 = vmul.f32 %v13297_v52, %v8626_v48  ;;  %v8789_v48 = vmul.f32 %v13284_v15, %v13208_v58  ;;  %v8791_v58 = vmul.f32 %v13291_v32, %v13217_v4 }
0x4b34   :  { %8745 = vrot.lane.b32.xlu1 %v8737_v2, %s11125_s30 }
0x4b35   :  { %v8730_v38 = vpop.permute.xlu1 %8729  ;;  %v8728_v54 = vpop.permute.xlu0 %8727 }
0x4b36   :  { %v8739_v17 = vmul.f32 %v13291_v32, %v8730_v38  ;;  %v8738_v63 = vmul.f32 %v13288_v42, %v8728_v54 }
0x4b38   :  { %8747 = vrot.lane.b32.xlu0 %v8738_v63, %s11125_s30  ;;  %8749 = vrot.lane.b32.xlu1 %v8739_v17, %s11125_s30  ;;  %v8687_v63 = vmul.f32 %v13297_v52, %v13192_v3  ;;  %v8790_v52 = vmul.f32 %v13288_v42, %v13181_v40 }
0x4b39   :  { %v8644_v35 = vpop.permute.xlu1 %8643 }
0x4b3a   :  { %v11064_v21 = vpop.eup %11063  ;;  %v8654_v11 = vadd.f32 %v8644_v35, %v13244_v60 }
0x4b3b   :  { %v11066_v26 = vpop.eup %11065 }
0x4b3c   :  { %11067 = vtanh.f32 %v8654_v11  ;;  %8645 = vrot.lane.b32.xlu0 %v8635_v62, %s11125_s30  ;;  %8779 = vrot.lane.b32.xlu1 %v11064_v21, %s11126_s3 }
0x4b40   :  { %8675 = vrot.lane.b32.xlu0 %v11066_v26, %s11126_s3  ;;  %v8766_v26 = vsub.f32 1.0, %v13288_v42 }
0x4b46   :  { %v11068_v25 = vpop.eup %11067 }
0x4b47   :  { %8671 = vrot.lane.b32.xlu1 %v11068_v25, %s11126_s3 }
0x4ba2   :  { %v8642_v18 = vpop.permute.xlu0 %8641 }
0x4ba3   :  { %v8653_v23 = vadd.f32 %v8642_v18, %v13264_v57 }
0x4ba5   :  { %11069 = vtanh.f32 %v8653_v23 }
0x4ba6   :  { %v8746_v37 = vpop.permute.xlu1 %8745 }
0x4ba7   :  { %v8757_v47 = vadd.f32 %v8746_v37, %v13267_v30 }
0x4ba9   :  { %11071 = vtanh.f32 %v8757_v47 }
0x4baa   :  { %v8748_v9 = vpop.permute.xlu0 %8747  ;;  %v8750_v60 = vpop.permute.xlu1 %8749 }
0x4bab   :  { %v8759_v14 = vadd.f32 %v8750_v60, %v13273_v45  ;;  %v8758_v30 = vadd.f32 %v8748_v9, %v13270_v46  ;;  %v8664_v45 = vsub.f32 1.0, %v13247_v13  ;;  %v8841_v13 = vld [vmem:[#allocation8 + $0x78] sm:$0xff] }
0x4bad   :  { %11073 = vtanh.f32 %v8759_v14 }
0x4bae   :  { %v8646_v53 = vpop.permute.xlu0 %8645  ;;  %v8780_v39 = vpop.permute.xlu1 %8779 }
0x4baf   :  { %v11070_v27 = vpop.eup %11069  ;;  %v8655_v33 = vadd.f32 %v8646_v53, %v13276_v56  ;;  %v8788_v57 = vmul.f32 %v8780_v39, %v8768_v49 }
0x4bb0   :  { %8669 = vrot.lane.b32.xlu0 %v11070_v27, %s11126_s3 }
0x4bb1   :  { %11075 = vtanh.f32 %v8655_v33  ;;  %v8796_v12 = vadd.f32 %v8792_v6, %v8788_v57 }
0x4bb2   :  { %v8676_v55 = vpop.permute.xlu0 %8675  ;;  %11077 = vtanh.f32 %v8758_v30 }
0x4bb3   :  { %v8684_v1 = vmul.f32 %v8676_v55, %v8664_v45  ;;  %8828 = vrot.lane.b32.xlu1 %v8796_v12, %s11126_s3  ;;  %v11072_v19 = vpop.eup %11071 }
0x4bb5   :  { %v8692_v56 = vadd.f32 %v8688_v22, %v8684_v1 }
0x4bb7   :  { %8807 = vrot.lane.b32.xlu0 %v8692_v56, %s11126_s3  ;;  %8773 = vrot.lane.b32.xlu1 %v11072_v19, %s11126_s3  ;;  %v11074_v8 = vpop.eup %11073 }
0x4bb9   :  { %v8672_v0 = vpop.permute.xlu1 %8671 }
0x4bba   :  { %v8682_v29 = vmul.f32 %v8672_v0, %v8662_v41 }
0x4bbb   :  { %v11076_v46 = vpop.eup %11075  ;;  %8777 = vrot.lane.b32.xlu1 %v11074_v8, %s11126_s3 }
0x4bbc   :  { %8673 = vrot.lane.b32.xlu0 %v11076_v46, %s11126_s3  ;;  %v11078_v44 = vpop.eup %11077  ;;  %v8690_v59 = vadd.f32 %v8686_v20, %v8682_v29 }
0x4bbf   :  { %8864 = vrot.lane.b32.xlu1 %v8862_v31, %s11124_s29 }
0x4bc0   :  { %8775 = vrot.lane.b32.xlu0 %v11078_v44, %s11126_s3 }
0x4bc4   :  { %8843 = vrot.lane.b32.xlu0 %v8841_v13, %s11125_s30 }
0x4bc8   :  { %8857 = vrot.lane.b32.xlu0 %v8855_v34, %s11123_s28  ;;  %s11128_s28 = smov [#allocation14]  }
0x4bc9   :  { %s8882_s29 = sshll.u32 %s11128_s28, 4  ;;  %s8883_s29 = int_to_ptr.vmem [resolvable:$true] %s8882_s29 }
0x4bca   :  { %s11095_s30 = scalar_lea.vmem %s8883_s29, 128  ;;  %p11100_p1 = scmp.lt.s32.totalorder %s8883_s29, %s8883_s29 }
0x4bcb   :  { %p11096_p0 = scmp.ne.s32.totalorder %s8883_s29, %s11095_s30  ;;  %p11101_p2 = scmp.lt.s32.totalorder %s11095_s30, %s11095_s30 }
0x4bcc   :  { %8803 = vrot.lane.b32.xlu0 %v8690_v59, %s11126_s3 }
0x4bcd   :  { %p11102_p3 = por %p11101_p2, %p11100_p1 }
0x4bcf   :  { %p11103_p4 = pnand %p11102_p3, %p11096_p0 }
0x4c22   :  { %v8670_v16 = vpop.permute.xlu0 %8669 }
0x4c23   :  { %v8681_v28 = vmul.f32 %v8670_v16, %v8661_v7 }
0x4c25   :  { %v8689_v51 = vadd.f32 %v8685_v50, %v8681_v28  ;;  %v8829_v43 = vpop.permute.xlu1 %8828 }
0x4c26   :  { %8838 = vst.msk [vmem:[#allocation13 + $0x78] sm:$0xff] %vm4278_vm4, %v8829_v43 }
0x4c27   :  { %8801 = vrot.lane.b32.xlu1 %v8689_v51, %s11126_s3 }
0x4c29   :  { %v8808_v36 = vpop.permute.xlu0 %8807  ;;  %v8774_v24 = vpop.permute.xlu1 %8773 }
0x4c2a   :  { %8817 = vst.msk [vmem:[#allocation12 + $0x78] sm:$0xff] %vm4278_vm4, %v8808_v36  ;;  %v8785_v2 = vmul.f32 %v8774_v24, %v8765_v5 }
0x4c2c   :  { %v8793_v38 = vadd.f32 %v8789_v48, %v8785_v2 }
0x4c2d   :  { %v8778_v54 = vpop.permute.xlu1 %8777  ;;  %v8869_v11 = vld [vmem:[#allocation13 + $0x78] sm:$0xff] }
0x4c2e   :  { %v8674_v17 = vpop.permute.xlu0 %8673  ;;  %8822 = vrot.lane.b32.xlu0 %v8793_v38, %s11126_s3  ;;  %v8787_v21 = vmul.f32 %v8778_v54, %v8767_v10 }
0x4c2f   :  { %v8683_v35 = vmul.f32 %v8674_v17, %v8663_v61 }
0x4c30   :  { %v8795_v25 = vadd.f32 %v8791_v58, %v8787_v21 }
0x4c31   :  { %v8691_v62 = vadd.f32 %v8687_v63, %v8683_v35  ;;  %v8848_v3 = vld [vmem:[#allocation12 + $0x78] sm:$0xff]  ;;  %v8865_v47 = vpop.permute.xlu1 %8864 }
0x4c32   :  { %v8776_v15 = vpop.permute.xlu0 %8775  ;;  %8871 = vrot.lane.b32.xlu0 %v8869_v11, %s11126_s3 }
0x4c33   :  { %8805 = vrot.lane.b32.xlu1 %v8691_v62, %s11126_s3  ;;  %v8786_v18 = vmul.f32 %v8776_v15, %v8766_v26 }
0x4c35   :  { %v8794_v4 = vadd.f32 %v8790_v52, %v8786_v18 }
0x4c36   :  { %v8844_v23 = vpop.permute.xlu0 %8843  ;;  %8826 = vrot.lane.b32.xlu0 %v8795_v25, %s11126_s3 }
0x4c37   :  { %8847 = vst.msk [vmem:[#allocation14] sm:$0xff] %vm8846_vm5, %v8844_v23  ;;  %8850 = vrot.lane.b32.xlu1 %v8848_v3, %s11127_s13 }
0x4c3a   :  { %v8858_v32 = vpop.permute.xlu0 %8857 }
0x4c3b   :  { %8824 = vrot.lane.b32.xlu1 %v8794_v4, %s11126_s3 }
0x4c3e   :  { %v8804_v37 = vpop.permute.xlu0 %8803 }
0x4c99   :  { %v8802_v9 = vpop.permute.xlu1 %8801 }
0x4ca0   :  { %v8823_v60 = vpop.permute.xlu0 %8822 }
0x4ca4   :  { %v8872_v14 = vpop.permute.xlu0 %8871 }
0x4ca5   :  { %v8806_v49 = vpop.permute.xlu1 %8805 }
0x4ca8   :  { %v8827_v53 = vpop.permute.xlu0 %8826 }
0x4ca9   :  { %v8851_v39 = vpop.permute.xlu1 %8850 }
0x4caa   :  { %8854 = vst.msk [vmem:[#allocation14] sm:$0xff] %vm8853_vm6, %v8851_v39 }
0x4cab   :  { %8861 = vst.msk [vmem:[#allocation14] sm:$0xff] %vm8860_vm7, %v8858_v32 }
0x4cac   :  { %8868 = vst.msk [vmem:[#allocation14] sm:$0xff] %vm8867_vm8, %v8865_v47 }
0x4cad   :  { %v8825_v40 = vpop.permute.xlu1 %8824  ;;  %8875 = vst.msk [vmem:[#allocation14] sm:$0xff] %vm8874_vm9, %v8872_v14 }
0x4cae   :  { %11106 = shalt.err (!%p11103_p4)
}
0x4caf   :  { %s11107_s5 = scalar_lea.hbm %s13379_s14, 128 }
0x4cb0   :  { %p11108_p5 = scmp.ne.s32.totalorder %s13379_s14, %s11107_s5  ;;  %p11111_p6 = scmp.lt.u32.totalorder %s11107_s5, %s13379_s14 }
0x4cb2   :  { %p11113_p7 = pnand %p11111_p6, %p11108_p5 }
0x4cb4   :  { %11116 = shalt.err (!%p11113_p7)
}
0x4cb5   :  { %8885 = dma.vmem_to_hbm [thread:$0]  %s8883_s29, 128, %s13379_s14, [#allocation15]  }
0x4cb6   :  { %11117 = dma.done.wait [#allocation15], 128  }
0x4cb7   :  { %11118 = vsyncadd [#allocation15], 4294967168 }
0x4cb8   :  { %8889 = vsyncpa [#allocation15], 1 }

</bundles_post_ra>
